<compile_context>
chip_gen: v7x
topology: tpu7x:2x2x1
jax: 0.10.0
libtpu: 0.0.40
codegen_flags: <defaults>
</compile_context>

<pallas_src>
import functools

import jax
import jax.numpy as jnp
from jax.experimental import pallas as pl
from jax.experimental.pallas import tpu as pltpu

POOL = 4            # nn.MaxPool1d(4): kernel_size == stride == 4
IN_FEATURES = 512   # nn.Linear(512, classes)
OUT_PAD = 128       # lane-dense padded output width


def _classifier_kernel(x_ref, w_ref, b_ref, o_ref, *, classes):
    # x_ref: (TN, 2048) flattened activation tile; feature f's pool window is
    #        lanes 4f .. 4f+3 (PyTorch flatten order: lane = 4*f + p).
    # w_ref: (2048, 128) weight with nonzero rows only at 4f+3.
    # b_ref: (1, 128) padded bias.   o_ref: (TN, 128) lane-dense output.
    y = x_ref[...]
    # MaxPool1d(4): roll-and-max (result[j] = max(y[j-3 .. j])) puts each
    # 4-lane window max at lane 4f+3.  Rotation wrap-around only pollutes
    # lanes whose weight rows are zero.
    m = jnp.maximum(y, pltpu.roll(y, shift=1, axis=1))
    m = jnp.maximum(m, pltpu.roll(m, shift=2, axis=1))
    # ReLU commutes with max -> apply once to the pooled values.
    m = jnp.maximum(m, 0.0)
    # FlattenLayer + nn.Linear(512, classes): a single MXU matmul; the
    # contaminated lanes multiply zero weight rows and contribute nothing.
    out = jnp.dot(
        m,
        w_ref[...],
        preferred_element_type=jnp.float32,
        precision=jax.lax.Precision.HIGHEST,
    )
    out = out + b_ref[...]                       # broadcast padded bias (1, 128)
    if classes == 1:
        out = jax.nn.sigmoid(out)                # padded lanes sliced off in wrapper
    o_ref[...] = out.astype(o_ref.dtype)


def mxnet_forward(x, weight, bias, classes=1, *, block_batch=1024):
    """Classifier head of MXNet.

    x:      (N, C, L) float32 activation (the output of `self.features`).
    weight: (classes, 512), bias: (classes,)  -- the nn.Linear parameters.
    """
    if classes == 2:  # mirrors the PyTorch __init__
        classes = 1
    N, C, L = x.shape
    assert L % POOL == 0
    Lp = L // POOL
    F = C * Lp
    assert F == IN_FEATURES, "nn.Linear(512, classes) requires C * (L // 4) == 512"
    CL = C * L  # 2048 flattened (pre-pool) feature lanes

    # --- batch tile selection -------------------------------------------------
    # block_batch=1024 keeps the double-buffered x tiles at 2 x 8 MiB, safe on
    # every generation (v7x has only 64 MiB VMEM per TensorCore).
    tn = min(block_batch, N)
    if tn == N and N > 8:
        # Guarantee >= 2 grid steps so dimension_semantics=("parallel",)
        # actually shards the batch across both v7x TensorCores.
        tn = pl.cdiv(N, 2)
    if tn < N and tn % 8 != 0:
        tn = max(8, (tn // 8) * 8)  # second-minor block dim must be 8-aligned

    # --- free layout plumbing (no HBM round trip) ------------------------------
    x2 = x.reshape(N, CL)  # row-major reshape: free, fully contiguous per row
    # PyTorch flatten order puts feature f = c*Lp + lp at lanes 4f..4f+3; the
    # kernel leaves the window max at lane 4f+3, so only rows 4f+3 of the big
    # weight carry the Linear weights (rest are zero).  classes is zero-padded
    # to 128 lanes so the output stores are lane-dense.
    w_big = jnp.zeros((CL, OUT_PAD), jnp.float32)
    w_big = w_big.at[POOL - 1::POOL, :classes].set(
        jnp.transpose(weight.reshape(classes, F)).astype(jnp.float32))
    b_big = jnp.zeros((1, OUT_PAD), jnp.float32)
    b_big = b_big.at[0, :classes].set(bias.astype(jnp.float32))

    kernel = functools.partial(_classifier_kernel, classes=classes)
    out = pl.pallas_call(
        kernel,
        out_shape=jax.ShapeDtypeStruct((N, OUT_PAD), jnp.float32),
        grid=(pl.cdiv(N, tn),),
        in_specs=[
            pl.BlockSpec((tn, CL), lambda i: (i, 0)),        # pipelined x tile
            pl.BlockSpec((CL, OUT_PAD), lambda i: (0, 0)),   # resident weight
            pl.BlockSpec((1, OUT_PAD), lambda i: (0, 0)),    # resident bias
        ],
        out_specs=pl.BlockSpec((tn, OUT_PAD), lambda i: (i, 0)),
        compiler_params=pltpu.CompilerParams(
            dimension_semantics=("parallel",),
            vmem_limit_bytes=48 * 1024 * 1024,
        ),
    )(x2, w_big, b_big)
    return out[:, :classes]


def mxnet_forward_ref(x, weight, bias, classes=1):
    """Pure-JAX reference mirroring the PyTorch classifier."""
    if classes == 2:
        classes = 1
    N, C, L = x.shape
    Lp = L // POOL
    xr = jnp.maximum(x, 0.0)
    pooled = jnp.max(xr.reshape(N, C, Lp, POOL), axis=-1)
    flat = pooled.reshape(N, C * Lp)
    out = jnp.dot(flat, weight.T, precision=jax.lax.Precision.HIGHEST) + bias
    if classes == 1:
        out = jax.nn.sigmoid(out)
    return out


if __name__ == "__main__":
    key = jax.random.PRNGKey(0)
    kx, kw1, kb1, kw4, kb4 = jax.random.split(key, 5)

    # Small shapes consistent with the module: C * (L // 4) == 512.
    N, C, L = 16, 32, 64
    x = jax.random.normal(kx, (N, C, L), dtype=jnp.float32)

    bound = 1.0 / jnp.sqrt(512.0)  # PyTorch-style uniform Linear init

    # Binary head (classes == 1 -> sigmoid).  With N=16 the wrapper picks
    # tn=8 -> a 2-step parallel grid (exercises the multi-TC path).
    w1 = jax.random.uniform(kw1, (1, 512), jnp.float32, -bound, bound)
    b1 = jax.random.uniform(kb1, (1,), jnp.float32, -bound, bound)
    out1 = jax.block_until_ready(mxnet_forward(x, w1, b1, classes=1))
    ref1 = mxnet_forward_ref(x, w1, b1, classes=1)
    assert out1.shape == (N, 1)
    assert jnp.allclose(out1, ref1, atol=1e-4, rtol=1e-4), (out1, ref1)

    # Multi-class head (no sigmoid) -- exercises the general matmul path.
    w4 = jax.random.uniform(kw4, (4, 512), jnp.float32, -bound, bound)
    b4 = jax.random.uniform(kb4, (4,), jnp.float32, -bound, bound)
    out4 = jax.block_until_ready(mxnet_forward(x, w4, b4, classes=4))
    ref4 = mxnet_forward_ref(x, w4, b4, classes=4)
    assert out4.shape == (N, 4)
    assert jnp.allclose(out4, ref4, atol=1e-4, rtol=1e-4), (out4, ref4)

    print("KERNEL_OK")
</pallas_src>

<mosaic_0001>
module attributes {stable_mosaic.version = 11 : i64} {
  func.func @_classifier_kernel(%arg0: i32, %arg1: memref<8x2048xf32, #tpu.memory_space<vmem>>, %arg2: memref<2048x128xf32, #tpu.memory_space<vmem>>, %arg3: memref<1x128xf32, #tpu.memory_space<vmem>>, %arg4: memref<8x128xf32, #tpu.memory_space<vmem>>) attributes {dimension_semantics = [#tpu.dimension_semantics<parallel>], iteration_bounds = array<i64: 2>, scalar_prefetch = 0 : i64, scratch_operands = 0 : i64, tpu.core_type = #tpu.core_type<tc>, window_params = [{transform_indices = @transform_0, window_bounds = array<i64: 8, 2048>}, {pipeline_mode = #tpu.pipeline_mode<synchronous>, transform_indices = @transform_1, window_bounds = array<i64: 2048, 128>}, {pipeline_mode = #tpu.pipeline_mode<synchronous>, transform_indices = @transform_2, window_bounds = array<i64: 1, 128>}, {transform_indices = @transform_3, window_bounds = array<i64: 8, 128>}]} {
    %c0 = arith.constant 0 : index
    %c0_0 = arith.constant 0 : index
    %0 = vector.load %arg1[%c0, %c0_0] : memref<8x2048xf32, #tpu.memory_space<vmem>>, vector<8x2048xf32>
    %c1_i32 = arith.constant 1 : i32
    %1 = tpu.dynamic_rotate %0 by %c1_i32 dim 1 : vector<8x2048xf32>, i32 -> vector<8x2048xf32>
    %2 = arith.maximumf %0, %1 : vector<8x2048xf32>
    %c2_i32 = arith.constant 2 : i32
    %3 = tpu.dynamic_rotate %2 by %c2_i32 dim 1 : vector<8x2048xf32>, i32 -> vector<8x2048xf32>
    %4 = arith.maximumf %2, %3 : vector<8x2048xf32>
    %cst = arith.constant 0.000000e+00 : f32
    %5 = vector.broadcast %cst : f32 to vector<8x2048xf32>
    %6 = arith.maximumf %4, %5 : vector<8x2048xf32>
    %c0_1 = arith.constant 0 : index
    %c0_2 = arith.constant 0 : index
    %7 = vector.load %arg2[%c0_1, %c0_2] : memref<2048x128xf32, #tpu.memory_space<vmem>>, vector<2048x128xf32>
    %cst_3 = arith.constant dense<0.000000e+00> : vector<8x128xf32>
    %8 = tpu.matmul %6, %7, %cst_3 {dimension_numbers = #tpu.dot_dimension_numbers<[1], [0], [0], [1], [0, 0, 1, 1], [], []>, precision = #tpu.contract_precision<fp32>} : vector<8x2048xf32>, vector<2048x128xf32>, vector<8x128xf32> -> vector<8x128xf32>
    %c0_4 = arith.constant 0 : index
    %c0_5 = arith.constant 0 : index
    %9 = vector.load %arg3[%c0_4, %c0_5] : memref<1x128xf32, #tpu.memory_space<vmem>>, vector<1x128xf32>
    %10 = vector.broadcast %9 : vector<1x128xf32> to vector<8x128xf32>
    %11 = arith.addf %8, %10 : vector<8x128xf32>
    %12 = arith.negf %11 : vector<8x128xf32>
    %13 = math.exp %12 : vector<8x128xf32>
    %cst_6 = arith.constant 1.000000e+00 : f32
    %14 = vector.broadcast %cst_6 : f32 to vector<8x128xf32>
    %15 = arith.addf %14, %13 : vector<8x128xf32>
    %16 = arith.divf %14, %15 : vector<8x128xf32>
    %c0_7 = arith.constant 0 : index
    %c0_8 = arith.constant 0 : index
    %17 = vector.load %arg4[%c0_7, %c0_8] : memref<8x128xf32, #tpu.memory_space<vmem>>, vector<8x128xf32>
    tpu.vector_store %arg4[%c0_7, %c0_8], %16 {strides = array<i32>} : memref<8x128xf32, #tpu.memory_space<vmem>>, vector<8x128xf32>,
    return
  }
  func.func @transform_0(%arg0: i32) -> (i32, i32) {
    %c0_i32 = arith.constant 0 : i32
    %c0_i32_0 = arith.constant 0 : i32
    return %arg0, %c0_i32 : i32, i32
  }
  func.func @transform_1(%arg0: i32) -> (i32, i32) {
    %c0_i32 = arith.constant 0 : i32
    %c0_i32_0 = arith.constant 0 : i32
    %c0_i32_1 = arith.constant 0 : i32
    return %c0_i32, %c0_i32_0 : i32, i32
  }
  func.func @transform_2(%arg0: i32) -> (i32, i32) {
    %c0_i32 = arith.constant 0 : i32
    %c0_i32_0 = arith.constant 0 : i32
    %c0_i32_1 = arith.constant 0 : i32
    return %c0_i32, %c0_i32_0 : i32, i32
  }
  func.func @transform_3(%arg0: i32) -> (i32, i32) {
    %c0_i32 = arith.constant 0 : i32
    %c0_i32_0 = arith.constant 0 : i32
    return %arg0, %c0_i32 : i32, i32
  }
}

</mosaic_0001>

<bundles_post_ra>
// kernel: tpu_custom_call.1
= control target key start
LH: loop header
LB: loop body
LE: loop exit
PB: predicated region body
PF: predicated region fallthrough
CT: control target
= control target key end

     0   :  { %8 = vsyncpa [#allocation3], 0  ;;  %s17128_s0 = inlined_call_operand.hbm [shape: f32[16,2048], index: 0, kind: input, shape index: {}]   ;;  %s17129_s1 = inlined_call_operand.hbm [shape: f32[2048,128], index: 1, kind: input, shape index: {}]   ;;  %s17130_s2 = inlined_call_operand.vmem [shape: f32[1,128], index: 2, kind: input, shape index: {}]   ;;  %s17131_s3 = inlined_call_operand.hbm [shape: f32[16,128], index: 3, kind: output, shape index: {}]  }
   0x1   :  { %10 = vsyncpa [#allocation3 + $0x1], 0 }
   0x2   :  { %11 = vsyncpa [#allocation6], 0 }
   0x3   :  { %12 = vsyncpa [#allocation4], 0 }
   0x4   :  { %14 = vsyncpa [#allocation4 + $0x1], 0  ;;  %s11083_s12 = smov 0   ;;  %s11085_s13 = smov 0  }
   0x5   :  { %s11087_s14 = smov 0   ;;  %s11089_s15 = smov 0  }
   0x6 LB: > { %s11104_s16 = sadd.s32 4294967295, %s11054_s15   ;;  %s7626_s17 = sadd.s32 4294967294, %s11054_s15   ;;  %s11054_s15 = sphi %s11089_s15, %s19836_s15   ;;  %s11050_s14 = sphi %s11087_s14, %s19835_s14   ;;  %s11046_s13 = sphi %s11085_s13, %s19834_s13   ;;  %s11042_s12 = sphi %s11083_s12, %s19833_s12  }
   0x7   : > { %p40_p0 = scmp.ne.s32.totalorder %s11046_s13, %s11042_s12  ;;  %p17132_p1 = scmp.eq.s32.totalorder %s11104_s16, 0 }
   0x8   : > { %p112_p3 = scmp.eq.s32.totalorder %s7626_s17, 1  ;;  %p7627_p5 = scmp.ge.s32.totalorder %s11054_s15, 1 }
   0x9   : > { %p11113_p4 = por %p17132_p1, %p40_p0  ;;  %p119_p7 = scmp.lt.s32.totalorder %s11054_s15, 3 }
   0xa   : > { %p11118_p6 = por %p112_p3, %p40_p0  ;;  %s11056_s21 = smov [#allocation5]  }
   0xb   : > { %s17992_s18 = scalar_select %p11113_p4, 1, 0 }
   0xc   : > { %s17993_s19 = scalar_select %p11118_p6, 1, 0 }
   0xd   : > { %p11123_p8 = pnand %p7627_p5, %p119_p7  ;;  %s131_s22 = sshll.u32 %s11056_s21, 4  ;;  %s11127_s22 = int_to_ptr.vmem [resolvable:$true] %s131_s22 }
   0xe   : > { %s11139_s24 = sadd.s32 1, %s11054_s15   ;;  %s27_s25 = sadd.s32 1, %s11050_s14 }
   0xf   : > { %s17994_s20 = scalar_select %p11123_p8, 1, 0 }
  0x10   : > { %p10868_p9 = pneg %p11123_p8  ;;  %s24_s26 = ssub.s32 %s11054_s15, %s11139_s24 }
  0x11   : > { %s10926_s29 = scalar_lea.hbm %s17129_s1, 32768 }
  0x12   : > { %p11134_p11 = pnand %p10868_p9, %p17132_p1  ;;  %p10927_p12 = scmp.ne.s32.totalorder %s17129_s1, %s10926_s29 }
  0x13   : > { %p10933_p5 = scmp.lt.u32.totalorder %s10926_s29, %s17129_s1 }
  0x14   : > { %p10928_p13 = pneg %p11134_p11 }
  0x16   : > { %p10929_p0 = pnand %p10928_p13, %p10927_p12 }
  0x18   : > { %p10930_p3 = pneg %p10929_p0 }
  0x1a   : > { %p10935_p7 = pnand %p10933_p5, %p10930_p3 }
  0x1c   : > { %10938 = shalt.err (!%p10935_p7)
}
  0x1d   : > { %s10939_s7 = scalar_lea.vmem %s11127_s22, 32768  ;;  %p10947_p2 = scmp.lt.s32.totalorder %s11127_s22, %s11127_s22 }
  0x1e   : > { %p10940_p9 = scmp.ne.s32.totalorder %s11127_s22, %s10939_s7  ;;  %p10948_p6 = scmp.lt.s32.totalorder %s10939_s7, %s10939_s7 }
  0x20   : > { %p10942_p10 = pnand %p10940_p9, %p10928_p13  ;;  %p10949_p4 = por %p10948_p6, %p10947_p2 }
  0x22   : > { %p10943_p1 = pneg %p10942_p10 }
  0x24   : > { %p10950_p8 = pnand %p10949_p4, %p10943_p1 }
  0x26   : > { %10953 = shalt.err (!%p10950_p8)
}
  0x27   : > { %s11057_s8 = smov 128   ;;  %s11058_s9 = smov 8  }
  0x28   : > { %10871 = dma.hbm_to_vmem [thread:$0]  (!%p11134_p11), %s17129_s1, 32768, %s11127_s22, [#allocation6], %s11057_s8, %s11057_s8, %s11058_s9  }
  0x29   : > { %p25_p2 = scmp.eq.s32.totalorder %s24_s26, 0  ;;  %p34_p1 = scmp.ne.s32.totalorder %s11050_s14, %s11046_s13 }
  0x2a   : > { %p35_p4 = scmp.eq.s32.totalorder %s11054_s15, 0  ;;  %p10881_p6 = scmp.lt.s32.totalorder %s11054_s15, 2 }
  0x2b   : > { %s11170_s17 = scalar_select %p25_p2, %s11050_s14, %s27_s25  }
  0x2c   : > { %p36_p8 = por %p35_p4, %p34_p1  ;;  %p17996_p10 = scmp.eq.s32.totalorder %s11104_s16, 1 }
  0x2d   : > { %s148_s27 = sand.u32 1, %s11050_s14   ;;  %s7643_s28 = sshll.u32 %s11054_s15, 11 }
  0x2e   : > { %p11174_p12 = por %p17996_p10, %p34_p1  ;;  %s7630_s29 = sshll.u32 %s148_s27, 7 }
  0x2f   : > { %s11183_s4 = scalar_lea.hbm %s17128_s0, %s7643_s28  ;;  %s152_s22 = scalar_lea.vmem [#allocation2], %s7630_s29 }
  0x30   : > { %s160_s25 = sshll.u32 %s152_s22, 4  ;;  %p11185_p11 = pnand %p10881_p6, %p36_p8  ;;  %s11189_s25 = int_to_ptr.vmem [resolvable:$true] %s160_s25 }
  0x31   : > { %s149_s5 = scalar_lea.sflag [#allocation3], %s148_s27  ;;  %s10954_s6 = scalar_lea.hbm %s11183_s4, 2048 }
  0x32   : > { %p10955_p13 = scmp.ne.s32.totalorder %s11183_s4, %s10954_s6  ;;  %p10956_p0 = pneg %p11185_p11 }
  0x33   : > { %s10959_s9 = scalar_lea.hbm %s17128_s0, 4096  ;;  %p10960_p7 = scmp.lt.u32.totalorder %s11183_s4, %s17128_s0 }
  0x34   : > { %p10957_p3 = pnand %p10956_p0, %p10955_p13  ;;  %p10961_p9 = scmp.lt.u32.totalorder %s10959_s9, %s10954_s6 }
  0x35   : > { %p10963_p1 = scmp.lt.u32.totalorder %s10954_s6, %s11183_s4 }
  0x36   : > { %p10958_p5 = pneg %p10957_p3  ;;  %p10962_p2 = por %p10961_p9, %p10960_p7 }
  0x38   : > { %p10964_p4 = por %p10963_p1, %p10962_p2 }
  0x3a   : > { %p10965_p6 = pnand %p10964_p4, %p10958_p5 }
  0x3c   : > { %10968 = shalt.err (!%p10965_p6)
}
  0x3d   : > { %s10969_s27 = scalar_lea.vmem %s11189_s25, 2048  ;;  %s11059_s28 = smov [#allocation2]  }
  0x3e   : > { %p10970_p8 = scmp.ne.s32.totalorder %s11189_s25, %s10969_s27  ;;  %s10974_s29 = sshll.u32 %s11059_s28, 4  ;;  %s10975_s29 = int_to_ptr.vmem [resolvable:$false] %s10974_s29 }
  0x3f   : > { %s10976_s23 = scalar_lea.vmem %s10975_s29, 4096  ;;  %p10977_p3 = scmp.lt.s32.totalorder %s11189_s25, %s10975_s29 }
  0x40   : > { %p10972_p10 = pnand %p10970_p8, %p10956_p0  ;;  %p10978_p7 = scmp.lt.s32.totalorder %s10976_s23, %s10969_s27 }
  0x42   : > { %p10973_p13 = pneg %p10972_p10  ;;  %p10979_p9 = por %p10978_p7, %p10977_p3 }
  0x44   : > { %p10980_p2 = pnand %p10979_p9, %p10973_p13 }
  0x46   : > { %10983 = shalt.err (!%p10980_p2)
}
  0x47   : > { %10875 = dma.hbm_to_vmem [thread:$0]  (!%p11185_p11), %s11183_s4, 2048, %s11189_s25, %s149_s5  }
  0x48   : > { %p17999_p5 = scmp.ne.s32.totalorder %s17994_s20, 0 }
  0x4a   : > { %169 = sbr.rel (%p17999_p5) target bundleno = 1500 (0x5dc), region = 32 }
  0x51   : > { %s11219_s30 = sand.u32 1, %s11046_s13   ;;  %p18000_p0 = scmp.ne.s32.totalorder %s17992_s18, 0 }
  0x52   : > { %s7634_s22 = sshll.u32 %s11219_s30, 7  ;;  %s172_s6 = scalar_lea.sflag [#allocation3], %s11219_s30 }
  0x53   : > { %s11223_s7 = scalar_lea.vmem [#allocation2], %s7634_s22 }
  0x54   : > { %11029 = dma.done.wait (%p18000_p0), %s172_s6, 2048  }
  0x55   : > { %11031 = vsyncadd (%p18000_p0), %s172_s6, 4294965248  ;;  %p18001_p11 = scmp.eq.s32.totalorder %s11104_s16, 0 }
  0x57   : > { %11033 = dma.done.wait (%p18001_p11), [#allocation6], 32768   ;;  %p18002_p1 = pmov %p18001_p11 }
  0x58   : > { %v11234_v0 = vld [vmem:[%s11223_s7 + $0x78] sm:$0xff]  ;;  %v11237_v1 = vld [vmem:[%s11223_s7] sm:$0xff]  ;;  %s11060_s20 = smov 1   ;;  %v216_v2 = vld [vmem:[%s11223_s7 + $0x70] sm:$0xff]  ;;  %s11061_s18 = smov 2  }
  0x59   : > { %11035 = vsyncadd (%p18002_p1), [#allocation6], 4294934528  ;;  %248 = vrot.lane.b32.xlu1 %v11234_v0, %s11060_s20  ;;  %218 = vrot.lane.b32.xlu0 %v11237_v1, %s11060_s20  ;;  %v382_v3 = vld [vmem:[#allocation5 + $0x80] sm:$0xff]  ;;  %v11245_v4 = vld [vmem:[%s11223_s7 + $0x8] sm:$0xff]  ;;  %s7636_s26 = sshll.u32 %s11219_s30, 3  ;;  %s7640_s5 = sshll.u32 %s11104_s16, 7 }
  0x5a   : > { %v383_v5 = vld [vmem:[#allocation5 + $0x88] sm:$0xff]  ;;  %v678_v6 = vand.u32 4294901760, %v382_v3  ;;  %v366_v7 = vld [vmem:[#allocation5] sm:$0xff]  ;;  %v11247_v11 = vld [vmem:[#allocation5 + $0x90] sm:$0xff]  ;;  %s201_s8 = scalar_lea.vmem [#allocation7], %s7636_s26  ;;  %s17084_s27 = scalar_lea.hbm %s17131_s3, %s7640_s5 }
  0x5b   : > { %v681_v8 = vand.u32 4294901760, %v383_v5  ;;  %v367_v9 = vld [vmem:[#allocation5 + $0x8] sm:$0xff]  ;;  %v630_v10 = vand.u32 4294901760, %v366_v7  ;;  %v11249_v12 = vld [vmem:[#allocation5 + $0x98] sm:$0xff]  ;;  %v684_v15 = vand.u32 4294901760, %v11247_v11  ;;  %v11255_v17 = vld [vmem:[#allocation5 + $0x10] sm:$0xff] }
  0x5c   : > { %v11251_v13 = vsub.f32 %v382_v3, %v678_v6  ;;  %v633_v14 = vand.u32 4294901760, %v367_v9  ;;  %v687_v16 = vand.u32 4294901760, %v11249_v12  ;;  %v11257_v18 = vld [vmem:[#allocation5 + $0x18] sm:$0xff]  ;;  %v636_v21 = vand.u32 4294901760, %v11255_v17  ;;  %v11308_v43 = vld [vmem:[#allocation5 + $0xa0] sm:$0xff]  ;;  %v11316_v48 = vld [vmem:[#allocation5 + $0xa8] sm:$0xff] }
  0x5d   : > { %246 = vrot.lane.b32.xlu1 %v216_v2, %s11060_s20  ;;  %220 = vrot.lane.b32.xlu0 %v11245_v4, %s11060_s20  ;;  %v11262_v19 = vsub.f32 %v383_v5, %v681_v8  ;;  %v11264_v20 = vsub.f32 %v366_v7, %v630_v10  ;;  %v639_v22 = vand.u32 4294901760, %v11257_v18  ;;  %v11272_v25 = vsub.f32 %v11247_v11, %v684_v15  ;;  %v11320_v53 = vld [vmem:[#allocation5 + $0x20] sm:$0xff]  ;;  %v11322_v54 = vld [vmem:[#allocation5 + $0x28] sm:$0xff]  ;;  %v11325_v59 = vld [vmem:[#allocation5 + $0xb0] sm:$0xff]  ;;  %s7546_s9 = sshll.u32 %s201_s8, 4  ;;  %s7533_s28 = scalar_lea.sflag [#allocation4], %s11219_s30  ;;  %s17086_s9 = int_to_ptr.vmem [resolvable:$true] %s7546_s9 }
  0x5e   : > { %v17153_v23 = vand.u32 4294901760, %v11251_v13  ;;  %v11269_v24 = vsub.f32 %v367_v9, %v633_v14  ;;  %v11275_v26 = vsub.f32 %v11249_v12, %v687_v16  ;;  %v11280_v29 = vsub.f32 %v11255_v17, %v636_v21  ;;  %v11327_v60 = vld [vmem:[#allocation5 + $0xb8] sm:$0xff]  ;;  %s10984_s29 = scalar_lea.vmem %s17086_s9, 128  ;;  %s11062_s16 = smov [#allocation7]  }
  0x5f   : > { %v17152_v27 = vand.u32 4294901760, %v11262_v19  ;;  %v17151_v28 = vand.u32 4294901760, %v11264_v20  ;;  %v11283_v30 = vsub.f32 %v11257_v18, %v639_v22  ;;  %v17147_v33 = vand.u32 4294901760, %v11272_v25  ;;  %p10985_p4 = scmp.ne.s32.totalorder %s17086_s9, %s10984_s29  ;;  %s10988_s23 = sshll.u32 %s11062_s16, 4  ;;  %s10989_s23 = int_to_ptr.vmem [resolvable:$false] %s10988_s23 }
  0x60   : > { %18003 = vst [vmem:[#allocation11_spill] sm:$0xff] %v11275_v26  ;;  %v857_v31 = vsub.f32 %v11251_v13, %v17153_v23  ;;  %v17149_v32 = vand.u32 4294901760, %v11269_v24  ;;  %v17145_v34 = vand.u32 4294901760, %v11275_v26  ;;  %v17144_v37 = vand.u32 4294901760, %v11280_v29  ;;  %s10990_s22 = scalar_lea.vmem %s10989_s23, 256  ;;  %p10991_p10 = scmp.lt.s32.totalorder %s17086_s9, %s10989_s23 }
  0x61   : > { %v864_v35 = vsub.f32 %v11262_v19, %v17152_v27  ;;  %v745_v36 = vsub.f32 %v11264_v20, %v17151_v28  ;;  %v17143_v38 = vand.u32 4294901760, %v11283_v30  ;;  %v871_v41 = vsub.f32 %v11272_v25, %v17147_v33  ;;  %p10986_p6 = pnand %p10985_p4, %p11174_p12  ;;  %p10992_p13 = scmp.lt.s32.totalorder %s10990_s22, %s10984_s29 }
  0x62   : > { %v858_v39 = vand.u32 4294901760, %v857_v31  ;;  %v752_v40 = vsub.f32 %v11269_v24, %v17149_v32  ;;  %v878_v42 = vsub.f32 %v11275_v26, %v17145_v34  ;;  %v759_v46 = vsub.f32 %v11280_v29, %v17144_v37 }
  0x63   : > { %v865_v44 = vand.u32 4294901760, %v864_v35  ;;  %v746_v45 = vand.u32 4294901760, %v745_v36  ;;  %v766_v47 = vsub.f32 %v11283_v30, %v17143_v38  ;;  %v872_v50 = vand.u32 4294901760, %v871_v41  ;;  %p10987_p8 = pneg %p10986_p6  ;;  %p10993_p3 = por %p10992_p13, %p10991_p10 }
  0x64   : > { %v753_v49 = vand.u32 4294901760, %v752_v40  ;;  %v879_v51 = vand.u32 4294901760, %v878_v42  ;;  %v11318_v52 = vpack.c.bf16 %v681_v8, %v678_v6  ;;  %v760_v56 = vand.u32 4294901760, %v759_v46  ;;  %v11338_v8 = vld [vmem:[#allocation5 + $0x30] sm:$0xff] }
  0x65   : > { %v9356_v55 = vpack.c.bf16 %v865_v44, %v858_v39  ;;  %v767_v57 = vand.u32 4294901760, %v766_v47  ;;  %v690_v58 = vand.u32 4294901760, %v11308_v43  ;;  %v693_v63 = vand.u32 4294901760, %v11316_v48  ;;  %p10994_p7 = pnand %p10993_p3, %p10987_p8 }
  0x66   : > { %v9358_v61 = vpack.c.bf16 %v753_v49, %v746_v45  ;;  %v9360_v62 = vpack.c.bf16 %v879_v51, %v872_v50  ;;  %9325 = vmatprep.subr.bf16.mxu0 %v11318_v52  ;;  %v11331_v2 = vpack.c.bf16 %v633_v14, %v630_v10  ;;  %v642_v6 = vand.u32 4294901760, %v11320_v53  ;;  %v11348_v14 = vld [vmem:[#allocation5 + $0x38] sm:$0xff] }
  0x67   : > { %9357 = vmatprep.subr.bf16.mxu1 %v9356_v55  ;;  %v9362_v3 = vpack.c.bf16 %v767_v57, %v760_v56  ;;  %v11334_v5 = vsub.f32 %v11308_v43, %v690_v58  ;;  %v645_v7 = vand.u32 4294901760, %v11322_v54  ;;  %v11341_v9 = vsub.f32 %v11316_v48, %v693_v63  ;;  %v11405_v55 = vld [vmem:[#allocation5 + $0xc0] sm:$0xff]  ;;  %v11407_v56 = vld [vmem:[#allocation5 + $0xc8] sm:$0xff] }
  0x68   : > { %9359 = vmatpush3.bf16.msra.mxu1 %v9358_v61  ;;  %9327 = vmatpush3.bf16.msra.mxu0 %v11331_v2  ;;  %v11344_v11 = vpack.c.bf16 %v687_v16, %v684_v15  ;;  %v696_v10 = vand.u32 4294901760, %v11325_v59  ;;  %v699_v12 = vand.u32 4294901760, %v11327_v60  ;;  %v11352_v18 = vsub.f32 %v11320_v53, %v642_v6 }
  0x69   : > { %9361 = vmatprep.subr.bf16.mxu1 %v9360_v62  ;;  %v17142_v17 = vand.u32 4294901760, %v11334_v5  ;;  %v11355_v31 = vsub.f32 %v11322_v54, %v645_v7  ;;  %v11357_v35 = vpack.c.bf16 %v639_v22, %v636_v21  ;;  %v17141_v15 = vand.u32 4294901760, %v11341_v9 }
  0x6a   : > { %9329 = vmatprep.subr.bf16.mxu0 %v11344_v11  ;;  %v11364_v16 = vsub.f32 %v11325_v59, %v696_v10  ;;  %v11367_v36 = vsub.f32 %v11327_v60, %v699_v12  ;;  %v17171_v39 = vand.u32 4294901760, %v11338_v8  ;;  %v17138_v21 = vand.u32 4294901760, %v11352_v18 }
  0x6b   : > { %v885_v40 = vsub.f32 %v11334_v5, %v17142_v17  ;;  %v17137_v22 = vand.u32 4294901760, %v11355_v31  ;;  %v17169_v41 = vand.u32 4294901760, %v11348_v14  ;;  %v892_v42 = vsub.f32 %v11341_v9, %v17141_v15 }
  0x6c   : > { %18004 = vst [vmem:[#allocation12_spill] sm:$0xff] %v11364_v16  ;;  %18005 = vst [vmem:[#allocation13_spill] sm:$0xff] %v11367_v36  ;;  %9363 = vmatpush3.bf16.msra.mxu1 %v9362_v3  ;;  %v17135_v43 = vand.u32 4294901760, %v11364_v16  ;;  %v17136_v44 = vand.u32 4294901760, %v11367_v36  ;;  %9331 = vmatpush3.bf16.msra.mxu0 %v11357_v35  ;;  %v11385_v45 = vsub.f32 %v11338_v8, %v17171_v39  ;;  %v11412_v3 = vld [vmem:[#allocation5 + $0x40] sm:$0xff] }
  0x6d   : > { %v886_v46 = vand.u32 4294901760, %v885_v40  ;;  %v773_v47 = vsub.f32 %v11352_v18, %v17138_v21  ;;  %v780_v48 = vsub.f32 %v11355_v31, %v17137_v22  ;;  %v11396_v49 = vsub.f32 %v11348_v14, %v17169_v41  ;;  %v11417_v22 = vld [vmem:[#allocation5 + $0x48] sm:$0xff] }
  0x6e   : > { %18006 = vst [vmem:[#allocation14_spill] sm:$0xff] %v11385_v45  ;;  %v893_v50 = vand.u32 4294901760, %v892_v42  ;;  %v899_v51 = vsub.f32 %v11364_v16, %v17135_v43  ;;  %v906_v53 = vsub.f32 %v11367_v36, %v17136_v44  ;;  %v17140_v54 = vand.u32 4294901760, %v11385_v45 }
  0x6f   : > { %18007 = vst [vmem:[#allocation15_spill] sm:$0xff] %v11396_v49  ;;  %v774_v57 = vand.u32 4294901760, %v773_v47  ;;  %v781_v60 = vand.u32 4294901760, %v780_v48  ;;  %v17139_v61 = vand.u32 4294901760, %v11396_v49  ;;  %v11410_v62 = vpack.c.bf16 %v693_v63, %v690_v58  ;;  %v11427_v48 = vld [vmem:[#allocation5 + $0xd8] sm:$0xff] }
  0x70   : > { %v9364_v40 = vpack.c.bf16 %v893_v50, %v886_v46  ;;  %v900_v42 = vand.u32 4294901760, %v899_v51  ;;  %v907_v43 = vand.u32 4294901760, %v906_v53  ;;  %v787_v44 = vsub.f32 %v11385_v45, %v17140_v54  ;;  %v11425_v46 = vld [vmem:[#allocation5 + $0xd0] sm:$0xff] }
  0x71   : > { %v9366_v21 = vpack.c.bf16 %v781_v60, %v774_v57  ;;  %v794_v47 = vsub.f32 %v11396_v49, %v17139_v61  ;;  %9333 = vmatprep.subr.bf16.mxu0 %v11410_v62  ;;  %v17168_v58 = vand.u32 4294901760, %v11405_v55  ;;  %v17166_v63 = vand.u32 4294901760, %v11407_v56  ;;  %v381_v49 = vld [vmem:[#allocation5 + $0x78] sm:$0xff] }
  0x72   : > { %9365 = vmatprep.subr.bf16.mxu1 %v9364_v40  ;;  %v9368_v50 = vpack.c.bf16 %v907_v43, %v900_v42  ;;  %v788_v51 = vand.u32 4294901760, %v787_v44  ;;  %v11429_v53 = vpack.c.bf16 %v645_v7, %v642_v6  ;;  %v17164_v57 = vand.u32 4294901760, %v11412_v3 }
  0x73   : > { %9367 = vmatpush3.bf16.msra.mxu1 %v9366_v21  ;;  %v795_v60 = vand.u32 4294901760, %v794_v47  ;;  %v11435_v61 = vsub.f32 %v11405_v55, %v17168_v58  ;;  %v11440_v54 = vsub.f32 %v11407_v56, %v17166_v63  ;;  %v17161_v40 = vand.u32 4294901760, %v11417_v22 }
  0x74   : > { %9369 = vmatprep.subr.bf16.mxu1 %v9368_v50  ;;  %9335 = vmatpush3.bf16.msra.mxu0 %v11429_v53  ;;  %v11447_v6 = vsub.f32 %v11412_v3, %v17164_v57  ;;  %v11451_v7 = vpack.c.bf16 %v699_v12, %v696_v10  ;;  %v17160_v21 = vand.u32 4294901760, %v11425_v46  ;;  %v17154_v43 = vand.u32 4294901760, %v11427_v48  ;;  %v11553_v57 = vld [vmem:[#allocation5 + $0xf8] sm:$0xff] }
  0x75   : > { %18008 = vst [vmem:[#allocation16_spill] sm:$0xff] %v11435_v61  ;;  %18009 = vst [vmem:[#allocation17_spill] sm:$0xff] %v11440_v54  ;;  %v9370_v44 = vpack.c.bf16 %v795_v60, %v788_v51  ;;  %v17146_v42 = vand.u32 4294901760, %v11435_v61  ;;  %v17148_v47 = vand.u32 4294901760, %v11440_v54  ;;  %v11460_v50 = vsub.f32 %v11417_v22, %v17161_v40 }
  0x76   : > { %18010 = vst [vmem:[#allocation18_spill] sm:$0xff] %v11447_v6  ;;  %v17150_v15 = vand.u32 4294901760, %v11447_v6  ;;  %9337 = vmatprep.subr.bf16.mxu0 %v11451_v7  ;;  %v11467_v59 = vsub.f32 %v11425_v46, %v17160_v21  ;;  %v11472_v10 = vsub.f32 %v11427_v48, %v17154_v43  ;;  %v11495_v43 = vld [vmem:[#allocation5 + $0x50] sm:$0xff]  ;;  %v17190_v58 = vand.u32 4294901760, %v11553_v57 }
  0x77   : > { %18011 = vst [vmem:[#allocation19_spill] sm:$0xff] %v11460_v50  ;;  %9371 = vmatpush3.bf16.msra.mxu1 %v9370_v44  ;;  %v913_v12 = vsub.f32 %v11435_v61, %v17146_v42  ;;  %v920_v51 = vsub.f32 %v11440_v54, %v17148_v47  ;;  %v17155_v60 = vand.u32 4294901760, %v11460_v50  ;;  %v11589_v61 = vld [vmem:[#allocation5 + $0x70] sm:$0xff]  ;;  %v18018_v45 = vand.u32 4294901760, %v11405_v55 }
  0x78   : > { %18012 = vst [vmem:[#allocation20_spill] sm:$0xff] %v11467_v59  ;;  %18013 = vst [vmem:[#allocation21_spill] sm:$0xff] %v11472_v10  ;;  %v801_v17 = vsub.f32 %v11447_v6, %v17150_v15  ;;  %v17156_v38 = vand.u32 4294901760, %v11467_v59  ;;  %v17157_v37 = vand.u32 4294901760, %v11472_v10  ;;  %v672_v55 = vand.u32 4294901760, %v11589_v61 }
  0x79   : > { %v914_v34 = vand.u32 4294901760, %v913_v12  ;;  %v921_v44 = vand.u32 4294901760, %v920_v51  ;;  %v808_v42 = vsub.f32 %v11460_v50, %v17155_v60  ;;  %v17159_v60 = vand.u32 4294901760, %v11495_v43 }
  0x7a   : > { %v802_v33 = vand.u32 4294901760, %v801_v17  ;;  %v927_v47 = vsub.f32 %v11467_v59, %v17156_v38  ;;  %v934_v32 = vsub.f32 %v11472_v10, %v17157_v37  ;;  %v11497_v17 = vld [vmem:[#allocation5 + $0x58] sm:$0xff]  ;;  %v18015_v10 = vand.u32 4294901760, %v11348_v14 }
  0x7b   : > { %v9372_v15 = vpack.c.bf16 %v921_v44, %v914_v34  ;;  %v809_v28 = vand.u32 4294901760, %v808_v42  ;;  %v17158_v38 = vand.u32 4294901760, %v11497_v17  ;;  %v11504_v34 = vsub.f32 %v11495_v43, %v17159_v60  ;;  %v11519_v42 = vld [vmem:[#allocation5 + $0x68] sm:$0xff] }
  0x7c   : > { %v928_v27 = vand.u32 4294901760, %v927_v47  ;;  %v935_v23 = vand.u32 4294901760, %v934_v32  ;;  %v675_v16 = vand.u32 4294901760, %v381_v49 }
  0x7d   : > { %9373 = vmatprep.subr.bf16.mxu1 %v9372_v15  ;;  %v9374_v12 = vpack.c.bf16 %v809_v28, %v802_v33  ;;  %v11509_v28 = vsub.f32 %v11497_v17, %v17158_v38  ;;  %v11517_v15 = vld [vmem:[#allocation5 + $0x60] sm:$0xff]  ;;  %v17165_v47 = vand.u32 4294901760, %v11504_v34 }
  0x7e   : > { %v9376_v51 = vpack.c.bf16 %v935_v23, %v928_v27  ;;  %v11511_v23 = vld [vmem:[#allocation5 + $0xe0] sm:$0xff]  ;;  %v11513_v27 = vld [vmem:[#allocation5 + $0xe8] sm:$0xff] }
  0x7f   : > { %9375 = vmatpush3.bf16.msra.mxu1 %v9374_v12  ;;  %v17162_v32 = vand.u32 4294901760, %v11511_v23  ;;  %v17163_v33 = vand.u32 4294901760, %v11513_v27  ;;  %v17167_v44 = vand.u32 4294901760, %v11509_v28  ;;  %v17170_v12 = vand.u32 4294901760, %v11517_v15 }
  0x80   : > { %9377 = vmatprep.subr.bf16.mxu1 %v9376_v51  ;;  %v17174_v51 = vand.u32 4294901760, %v11519_v42  ;;  %v815_v60 = vsub.f32 %v11504_v34, %v17165_v47 }
  0x81   : > { %v11528_v37 = vsub.f32 %v11511_v23, %v17162_v32  ;;  %v11533_v38 = vsub.f32 %v11513_v27, %v17163_v33  ;;  %v822_v21 = vsub.f32 %v11509_v28, %v17167_v44  ;;  %v11544_v40 = vsub.f32 %v11517_v15, %v17170_v12  ;;  %v11551_v33 = vld [vmem:[#allocation5 + $0xf0] sm:$0xff] }
  0x82   : > { %v11549_v32 = vsub.f32 %v11519_v42, %v17174_v51  ;;  %v17185_v44 = vand.u32 4294901760, %v11551_v33  ;;  %v816_v41 = vand.u32 4294901760, %v815_v60  ;;  %v18014_v60 = vand.u32 4294901760, %v11338_v8 }
  0x83   : > { %v17179_v47 = vand.u32 4294901760, %v11528_v37  ;;  %v17182_v63 = vand.u32 4294901760, %v11533_v38  ;;  %v823_v12 = vand.u32 4294901760, %v822_v21  ;;  %v11575_v21 = vsub.f32 %v11553_v57, %v17190_v58 }
  0x84   : > { %v11570_v50 = vsub.f32 %v11551_v33, %v17185_v44  ;;  %v11581_v39 = vpack.c.bf16 %v18015_v10, %v18014_v60  ;;  %v18016_v6 = vand.u32 4294901760, %v11544_v40  ;;  %v18017_v54 = vand.u32 4294901760, %v11549_v32 }
  0x85   : > { %v941_v51 = vsub.f32 %v11528_v37, %v17179_v47  ;;  %v948_v59 = vsub.f32 %v11533_v38, %v17182_v63  ;;  %v9378_v47 = vpack.c.bf16 %v823_v12, %v816_v41  ;;  %v250_v58 = vlaneseq }
  0x86   : > { %v829_v63 = vsub.f32 %v11544_v40, %v18016_v6  ;;  %v836_v44 = vsub.f32 %v11549_v32, %v18017_v54  ;;  %v18019_v8 = vand.u32 4294901760, %v11407_v56  ;;  %9339 = vmatpush3.bf16.msra.mxu0 %v11581_v39  ;;  %v17200_v60 = vand.u32 4294901760, %v11570_v50 }
  0x87   : > { %v942_v10 = vand.u32 4294901760, %v941_v51  ;;  %v949_v41 = vand.u32 4294901760, %v948_v59  ;;  %9379 = vmatpush3.bf16.msra.mxu1 %v9378_v47  ;;  %v17199_v54 = vand.u32 4294901760, %v11575_v21  ;;  %v18021_v56 = vand.u32 4294901760, %v11417_v22 }
  0x88   : > { %v11595_v14 = vpack.c.bf16 %v18019_v8, %v18018_v45  ;;  %v830_v6 = vand.u32 4294901760, %v829_v63  ;;  %v837_v12 = vand.u32 4294901760, %v836_v44  ;;  %v18020_v45 = vand.u32 4294901760, %v11412_v3 }
  0x89   : > { %v9380_v36 = vpack.c.bf16 %v949_v41, %v942_v10  ;;  %v955_v63 = vsub.f32 %v11570_v50, %v17200_v60  ;;  %v962_v47 = vsub.f32 %v11575_v21, %v17199_v54  ;;  %v11614_v44 = vand.u32 127, %v250_v58 }
  0x8a   : > { %9341 = vmatprep.subr.bf16.mxu0 %v11595_v14  ;;  %v11606_v59 = vpack.c.bf16 %v18021_v56, %v18020_v45  ;;  %v9382_v51 = vpack.c.bf16 %v837_v12, %v830_v6  ;;  %v11617_v8 = vsub.f32 %v11589_v61, %v672_v55  ;;  %v11619_v3 = vsub.f32 %v381_v49, %v675_v16 }
  0x8b   : > { %18023 = vst [vmem:[#allocation23_spill] sm:$0xff] %v11614_v44  ;;  %9381 = vmatprep.subr.bf16.mxu1 %v9380_v36  ;;  %v956_v22 = vand.u32 4294901760, %v955_v63  ;;  %v963_v10 = vand.u32 4294901760, %v962_v47  ;;  %v18024_v41 = vand.u32 4294901760, %v11425_v46  ;;  %v18025_v6 = vand.u32 4294901760, %v11427_v48 }
  0x8c   : > { %18022 = vst [vmem:[#allocation22_spill] sm:$0xff] %v11606_v59  ;;  %9343 = vmatpush3.bf16.msra.mxu0 %v11606_v59  ;;  %9383 = vmatpush3.bf16.msra.mxu1 %v9382_v51  ;;  %v17198_v58 = vand.u32 4294901760, %v11617_v8  ;;  %v17197_v36 = vand.u32 4294901760, %v11619_v3  ;;  %v18027_v61 = vand.u32 4294901760, %v11495_v43  ;;  %v18028_v49 = vand.u32 4294901760, %v11497_v17 }
  0x8d   : > { %v11626_v12 = vpack.c.bf16 %v18025_v6, %v18024_v41  ;;  %v9384_v45 = vpack.c.bf16 %v963_v10, %v956_v22  ;;  %vm252_vm0 = vcmp.lt.s32.totalorder %v11614_v44, 1  ;;  %v18030_v47 = vand.u32 4294901760, %v11511_v23 }
  0x8e   : > { %v11634_v56 = vpack.c.bf16 %v18028_v49, %v18027_v61  ;;  %v843_v46 = vsub.f32 %v11617_v8, %v17198_v58  ;;  %v850_v48 = vsub.f32 %v11619_v3, %v17197_v36  ;;  %v18031_v22 = vand.u32 4294901760, %v11513_v27 }
  0x8f   : > { %18026 = vst [vmem:[#allocation24_spill] sm:$0xff] %v11626_v12  ;;  %9345 = vmatprep.subr.bf16.mxu0 %v11626_v12  ;;  %9385 = vmatprep.subr.bf16.mxu1 %v9384_v45  ;;  %v18033_v45 = vand.u32 4294901760, %v11517_v15  ;;  %v18034_v49 = vand.u32 4294901760, %v11519_v42  ;;  %v18037_v27 = vand.u32 4294901760, %v11553_v57  ;;  %v11682_v57 = vpack.c.bf16 %v675_v16, %v672_v55  ;;  %v11723_v55 = vld [vmem:[#allocation5 + $0x198] sm:$0xff] }
  0x90   : > { %18029 = vst [vmem:[#allocation25_spill] sm:$0xff] %v11634_v56  ;;  %9347 = vmatpush3.bf16.msra.mxu0 %v11634_v56  ;;  %v844_v17 = vand.u32 4294901760, %v843_v46  ;;  %v851_v63 = vand.u32 4294901760, %v850_v48  ;;  %v11649_v10 = vpack.c.bf16 %v18031_v22, %v18030_v47  ;;  %v9388_v47 = vpack.c.bf16 %v11262_v19, %v11251_v13  ;;  %v11721_v22 = vld [vmem:[#allocation5 + $0x190] sm:$0xff]  ;;  %18045 = vst [vmem:[#allocation35_spill] sm:$0xff] %v11723_v55 }
  0x91   : > { %v11659_v46 = vpack.c.bf16 %v18034_v49, %v18033_v45  ;;  %vm317_vm1 = vcmp.lt.s32.totalorder %v11614_v44, 2  ;;  %18044 = vst [vmem:[#allocation34_spill] sm:$0xff] %v11721_v22 }
  0x92   : > { %18032 = vst [vmem:[#allocation26_spill] sm:$0xff] %v11649_v10  ;;  %v9386_v61 = vpack.c.bf16 %v851_v63, %v844_v17  ;;  %9349 = vmatprep.subr.bf16.mxu0 %v11649_v10 }
  0x94   : > { %9387 = vmatpush3.bf16.msra.mxu1 %v9386_v61  ;;  %9351 = vmatpush3.bf16.msra.mxu0 %v11659_v46 }
  0x95   : > { %9421 = vmatprep.subr.bf16.mxu1 %v11318_v52 }
  0xcb   : > { %v249_v43 = vpop.permute.xlu1 %248  ;;  %v219_v51 = vpop.permute.xlu0 %218 }
  0xcc   : > { %v268_v41 = vsel %vm252_vm0, %v249_v43, %v219_v51 }
  0xcd   : > { %v269_v6 = vmax.f32 %v11237_v1, %v268_v41  ;;  %v18036_v1 = vand.u32 4294901760, %v11551_v33 }
  0xcf   : > { %v11661_v48 = vpop.permute.xlu1 %246  ;;  %285 = vrot.lane.b32.xlu0 %v269_v6, %s11061_s18  ;;  %v221_v23 = vpop.permute.xlu0 %220  ;;  %v11668_v17 = vpack.c.bf16 %v18037_v27, %v18036_v1 }
  0xd0   : > { %18035 = vst [vmem:[#allocation27_spill] sm:$0xff] %v11661_v48  ;;  %v253_v15 = vsel %vm252_vm0, %v11661_v48, %v249_v43  ;;  %v267_v42 = vsel %vm252_vm0, %v219_v51, %v221_v23  ;;  %v205_v43 = vld [vmem:[%s11223_s7 + $0x18] sm:$0xff]  ;;  %v204_v51 = vld [vmem:[%s11223_s7 + $0x10] sm:$0xff]  ;;  %v11779_v48 = vld [vmem:[#allocation5 + $0x128] sm:$0xff] }
  0xd1   : > { %v11678_v63 = vmax.f32 %v11234_v0, %v253_v15  ;;  %v270_v33 = vmax.f32 %v11245_v4, %v267_v42  ;;  %9353 = vmatprep.subr.bf16.mxu0 %v11668_v17  ;;  %v11715_v42 = vld [vmem:[#allocation5 + $0x100] sm:$0xff]  ;;  %v11740_v4 = vld [vmem:[#allocation5 + $0x110] sm:$0xff]  ;;  %18059 = vst [vmem:[#allocation47_spill] sm:$0xff] %v11779_v48 }
  0xd2   : > { %9355 = vmatpush3.bf16.msra.mxu0 %v11682_v57  ;;  %18041 = vst [vmem:[#allocation31_spill] sm:$0xff] %v11715_v42  ;;  %18049 = vst [vmem:[#allocation39_spill] sm:$0xff] %v11740_v4 }
  0xd3   : > { %18038 = vst [vmem:[#allocation28_spill] sm:$0xff] %v11678_v63  ;;  %315 = vrot.lane.b32.xlu0 %v11678_v63, %s11061_s18  ;;  %287 = vrot.lane.b32.xlu1 %v270_v33, %s11061_s18 }
  0xd4   : > { %9389 = vmatprep.subr.bf16.mxu0 %v9388_v47  ;;  %v11717_v47 = vld [vmem:[#allocation5 + $0x108] sm:$0xff] }
  0xd5   : > { %18042 = vst [vmem:[#allocation32_spill] sm:$0xff] %v11717_v47 }
  0xd7   : > { %224 = vrot.lane.b32.xlu0 %v205_v43, %s11060_s20  ;;  %222 = vrot.lane.b32.xlu1 %v204_v51, %s11060_s20 }
 0x141   : > { %v286_v41 = vpop.permute.xlu0 %285 }
 0x145   : > { %v11705_v61 = vpop.permute.xlu1 %287  ;;  %v11707_v45 = vpop.permute.xlu0 %315 }
 0x146   : > { %18039 = vst [vmem:[#allocation29_spill] sm:$0xff] %v11705_v61  ;;  %18040 = vst [vmem:[#allocation30_spill] sm:$0xff] %v11707_v45  ;;  %v332_v49 = vsel %vm317_vm1, %v286_v41, %v11705_v61  ;;  %v333_v1 = vsel %vm317_vm1, %v11707_v45, %v286_v41  ;;  %v11777_v45 = vld [vmem:[#allocation5 + $0x120] sm:$0xff]  ;;  %v11812_v61 = vld [vmem:[#allocation5 + $0x1b8] sm:$0xff] }
 0x147   : > { %v335_v27 = vmax.f32 %v270_v33, %v332_v49  ;;  %v334_v15 = vmax.f32 %v269_v6, %v333_v1  ;;  %v11746_v33 = vld [vmem:[#allocation5 + $0x1a0] sm:$0xff]  ;;  %18058 = vst [vmem:[#allocation46_spill] sm:$0xff] %v11777_v45  ;;  %18066 = vst [vmem:[#allocation52_spill] sm:$0xff] %v11812_v61 }
 0x148   : > { %18051 = vst [vmem:[#allocation41_spill] sm:$0xff] %v11746_v33 }
 0x149   : > { %v351_v36 = vmax.f32 %v335_v27, 0.0  ;;  %v350_v58 = vmax.f32 %v334_v15, 0.0  ;;  %v223_v54 = vpop.permute.xlu1 %222  ;;  %v11719_v60 = vpop.permute.xlu0 %224 }
 0x14a   : > { %18043 = vst [vmem:[#allocation33_spill] sm:$0xff] %v11719_v60  ;;  %v266_v16 = vsel %vm252_vm0, %v221_v23, %v223_v54  ;;  %v265_v6 = vsel %vm252_vm0, %v223_v54, %v11719_v60  ;;  %v11742_v23 = vld [vmem:[#allocation5 + $0x118] sm:$0xff]  ;;  %v18063_v54 = vand.u32 4294901760, %v11723_v55 }
 0x14b   : > { %v11732_v49 = vand.u32 4294901760, %v351_v36  ;;  %v11734_v1 = vand.u32 4294901760, %v350_v58  ;;  %v11736_v27 = vmax.f32 %v204_v51, %v266_v16  ;;  %v11738_v15 = vmax.f32 %v205_v43, %v265_v6  ;;  %18050 = vst [vmem:[#allocation40_spill] sm:$0xff] %v11742_v23  ;;  %v11757_v43 = vld [vmem:[#allocation5 + $0x1a8] sm:$0xff]  ;;  %v11763_v51 = vld [vmem:[%s11223_s7 + $0x20] sm:$0xff] }
 0x14c   : > { %18052 = vst [vmem:[#allocation42_spill] sm:$0xff] %v11757_v43  ;;  %18053 = vst [vmem:[#allocation43_spill] sm:$0xff] %v11763_v51  ;;  %v11797_v44 = vsub.f32 %v11723_v55, %v18063_v54  ;;  %v11810_v55 = vld [vmem:[#allocation5 + $0x1b0] sm:$0xff]  ;;  %v18069_v54 = vand.u32 4294901760, %v11742_v23 }
 0x14d   : > { %18046 = vst [vmem:[#allocation36_spill] sm:$0xff] %v11734_v1  ;;  %18047 = vst [vmem:[#allocation37_spill] sm:$0xff] %v11736_v27  ;;  %v11749_v41 = vsub.f32 %v351_v36, %v11732_v49  ;;  %v11752_v63 = vsub.f32 %v350_v58, %v11734_v1  ;;  %289 = vrot.lane.b32.xlu1 %v11736_v27, %s11061_s18  ;;  %966 = vmatprep.mubr.f32.mxu1 %v11732_v49  ;;  %v18054_v36 = vand.u32 4294901760, %v11715_v42 }
 0x14e   : > { %18048 = vst [vmem:[#allocation38_spill] sm:$0xff] %v11738_v15  ;;  %291 = vrot.lane.b32.xlu0 %v11738_v15, %s11061_s18  ;;  %968 = vmatmul.mubr.f32.vlgmr.msra.gmra.mrb[0].mxu1 %v11734_v1  ;;  %v18056_v58 = vand.u32 4294901760, %v11717_v47  ;;  %v11784_v15 = vld [vmem:[%s11223_s7 + $0x28] sm:$0xff]  ;;  %18064 = vst [vmem:[#allocation50_spill] sm:$0xff] %v11797_v44  ;;  %v11832_v1 = vld [vmem:[#allocation5 + $0x138] sm:$0xff] }
 0x14f   : > { %v11768_v16 = vsub.f32 %v11715_v42, %v18054_v36  ;;  %9423 = vmatpush3.bf16.msra.mxu1 %v11331_v2  ;;  %v727_v60 = vand.u32 4294901760, %v11749_v41  ;;  %18060 = vst [vmem:[#allocation48_spill] sm:$0xff] %v11784_v15  ;;  %v17214_v36 = vand.u32 4294901760, %v11752_v63  ;;  %18065 = vst [vmem:[#allocation51_spill] sm:$0xff] %v11810_v55  ;;  %v11830_v42 = vld [vmem:[#allocation5 + $0x130] sm:$0xff] }
 0x150   : > { %v11773_v6 = vsub.f32 %v11717_v47, %v18056_v58  ;;  %9425 = vmatprep.subr.bf16.mxu1 %v11344_v11  ;;  %v18061_v58 = vand.u32 4294901760, %v11721_v22  ;;  %v9390_v47 = vpack.c.bf16 %v11269_v24, %v11264_v20  ;;  %18071 = vst [vmem:[#allocation55_spill] sm:$0xff] %v11830_v42  ;;  %18072 = vst [vmem:[#allocation56_spill] sm:$0xff] %v11832_v1 }
 0x151   : > { %18055 = vst [vmem:[#allocation44_spill] sm:$0xff] %v11768_v16  ;;  %226 = vrot.lane.b32.xlu1 %v11763_v51, %s11060_s20  ;;  %1210 = vmatprep.mubr.f32.mxu1 %v727_v60  ;;  %v728_v27 = vsub.f32 %v11749_v41, %v727_v60  ;;  %v9392_v60 = vpack.c.bf16 %v11275_v26, %v11272_v25  ;;  %v18067_v51 = vand.u32 4294901760, %v11740_v4  ;;  %v18073_v16 = vand.u32 4294901760, %v11746_v33 }
 0x152   : > { %18057 = vst [vmem:[#allocation45_spill] sm:$0xff] %v11773_v6  ;;  %v11792_v0 = vsub.f32 %v11721_v22, %v18061_v58  ;;  %v734_v58 = vsub.f32 %v11752_v63, %v17214_v36  ;;  %228 = vrot.lane.b32.xlu0 %v11784_v15, %s11060_s20  ;;  %v11828_v22 = vsub.f32 %v11742_v23, %v18069_v54  ;;  %v18075_v54 = vand.u32 4294901760, %v11757_v43 }
 0x153   : > { %v11823_v36 = vsub.f32 %v11740_v4, %v18067_v51  ;;  %9427 = vmatpush3.bf16.msra.mxu1 %v11357_v35  ;;  %v729_v15 = vand.u32 4294901760, %v728_v27  ;;  %v11838_v26 = vsub.f32 %v11746_v33, %v18073_v16  ;;  %v18077_v16 = vand.u32 4294901760, %v11777_v45  ;;  %v11866_v27 = vld [vmem:[#allocation5 + $0x1c8] sm:$0xff] }
 0x154   : > { %18062 = vst [vmem:[#allocation49_spill] sm:$0xff] %v11792_v0  ;;  %18070 = vst [vmem:[#allocation54_spill] sm:$0xff] %v11828_v22  ;;  %v735_v6 = vand.u32 4294901760, %v734_v58  ;;  %9429 = vmatprep.subr.bf16.mxu1 %v11410_v62  ;;  %v11846_v23 = vsub.f32 %v11757_v43, %v18075_v54  ;;  %v18079_v51 = vand.u32 4294901760, %v11779_v48  ;;  %v11864_v43 = vld [vmem:[#allocation5 + $0x1c0] sm:$0xff]  ;;  %v11870_v58 = vld [vmem:[#allocation5 + $0x148] sm:$0xff]  ;;  %v9396_v4 = vpack.c.bf16 %v11341_v9, %v11334_v5 }
 0x155   : > { %18068 = vst [vmem:[#allocation53_spill] sm:$0xff] %v11823_v36  ;;  %18074 = vst [vmem:[#allocation57_spill] sm:$0xff] %v11838_v26  ;;  %730 = vmatprep.mubr.f32.mxu0 %v729_v15  ;;  %v11855_v33 = vsub.f32 %v11777_v45, %v18077_v16  ;;  %v11868_v15 = vld [vmem:[#allocation5 + $0x140] sm:$0xff]  ;;  %v18089_v54 = vand.u32 4294901760, %v11830_v42  ;;  %v11909_v45 = vld [vmem:[#allocation5 + $0x1d8] sm:$0xff] }
 0x156   : > { %18076 = vst [vmem:[#allocation58_spill] sm:$0xff] %v11846_v23  ;;  %v11860_v44 = vsub.f32 %v11779_v48, %v18079_v51  ;;  %18081 = vst [vmem:[#allocation61_spill] sm:$0xff] %v11864_v43  ;;  %736 = vmatmul.mubr.f32.vlgmr.msra.gmra.mrb[0].mxu0 %v735_v6  ;;  %v9394_v51 = vpack.c.bf16 %v11283_v30, %v11280_v29  ;;  %v18085_v6 = vand.u32 4294901760, %v11810_v55  ;;  %v11911_v23 = vld [vmem:[#allocation5 + $0x150] sm:$0xff]  ;;  %v18103_v22 = vand.u32 4294901760, %v11868_v15  ;;  %v11962_v36 = vld [vmem:[#allocation5 + $0x168] sm:$0xff] }
 0x157   : > { %18078 = vst [vmem:[#allocation59_spill] sm:$0xff] %v11855_v33  ;;  %18082 = vst [vmem:[#allocation62_spill] sm:$0xff] %v11866_v27  ;;  %9391 = vmatpush3.bf16.msra.mxu0 %v9390_v47  ;;  %9431 = vmatpush3.bf16.msra.mxu1 %v11429_v53  ;;  %v18087_v47 = vand.u32 4294901760, %v11812_v61  ;;  %v18099_v33 = vand.u32 4294901760, %v11864_v43 }
 0x158   : > { %18080 = vst [vmem:[#allocation60_spill] sm:$0xff] %v11860_v44  ;;  %18083 = vst [vmem:[#allocation63_spill] sm:$0xff] %v11868_v15  ;;  %1103 = vmatprep.mubr.f32.mxu0 %v11749_v41  ;;  %9393 = vmatprep.subr.bf16.mxu0 %v9392_v60  ;;  %v11885_v48 = vsub.f32 %v11810_v55, %v18085_v6  ;;  %v11898_v41 = vsub.f32 %v11830_v42, %v18089_v54  ;;  %v18091_v60 = vand.u32 4294901760, %v11832_v1  ;;  %v11913_v44 = vld [vmem:[#allocation5 + $0x158] sm:$0xff] }
 0x159   : > { %18084 = vst [vmem:[#allocation64_spill] sm:$0xff] %v11870_v58  ;;  %v11890_v16 = vsub.f32 %v11812_v61, %v18087_v47  ;;  %9433 = vmatprep.subr.bf16.mxu1 %v11451_v7  ;;  %v11907_v61 = vld [vmem:[#allocation5 + $0x1d0] sm:$0xff]  ;;  %18094 = vst [vmem:[#allocation70_spill] sm:$0xff] %v11909_v45  ;;  %v18097_v55 = vld [vmem:[#allocation12_spill] sm:$0xff]  ;;  %v11928_v26 = vsub.f32 %v11864_v43, %v18099_v33  ;;  %v18105_v42 = vand.u32 4294901760, %v11870_v58  ;;  %v18118_v43 = vand.u32 4294901760, %v11913_v44 }
 0x15a   : > { %18086 = vst [vmem:[#allocation65_spill] sm:$0xff] %v11885_v48  ;;  %18090 = vst [vmem:[#allocation67_spill] sm:$0xff] %v11898_v41  ;;  %v11903_v6 = vsub.f32 %v11832_v1, %v18091_v60  ;;  %v9398_v60 = vpack.c.bf16 %v11355_v31, %v11352_v18  ;;  %v18098_v1 = vld [vmem:[#allocation13_spill] sm:$0xff]  ;;  %v18112_v0 = vand.u32 4294901760, %v11907_v61  ;;  %v18114_v48 = vand.u32 4294901760, %v11909_v45 }
 0x15b   : > { %18088 = vst [vmem:[#allocation66_spill] sm:$0xff] %v11890_v16  ;;  %18093 = vst [vmem:[#allocation69_spill] sm:$0xff] %v11907_v61  ;;  %9395 = vmatpush3.bf16.msra.mxu0 %v9394_v51  ;;  %9435 = vmatpush3.bf16.msra.mxu1 %v11581_v39  ;;  %v9400_v47 = vpack.c.bf16 %v18098_v1, %v18097_v55  ;;  %v18101_v51 = vand.u32 4294901760, %v11866_v27  ;;  %v11953_v16 = vld [vmem:[#allocation5 + $0x160] sm:$0xff] }
 0x15c   : > { %18092 = vst [vmem:[#allocation68_spill] sm:$0xff] %v11903_v6  ;;  %18095 = vst [vmem:[#allocation71_spill] sm:$0xff] %v11911_v23  ;;  %9397 = vmatprep.subr.bf16.mxu0 %v9396_v4  ;;  %9437 = vmatprep.subr.bf16.mxu1 %v11595_v14  ;;  %v11940_v4 = vsub.f32 %v11868_v15, %v18103_v22  ;;  %v11945_v6 = vsub.f32 %v11870_v58, %v18105_v42  ;;  %v18108_v22 = vld [vmem:[#allocation14_spill] sm:$0xff]  ;;  %v18109_v15 = vld [vmem:[#allocation15_spill] sm:$0xff] }
 0x15d   : > { %18096 = vst [vmem:[#allocation72_spill] sm:$0xff] %v11913_v44  ;;  %18100 = vst [vmem:[#allocation12_spill] sm:$0xff] %v11928_v26  ;;  %v11933_v54 = vsub.f32 %v11866_v27, %v18101_v51  ;;  %v11949_v51 = vld [vmem:[#allocation5 + $0x1e0] sm:$0xff]  ;;  %v11951_v27 = vld [vmem:[#allocation5 + $0x1e8] sm:$0xff]  ;;  %v9402_v42 = vpack.c.bf16 %v18109_v15, %v18108_v22 }
 0x15e   : > { %18104 = vst [vmem:[#allocation73_spill] sm:$0xff] %v11940_v4  ;;  %18106 = vst [vmem:[#allocation74_spill] sm:$0xff] %v11945_v6  ;;  %v18110_v58 = vld [vmem:[#allocation16_spill] sm:$0xff]  ;;  %v18111_v41 = vld [vmem:[#allocation17_spill] sm:$0xff]  ;;  %v11987_v6 = vsub.f32 %v11913_v44, %v18118_v43 }
 0x15f   : > { %18102 = vst [vmem:[#allocation13_spill] sm:$0xff] %v11933_v54  ;;  %18107 = vst [vmem:[#allocation75_spill] sm:$0xff] %v11949_v51  ;;  %9399 = vmatpush3.bf16.msra.mxu0 %v9398_v60  ;;  %9439 = vmatpush3.bf16.msra.mxu1 %v11606_v59  ;;  %v9404_v33 = vpack.c.bf16 %v18111_v41, %v18110_v58  ;;  %v11970_v60 = vsub.f32 %v11907_v61, %v18112_v0  ;;  %v18116_v41 = vand.u32 4294901760, %v11911_v23  ;;  %v18122_v26 = vld [vmem:[#allocation19_spill] sm:$0xff]  ;;  %v12002_v43 = vld [vmem:[#allocation5 + $0x178] sm:$0xff] }
 0x160   : > { %9401 = vmatprep.subr.bf16.mxu0 %v9400_v47  ;;  %9441 = vmatprep.subr.bf16.mxu1 %v11626_v12  ;;  %v11975_v54 = vsub.f32 %v11909_v45, %v18114_v48  ;;  %18119 = vst [vmem:[#allocation76_spill] sm:$0xff] %v11987_v6  ;;  %v11991_v48 = vld [vmem:[#allocation5 + $0x1f0] sm:$0xff]  ;;  %v11993_v45 = vld [vmem:[#allocation5 + $0x1f8] sm:$0xff]  ;;  %18124 = vst [vmem:[#allocation19_spill] sm:$0xff] %v12002_v43 }
 0x161   : > { %18113 = vst [vmem:[#allocation14_spill] sm:$0xff] %v11970_v60  ;;  %v11982_v47 = vsub.f32 %v11911_v23, %v18116_v41  ;;  %18120 = vst [vmem:[#allocation77_spill] sm:$0xff] %v11993_v45  ;;  %v18121_v41 = vld [vmem:[#allocation18_spill] sm:$0xff]  ;;  %v12000_v4 = vld [vmem:[#allocation5 + $0x170] sm:$0xff]  ;;  %v17287_v6 = vand.u32 4294901760, %v11993_v45 }
 0x162   : > { %18115 = vst [vmem:[#allocation15_spill] sm:$0xff] %v11975_v54  ;;  %v9406_v23 = vpack.c.bf16 %v18122_v26, %v18121_v41  ;;  %18123 = vst [vmem:[#allocation18_spill] sm:$0xff] %v12000_v4  ;;  %v18125_v0 = vld [vmem:[#allocation20_spill] sm:$0xff]  ;;  %v18126_v44 = vld [vmem:[#allocation21_spill] sm:$0xff]  ;;  %v18128_v54 = vand.u32 4294901760, %v11951_v27 }
 0x163   : > { %18117 = vst [vmem:[#allocation16_spill] sm:$0xff] %v11982_v47  ;;  %9403 = vmatpush3.bf16.msra.mxu0 %v9402_v42  ;;  %9443 = vmatpush3.bf16.msra.mxu1 %v11634_v56  ;;  %v9408_v12 = vpack.c.bf16 %v18126_v44, %v18125_v0  ;;  %v18127_v42 = vand.u32 4294901760, %v11949_v51  ;;  %v18129_v56 = vand.u32 4294901760, %v11953_v16  ;;  %v18131_v47 = vand.u32 4294901760, %v11962_v36 }
 0x164   : > { %9405 = vmatprep.subr.bf16.mxu0 %v9404_v33  ;;  %9445 = vmatprep.subr.bf16.mxu1 %v11649_v10  ;;  %v12017_v60 = vsub.f32 %v11951_v27, %v18128_v54  ;;  %v17288_v33 = vand.u32 4294901760, %v11991_v48 }
 0x165   : > { %v12012_v59 = vsub.f32 %v11949_v51, %v18127_v42  ;;  %v12022_v61 = vsub.f32 %v11953_v16, %v18129_v56  ;;  %v12029_v10 = vsub.f32 %v11962_v36, %v18131_v47  ;;  %v17289_v42 = vand.u32 4294901760, %v12000_v4 }
 0x166   : > { %v12042_v47 = vsub.f32 %v11991_v48, %v17288_v33  ;;  %v12047_v51 = vsub.f32 %v11993_v45, %v17287_v6  ;;  %v18138_v56 = vpack.c.bf16 %v11509_v28, %v11504_v34  ;;  %v18139_v33 = vpack.c.bf16 %v11533_v38, %v11528_v37 }
 0x167   : > { %18130 = vst [vmem:[#allocation20_spill] sm:$0xff] %v12022_v61  ;;  %18132 = vst [vmem:[#allocation21_spill] sm:$0xff] %v12029_v10  ;;  %9407 = vmatpush3.bf16.msra.mxu0 %v9406_v23  ;;  %9447 = vmatpush3.bf16.msra.mxu1 %v11659_v46  ;;  %v12052_v23 = vsub.f32 %v12000_v4, %v17289_v42  ;;  %v18142_v6 = vpack.c.bf16 %v11575_v21, %v11570_v50 }
 0x168   : > { %9409 = vmatprep.subr.bf16.mxu0 %v9408_v12  ;;  %9449 = vmatprep.subr.bf16.mxu1 %v11668_v17  ;;  %18133 = vst [vmem:[#allocation78_spill] sm:$0xff] %v12042_v47  ;;  %18134 = vst [vmem:[#allocation79_spill] sm:$0xff] %v12047_v51  ;;  %v18136_v12 = vand.u32 4294901760, %v12002_v43 }
 0x169   : > { %18135 = vst [vmem:[#allocation80_spill] sm:$0xff] %v12052_v23 }
 0x16a   : > { %v12057_v54 = vsub.f32 %v12002_v43, %v18136_v12  ;;  %v18140_v12 = vand.u32 4294901760, %v11752_v63  ;;  %v12088_v43 = vld [vmem:[#allocation5 + $0x188] sm:$0xff] }
 0x16b   : > { %9411 = vmatpush3.bf16.msra.mxu0 %v18138_v56  ;;  %9451 = vmatpush3.bf16.msra.mxu1 %v11682_v57  ;;  %v18141_v56 = vpack.c.bf16 %v11549_v32, %v11544_v40  ;;  %v1543_v45 = vand.u32 4294901760, %v12088_v43 }
 0x16c   : > { %18137 = vst [vmem:[#allocation81_spill] sm:$0xff] %v12057_v54  ;;  %9413 = vmatprep.subr.bf16.mxu0 %v18139_v33  ;;  %9485 = vmatprep.subr.bf16.mxu1 %v11318_v52  ;;  %v18143_v52 = vand.u32 4294901760, %v11251_v13  ;;  %v18144_v33 = vand.u32 4294901760, %v11262_v19  ;;  %v18148_v19 = vand.u32 4294901760, %v11272_v25  ;;  %v18153_v25 = vand.u32 4294901760, %v11334_v5 }
 0x16d   : > { %v18158_v5 = vand.u32 4294901760, %v11355_v31  ;;  %v18162_v31 = vand.u32 4294901760, %v18109_v15 }
 0x16e   : > { %1214 = vmatmul.mubr.f32.vlgmr.msra.gmra.mrb[2].mxu1 %v18140_v12  ;;  %v9452_v42 = vpack.c.bf16 %v18144_v33, %v18143_v52  ;;  %v12086_v12 = vld [vmem:[#allocation5 + $0x180] sm:$0xff] }
 0x16f   : > { %9415 = vmatpush3.bf16.msra.mxu0 %v18141_v56  ;;  %9487 = vmatpush3.bf16.msra.mxu1 %v11331_v2  ;;  %v18145_v2 = vpack.c.bf16 %v11619_v3, %v11617_v8  ;;  %v18146_v56 = vand.u32 4294901760, %v11264_v20  ;;  %v1540_v4 = vand.u32 4294901760, %v12086_v12  ;;  %v18151_v20 = vand.u32 4294901760, %v11280_v29 }
 0x170   : > { %1484 = vmatprep.mubr.f32.mxu1 %v11732_v49  ;;  %9417 = vmatprep.subr.bf16.mxu0 %v18142_v6  ;;  %v18147_v6 = vand.u32 4294901760, %v11269_v24  ;;  %v18152_v24 = vand.u32 4294901760, %v11283_v30  ;;  %v12124_v29 = vsub.f32 %v12088_v43, %v1543_v45  ;;  %v18157_v30 = vand.u32 4294901760, %v11352_v18 }
 0x171   : > { %9489 = vmatprep.subr.bf16.mxu1 %v11344_v11  ;;  %v18149_v11 = vld [vmem:[#allocation11_spill] sm:$0xff]  ;;  %v18161_v18 = vand.u32 4294901760, %v18108_v22  ;;  %v18169_v22 = vld [vmem:[#allocation49_spill] sm:$0xff] }
 0x172   : > { %v9454_v13 = vpack.c.bf16 %v18147_v6, %v18146_v56  ;;  %v18150_v52 = vand.u32 4294901760, %v18149_v11  ;;  %18156 = vst [vmem:[#allocation82_spill] sm:$0xff] %v12124_v29  ;;  %v17297_v6 = vand.u32 4294901760, %v12124_v29  ;;  %v18166_v11 = vld [vmem:[#allocation44_spill] sm:$0xff] }
 0x173   : > { %9419 = vmatpush3.bf16.msra.mxu0 %v18145_v2  ;;  %9491 = vmatpush3.bf16.msra.mxu1 %v11357_v35  ;;  %v9458_v35 = vpack.c.bf16 %v18152_v24, %v18151_v20  ;;  %v18168_v20 = vld [vmem:[#allocation22_spill] sm:$0xff] }
 0x174   : > { %9453 = vmatprep.subr.bf16.mxu0 %v9452_v42  ;;  %9493 = vmatprep.subr.bf16.mxu1 %v11410_v62  ;;  %v9456_v33 = vpack.c.bf16 %v18150_v52, %v18148_v19  ;;  %v18154_v62 = vand.u32 4294901760, %v11341_v9  ;;  %v18159_v9 = vand.u32 4294901760, %v18097_v55  ;;  %v18167_v52 = vld [vmem:[#allocation45_spill] sm:$0xff]  ;;  %v1726_v15 = vsub.f32 %v12124_v29, %v17297_v6  ;;  %v18170_v24 = vld [vmem:[#allocation50_spill] sm:$0xff] }
 0x176   : > { %1106 = vmatmul.mubr.f32.vlgmr.msra.gmra.mrb[2].mxu0 %v11752_v63  ;;  %v9460_v42 = vpack.c.bf16 %v18154_v62, %v18153_v25  ;;  %v12119_v63 = vsub.f32 %v12086_v12, %v1540_v4  ;;  %v18171_v25 = vld [vmem:[#allocation24_spill] sm:$0xff]  ;;  %v18172_v62 = vand.u32 4294901760, %v18121_v41  ;;  %v18177_v41 = vld [vmem:[#allocation54_spill] sm:$0xff]  ;;  %v18200_v12 = vld [vmem:[#allocation73_spill] sm:$0xff] }
 0x177   : > { %9455 = vmatpush3.bf16.msra.mxu0 %v9454_v13  ;;  %1380 = vmatprep.mubr.f32.mxu0 %v11732_v49  ;;  %v18160_v49 = vand.u32 4294901760, %v18098_v1  ;;  %v18164_v13 = vld [vmem:[#allocation17_spill] sm:$0xff]  ;;  %v17296_v1 = vand.u32 4294901760, %v18166_v11 }
 0x178   : > { %9495 = vmatpush3.bf16.msra.mxu1 %v11429_v53  ;;  %9457 = vmatprep.subr.bf16.mxu0 %v9456_v33  ;;  %18155 = vst [vmem:[#allocation11_spill] sm:$0xff] %v12119_v63  ;;  %v9462_v53 = vpack.c.bf16 %v18158_v5, %v18157_v30  ;;  %v17307_v56 = vand.u32 4294901760, %v12119_v63  ;;  %v18165_v19 = vand.u32 4294901760, %v18164_v13  ;;  %v17295_v33 = vand.u32 4294901760, %v18167_v52  ;;  %v18174_v5 = vld [vmem:[#allocation53_spill] sm:$0xff] }
 0x179   : > { %9497 = vmatprep.subr.bf16.mxu1 %v11451_v7  ;;  %v9464_v2 = vpack.c.bf16 %v18160_v49, %v18159_v9  ;;  %v9466_v7 = vpack.c.bf16 %v18162_v31, %v18161_v18  ;;  %v18175_v9 = vand.u32 4294901760, %v18125_v0  ;;  %v18176_v49 = vand.u32 4294901760, %v18126_v44 }
 0x17a   : > { %v1607_v18 = vsub.f32 %v18166_v11, %v17296_v1  ;;  %v1614_v31 = vsub.f32 %v18167_v52, %v17295_v33  ;;  %v18187_v33 = vld [vmem:[#allocation60_spill] sm:$0xff] }
 0x17b   : > { %9459 = vmatpush3.bf16.msra.mxu0 %v9458_v35  ;;  %v17293_v35 = vand.u32 4294901760, %v18170_v24 }
 0x17c   : > { %9499 = vmatpush3.bf16.msra.mxu1 %v11581_v39  ;;  %9461 = vmatprep.subr.bf16.mxu0 %v9460_v42  ;;  %v18163_v39 = vand.u32 4294901760, %v18110_v58  ;;  %v17294_v58 = vand.u32 4294901760, %v18169_v22  ;;  %v18173_v42 = vand.u32 4294901760, %v18122_v26  ;;  %v18178_v26 = vld [vmem:[#allocation25_spill] sm:$0xff]  ;;  %v1608_v1 = vand.u32 4294901760, %v1607_v18 }
 0x17d   : > { %9501 = vmatprep.subr.bf16.mxu1 %v11595_v14  ;;  %v1719_v14 = vsub.f32 %v12119_v63, %v17307_v56  ;;  %v1740_v0 = vsub.f32 %v18170_v24, %v17293_v35  ;;  %v1615_v6 = vand.u32 4294901760, %v1614_v31  ;;  %v18193_v31 = vld [vmem:[#allocation66_spill] sm:$0xff] }
 0x17e   : > { %v9468_v55 = vpack.c.bf16 %v18165_v19, %v18163_v39  ;;  %v9470_v30 = vpack.c.bf16 %v18173_v42, %v18172_v62  ;;  %v17306_v39 = vand.u32 4294901760, %v18177_v41  ;;  %v1733_v44 = vsub.f32 %v18169_v22, %v17294_v58  ;;  %v18179_v19 = vld [vmem:[#allocation26_spill] sm:$0xff]  ;;  %v18182_v42 = vld [vmem:[#allocation57_spill] sm:$0xff]  ;;  %v18186_v58 = vld [vmem:[#allocation59_spill] sm:$0xff] }
 0x17f   : > { %9463 = vmatpush3.bf16.msra.mxu0 %v9462_v53  ;;  %v17298_v53 = vand.u32 4294901760, %v18174_v5  ;;  %v1720_v13 = vand.u32 4294901760, %v1719_v14 }
 0x180   : > { %9503 = vmatpush3.bf16.msra.mxu1 %v18168_v20  ;;  %9465 = vmatprep.subr.bf16.mxu0 %v9464_v2  ;;  %v9472_v2 = vpack.c.bf16 %v18176_v49, %v18175_v9  ;;  %v18180_v20 = vand.u32 4294901760, %v11504_v34  ;;  %v17303_v9 = vand.u32 4294901760, %v18182_v42  ;;  %v18185_v49 = vand.u32 4294901760, %v11533_v38 }
 0x181   : > { %9505 = vmatprep.subr.bf16.mxu1 %v18171_v25  ;;  %v18181_v25 = vand.u32 4294901760, %v11509_v28  ;;  %v1621_v35 = vsub.f32 %v18174_v5, %v17298_v53  ;;  %v17300_v34 = vand.u32 4294901760, %v18187_v33  ;;  %v18188_v28 = vand.u32 4294901760, %v11544_v40 }
 0x182   : > { %v18190_v38 = vand.u32 4294901760, %v11570_v50  ;;  %v1734_v53 = vand.u32 4294901760, %v1733_v44  ;;  %v1741_v40 = vand.u32 4294901760, %v1740_v0  ;;  %v17305_v50 = vand.u32 4294901760, %v18193_v31 }
 0x183   : > { %9467 = vmatpush3.bf16.msra.mxu0 %v9466_v7  ;;  %v1727_v7 = vand.u32 4294901760, %v1726_v15  ;;  %v9474_v62 = vpack.c.bf16 %v18181_v25, %v18180_v20  ;;  %v18184_v15 = vand.u32 4294901760, %v11528_v37  ;;  %v18189_v20 = vand.u32 4294901760, %v11549_v32 }
 0x184   : > { %9507 = vmatpush3.bf16.msra.mxu1 %v18178_v26  ;;  %9469 = vmatprep.subr.bf16.mxu0 %v9468_v55  ;;  %v18183_v55 = vld [vmem:[#allocation58_spill] sm:$0xff]  ;;  %v1628_v37 = vsub.f32 %v18177_v41, %v17306_v39  ;;  %v1747_v32 = vsub.f32 %v18182_v42, %v17303_v9  ;;  %v1622_v44 = vand.u32 4294901760, %v1621_v35  ;;  %v1642_v0 = vsub.f32 %v18187_v33, %v17300_v34  ;;  %v18199_v34 = vld [vmem:[#allocation13_spill] sm:$0xff] }
 0x185   : > { %9509 = vmatprep.subr.bf16.mxu1 %v18179_v19  ;;  %v17302_v14 = vand.u32 4294901760, %v18183_v55  ;;  %v9476_v26 = vpack.c.bf16 %v18185_v49, %v18184_v15  ;;  %v17299_v19 = vand.u32 4294901760, %v18186_v58  ;;  %v9478_v25 = vpack.c.bf16 %v18189_v20, %v18188_v28 }
 0x186   : > { %v18191_v15 = vand.u32 4294901760, %v11575_v21  ;;  %v18194_v21 = vand.u32 4294901760, %v11617_v8  ;;  %v9550_v28 = vpack.c.bf16 %v1615_v6, %v1608_v1  ;;  %v1629_v20 = vand.u32 4294901760, %v1628_v37  ;;  %v18212_v37 = vld [vmem:[#allocation35_spill] sm:$0xff] }
 0x187   : > { %9471 = vmatpush3.bf16.msra.mxu0 %v9470_v30  ;;  %v9548_v30 = vpack.c.bf16 %v1727_v7, %v1720_v13  ;;  %v1754_v18 = vsub.f32 %v18183_v55, %v17302_v14  ;;  %v18195_v13 = vand.u32 4294901760, %v11619_v3  ;;  %v12233_v8 = vpack.c.bf16 %v1543_v45, %v1540_v4  ;;  %v18196_v3 = vld [vmem:[#allocation67_spill] sm:$0xff] }
 0x188   : > { %9511 = vmatpush3.bf16.msra.mxu1 %v11659_v46  ;;  %9473 = vmatprep.subr.bf16.mxu0 %v9472_v2  ;;  %v9480_v49 = vpack.c.bf16 %v18191_v15, %v18190_v38  ;;  %v18192_v46 = vld [vmem:[#allocation65_spill] sm:$0xff]  ;;  %v17304_v38 = vand.u32 4294901760, %v18196_v3  ;;  %v9552_v35 = vpack.c.bf16 %v1741_v40, %v1734_v53  ;;  %v18197_v15 = vld [vmem:[#allocation68_spill] sm:$0xff]  ;;  %v1748_v6 = vand.u32 4294901760, %v1747_v32  ;;  %v18204_v14 = vld [vmem:[#allocation15_spill] sm:$0xff] }
 0x189   : > { %9513 = vmatprep.subr.bf16.mxu1 %v11668_v17  ;;  %v17301_v2 = vand.u32 4294901760, %v18192_v46  ;;  %v9482_v7 = vpack.c.bf16 %v18195_v13, %v18194_v21  ;;  %v1635_v17 = vsub.f32 %v18186_v58, %v17299_v19  ;;  %v17308_v21 = vand.u32 4294901760, %v18197_v15  ;;  %v18198_v13 = vld [vmem:[#allocation12_spill] sm:$0xff] }
 0x18a   : > { %v17309_v19 = vand.u32 4294901760, %v18198_v13  ;;  %v1755_v1 = vand.u32 4294901760, %v1754_v18  ;;  %v1768_v4 = vsub.f32 %v18193_v31, %v17305_v50  ;;  %v1643_v43 = vand.u32 4294901760, %v1642_v0  ;;  %v18202_v40 = vld [vmem:[#allocation36_spill] sm:$0xff]  ;;  %v18203_v18 = vld [vmem:[#allocation14_spill] sm:$0xff] }
 0x18b   : > { %9475 = vmatpush3.bf16.msra.mxu0 %v9474_v62  ;;  %v17311_v62 = vand.u32 4294901760, %v18199_v34  ;;  %v1761_v45 = vsub.f32 %v18192_v46, %v17301_v2  ;;  %v1649_v32 = vsub.f32 %v18196_v3, %v17304_v38  ;;  %v18207_v50 = vld [vmem:[#allocation32_spill] sm:$0xff]  ;;  %v18213_v53 = vand.u32 4294901760, %v18212_v37 }
 0x18c   : > { %9515 = vmatpush3.bf16.msra.mxu1 %v11682_v57  ;;  %9477 = vmatprep.subr.bf16.mxu0 %v9476_v26  ;;  %v1636_v57 = vand.u32 4294901760, %v1635_v17  ;;  %v18201_v26 = vld [vmem:[#allocation74_spill] sm:$0xff]  ;;  %v1656_v17 = vsub.f32 %v18197_v15, %v17308_v21  ;;  %v1775_v0 = vsub.f32 %v18198_v13, %v17309_v19  ;;  %v18208_v39 = vand.u32 4294901760, %v18207_v50 }
 0x18d   : > { %9549 = vmatprep.subr.bf16.mxu1 %v9548_v30  ;;  %v9554_v30 = vpack.c.bf16 %v1629_v20, %v1622_v44  ;;  %v9556_v44 = vpack.c.bf16 %v1755_v1, %v1748_v6  ;;  %v18205_v20 = vld [vmem:[#allocation31_spill] sm:$0xff]  ;;  %v1769_v56 = vand.u32 4294901760, %v1768_v4  ;;  %v18210_v21 = vld [vmem:[#allocation34_spill] sm:$0xff]  ;;  %v18215_v13 = vand.u32 4294901760, %v18200_v12  ;;  %v18220_v4 = vld [vmem:[#allocation76_spill] sm:$0xff] }
 0x18e   : > { %v18206_v38 = vand.u32 4294901760, %v18205_v20  ;;  %v9558_v9 = vpack.c.bf16 %v1643_v43, %v1636_v57  ;;  %v18211_v2 = vand.u32 4294901760, %v18210_v21  ;;  %v18216_v6 = vand.u32 4294901760, %v18201_v26 }
 0x18f   : > { %1486 = vmatmul.mubr.f32.vlgmr.msra.gmra.mrb[4].mxu1 %v18202_v40  ;;  %9479 = vmatpush3.bf16.msra.mxu0 %v9478_v25  ;;  %v1782_v25 = vsub.f32 %v18199_v34, %v17311_v62  ;;  %v1657_v43 = vand.u32 4294901760, %v1656_v17  ;;  %v17313_v20 = vand.u32 4294901760, %v12012_v59  ;;  %v18223_v62 = vld [vmem:[#allocation40_spill] sm:$0xff] }
 0x190   : > { %9481 = vmatprep.subr.bf16.mxu0 %v9480_v49  ;;  %9551 = vmatpush3.bf16.msra.mxu1 %v9550_v28  ;;  %v12267_v49 = vpack.c.bf16 %v18208_v39, %v18206_v38  ;;  %v1762_v28 = vand.u32 4294901760, %v1761_v45  ;;  %v12273_v19 = vpack.c.bf16 %v18213_v53, %v18211_v2  ;;  %v1670_v1 = vsub.f32 %v18201_v26, %v18216_v6  ;;  %v18219_v45 = vld [vmem:[#allocation16_spill] sm:$0xff] }
 0x191   : > { %9553 = vmatprep.subr.bf16.mxu1 %v9552_v35  ;;  %v1663_v35 = vsub.f32 %v18200_v12, %v18215_v13  ;;  %v18217_v39 = vand.u32 4294901760, %v18203_v18  ;;  %v18218_v38 = vand.u32 4294901760, %v18204_v14  ;;  %v1650_v13 = vand.u32 4294901760, %v1649_v32  ;;  %v18227_v32 = vld [vmem:[#allocation42_spill] sm:$0xff] }
 0x192   : > { %18209 = vst [vmem:[#allocation17_spill] sm:$0xff] %v12267_v49  ;;  %18214 = vst [vmem:[#allocation44_spill] sm:$0xff] %v12273_v19  ;;  %v1776_v53 = vand.u32 4294901760, %v1775_v0  ;;  %v1783_v37 = vand.u32 4294901760, %v1782_v25  ;;  %v17314_v6 = vand.u32 4294901760, %v12017_v60  ;;  %v18224_v2 = vand.u32 4294901760, %v18223_v62 }
 0x193   : > { %9483 = vmatpush3.bf16.msra.mxu0 %v9482_v7  ;;  %v1789_v50 = vsub.f32 %v18203_v18, %v18217_v39  ;;  %v1796_v21 = vsub.f32 %v18204_v14, %v18218_v38  ;;  %v9560_v7 = vpack.c.bf16 %v1769_v56, %v1762_v28  ;;  %v18221_v39 = vld [vmem:[#allocation39_spill] sm:$0xff]  ;;  %v18228_v17 = vand.u32 4294901760, %v18227_v32  ;;  %v18231_v32 = vld [vmem:[#allocation46_spill] sm:$0xff] }
 0x194   : > { %9555 = vmatpush3.bf16.msra.mxu1 %v9554_v30  ;;  %9517 = vmatprep.subr.bf16.mxu0 %v12233_v8  ;;  %v18222_v38 = vand.u32 4294901760, %v18221_v39  ;;  %v18225_v30 = vld [vmem:[#allocation41_spill] sm:$0xff]  ;;  %v1664_v25 = vand.u32 4294901760, %v1663_v35  ;;  %v1671_v56 = vand.u32 4294901760, %v1670_v1  ;;  %v18230_v62 = vand.u32 4294901760, %v18220_v4 }
 0x195   : > { %9557 = vmatprep.subr.bf16.mxu1 %v9556_v44  ;;  %v18226_v18 = vand.u32 4294901760, %v18225_v30  ;;  %v1790_v44 = vand.u32 4294901760, %v1789_v50  ;;  %v1797_v28 = vand.u32 4294901760, %v1796_v21  ;;  %v1803_v50 = vsub.f32 %v12012_v59, %v17313_v20 }
 0x196   : > { %1382 = vmatmul.mubr.f32.vlgmr.msra.gmra.mrb[4].mxu0 %v18202_v40  ;;  %v12297_v57 = vpack.c.bf16 %v18224_v2, %v18222_v38  ;;  %v18229_v40 = vand.u32 4294901760, %v18219_v45  ;;  %v1684_v2 = vsub.f32 %v18220_v4, %v18230_v62  ;;  %v9562_v38 = vpack.c.bf16 %v1657_v43, %v1650_v13  ;;  %v18233_v43 = vld [vmem:[#allocation47_spill] sm:$0xff] }
 0x197   : > { %v12303_v0 = vpack.c.bf16 %v18228_v17, %v18226_v18  ;;  %9519 = vmatpush3.bf16.msra.mxu0 %v12267_v49  ;;  %v9564_v18 = vpack.c.bf16 %v1783_v37, %v1776_v53  ;;  %v1810_v21 = vsub.f32 %v12017_v60, %v17314_v6  ;;  %v18232_v13 = vand.u32 4294901760, %v18231_v32  ;;  %v18235_v17 = vld [vmem:[#allocation51_spill] sm:$0xff] }
 0x198   : > { %v1677_v39 = vsub.f32 %v18219_v45, %v18229_v40  ;;  %9559 = vmatpush3.bf16.msra.mxu1 %v9558_v9  ;;  %9521 = vmatprep.subr.bf16.mxu0 %v12273_v19  ;;  %v17315_v9 = vand.u32 4294901760, %v12047_v51  ;;  %v18234_v53 = vand.u32 4294901760, %v18233_v43  ;;  %v18237_v40 = vld [vmem:[#allocation52_spill] sm:$0xff]  ;;  %v9566_v20 = vpack.c.bf16 %v1671_v56, %v1664_v25 }
 0x199   : > { %9561 = vmatprep.subr.bf16.mxu1 %v9560_v7  ;;  %v18236_v7 = vand.u32 4294901760, %v18235_v17  ;;  %v18238_v62 = vand.u32 4294901760, %v18237_v40  ;;  %v9568_v6 = vpack.c.bf16 %v1797_v28, %v1790_v44  ;;  %v1685_v30 = vand.u32 4294901760, %v1684_v2  ;;  %v18242_v2 = vld [vmem:[#allocation55_spill] sm:$0xff]  ;;  %v18244_v40 = vld [vmem:[#allocation56_spill] sm:$0xff] }
 0x19a   : > { %v12327_v37 = vpack.c.bf16 %v18234_v53, %v18232_v13  ;;  %v1678_v35 = vand.u32 4294901760, %v1677_v39  ;;  %v18239_v32 = vand.u32 4294901760, %v12022_v61  ;;  %v18240_v43 = vand.u32 4294901760, %v12029_v10 }
 0x19b   : > { %v12333_v1 = vpack.c.bf16 %v18238_v62, %v18236_v7  ;;  %9523 = vmatpush3.bf16.msra.mxu0 %v12297_v57  ;;  %v1804_v25 = vand.u32 4294901760, %v1803_v50  ;;  %v1811_v56 = vand.u32 4294901760, %v1810_v21  ;;  %v18241_v44 = vand.u32 4294901760, %v12042_v47  ;;  %v18248_v21 = vld [vmem:[#allocation62_spill] sm:$0xff] }
 0x19c   : > { %9563 = vmatpush3.bf16.msra.mxu1 %v9562_v38  ;;  %9525 = vmatprep.subr.bf16.mxu0 %v12303_v0  ;;  %v1691_v13 = vsub.f32 %v12022_v61, %v18239_v32  ;;  %v1698_v53 = vsub.f32 %v12029_v10, %v18240_v43  ;;  %v1824_v39 = vsub.f32 %v12047_v51, %v17315_v9  ;;  %v18243_v38 = vand.u32 4294901760, %v18242_v2  ;;  %v12583_v61 = vld [vmem:[#allocation5 + $0x240] sm:$0xff] }
 0x19d   : > { %9565 = vmatprep.subr.bf16.mxu1 %v9564_v18  ;;  %v1817_v28 = vsub.f32 %v12042_v47, %v18241_v44  ;;  %v18245_v62 = vand.u32 4294901760, %v18244_v40  ;;  %v9570_v43 = vpack.c.bf16 %v1685_v30, %v1678_v35  ;;  %v18246_v18 = vld [vmem:[#allocation61_spill] sm:$0xff]  ;;  %v18249_v7 = vand.u32 4294901760, %v18248_v21  ;;  %18324 = vst [vmem:[#allocation41_spill] sm:$0xff] %v12583_v61 }
 0x19e   : > { %v18247_v50 = vand.u32 4294901760, %v18246_v18  ;;  %v1692_v44 = vand.u32 4294901760, %v1691_v13  ;;  %v1699_v9 = vand.u32 4294901760, %v1698_v53  ;;  %v18250_v47 = vand.u32 4294901760, %v12052_v23  ;;  %v18254_v18 = vld [vmem:[#allocation64_spill] sm:$0xff]  ;;  %v18256_v53 = vld [vmem:[#allocation69_spill] sm:$0xff] }
 0x19f   : > { %9527 = vmatpush3.bf16.msra.mxu0 %v12327_v37  ;;  %v12356_v32 = vpack.c.bf16 %v18245_v62, %v18243_v38  ;;  %v18251_v40 = vand.u32 4294901760, %v12057_v54  ;;  %v9572_v35 = vpack.c.bf16 %v1811_v56, %v1804_v25  ;;  %v1818_v30 = vand.u32 4294901760, %v1817_v28 }
 0x1a0   : > { %v12362_v17 = vpack.c.bf16 %v18249_v7, %v18247_v50  ;;  %9567 = vmatpush3.bf16.msra.mxu1 %v9566_v20  ;;  %9529 = vmatprep.subr.bf16.mxu0 %v12333_v1  ;;  %v1705_v2 = vsub.f32 %v12052_v23, %v18250_v47  ;;  %v1825_v62 = vand.u32 4294901760, %v1824_v39  ;;  %v18252_v7 = vld [vmem:[#allocation63_spill] sm:$0xff]  ;;  %v18255_v50 = vand.u32 4294901760, %v18254_v18  ;;  %v18258_v23 = vld [vmem:[#allocation70_spill] sm:$0xff] }
 0x1a1   : > { %v1712_v38 = vsub.f32 %v12057_v54, %v18251_v40  ;;  %9569 = vmatprep.subr.bf16.mxu1 %v9568_v6  ;;  %v18253_v20 = vand.u32 4294901760, %v18252_v7  ;;  %v9574_v47 = vpack.c.bf16 %v1699_v9, %v1692_v44  ;;  %v18257_v21 = vand.u32 4294901760, %v18256_v53  ;;  %v18260_v39 = vld [vmem:[#allocation71_spill] sm:$0xff] }
 0x1a2   : > { %v18259_v40 = vand.u32 4294901760, %v18258_v23  ;;  %v1706_v25 = vand.u32 4294901760, %v1705_v2  ;;  %v9576_v28 = vpack.c.bf16 %v1825_v62, %v1818_v30  ;;  %v18261_v7 = vand.u32 4294901760, %v18260_v39  ;;  %v18264_v44 = vld [vmem:[#allocation75_spill] sm:$0xff]  ;;  %v12490_v39 = vld [vmem:[#allocation5 + $0x228] sm:$0xff] }
 0x1a3   : > { %9531 = vmatpush3.bf16.msra.mxu0 %v12356_v32  ;;  %v12376_v13 = vpack.c.bf16 %v18255_v50, %v18253_v20  ;;  %v1713_v56 = vand.u32 4294901760, %v1712_v38  ;;  %v18262_v20 = vld [vmem:[#allocation72_spill] sm:$0xff]  ;;  %v18265_v23 = vand.u32 4294901760, %v18264_v44  ;;  %v18266_v50 = vand.u32 4294901760, %v11951_v27  ;;  %v18274_v27 = vld [vmem:[#allocation18_spill] sm:$0xff]  ;;  %18302 = vst [vmem:[#allocation74_spill] sm:$0xff] %v12490_v39 }
 0x1a4   : > { %9571 = vmatpush3.bf16.msra.mxu1 %v9570_v43  ;;  %9533 = vmatprep.subr.bf16.mxu0 %v12362_v17  ;;  %v12383_v6 = vpack.c.bf16 %v18259_v40, %v18257_v21  ;;  %v18263_v18 = vand.u32 4294901760, %v18262_v20  ;;  %v18267_v38 = vand.u32 4294901760, %v11953_v16  ;;  %v18270_v62 = vand.u32 4294901760, %v11991_v48  ;;  %v18276_v16 = vld [vmem:[#allocation19_spill] sm:$0xff] }
 0x1a5   : > { %9573 = vmatprep.subr.bf16.mxu1 %v9572_v35  ;;  %v9578_v9 = vpack.c.bf16 %v1713_v56, %v1706_v25  ;;  %v12397_v2 = vpack.c.bf16 %v18266_v50, %v18265_v23  ;;  %v18268_v35 = vand.u32 4294901760, %v11962_v36  ;;  %v18275_v40 = vand.u32 4294901760, %v18274_v27  ;;  %v18283_v23 = vld [vmem:[#allocation38_spill] sm:$0xff] }
 0x1a6   : > { %v12390_v43 = vpack.c.bf16 %v18263_v18, %v18261_v7  ;;  %v18277_v25 = vand.u32 4294901760, %v18276_v16  ;;  %v9580_v56 = vpack.c.bf16 %v12124_v29, %v12119_v63  ;;  %v18282_v18 = vld [vmem:[#allocation37_spill] sm:$0xff] }
 0x1a7   : > { %9535 = vmatpush3.bf16.msra.mxu0 %v12376_v13  ;;  %v12404_v30 = vpack.c.bf16 %v18268_v35, %v18267_v38  ;;  %v12435_v38 = vld [vmem:[#allocation5 + $0x200] sm:$0xff] }
 0x1a8   : > { %9575 = vmatpush3.bf16.msra.mxu1 %v9574_v47  ;;  %9537 = vmatprep.subr.bf16.mxu0 %v12383_v6  ;;  %v18271_v47 = vld [vmem:[#allocation77_spill] sm:$0xff]  ;;  %v12419_v36 = vpack.c.bf16 %v18277_v25, %v18275_v40  ;;  %18284 = vst [vmem:[#allocation24_spill] sm:$0xff] %v12435_v38  ;;  %v18304_v63 = vand.u32 4294901760, %v12435_v38 }
 0x1a9   : > { %9577 = vmatprep.subr.bf16.mxu1 %v9576_v28  ;;  %18269 = vst [vmem:[#allocation45_spill] sm:$0xff] %v12404_v30  ;;  %v18272_v53 = vand.u32 4294901760, %v18271_v47  ;;  %v18279_v28 = vld [vmem:[#allocation29_spill] sm:$0xff]  ;;  %v12437_v47 = vld [vmem:[#allocation5 + $0x208] sm:$0xff] }
 0x1aa   : > { %18278 = vst [vmem:[#allocation49_spill] sm:$0xff] %v12419_v36  ;;  %18285 = vst [vmem:[#allocation53_spill] sm:$0xff] %v12437_v47  ;;  %v18287_v40 = vld [vmem:[#allocation33_spill] sm:$0xff]  ;;  %v12503_v29 = vsub.f32 %v12435_v38, %v18304_v63 }
 0x1ab   : > { %9539 = vmatpush3.bf16.msra.mxu0 %v12390_v43  ;;  %v12411_v21 = vpack.c.bf16 %v18272_v53, %v18270_v62  ;;  %v12439_v53 = vld [vmem:[#allocation5 + $0x290] sm:$0xff] }
 0x1ac   : > { %9579 = vmatpush3.bf16.msra.mxu1 %v9578_v9  ;;  %9541 = vmatprep.subr.bf16.mxu0 %v12397_v2  ;;  %18286 = vst [vmem:[#allocation54_spill] sm:$0xff] %v12439_v53 }
 0x1ad   : > { %18273 = vst [vmem:[#allocation22_spill] sm:$0xff] %v12411_v21  ;;  %9613 = vmatprep.subr.bf16.mxu1 %v12233_v8 }
 0x1af   : > { %9543 = vmatpush3.bf16.msra.mxu0 %v12404_v30 }
 0x1b0   : > { %9545 = vmatprep.subr.bf16.mxu0 %v12411_v21 }
 0x1b3   : > { %9547 = vmatpush3.bf16.msra.mxu0 %v12419_v36 }
 0x1b4   : > { %9581 = vmatprep.subr.bf16.mxu0 %v9580_v56  ;;  %v12446_v56 = vld [vmem:[#allocation5 + $0x298] sm:$0xff] }
 0x1b5   : > { %18289 = vst [vmem:[#allocation26_spill] sm:$0xff] %v12446_v56 }
 0x1bf   : > { %v290_v48 = vpop.permute.xlu1 %289 }
 0x1c0   : > { %v331_v7 = vsel %vm317_vm1, %v18279_v28, %v290_v48  ;;  %v12428_v20 = vpop.permute.xlu0 %291 }
 0x1c1   : > { %18281 = vst [vmem:[#allocation50_spill] sm:$0xff] %v12428_v20  ;;  %v336_v9 = vmax.f32 %v18282_v18, %v331_v7  ;;  %v330_v44 = vsel %vm317_vm1, %v290_v48, %v12428_v20  ;;  %v12448_v48 = vld [vmem:[#allocation5 + $0x210] sm:$0xff]  ;;  %v18297_v20 = vld [vmem:[#allocation48_spill] sm:$0xff] }
 0x1c2   : > { %v337_v50 = vmax.f32 %v18283_v23, %v330_v44  ;;  %18290 = vst [vmem:[#allocation57_spill] sm:$0xff] %v12448_v48  ;;  %v18292_v7 = vld [vmem:[#allocation43_spill] sm:$0xff]  ;;  %v12459_v23 = vld [vmem:[#allocation5 + $0x218] sm:$0xff] }
 0x1c3   : > { %v352_v35 = vmax.f32 %v336_v9, 0.0  ;;  %v227_v62 = vpop.permute.xlu1 %226  ;;  %18294 = vst [vmem:[#allocation60_spill] sm:$0xff] %v12459_v23 }
 0x1c4   : > { %v353_v27 = vmax.f32 %v337_v50, 0.0  ;;  %v264_v16 = vsel %vm252_vm0, %v18287_v40, %v227_v62  ;;  %v12444_v25 = vpop.permute.xlu0 %228  ;;  %v12461_v50 = vld [vmem:[#allocation5 + $0x2a0] sm:$0xff] }
 0x1c5   : > { %18288 = vst [vmem:[#allocation25_spill] sm:$0xff] %v12444_v25  ;;  %v12450_v28 = vand.u32 4294901760, %v352_v35  ;;  %v12453_v18 = vmax.f32 %v18292_v7, %v264_v16  ;;  %v263_v9 = vsel %vm252_vm0, %v227_v62, %v12444_v25  ;;  %18295 = vst [vmem:[#allocation65_spill] sm:$0xff] %v12461_v50  ;;  %v12470_v7 = vld [vmem:[#allocation5 + $0x2a8] sm:$0xff]  ;;  %v12472_v62 = vld [vmem:[#allocation5 + $0x220] sm:$0xff] }
 0x1c6   : > { %v12463_v40 = vand.u32 4294901760, %v353_v27  ;;  %v12466_v54 = vmax.f32 %v18297_v20, %v263_v9  ;;  %18299 = vst [vmem:[#allocation68_spill] sm:$0xff] %v12470_v7  ;;  %18300 = vst [vmem:[#allocation13_spill] sm:$0xff] %v12472_v62  ;;  %v12486_v16 = vld [vmem:[%s11223_s7 + $0x30] sm:$0xff]  ;;  %v12495_v20 = vld [vmem:[%s11223_s7 + $0x38] sm:$0xff] }
 0x1c7   : > { %18291 = vst [vmem:[#allocation58_spill] sm:$0xff] %v12450_v28  ;;  %18293 = vst [vmem:[#allocation59_spill] sm:$0xff] %v12453_v18  ;;  %v12475_v44 = vsub.f32 %v352_v35, %v12450_v28  ;;  %293 = vrot.lane.b32.xlu1 %v12453_v18, %s11061_s18  ;;  %v18305_v35 = vand.u32 4294901760, %v12437_v47 }
 0x1c8   : > { %18296 = vst [vmem:[#allocation66_spill] sm:$0xff] %v12463_v40  ;;  %18298 = vst [vmem:[#allocation67_spill] sm:$0xff] %v12466_v54  ;;  %v1588_v9 = vsub.f32 %v353_v27, %v12463_v40  ;;  %1828 = vmatprep.mubr.f32.mxu1 %v12463_v40  ;;  %295 = vrot.lane.b32.xlu0 %v12466_v54, %s11061_s18  ;;  %v18308_v27 = vand.u32 4294901760, %v12446_v56 }
 0x1c9   : > { %18301 = vst [vmem:[#allocation73_spill] sm:$0xff] %v12486_v16  ;;  %1830 = vmatmul.mubr.f32.vlgmr.msra.gmra.mrb[6].mxu1 %v12450_v28  ;;  %18303 = vst [vmem:[#allocation36_spill] sm:$0xff] %v12495_v20  ;;  %v12508_v18 = vsub.f32 %v12437_v47, %v18305_v35  ;;  %v18306_v28 = vand.u32 4294901760, %v12439_v53  ;;  %v18307_v25 = vand.u32 4294901760, %v12475_v44  ;;  %v18309_v35 = vand.u32 4294901760, %v12448_v48 }
 0x1ca   : > { %9615 = vmatpush3.bf16.msra.mxu1 %v12267_v49  ;;  %v1589_v54 = vand.u32 4294901760, %v1588_v9  ;;  %v12524_v38 = vsub.f32 %v12446_v56, %v18308_v27  ;;  %v18314_v56 = vand.u32 4294901760, %v12461_v50  ;;  %v18317_v49 = vand.u32 4294901760, %v12470_v7 }
 0x1cb   : > { %v12513_v51 = vsub.f32 %v12439_v53, %v18306_v28  ;;  %9617 = vmatprep.subr.bf16.mxu1 %v12273_v19  ;;  %230 = vrot.lane.b32.xlu1 %v12486_v16, %s11060_s20  ;;  %v1596_v63 = vsub.f32 %v12475_v44, %v18307_v25  ;;  %v12529_v47 = vsub.f32 %v12448_v48, %v18309_v35  ;;  %v12532_v53 = vld [vmem:[#allocation5 + $0x2b0] sm:$0xff]  ;;  %v12534_v19 = vld [vmem:[#allocation5 + $0x2b8] sm:$0xff]  ;;  %v18312_v16 = vand.u32 4294901760, %v12459_v23 }
 0x1cc   : > { %18310 = vst [vmem:[#allocation15_spill] sm:$0xff] %v12532_v53  ;;  %18311 = vst [vmem:[#allocation31_spill] sm:$0xff] %v12534_v19  ;;  %2072 = vmatprep.mubr.f32.mxu1 %v1589_v54  ;;  %232 = vrot.lane.b32.xlu0 %v12495_v20, %s11060_s20  ;;  %v1590_v25 = vsub.f32 %v1588_v9, %v1589_v54  ;;  %v12546_v35 = vsub.f32 %v12461_v50, %v18314_v56  ;;  %v12548_v28 = vld [vmem:[#allocation5 + $0x230] sm:$0xff]  ;;  %v12550_v48 = vld [vmem:[#allocation5 + $0x238] sm:$0xff]  ;;  %v18318_v54 = vand.u32 4294901760, %v12472_v62 }
 0x1cd   : > { %v12541_v27 = vsub.f32 %v12459_v23, %v18312_v16  ;;  %18315 = vst [vmem:[#allocation34_spill] sm:$0xff] %v12548_v28  ;;  %18316 = vst [vmem:[#allocation35_spill] sm:$0xff] %v12550_v48  ;;  %v1597_v40 = vand.u32 4294901760, %v1596_v63  ;;  %v12555_v20 = vsub.f32 %v12470_v7, %v18317_v49  ;;  %v18320_v49 = vand.u32 4294901760, %v12490_v39  ;;  %v12577_v7 = vld [vmem:[#allocation5 + $0x2c0] sm:$0xff]  ;;  %v12585_v50 = vld [vmem:[#allocation5 + $0x248] sm:$0xff] }
 0x1ce   : > { %v12560_v16 = vsub.f32 %v12472_v62, %v18318_v54  ;;  %9619 = vmatpush3.bf16.msra.mxu1 %v12297_v57  ;;  %v1591_v56 = vand.u32 4294901760, %v1590_v25  ;;  %18322 = vst [vmem:[#allocation39_spill] sm:$0xff] %v12577_v7  ;;  %v12579_v25 = vld [vmem:[#allocation5 + $0x2c8] sm:$0xff]  ;;  %18325 = vst [vmem:[#allocation42_spill] sm:$0xff] %v12585_v50  ;;  %v18326_v23 = vpack.c.bf16 %v18167_v52, %v18166_v11  ;;  %v18327_v63 = vand.u32 4294901760, %v12532_v53  ;;  %v12622_v62 = vld [vmem:[#allocation5 + $0x2d0] sm:$0xff] }
 0x1cf   : > { %18313 = vst [vmem:[#allocation32_spill] sm:$0xff] %v12541_v27  ;;  %9621 = vmatprep.subr.bf16.mxu1 %v12303_v0  ;;  %v12573_v54 = vsub.f32 %v12490_v39, %v18320_v49  ;;  %18323 = vst [vmem:[#allocation40_spill] sm:$0xff] %v12579_v25  ;;  %v18329_v39 = vand.u32 4294901760, %v12534_v19  ;;  %v18332_v49 = vand.u32 4294901760, %v12548_v28 }
 0x1d0   : > { %18319 = vst [vmem:[#allocation16_spill] sm:$0xff] %v12560_v16  ;;  %1592 = vmatprep.mubr.f32.mxu0 %v1591_v56  ;;  %v12598_v56 = vsub.f32 %v12532_v53, %v18327_v63  ;;  %v18334_v63 = vand.u32 4294901760, %v12550_v48  ;;  %18336 = vst [vmem:[#allocation55_spill] sm:$0xff] %v12622_v62 }
 0x1d1   : > { %18321 = vst [vmem:[#allocation76_spill] sm:$0xff] %v12573_v54  ;;  %1598 = vmatmul.mubr.f32.vlgmr.msra.gmra.mrb[6].mxu0 %v1597_v40  ;;  %v12603_v27 = vsub.f32 %v12534_v19, %v18329_v39  ;;  %v12613_v54 = vsub.f32 %v12548_v28, %v18332_v49  ;;  %v12629_v19 = vld [vmem:[#allocation5 + $0x258] sm:$0xff]  ;;  %v18340_v39 = vpack.c.bf16 %v18177_v41, %v18174_v5  ;;  %v18341_v40 = vand.u32 4294901760, %v12577_v7 }
 0x1d2   : > { %9583 = vmatpush3.bf16.msra.mxu0 %v18326_v23  ;;  %9623 = vmatpush3.bf16.msra.mxu1 %v12327_v37  ;;  %18328 = vst [vmem:[#allocation46_spill] sm:$0xff] %v12598_v56  ;;  %v18331_v23 = vpack.c.bf16 %v18170_v24, %v18169_v22  ;;  %v12618_v53 = vsub.f32 %v12550_v48, %v18334_v63  ;;  %18339 = vst [vmem:[#allocation62_spill] sm:$0xff] %v12629_v19  ;;  %v18343_v28 = vand.u32 4294901760, %v12579_v25  ;;  %v12719_v56 = vld [vmem:[#allocation5 + $0x278] sm:$0xff] }
 0x1d3   : > { %18330 = vst [vmem:[#allocation47_spill] sm:$0xff] %v12603_v27  ;;  %1965 = vmatprep.mubr.f32.mxu0 %v1588_v9  ;;  %18333 = vst [vmem:[#allocation51_spill] sm:$0xff] %v12613_v54  ;;  %v12624_v9 = vld [vmem:[#allocation5 + $0x2d8] sm:$0xff]  ;;  %9625 = vmatprep.subr.bf16.mxu1 %v12333_v1  ;;  %v12642_v48 = vsub.f32 %v12577_v7, %v18341_v40  ;;  %v18348_v7 = vand.u32 4294901760, %v12585_v50  ;;  %v12671_v54 = vld [vmem:[#allocation5 + $0x2e8] sm:$0xff] }
 0x1d4   : > { %9585 = vmatprep.subr.bf16.mxu0 %v18331_v23  ;;  %18335 = vst [vmem:[#allocation52_spill] sm:$0xff] %v12618_v53  ;;  %18337 = vst [vmem:[#allocation56_spill] sm:$0xff] %v12624_v9  ;;  %v12627_v23 = vld [vmem:[#allocation5 + $0x250] sm:$0xff]  ;;  %v12647_v16 = vsub.f32 %v12579_v25, %v18343_v28  ;;  %v18345_v53 = vpack.c.bf16 %v18183_v55, %v18182_v42  ;;  %v18355_v25 = vand.u32 4294901760, %v12624_v9 }
 0x1d5   : > { %18338 = vst [vmem:[#allocation61_spill] sm:$0xff] %v12627_v23  ;;  %18342 = vst [vmem:[#allocation63_spill] sm:$0xff] %v12642_v48  ;;  %v12663_v28 = vsub.f32 %v12585_v50, %v18348_v7  ;;  %v18353_v7 = vand.u32 4294901760, %v12622_v62  ;;  %v12689_v50 = vld [vmem:[#allocation5 + $0x260] sm:$0xff]  ;;  %v12711_v48 = vld [vmem:[#allocation5 + $0x2f8] sm:$0xff] }
 0x1d6   : > { %9587 = vmatpush3.bf16.msra.mxu0 %v18340_v39  ;;  %9627 = vmatpush3.bf16.msra.mxu1 %v12356_v32  ;;  %18344 = vst [vmem:[#allocation64_spill] sm:$0xff] %v12647_v16  ;;  %v18346_v39 = vand.u32 4294901760, %v12583_v61  ;;  %18351 = vst [vmem:[#allocation72_spill] sm:$0xff] %v12671_v54  ;;  %v12687_v49 = vsub.f32 %v12624_v9, %v18355_v25  ;;  %v12691_v16 = vld [vmem:[#allocation5 + $0x268] sm:$0xff]  ;;  %v18369_v9 = vld [vmem:[#allocation12_spill] sm:$0xff] }
 0x1d7   : > { %9589 = vmatprep.subr.bf16.mxu0 %v18345_v53  ;;  %9629 = vmatprep.subr.bf16.mxu1 %v12362_v17  ;;  %18349 = vst [vmem:[#allocation70_spill] sm:$0xff] %v12663_v28  ;;  %v12669_v53 = vld [vmem:[#allocation5 + $0x2e0] sm:$0xff]  ;;  %v12682_v63 = vsub.f32 %v12622_v62, %v18353_v7  ;;  %18357 = vst [vmem:[#allocation18_spill] sm:$0xff] %v12689_v50  ;;  %v18362_v62 = vand.u32 4294901760, %v12629_v19  ;;  %v18368_v28 = vpack.c.bf16 %v18197_v15, %v18196_v3 }
 0x1d8   : > { %v12658_v40 = vsub.f32 %v12583_v61, %v18346_v39  ;;  %18350 = vst [vmem:[#allocation71_spill] sm:$0xff] %v12669_v53  ;;  %v18352_v61 = vpack.c.bf16 %v18187_v33, %v18186_v58  ;;  %18356 = vst [vmem:[#allocation77_spill] sm:$0xff] %v12687_v49  ;;  %v18359_v39 = vpack.c.bf16 %v18193_v31, %v18192_v46  ;;  %v18375_v49 = vand.u32 4294901760, %v12689_v50 }
 0x1d9   : > { %18354 = vst [vmem:[#allocation75_spill] sm:$0xff] %v12682_v63  ;;  %18358 = vst [vmem:[#allocation19_spill] sm:$0xff] %v12691_v16  ;;  %v12705_v25 = vsub.f32 %v12629_v19, %v18362_v62  ;;  %v18371_v19 = vand.u32 4294901760, %v12669_v53  ;;  %v18377_v27 = vand.u32 4294901760, %v12691_v16 }
 0x1da   : > { %18347 = vst [vmem:[#allocation69_spill] sm:$0xff] %v12658_v40  ;;  %9591 = vmatpush3.bf16.msra.mxu0 %v18352_v61  ;;  %9631 = vmatpush3.bf16.msra.mxu1 %v12376_v13  ;;  %v18360_v61 = vand.u32 4294901760, %v12627_v23  ;;  %v12709_v40 = vld [vmem:[#allocation5 + $0x2f0] sm:$0xff]  ;;  %18365 = vst [vmem:[#allocation33_spill] sm:$0xff] %v12711_v48 }
 0x1db   : > { %9593 = vmatprep.subr.bf16.mxu0 %v18359_v39  ;;  %9633 = vmatprep.subr.bf16.mxu1 %v12383_v6  ;;  %18363 = vst [vmem:[#allocation37_spill] sm:$0xff] %v12705_v25  ;;  %18364 = vst [vmem:[#allocation38_spill] sm:$0xff] %v12709_v40  ;;  %v18370_v39 = vpack.c.bf16 %v18199_v34, %v18369_v9  ;;  %v12736_v62 = vsub.f32 %v12669_v53, %v18371_v19  ;;  %v18373_v25 = vand.u32 4294901760, %v12671_v54 }
 0x1dc   : > { %v12700_v7 = vsub.f32 %v12627_v23, %v18360_v61  ;;  %v12717_v23 = vld [vmem:[#allocation5 + $0x270] sm:$0xff]  ;;  %18367 = vst [vmem:[#allocation48_spill] sm:$0xff] %v12719_v56  ;;  %v12748_v61 = vsub.f32 %v12689_v50, %v18375_v49  ;;  %v12753_v63 = vsub.f32 %v12691_v16, %v18377_v27  ;;  %v18379_v19 = vpack.c.bf16 %v18201_v26, %v18200_v12  ;;  %v18396_v50 = vld [vmem:[#allocation66_spill] sm:$0xff] }
 0x1dd   : > { %18366 = vst [vmem:[#allocation43_spill] sm:$0xff] %v12717_v23  ;;  %18372 = vst [vmem:[#allocation12_spill] sm:$0xff] %v12736_v62  ;;  %v18382_v49 = vand.u32 4294901760, %v12709_v40  ;;  %v18384_v16 = vand.u32 4294901760, %v12711_v48 }
 0x1de   : > { %18361 = vst [vmem:[#allocation29_spill] sm:$0xff] %v12700_v7  ;;  %9595 = vmatpush3.bf16.msra.mxu0 %v18368_v28  ;;  %9635 = vmatpush3.bf16.msra.mxu1 %v12390_v43  ;;  %v12741_v28 = vsub.f32 %v12671_v54, %v18373_v25  ;;  %18376 = vst [vmem:[#allocation84_spill] sm:$0xff] %v12748_v61  ;;  %v18386_v25 = vand.u32 4294901760, %v12717_v23 }
 0x1df   : > { %9597 = vmatprep.subr.bf16.mxu0 %v18370_v39  ;;  %9637 = vmatprep.subr.bf16.mxu1 %v12397_v2  ;;  %18378 = vst [vmem:[#allocation85_spill] sm:$0xff] %v12753_v63  ;;  %v18380_v39 = vld [vmem:[#allocation14_spill] sm:$0xff]  ;;  %v12768_v27 = vsub.f32 %v12709_v40, %v18382_v49  ;;  %v18392_v49 = vand.u32 4294901760, %v12475_v44  ;;  %v18397_v40 = vld [vmem:[#allocation79_spill] sm:$0xff] }
 0x1e0   : > { %18374 = vst [vmem:[#allocation83_spill] sm:$0xff] %v12741_v28  ;;  %v18381_v7 = vpack.c.bf16 %v18204_v14, %v18380_v39  ;;  %v12780_v54 = vsub.f32 %v12717_v23, %v18386_v25  ;;  %v18391_v25 = vpack.c.bf16 %v12017_v60, %v12012_v59 }
 0x1e1   : > { %18383 = vst [vmem:[#allocation14_spill] sm:$0xff] %v12768_v27  ;;  %v18404_v27 = vld [vmem:[#allocation44_spill] sm:$0xff] }
 0x1e2   : > { %9599 = vmatpush3.bf16.msra.mxu0 %v18379_v19  ;;  %9639 = vmatpush3.bf16.msra.mxu1 %v12404_v30  ;;  %v12773_v19 = vsub.f32 %v12711_v48, %v18384_v16  ;;  %18387 = vst [vmem:[#allocation87_spill] sm:$0xff] %v12780_v54  ;;  %v18390_v16 = vpack.c.bf16 %v18220_v4, %v18219_v45  ;;  %v18395_v48 = vld [vmem:[#allocation17_spill] sm:$0xff] }
 0x1e3   : > { %9601 = vmatprep.subr.bf16.mxu0 %v18381_v7  ;;  %9641 = vmatprep.subr.bf16.mxu1 %v12411_v21  ;;  %v18388_v7 = vand.u32 4294901760, %v12719_v56 }
 0x1e4   : > { %18385 = vst [vmem:[#allocation86_spill] sm:$0xff] %v12773_v19 }
 0x1e5   : > { %v12785_v53 = vsub.f32 %v12719_v56, %v18388_v7  ;;  %v12799_v7 = vld [vmem:[#allocation5 + $0x280] sm:$0xff]  ;;  %v12801_v56 = vld [vmem:[#allocation5 + $0x288] sm:$0xff] }
 0x1e6   : > { %9603 = vmatpush3.bf16.msra.mxu0 %v18390_v16  ;;  %9643 = vmatpush3.bf16.msra.mxu1 %v12419_v36  ;;  %v18393_v16 = vld [vmem:[#allocation20_spill] sm:$0xff]  ;;  %v18398_v36 = vld [vmem:[#allocation78_spill] sm:$0xff]  ;;  %v2402_v19 = vand.u32 4294901760, %v12799_v7 }
 0x1e7   : > { %18389 = vst [vmem:[#allocation88_spill] sm:$0xff] %v12785_v53  ;;  %9605 = vmatprep.subr.bf16.mxu0 %v18391_v25  ;;  %9677 = vmatprep.subr.bf16.mxu1 %v12233_v8  ;;  %v18394_v23 = vpack.c.bf16 %v12029_v10, %v18393_v16  ;;  %v18399_v25 = vpack.c.bf16 %v18397_v40, %v18398_v36  ;;  %v18400_v8 = vld [vmem:[#allocation11_spill] sm:$0xff]  ;;  %v18402_v53 = vld [vmem:[#allocation82_spill] sm:$0xff]  ;;  %v18406_v10 = vld [vmem:[#allocation80_spill] sm:$0xff]  ;;  %v18408_v40 = vand.u32 4294901760, %v18166_v11 }
 0x1e8   : > { %v18401_v21 = vand.u32 4294901760, %v18400_v8  ;;  %v18403_v54 = vand.u32 4294901760, %v18402_v53 }
 0x1e9   : > { %2076 = vmatmul.mubr.f32.vlgmr.msra.gmra.mrb[8].mxu1 %v18392_v49  ;;  %v17433_v49 = vand.u32 4294901760, %v12801_v56 }
 0x1ea   : > { %9607 = vmatpush3.bf16.msra.mxu0 %v18394_v23  ;;  %9679 = vmatpush3.bf16.msra.mxu1 %v18395_v48  ;;  %v9644_v30 = vpack.c.bf16 %v18403_v54, %v18401_v21  ;;  %v18405_v23 = vld [vmem:[#allocation81_spill] sm:$0xff]  ;;  %v18410_v21 = vand.u32 4294901760, %v18169_v22  ;;  %v18411_v54 = vand.u32 4294901760, %v18170_v24  ;;  %v18415_v22 = vand.u32 4294901760, %v18177_v41 }
 0x1eb   : > { %2346 = vmatprep.mubr.f32.mxu1 %v18396_v50  ;;  %9609 = vmatprep.subr.bf16.mxu0 %v18399_v25  ;;  %v18407_v48 = vpack.c.bf16 %v18405_v23, %v18406_v10  ;;  %v18409_v25 = vand.u32 4294901760, %v18167_v52  ;;  %v12841_v11 = vsub.f32 %v12801_v56, %v17433_v49  ;;  %v18414_v52 = vand.u32 4294901760, %v18174_v5 }
 0x1ec   : > { %9681 = vmatprep.subr.bf16.mxu1 %v18404_v27  ;;  %v9648_v53 = vpack.c.bf16 %v18411_v54, %v18410_v21  ;;  %v12836_v27 = vsub.f32 %v12799_v7, %v2402_v19  ;;  %v18418_v5 = vand.u32 4294901760, %v18186_v58  ;;  %v18419_v41 = vand.u32 4294901760, %v18187_v33  ;;  %v18467_v7 = vld [vmem:[#allocation75_spill] sm:$0xff] }
 0x1ed   : > { %v9646_v8 = vpack.c.bf16 %v18409_v25, %v18408_v40  ;;  %18413 = vst [vmem:[#allocation17_spill] sm:$0xff] %v12841_v11  ;;  %v9650_v24 = vpack.c.bf16 %v18415_v22, %v18414_v52  ;;  %v17418_v58 = vand.u32 4294901760, %v12513_v51  ;;  %v17417_v52 = vand.u32 4294901760, %v12524_v38 }
 0x1ee   : > { %9611 = vmatpush3.bf16.msra.mxu0 %v18407_v48  ;;  %9683 = vmatpush3.bf16.msra.mxu1 %v12297_v57  ;;  %18412 = vst [vmem:[#allocation20_spill] sm:$0xff] %v12836_v27  ;;  %v18416_v57 = vand.u32 4294901760, %v18182_v42  ;;  %v17422_v40 = vand.u32 4294901760, %v12836_v27  ;;  %v17419_v48 = vand.u32 4294901760, %v12508_v18  ;;  %v18420_v42 = vand.u32 4294901760, %v18192_v46 }
 0x1ef   : > { %9645 = vmatprep.subr.bf16.mxu0 %v9644_v30  ;;  %9685 = vmatprep.subr.bf16.mxu1 %v12303_v0  ;;  %v18417_v0 = vand.u32 4294901760, %v18183_v55  ;;  %v18421_v55 = vand.u32 4294901760, %v18193_v31  ;;  %v18423_v46 = vand.u32 4294901760, %v18197_v15  ;;  %v2595_v22 = vsub.f32 %v12513_v51, %v17418_v58 }
 0x1f0   : > { %v12888_v21 = vsub.f32 %v12508_v18, %v17419_v48  ;;  %v18449_v48 = vand.u32 4294901760, %v18393_v16 }
 0x1f1   : > { %1968 = vmatmul.mubr.f32.vlgmr.msra.gmra.mrb[8].mxu0 %v12475_v44  ;;  %v9652_v30 = vpack.c.bf16 %v18417_v0, %v18416_v57  ;;  %v17421_v44 = vand.u32 4294901760, %v12841_v11  ;;  %v9656_v25 = vpack.c.bf16 %v18421_v55, %v18420_v42  ;;  %v18426_v57 = vld [vmem:[#allocation32_spill] sm:$0xff]  ;;  %v18427_v0 = vand.u32 4294901760, %v18200_v12 }
 0x1f2   : > { %9647 = vmatpush3.bf16.msra.mxu0 %v9646_v8  ;;  %2242 = vmatprep.mubr.f32.mxu0 %v18396_v50  ;;  %v9654_v50 = vpack.c.bf16 %v18419_v41, %v18418_v5  ;;  %v18430_v5 = vand.u32 4294901760, %v18204_v14  ;;  %v18433_v55 = vand.u32 4294901760, %v12012_v59  ;;  %v17414_v14 = vand.u32 4294901760, %v12555_v20 }
 0x1f3   : > { %9687 = vmatpush3.bf16.msra.mxu1 %v12327_v37  ;;  %9649 = vmatprep.subr.bf16.mxu0 %v9648_v53  ;;  %v17420_v37 = vand.u32 4294901760, %v12503_v29  ;;  %v2588_v33 = vsub.f32 %v12841_v11, %v17421_v44  ;;  %v2602_v59 = vsub.f32 %v12524_v38, %v17417_v52  ;;  %v18446_v52 = vld [vmem:[#allocation47_spill] sm:$0xff] }
 0x1f4   : > { %9689 = vmatprep.subr.bf16.mxu1 %v12333_v1  ;;  %v2581_v1 = vsub.f32 %v12836_v27, %v17422_v40  ;;  %v17434_v58 = vand.u32 4294901760, %v18446_v52  ;;  %v18452_v40 = vand.u32 4294901760, %v18398_v36 }
 0x1f5   : > { %v12883_v31 = vsub.f32 %v12503_v29, %v17420_v37  ;;  %v2589_v53 = vand.u32 4294901760, %v2588_v33  ;;  %v2596_v33 = vand.u32 4294901760, %v2595_v22  ;;  %v18450_v37 = vld [vmem:[#allocation21_spill] sm:$0xff] }
 0x1f6   : > { %9651 = vmatpush3.bf16.msra.mxu0 %v9650_v24  ;;  %v2582_v15 = vand.u32 4294901760, %v2581_v1  ;;  %v17416_v24 = vand.u32 4294901760, %v12529_v47  ;;  %v18451_v44 = vand.u32 4294901760, %v18450_v37  ;;  %v2630_v36 = vsub.f32 %v18446_v52, %v17434_v58  ;;  %v18459_v37 = vld [vmem:[#allocation64_spill] sm:$0xff] }
 0x1f7   : > { %9691 = vmatpush3.bf16.msra.mxu1 %v12356_v32  ;;  %9653 = vmatprep.subr.bf16.mxu0 %v9652_v30  ;;  %v18422_v32 = vand.u32 4294901760, %v18196_v3  ;;  %v18425_v3 = vand.u32 4294901760, %v18199_v34  ;;  %v18429_v30 = vand.u32 4294901760, %v18380_v39  ;;  %v2470_v12 = vand.u32 4294901760, %v12883_v31  ;;  %v18436_v31 = vld [vmem:[#allocation76_spill] sm:$0xff] }
 0x1f8   : > { %9693 = vmatprep.subr.bf16.mxu1 %v12362_v17  ;;  %v18424_v17 = vand.u32 4294901760, %v18369_v9  ;;  %v18428_v9 = vand.u32 4294901760, %v18201_v26  ;;  %v2477_v26 = vand.u32 4294901760, %v12888_v21  ;;  %v17413_v39 = vand.u32 4294901760, %v12546_v35 }
 0x1f9   : > { %v9658_v8 = vpack.c.bf16 %v18423_v46, %v18422_v32  ;;  %v9664_v41 = vpack.c.bf16 %v18430_v5, %v18429_v30  ;;  %v2483_v32 = vsub.f32 %v12529_v47, %v17416_v24  ;;  %v18435_v46 = vld [vmem:[#allocation16_spill] sm:$0xff]  ;;  %v17428_v21 = vand.u32 4294901760, %v18436_v31  ;;  %v18440_v30 = vld [vmem:[#allocation45_spill] sm:$0xff] }
 0x1fa   : > { %9655 = vmatpush3.bf16.msra.mxu0 %v9654_v50  ;;  %v9660_v54 = vpack.c.bf16 %v18425_v3, %v18424_v17  ;;  %v9662_v34 = vpack.c.bf16 %v18428_v9, %v18427_v0  ;;  %v18432_v50 = vand.u32 4294901760, %v18220_v4  ;;  %v17429_v4 = vand.u32 4294901760, %v12741_v28  ;;  %v18439_v0 = vld [vmem:[#allocation86_spill] sm:$0xff] }
 0x1fb   : > { %9695 = vmatpush3.bf16.msra.mxu1 %v12376_v13  ;;  %9657 = vmatprep.subr.bf16.mxu0 %v9656_v25  ;;  %v17415_v13 = vand.u32 4294901760, %v18426_v57  ;;  %v18434_v25 = vand.u32 4294901760, %v12017_v60  ;;  %v17430_v60 = vand.u32 4294901760, %v12736_v62  ;;  %v17427_v17 = vand.u32 4294901760, %v12748_v61 }
 0x1fc   : > { %9697 = vmatprep.subr.bf16.mxu1 %v12383_v6  ;;  %v18431_v6 = vand.u32 4294901760, %v18219_v45  ;;  %v9740_v45 = vpack.c.bf16 %v2589_v53, %v2582_v15  ;;  %v17426_v3 = vand.u32 4294901760, %v12753_v63  ;;  %v2616_v15 = vsub.f32 %v12555_v20, %v17414_v14  ;;  %v18438_v53 = vld [vmem:[#allocation14_spill] sm:$0xff] }
 0x1fd   : > { %v9668_v1 = vpack.c.bf16 %v18434_v25, %v18433_v55  ;;  %v17425_v22 = vand.u32 4294901760, %v18438_v53  ;;  %v17423_v9 = vand.u32 4294901760, %v18439_v0  ;;  %v2603_v5 = vand.u32 4294901760, %v2602_v59  ;;  %v18442_v55 = vld [vmem:[#allocation88_spill] sm:$0xff] }
 0x1fe   : > { %v9666_v42 = vpack.c.bf16 %v18432_v50, %v18431_v6  ;;  %9659 = vmatpush3.bf16.msra.mxu0 %v9658_v8  ;;  %v17424_v8 = vand.u32 4294901760, %v18435_v46  ;;  %v18441_v6 = vld [vmem:[#allocation87_spill] sm:$0xff]  ;;  %v12960_v25 = vpack.c.bf16 %v17426_v3, %v17427_v17  ;;  %v2484_v14 = vand.u32 4294901760, %v2483_v32 }
 0x1ff   : > { %9699 = vmatpush3.bf16.msra.mxu1 %v12390_v43  ;;  %9661 = vmatprep.subr.bf16.mxu0 %v9660_v54  ;;  %v2490_v43 = vsub.f32 %v18426_v57, %v17415_v13  ;;  %v2609_v54 = vsub.f32 %v12546_v35, %v17413_v39  ;;  %v17432_v50 = vand.u32 4294901760, %v18441_v6  ;;  %v18444_v39 = vld [vmem:[#allocation22_spill] sm:$0xff]  ;;  %v2617_v17 = vand.u32 4294901760, %v2616_v15 }
 0x200   : > { %9701 = vmatprep.subr.bf16.mxu1 %v12397_v2  ;;  %v12943_v2 = vpack.c.bf16 %v17429_v4, %v17430_v60  ;;  %18443 = vst [vmem:[#allocation78_spill] sm:$0xff] %v12960_v25  ;;  %v18445_v13 = vld [vmem:[#allocation46_spill] sm:$0xff]  ;;  %v9742_v4 = vpack.c.bf16 %v2477_v26, %v2470_v12  ;;  %v9744_v60 = vpack.c.bf16 %v2603_v5, %v2596_v33  ;;  %v18461_v12 = vand.u32 4294901760, %v18405_v23  ;;  %v18465_v5 = vld [vmem:[#allocation69_spill] sm:$0xff] }
 0x201   : > { %v17435_v24 = vand.u32 4294901760, %v18445_v13  ;;  %v2491_v59 = vand.u32 4294901760, %v2490_v43  ;;  %v9670_v43 = vpack.c.bf16 %v18451_v44, %v18449_v48  ;;  %v2610_v3 = vand.u32 4294901760, %v2609_v54 }
 0x202   : > { %18437 = vst [vmem:[#allocation66_spill] sm:$0xff] %v12943_v2  ;;  %9663 = vmatpush3.bf16.msra.mxu0 %v9662_v34  ;;  %v17431_v34 = vand.u32 4294901760, %v18442_v55  ;;  %v17439_v48 = vand.u32 4294901760, %v18459_v37  ;;  %v18463_v54 = vand.u32 4294901760, %v12801_v56  ;;  %v17441_v58 = vand.u32 4294901760, %v18465_v5  ;;  %v18468_v56 = vld [vmem:[#allocation77_spill] sm:$0xff] }
 0x203   : > { %9703 = vmatpush3.bf16.msra.mxu1 %v18440_v30  ;;  %9665 = vmatprep.subr.bf16.mxu0 %v9664_v41  ;;  %v12969_v41 = vpack.c.bf16 %v17423_v9, %v17425_v22  ;;  %v2497_v30 = vsub.f32 %v18435_v46, %v17424_v8  ;;  %v18453_v9 = vld [vmem:[#allocation79_spill] sm:$0xff]  ;;  %v2623_v16 = vsub.f32 %v18445_v13, %v17435_v24  ;;  %v18466_v24 = vld [vmem:[#allocation70_spill] sm:$0xff]  ;;  %v18514_v25 = vand.u32 4294901760, %v18441_v6  ;;  %v18522_v2 = vld [vmem:[#allocation56_spill] sm:$0xff] }
 0x204   : > { %9705 = vmatprep.subr.bf16.mxu1 %v18444_v39  ;;  %v2504_v39 = vsub.f32 %v18436_v31, %v17428_v21  ;;  %v12981_v32 = vpack.c.bf16 %v17431_v34, %v17432_v50  ;;  %v18454_v8 = vand.u32 4294901760, %v18453_v9  ;;  %v18455_v21 = vld [vmem:[#allocation49_spill] sm:$0xff]  ;;  %v18456_v34 = vld [vmem:[#allocation51_spill] sm:$0xff]  ;;  %v9746_v33 = vpack.c.bf16 %v2491_v59, %v2484_v14 }
 0x205   : > { %18447 = vst [vmem:[#allocation11_spill] sm:$0xff] %v12969_v41  ;;  %v17437_v50 = vand.u32 4294901760, %v18456_v34  ;;  %v13011_v15 = vpack.c.bf16 %v18463_v54, %v2402_v19  ;;  %v9748_v9 = vpack.c.bf16 %v2617_v17, %v2610_v3  ;;  %v17442_v59 = vand.u32 4294901760, %v18467_v7 }
 0x206   : > { %18448 = vst [vmem:[#allocation82_spill] sm:$0xff] %v12981_v32  ;;  %9667 = vmatpush3.bf16.msra.mxu0 %v9666_v42  ;;  %v9672_v22 = vpack.c.bf16 %v18454_v8, %v18452_v40  ;;  %v18457_v42 = vld [vmem:[#allocation52_spill] sm:$0xff]  ;;  %v18458_v40 = vld [vmem:[#allocation63_spill] sm:$0xff]  ;;  %v2498_v8 = vand.u32 4294901760, %v2497_v30  ;;  %v17443_v19 = vand.u32 4294901760, %v18468_v56  ;;  %v2624_v17 = vand.u32 4294901760, %v2623_v16 }
 0x207   : > { %9707 = vmatpush3.bf16.msra.mxu1 %v18455_v21  ;;  %9669 = vmatprep.subr.bf16.mxu0 %v9668_v1  ;;  %v17436_v49 = vand.u32 4294901760, %v18457_v42  ;;  %v17438_v44 = vand.u32 4294901760, %v18458_v40  ;;  %v18460_v1 = vand.u32 4294901760, %v18406_v10  ;;  %v18462_v21 = vld [vmem:[#allocation58_spill] sm:$0xff]  ;;  %18464 = vst [vmem:[#allocation44_spill] sm:$0xff] %v13011_v15  ;;  %v17440_v10 = vand.u32 4294901760, %v18466_v24 }
 0x208   : > { %9741 = vmatprep.subr.bf16.mxu1 %v9740_v45  ;;  %v2505_v45 = vand.u32 4294901760, %v2504_v39  ;;  %v2511_v23 = vsub.f32 %v18456_v34, %v17437_v50  ;;  %v2631_v3 = vand.u32 4294901760, %v2630_v36  ;;  %v18469_v30 = vld [vmem:[#allocation24_spill] sm:$0xff]  ;;  %v18494_v32 = vld [vmem:[#allocation13_spill] sm:$0xff] }
 0x209   : > { %v9674_v26 = vpack.c.bf16 %v18461_v12, %v18460_v1  ;;  %v2518_v14 = vsub.f32 %v18457_v42, %v17436_v49  ;;  %v18470_v39 = vand.u32 4294901760, %v18469_v30  ;;  %v18474_v49 = vld [vmem:[#allocation54_spill] sm:$0xff]  ;;  %v2532_v30 = vsub.f32 %v18466_v24, %v17440_v10  ;;  %v18481_v10 = vld [vmem:[#allocation57_spill] sm:$0xff] }
 0x20a   : > { %2348 = vmatmul.mubr.f32.vlgmr.msra.gmra.mrb[10].mxu1 %v18462_v21  ;;  %9671 = vmatpush3.bf16.msra.mxu0 %v9670_v43  ;;  %v18471_v43 = vld [vmem:[#allocation53_spill] sm:$0xff]  ;;  %v9750_v54 = vpack.c.bf16 %v2505_v45, %v2498_v8  ;;  %v18475_v50 = vand.u32 4294901760, %v18474_v49  ;;  %v2512_v49 = vand.u32 4294901760, %v2511_v23  ;;  %v9752_v45 = vpack.c.bf16 %v2631_v3, %v2624_v17  ;;  %v18489_v3 = vld [vmem:[#allocation68_spill] sm:$0xff] }
 0x20b   : > { %9673 = vmatprep.subr.bf16.mxu0 %v9672_v22  ;;  %9743 = vmatpush3.bf16.msra.mxu1 %v9742_v4  ;;  %v2637_v22 = vsub.f32 %v18458_v40, %v17438_v44  ;;  %v2644_v4 = vsub.f32 %v18459_v37, %v17439_v48  ;;  %v18472_v1 = vand.u32 4294901760, %v18471_v43  ;;  %v2525_v44 = vsub.f32 %v18465_v5, %v17441_v58  ;;  %v18479_v48 = vld [vmem:[#allocation29_spill] sm:$0xff]  ;;  %v18483_v58 = vld [vmem:[#allocation60_spill] sm:$0xff] }
 0x20c   : > { %9745 = vmatprep.subr.bf16.mxu1 %v9744_v60  ;;  %v18476_v60 = vld [vmem:[#allocation26_spill] sm:$0xff]  ;;  %v17444_v43 = vand.u32 4294901760, %v18479_v48  ;;  %v2519_v8 = vand.u32 4294901760, %v2518_v14 }
 0x20d   : > { %v13033_v12 = vpack.c.bf16 %v18472_v1, %v18470_v39  ;;  %v18477_v16 = vand.u32 4294901760, %v18476_v60  ;;  %v18480_v39 = vld [vmem:[#allocation37_spill] sm:$0xff]  ;;  %v2638_v60 = vand.u32 4294901760, %v2637_v22  ;;  %v18484_v1 = vand.u32 4294901760, %v18483_v58 }
 0x20e   : > { %9675 = vmatpush3.bf16.msra.mxu0 %v9674_v26  ;;  %v2658_v26 = vsub.f32 %v18468_v56, %v17443_v19  ;;  %v2526_v14 = vand.u32 4294901760, %v2525_v44  ;;  %v2539_v19 = vsub.f32 %v18479_v48, %v17444_v43  ;;  %v18490_v22 = vand.u32 4294901760, %v18489_v3 }
 0x20f   : > { %18473 = vst [vmem:[#allocation81_spill] sm:$0xff] %v13033_v12  ;;  %v13039_v36 = vpack.c.bf16 %v18477_v16, %v18475_v50  ;;  %9747 = vmatpush3.bf16.msra.mxu1 %v9746_v33  ;;  %9709 = vmatprep.subr.bf16.mxu0 %v13011_v15  ;;  %v2651_v50 = vsub.f32 %v18467_v7, %v17442_v59  ;;  %v2645_v16 = vand.u32 4294901760, %v2644_v4  ;;  %v18482_v33 = vand.u32 4294901760, %v18481_v10  ;;  %v18487_v10 = vld [vmem:[#allocation65_spill] sm:$0xff] }
 0x210   : > { %9749 = vmatprep.subr.bf16.mxu1 %v9748_v9  ;;  %v2533_v59 = vand.u32 4294901760, %v2532_v30  ;;  %v18486_v9 = vand.u32 4294901760, %v18480_v39  ;;  %v18488_v58 = vand.u32 4294901760, %v18487_v10  ;;  %v2659_v30 = vand.u32 4294901760, %v2658_v26  ;;  %v18498_v26 = vld [vmem:[#allocation15_spill] sm:$0xff] }
 0x211   : > { %18478 = vst [vmem:[#allocation80_spill] sm:$0xff] %v13039_v36  ;;  %2244 = vmatmul.mubr.f32.vlgmr.msra.gmra.mrb[10].mxu0 %v18462_v21  ;;  %v13061_v23 = vpack.c.bf16 %v18484_v1, %v18482_v33  ;;  %v9754_v21 = vpack.c.bf16 %v2519_v8, %v2512_v49  ;;  %v2652_v44 = vand.u32 4294901760, %v2651_v50  ;;  %v9756_v1 = vpack.c.bf16 %v2645_v16, %v2638_v60  ;;  %v18496_v8 = vld [vmem:[#allocation74_spill] sm:$0xff]  ;;  %v18500_v60 = vld [vmem:[#allocation31_spill] sm:$0xff] }
 0x212   : > { %9711 = vmatpush3.bf16.msra.mxu0 %v13033_v12  ;;  %v2546_v17 = vsub.f32 %v18480_v39, %v18486_v9  ;;  %v13075_v4 = vpack.c.bf16 %v18490_v22, %v18488_v58  ;;  %v18492_v33 = vand.u32 4294901760, %v12736_v62  ;;  %v18493_v9 = vand.u32 4294901760, %v12741_v28 }
 0x213   : > { %18485 = vst [vmem:[#allocation32_spill] sm:$0xff] %v13061_v23  ;;  %9751 = vmatpush3.bf16.msra.mxu1 %v9750_v54  ;;  %9713 = vmatprep.subr.bf16.mxu0 %v13039_v36  ;;  %v18495_v49 = vand.u32 4294901760, %v18494_v32  ;;  %v18497_v10 = vand.u32 4294901760, %v18496_v8  ;;  %v9758_v50 = vpack.c.bf16 %v2533_v59, %v2526_v14  ;;  %v18501_v16 = vand.u32 4294901760, %v18500_v60 }
 0x214   : > { %18491 = vst [vmem:[#allocation16_spill] sm:$0xff] %v13075_v4  ;;  %9753 = vmatprep.subr.bf16.mxu1 %v9752_v45  ;;  %v2665_v43 = vsub.f32 %v12736_v62, %v18492_v33  ;;  %v2672_v54 = vsub.f32 %v12741_v28, %v18493_v9  ;;  %v18499_v45 = vand.u32 4294901760, %v18498_v26  ;;  %v2540_v3 = vand.u32 4294901760, %v2539_v19  ;;  %v18508_v26 = vld [vmem:[#allocation35_spill] sm:$0xff] }
 0x215   : > { %v13087_v41 = vpack.c.bf16 %v18497_v10, %v18495_v49  ;;  %v2547_v22 = vand.u32 4294901760, %v2546_v17  ;;  %v9760_v33 = vpack.c.bf16 %v2659_v30, %v2652_v44  ;;  %v18502_v32 = vand.u32 4294901760, %v12748_v61  ;;  %v18506_v44 = vld [vmem:[#allocation34_spill] sm:$0xff] }
 0x216   : > { %9715 = vmatpush3.bf16.msra.mxu0 %v13061_v23  ;;  %v13094_v58 = vpack.c.bf16 %v18501_v16, %v18499_v45  ;;  %v18503_v49 = vand.u32 4294901760, %v12753_v63  ;;  %v2666_v14 = vand.u32 4294901760, %v2665_v43  ;;  %v2673_v8 = vand.u32 4294901760, %v2672_v54  ;;  %v18512_v54 = vld [vmem:[#allocation40_spill] sm:$0xff] }
 0x217   : > { %9755 = vmatpush3.bf16.msra.mxu1 %v9754_v21  ;;  %9717 = vmatprep.subr.bf16.mxu0 %v13075_v4  ;;  %v2553_v9 = vsub.f32 %v12748_v61, %v18502_v32  ;;  %v18504_v10 = vand.u32 4294901760, %v18438_v53  ;;  %v18505_v17 = vand.u32 4294901760, %v18439_v0  ;;  %v18507_v30 = vand.u32 4294901760, %v18506_v44  ;;  %v13230_v61 = vld [vmem:[#allocation5 + $0x3a0] sm:$0xff] }
 0x218   : > { %v2560_v59 = vsub.f32 %v12753_v63, %v18503_v49  ;;  %9757 = vmatprep.subr.bf16.mxu1 %v9756_v1  ;;  %v18509_v45 = vand.u32 4294901760, %v18508_v26  ;;  %v9762_v16 = vpack.c.bf16 %v2547_v22, %v2540_v3  ;;  %v18510_v1 = vld [vmem:[#allocation39_spill] sm:$0xff]  ;;  %v18513_v32 = vand.u32 4294901760, %v18512_v54  ;;  %18566 = vst [vmem:[#allocation75_spill] sm:$0xff] %v13230_v61 }
 0x219   : > { %v2679_v19 = vsub.f32 %v18438_v53, %v18504_v10  ;;  %v2686_v21 = vsub.f32 %v18439_v0, %v18505_v17  ;;  %v18511_v43 = vand.u32 4294901760, %v18510_v1  ;;  %v2554_v10 = vand.u32 4294901760, %v2553_v9  ;;  %v18516_v1 = vld [vmem:[#allocation41_spill] sm:$0xff] }
 0x21a   : > { %9719 = vmatpush3.bf16.msra.mxu0 %v13087_v41  ;;  %v13114_v60 = vpack.c.bf16 %v18509_v45, %v18507_v30  ;;  %v2561_v17 = vand.u32 4294901760, %v2560_v59  ;;  %v2567_v44 = vsub.f32 %v18441_v6, %v18514_v25  ;;  %v18515_v26 = vand.u32 4294901760, %v18442_v55  ;;  %v18520_v59 = vld [vmem:[#allocation55_spill] sm:$0xff] }
 0x21b   : > { %v13120_v49 = vpack.c.bf16 %v18513_v32, %v18511_v43  ;;  %9759 = vmatpush3.bf16.msra.mxu1 %v9758_v50  ;;  %9721 = vmatprep.subr.bf16.mxu0 %v13094_v58  ;;  %v9764_v3 = vpack.c.bf16 %v2673_v8, %v2666_v14  ;;  %v2680_v22 = vand.u32 4294901760, %v2679_v19  ;;  %v2687_v45 = vand.u32 4294901760, %v2686_v21  ;;  %v18518_v43 = vld [vmem:[#allocation42_spill] sm:$0xff] }
 0x21c   : > { %v2574_v30 = vsub.f32 %v18442_v55, %v18515_v26  ;;  %9761 = vmatprep.subr.bf16.mxu1 %v9760_v33  ;;  %v18517_v50 = vand.u32 4294901760, %v18516_v1  ;;  %v18519_v54 = vand.u32 4294901760, %v18518_v43  ;;  %v9766_v25 = vpack.c.bf16 %v2561_v17, %v2554_v10  ;;  %v18528_v17 = vld [vmem:[#allocation71_spill] sm:$0xff]  ;;  %v18555_v55 = vld [vmem:[#allocation25_spill] sm:$0xff] }
 0x21d   : > { %v18521_v32 = vand.u32 4294901760, %v18520_v59  ;;  %v18523_v26 = vand.u32 4294901760, %v18522_v2  ;;  %v2568_v14 = vand.u32 4294901760, %v2567_v44  ;;  %v9768_v19 = vpack.c.bf16 %v2687_v45, %v2680_v22  ;;  %v18532_v45 = vld [vmem:[#allocation18_spill] sm:$0xff] }
 0x21e   : > { %9723 = vmatpush3.bf16.msra.mxu0 %v13114_v60  ;;  %v13134_v9 = vpack.c.bf16 %v18519_v54, %v18517_v50  ;;  %v2575_v8 = vand.u32 4294901760, %v2574_v30  ;;  %v18524_v50 = vld [vmem:[#allocation61_spill] sm:$0xff]  ;;  %v18529_v44 = vand.u32 4294901760, %v18528_v17  ;;  %v18530_v30 = vld [vmem:[#allocation72_spill] sm:$0xff]  ;;  %v18533_v59 = vand.u32 4294901760, %v18532_v45 }
 0x21f   : > { %9763 = vmatpush3.bf16.msra.mxu1 %v9762_v16  ;;  %9725 = vmatprep.subr.bf16.mxu0 %v13120_v49  ;;  %v13141_v33 = vpack.c.bf16 %v18523_v26, %v18521_v32  ;;  %v18525_v43 = vand.u32 4294901760, %v18524_v50  ;;  %v18526_v16 = vld [vmem:[#allocation62_spill] sm:$0xff]  ;;  %v18534_v32 = vld [vmem:[#allocation19_spill] sm:$0xff]  ;;  %v18544_v17 = vld [vmem:[#allocation48_spill] sm:$0xff]  ;;  %v9772_v45 = vpack.c.bf16 %v12841_v11, %v12836_v27 }
 0x220   : > { %9765 = vmatprep.subr.bf16.mxu1 %v9764_v3  ;;  %v18527_v54 = vand.u32 4294901760, %v18526_v16  ;;  %v9770_v2 = vpack.c.bf16 %v2575_v8, %v2568_v14  ;;  %v18531_v3 = vand.u32 4294901760, %v18530_v30  ;;  %v18535_v26 = vand.u32 4294901760, %v18534_v32  ;;  %v18539_v8 = vld [vmem:[#allocation33_spill] sm:$0xff]  ;;  %v13207_v11 = vld [vmem:[#allocation5 + $0x390] sm:$0xff] }
 0x221   : > { %v7711_v21 = vpop.f32.mrb[0].mxu1  ;;  %18556 = vst [vmem:[#allocation49_spill] sm:$0xff] %v13207_v11 }
 0x222   : > { %v7712_v1 = vpop.f32.mrb[1].mxu1  ;;  %9727 = vmatpush3.bf16.msra.mxu0 %v13134_v9  ;;  %v13148_v6 = vpack.c.bf16 %v18527_v54, %v18525_v43  ;;  %v13155_v22 = vpack.c.bf16 %v18531_v3, %v18529_v44  ;;  %v13162_v50 = vpack.c.bf16 %v18535_v26, %v18533_v59  ;;  %v7637_v43 = vld [vmem:[%s17130_s2] ss:$0 sm:$0xff]  ;;  %v18542_v54 = vld [vmem:[#allocation43_spill] sm:$0xff]  ;;  %v18545_v44 = vand.u32 4294901760, %v18544_v17 }
 0x223   : > { %v7713_v10 = vadd.f32 %v7712_v1, %v7711_v21  ;;  %9767 = vmatpush3.bf16.msra.mxu1 %v9766_v25  ;;  %9729 = vmatprep.subr.bf16.mxu0 %v13141_v33  ;;  %v18537_v25 = vld [vmem:[#allocation38_spill] sm:$0xff]  ;;  %v18540_v21 = vand.u32 4294901760, %v18539_v8 }
 0x224   : > { %9769 = vmatprep.subr.bf16.mxu1 %v9768_v19  ;;  %18536 = vst [vmem:[#allocation76_spill] sm:$0xff] %v13162_v50  ;;  %v18538_v14 = vand.u32 4294901760, %v18537_v25 }
 0x226   : > { %9731 = vmatpush3.bf16.msra.mxu0 %v13148_v6  ;;  %v13169_v1 = vpack.c.bf16 %v18540_v21, %v18538_v14  ;;  %v18548_v14 = vld [vmem:[#allocation50_spill] sm:$0xff] }
 0x227   : > { %9771 = vmatpush3.bf16.msra.mxu1 %v9770_v2  ;;  %9733 = vmatprep.subr.bf16.mxu0 %v13155_v22  ;;  %v18543_v2 = vand.u32 4294901760, %v18542_v54 }
 0x228   : > { %18541 = vst [vmem:[#allocation45_spill] sm:$0xff] %v13169_v1  ;;  %9805 = vmatprep.subr.bf16.mxu1 %v13011_v15 }
 0x229   : > { %v7676_v19 = vpop.f32.mrb[0].mxu0  ;;  %v13180_v30 = vpack.c.bf16 %v18545_v44, %v18543_v2  ;;  %v18551_v2 = vld [vmem:[#allocation67_spill] sm:$0xff] }
 0x22a   : > { %v7677_v16 = vpop.f32.mrb[1].mxu0  ;;  %9735 = vmatpush3.bf16.msra.mxu0 %v13162_v50 }
 0x22b   : > { %18546 = vst [vmem:[#allocation22_spill] sm:$0xff] %v13180_v30  ;;  %v7678_v3 = vadd.f32 %v7677_v16, %v7676_v19  ;;  %9737 = vmatprep.subr.bf16.mxu0 %v13169_v1  ;;  %v18550_v16 = vld [vmem:[#allocation59_spill] sm:$0xff] }
 0x22d   : > { %v738_v59 = vadd.f32 %v7678_v3, %v7637_v43  ;;  %v13200_v3 = vld [vmem:[#allocation5 + $0x308] sm:$0xff] }
 0x22e   : > { %9739 = vmatpush3.bf16.msra.mxu0 %v13180_v30  ;;  %18553 = vst [vmem:[#allocation21_spill] sm:$0xff] %v13200_v3 }
 0x22f   : > { %v13186_v32 = vadd.f32 %v7713_v10, %v738_v59  ;;  %9773 = vmatprep.subr.bf16.mxu0 %v9772_v45  ;;  %v13198_v10 = vld [vmem:[#allocation5 + $0x300] sm:$0xff] }
 0x230   : > { %18552 = vst [vmem:[#allocation47_spill] sm:$0xff] %v13198_v10 }
 0x239   : > { %v294_v26 = vpop.permute.xlu1 %293 }
 0x23a   : > { %v13188_v25 = vpop.permute.xlu0 %295  ;;  %v329_v21 = vsel %vm317_vm1, %v18548_v14, %v294_v26 }
 0x23b   : > { %18547 = vst [vmem:[#allocation46_spill] sm:$0xff] %v13188_v25  ;;  %v328_v19 = vsel %vm317_vm1, %v294_v26, %v13188_v25  ;;  %v338_v54 = vmax.f32 %v18550_v16, %v329_v21  ;;  %v13209_v26 = vld [vmem:[#allocation5 + $0x398] sm:$0xff]  ;;  %v18559_v16 = vld [vmem:[#allocation73_spill] sm:$0xff] }
 0x23c   : > { %v339_v43 = vmax.f32 %v18551_v2, %v328_v19  ;;  %18557 = vst [vmem:[#allocation51_spill] sm:$0xff] %v13209_v26  ;;  %v13219_v2 = vld [vmem:[#allocation5 + $0x310] sm:$0xff] }
 0x23d   : > { %v354_v17 = vmax.f32 %v338_v54, 0.0  ;;  %v231_v44 = vpop.permute.xlu1 %230  ;;  %18561 = vst [vmem:[#allocation64_spill] sm:$0xff] %v13219_v2 }
 0x23e   : > { %v355_v45 = vmax.f32 %v339_v43, 0.0  ;;  %v13202_v59 = vpop.permute.xlu0 %232  ;;  %v262_v14 = vsel %vm252_vm0, %v18555_v55, %v231_v44  ;;  %v13221_v43 = vld [vmem:[#allocation5 + $0x318] sm:$0xff] }
 0x23f   : > { %18554 = vst [vmem:[#allocation79_spill] sm:$0xff] %v13202_v59  ;;  %v13211_v21 = vand.u32 4294901760, %v354_v17  ;;  %v261_v19 = vsel %vm252_vm0, %v231_v44, %v13202_v59  ;;  %v13217_v54 = vmax.f32 %v18559_v16, %v262_v14  ;;  %18562 = vst [vmem:[#allocation58_spill] sm:$0xff] %v13221_v43  ;;  %v18564_v55 = vld [vmem:[#allocation36_spill] sm:$0xff]  ;;  %v13232_v44 = vld [vmem:[#allocation5 + $0x3a8] sm:$0xff] }
 0x240   : > { %v13223_v25 = vand.u32 4294901760, %v355_v45  ;;  %v13226_v27 = vmax.f32 %v18564_v55, %v261_v19  ;;  %18567 = vst [vmem:[#allocation77_spill] sm:$0xff] %v13232_v44  ;;  %v13241_v55 = vld [vmem:[#allocation5 + $0x320] sm:$0xff]  ;;  %v13254_v59 = vld [vmem:[#allocation5 + $0x328] sm:$0xff] }
 0x241   : > { %18558 = vst [vmem:[#allocation52_spill] sm:$0xff] %v13211_v21  ;;  %18560 = vst [vmem:[#allocation63_spill] sm:$0xff] %v13217_v54  ;;  %v13235_v14 = vsub.f32 %v354_v17, %v13211_v21  ;;  %v7781_v16 = vpop.f32.mrb[2].mxu1  ;;  %297 = vrot.lane.b32.xlu1 %v13217_v54, %s11061_s18  ;;  %v13250_v17 = vld [vmem:[%s11223_s7 + $0x40] sm:$0xff]  ;;  %v18573_v54 = vand.u32 4294901760, %v13198_v10 }
 0x242   : > { %18563 = vst [vmem:[#allocation69_spill] sm:$0xff] %v13223_v25  ;;  %18565 = vst [vmem:[#allocation70_spill] sm:$0xff] %v13226_v27  ;;  %v13244_v0 = vsub.f32 %v355_v45, %v13223_v25  ;;  %v7782_v53 = vpop.f32.mrb[3].mxu1  ;;  %2690 = vmatprep.mubr.f32.mxu1 %v13223_v25  ;;  %299 = vrot.lane.b32.xlu0 %v13226_v27, %s11061_s18  ;;  %v13261_v45 = vld [vmem:[%s11223_s7 + $0x48] sm:$0xff] }
 0x243   : > { %18568 = vst [vmem:[#allocation24_spill] sm:$0xff] %v13235_v14  ;;  %18569 = vst [vmem:[#allocation53_spill] sm:$0xff] %v13241_v55  ;;  %v13257_v63 = vadd.f32 %v7782_v53, %v7781_v16  ;;  %2692 = vmatmul.mubr.f32.vlgmr.msra.gmra.mrb[12].mxu1 %v13211_v21  ;;  %v13270_v15 = vsub.f32 %v13198_v10, %v18573_v54  ;;  %v18574_v53 = vand.u32 4294901760, %v13200_v3  ;;  %v13278_v21 = vld [vmem:[#allocation5 + $0x3b0] sm:$0xff]  ;;  %v18576_v27 = vand.u32 4294901760, %v13235_v14 }
 0x244   : > { %18570 = vst [vmem:[#allocation54_spill] sm:$0xff] %v13250_v17  ;;  %18571 = vst [vmem:[#allocation26_spill] sm:$0xff] %v13254_v59  ;;  %9807 = vmatpush3.bf16.msra.mxu1 %v13033_v12  ;;  %v2451_v8 = vand.u32 4294901760, %v13244_v0  ;;  %v18577_v54 = vand.u32 4294901760, %v13207_v11  ;;  %v13299_v12 = vld [vmem:[#allocation5 + $0x330] sm:$0xff] }
 0x245   : > { %18572 = vst [vmem:[#allocation29_spill] sm:$0xff] %v13261_v45  ;;  %v13275_v16 = vsub.f32 %v13200_v3, %v18574_v53  ;;  %18575 = vst [vmem:[#allocation37_spill] sm:$0xff] %v13278_v21  ;;  %9809 = vmatprep.subr.bf16.mxu1 %v13039_v36  ;;  %234 = vrot.lane.b32.xlu1 %v13250_v17, %s11060_s20  ;;  %v2458_v25 = vsub.f32 %v13235_v14, %v18576_v27  ;;  %v18578_v53 = vand.u32 4294901760, %v13209_v26  ;;  %v13297_v36 = vld [vmem:[#allocation5 + $0x3b8] sm:$0xff] }
 0x246   : > { %v13289_v10 = vsub.f32 %v13207_v11, %v18577_v54  ;;  %18579 = vst [vmem:[#allocation57_spill] sm:$0xff] %v13297_v36  ;;  %18580 = vst [vmem:[#allocation60_spill] sm:$0xff] %v13299_v12  ;;  %2934 = vmatprep.mubr.f32.mxu1 %v2451_v8  ;;  %236 = vrot.lane.b32.xlu0 %v13261_v45, %s11060_s20  ;;  %v2452_v27 = vsub.f32 %v13244_v0, %v2451_v8  ;;  %v18581_v54 = vand.u32 4294901760, %v13219_v2  ;;  %v13314_v3 = vld [vmem:[#allocation5 + $0x338] sm:$0xff] }
 0x247   : > { %v13294_v19 = vsub.f32 %v13209_v26, %v18578_v53  ;;  %v18582_v53 = vand.u32 4294901760, %v13221_v43  ;;  %18583 = vst [vmem:[#allocation65_spill] sm:$0xff] %v13314_v3  ;;  %v2459_v11 = vand.u32 4294901760, %v2458_v25  ;;  %v18584_v14 = vand.u32 4294901760, %v13230_v61 }
 0x248   : > { %v13307_v17 = vsub.f32 %v13219_v2, %v18581_v54  ;;  %v18585_v8 = vand.u32 4294901760, %v13232_v44  ;;  %9811 = vmatpush3.bf16.msra.mxu1 %v13061_v23  ;;  %v2453_v2 = vand.u32 4294901760, %v2452_v27  ;;  %v13342_v27 = vld [vmem:[#allocation5 + $0x3c0] sm:$0xff]  ;;  %v13344_v23 = vld [vmem:[#allocation5 + $0x3c8] sm:$0xff] }
 0x249   : > { %v13312_v26 = vsub.f32 %v13221_v43, %v18582_v53  ;;  %v13319_v62 = vsub.f32 %v13230_v61, %v18584_v14  ;;  %v18586_v53 = vand.u32 4294901760, %v13241_v55  ;;  %v7746_v61 = vpop.f32.mrb[2].mxu0  ;;  %9813 = vmatprep.subr.bf16.mxu1 %v13075_v4  ;;  %18589 = vst [vmem:[#allocation13_spill] sm:$0xff] %v13342_v27  ;;  %18590 = vst [vmem:[#allocation74_spill] sm:$0xff] %v13344_v23  ;;  %v13352_v4 = vld [vmem:[#allocation5 + $0x348] sm:$0xff] }
 0x24a   : > { %v13324_v45 = vsub.f32 %v13232_v44, %v18585_v8  ;;  %v18587_v8 = vand.u32 4294901760, %v13254_v59  ;;  %v7747_v25 = vpop.f32.mrb[3].mxu0  ;;  %2454 = vmatprep.mubr.f32.mxu0 %v2453_v2  ;;  %18592 = vst [vmem:[#allocation31_spill] sm:$0xff] %v13352_v4  ;;  %v18595_v14 = vpack.c.bf16 %v12508_v18, %v12503_v29  ;;  %v13395_v2 = vld [vmem:[#allocation5 + $0x3d8] sm:$0xff] }
 0x24b   : > { %v13331_v43 = vsub.f32 %v13241_v55, %v18586_v53  ;;  %v13350_v55 = vld [vmem:[#allocation5 + $0x340] sm:$0xff]  ;;  %v7748_v54 = vadd.f32 %v7747_v25, %v7746_v61  ;;  %2460 = vmatmul.mubr.f32.vlgmr.msra.gmra.mrb[12].mxu0 %v2459_v11  ;;  %v18596_v61 = vand.u32 4294901760, %v13297_v36  ;;  %v13393_v53 = vld [vmem:[#allocation5 + $0x3d0] sm:$0xff]  ;;  %18604 = vst [vmem:[#allocation42_spill] sm:$0xff] %v13395_v2 }
 0x24c   : > { %v13339_v44 = vsub.f32 %v13254_v59, %v18587_v8  ;;  %18591 = vst [vmem:[#allocation15_spill] sm:$0xff] %v13350_v55  ;;  %v18593_v59 = vand.u32 4294901760, %v13278_v21  ;;  %9775 = vmatpush3.bf16.msra.mxu0 %v18595_v14  ;;  %9815 = vmatpush3.bf16.msra.mxu1 %v13087_v41  ;;  %v18600_v14 = vpack.c.bf16 %v12524_v38, %v12513_v51  ;;  %18603 = vst [vmem:[#allocation41_spill] sm:$0xff] %v13393_v53 }
 0x24d   : > { %v13372_v11 = vsub.f32 %v13297_v36, %v18596_v61  ;;  %v1108_v8 = vadd.f32 %v7748_v54, %v13186_v32  ;;  %2827 = vmatprep.mubr.f32.mxu0 %v13244_v0  ;;  %v18601_v61 = vand.u32 4294901760, %v13314_v3  ;;  %9817 = vmatprep.subr.bf16.mxu1 %v13094_v58  ;;  %v13398_v0 = vld [vmem:[#allocation5 + $0x350] sm:$0xff]  ;;  %v13400_v32 = vld [vmem:[#allocation5 + $0x358] sm:$0xff] }
 0x24e   : > { %18588 = vst [vmem:[#allocation68_spill] sm:$0xff] %v13339_v44  ;;  %v13359_v28 = vsub.f32 %v13278_v21, %v18593_v59  ;;  %v18598_v59 = vand.u32 4294901760, %v13299_v12  ;;  %9777 = vmatprep.subr.bf16.mxu0 %v18600_v14  ;;  %18605 = vst [vmem:[#allocation55_spill] sm:$0xff] %v13398_v0  ;;  %v18610_v21 = vand.u32 4294901760, %v13344_v23 }
 0x24f   : > { %18597 = vst [vmem:[#allocation35_spill] sm:$0xff] %v13372_v11  ;;  %v13389_v36 = vsub.f32 %v13314_v3, %v18601_v61  ;;  %18606 = vst [vmem:[#allocation56_spill] sm:$0xff] %v13400_v32  ;;  %v13405_v14 = vadd.f32 %v13257_v63, %v1108_v8  ;;  %v18612_v61 = vpack.c.bf16 %v12555_v20, %v12546_v35  ;;  %v13493_v11 = vld [vmem:[#allocation5 + $0x378] sm:$0xff] }
 0x250   : > { %18594 = vst [vmem:[#allocation34_spill] sm:$0xff] %v13359_v28  ;;  %v13377_v25 = vsub.f32 %v13299_v12, %v18598_v59  ;;  %v18607_v12 = vpack.c.bf16 %v18426_v57, %v12529_v47  ;;  %9819 = vmatpush3.bf16.msra.mxu1 %v13114_v60  ;;  %v18608_v59 = vand.u32 4294901760, %v13342_v27  ;;  %v13421_v54 = vsub.f32 %v13344_v23, %v18610_v21 }
 0x251   : > { %18602 = vst [vmem:[#allocation40_spill] sm:$0xff] %v13389_v36  ;;  %9821 = vmatprep.subr.bf16.mxu1 %v13120_v49  ;;  %v13445_v36 = vld [vmem:[#allocation5 + $0x3e8] sm:$0xff]  ;;  %v18622_v23 = vand.u32 4294901760, %v13395_v2  ;;  %18632 = vst [vmem:[#allocation25_spill] sm:$0xff] %v13493_v11 }
 0x252   : > { %18599 = vst [vmem:[#allocation39_spill] sm:$0xff] %v13377_v25  ;;  %9779 = vmatpush3.bf16.msra.mxu0 %v18607_v12  ;;  %v13416_v3 = vsub.f32 %v13342_v27, %v18608_v59  ;;  %18611 = vst [vmem:[#allocation62_spill] sm:$0xff] %v13421_v54  ;;  %v18613_v12 = vand.u32 4294901760, %v13350_v55  ;;  %v18615_v27 = vand.u32 4294901760, %v13352_v4  ;;  %v13465_v54 = vld [vmem:[#allocation5 + $0x368] sm:$0xff] }
 0x253   : > { %9781 = vmatprep.subr.bf16.mxu0 %v18612_v61  ;;  %v13443_v61 = vld [vmem:[#allocation5 + $0x3e0] sm:$0xff]  ;;  %18618 = vst [vmem:[#allocation19_spill] sm:$0xff] %v13445_v36  ;;  %v13461_v63 = vsub.f32 %v13395_v2, %v18622_v23  ;;  %18625 = vst [vmem:[#allocation48_spill] sm:$0xff] %v13465_v54  ;;  %v18640_v25 = vand.u32 4294901760, %v13465_v54 }
 0x254   : > { %18609 = vst [vmem:[#allocation61_spill] sm:$0xff] %v13416_v3  ;;  %v13432_v59 = vsub.f32 %v13350_v55, %v18613_v12  ;;  %v13437_v21 = vsub.f32 %v13352_v4, %v18615_v27  ;;  %18617 = vst [vmem:[#allocation18_spill] sm:$0xff] %v13443_v61  ;;  %v18619_v55 = vpack.c.bf16 %v18436_v31, %v18435_v46  ;;  %9823 = vmatpush3.bf16.msra.mxu1 %v13134_v9  ;;  %v13463_v4 = vld [vmem:[#allocation5 + $0x360] sm:$0xff]  ;;  %v13485_v3 = vld [vmem:[#allocation5 + $0x3f8] sm:$0xff] }
 0x255   : > { %v18620_v27 = vand.u32 4294901760, %v13393_v53  ;;  %18623 = vst [vmem:[#allocation33_spill] sm:$0xff] %v13461_v63  ;;  %18624 = vst [vmem:[#allocation43_spill] sm:$0xff] %v13463_v4  ;;  %v18626_v12 = vpack.c.bf16 %v18446_v52, %v18445_v13  ;;  %9825 = vmatprep.subr.bf16.mxu1 %v13141_v33  ;;  %v17515_v2 = vand.u32 4294901760, %v13443_v61  ;;  %v13527_v28 = vsub.f32 %v13465_v54, %v18640_v25  ;;  %v18663_v54 = vld [vmem:[#allocation69_spill] sm:$0xff] }
 0x256   : > { %18614 = vst [vmem:[#allocation71_spill] sm:$0xff] %v13432_v59  ;;  %18616 = vst [vmem:[#allocation72_spill] sm:$0xff] %v13437_v21  ;;  %9783 = vmatpush3.bf16.msra.mxu0 %v18619_v55  ;;  %v18627_v55 = vand.u32 4294901760, %v13398_v0  ;;  %v13483_v59 = vld [vmem:[#allocation5 + $0x3f0] sm:$0xff]  ;;  %v18633_v21 = vpack.c.bf16 %v18457_v42, %v18456_v34  ;;  %v18646_v63 = vand.u32 4294901760, %v13485_v3 }
 0x257   : > { %v13456_v8 = vsub.f32 %v13393_v53, %v18620_v27  ;;  %9785 = vmatprep.subr.bf16.mxu0 %v18626_v12  ;;  %v18628_v53 = vand.u32 4294901760, %v13400_v32  ;;  %18629 = vst [vmem:[#allocation50_spill] sm:$0xff] %v13483_v59  ;;  %18630 = vst [vmem:[#allocation59_spill] sm:$0xff] %v13485_v3  ;;  %v18634_v12 = vpack.c.bf16 %v18459_v37, %v18458_v40 }
 0x258   : > { %v13474_v27 = vsub.f32 %v13398_v0, %v18627_v55  ;;  %v13491_v0 = vld [vmem:[#allocation5 + $0x370] sm:$0xff]  ;;  %9827 = vmatpush3.bf16.msra.mxu1 %v13148_v6  ;;  %18641 = vst [vmem:[#allocation90_spill] sm:$0xff] %v13527_v28  ;;  %v18675_v28 = vld [vmem:[#allocation32_spill] sm:$0xff] }
 0x259   : > { %18621 = vst [vmem:[#allocation38_spill] sm:$0xff] %v13456_v8  ;;  %v13479_v23 = vsub.f32 %v13400_v32, %v18628_v53  ;;  %18631 = vst [vmem:[#allocation67_spill] sm:$0xff] %v13491_v0  ;;  %9829 = vmatprep.subr.bf16.mxu1 %v13155_v22  ;;  %v13510_v53 = vsub.f32 %v13443_v61, %v17515_v2  ;;  %v18636_v32 = vand.u32 4294901760, %v13445_v36  ;;  %v18638_v8 = vand.u32 4294901760, %v13463_v4  ;;  %v18657_v61 = vld [vmem:[#allocation24_spill] sm:$0xff] }
 0x25a   : > { %9787 = vmatpush3.bf16.msra.mxu0 %v18633_v21  ;;  %v18642_v2 = vpack.c.bf16 %v18466_v24, %v18465_v5 }
 0x25b   : > { %9789 = vmatprep.subr.bf16.mxu0 %v18634_v12  ;;  %18635 = vst [vmem:[#allocation73_spill] sm:$0xff] %v13510_v53  ;;  %v13515_v21 = vsub.f32 %v13445_v36, %v18636_v32  ;;  %v13522_v55 = vsub.f32 %v13463_v4, %v18638_v8  ;;  %v18643_v12 = vpack.c.bf16 %v18468_v56, %v18467_v7  ;;  %v18644_v8 = vand.u32 4294901760, %v13483_v59 }
 0x25c   : > { %9831 = vmatpush3.bf16.msra.mxu1 %v13162_v50  ;;  %v18648_v32 = vand.u32 4294901760, %v13491_v0  ;;  %v18659_v50 = vld [vmem:[#allocation85_spill] sm:$0xff] }
 0x25d   : > { %18637 = vst [vmem:[#allocation36_spill] sm:$0xff] %v13515_v21  ;;  %18639 = vst [vmem:[#allocation89_spill] sm:$0xff] %v13522_v55  ;;  %9833 = vmatprep.subr.bf16.mxu1 %v13169_v1  ;;  %v13542_v25 = vsub.f32 %v13483_v59, %v18644_v8  ;;  %v18656_v59 = vld [vmem:[#allocation44_spill] sm:$0xff]  ;;  %v18658_v1 = vand.u32 4294901760, %v18657_v61 }
 0x25e   : > { %9791 = vmatpush3.bf16.msra.mxu0 %v18642_v2  ;;  %v13547_v2 = vsub.f32 %v13485_v3, %v18646_v63  ;;  %v13554_v4 = vsub.f32 %v13491_v0, %v18648_v32  ;;  %v18652_v63 = vpack.c.bf16 %v18480_v39, %v18479_v48  ;;  %v18653_v3 = vld [vmem:[#allocation83_spill] sm:$0xff]  ;;  %v18654_v32 = vld [vmem:[#allocation12_spill] sm:$0xff] }
 0x25f   : > { %9793 = vmatprep.subr.bf16.mxu0 %v18643_v12  ;;  %18645 = vst [vmem:[#allocation91_spill] sm:$0xff] %v13542_v25  ;;  %v18650_v12 = vand.u32 4294901760, %v13493_v11  ;;  %v18655_v0 = vpack.c.bf16 %v18653_v3, %v18654_v32  ;;  %v13579_v25 = vld [vmem:[#allocation5 + $0x380] sm:$0xff]  ;;  %v18664_v3 = vld [vmem:[#allocation86_spill] sm:$0xff] }
 0x260   : > { %18647 = vst [vmem:[#allocation92_spill] sm:$0xff] %v13547_v2  ;;  %18649 = vst [vmem:[#allocation93_spill] sm:$0xff] %v13554_v4  ;;  %9835 = vmatpush3.bf16.msra.mxu1 %v13180_v30  ;;  %v18660_v2 = vld [vmem:[#allocation84_spill] sm:$0xff]  ;;  %v18662_v30 = vld [vmem:[#allocation81_spill] sm:$0xff] }
 0x261   : > { %v13559_v36 = vsub.f32 %v13493_v11, %v18650_v12  ;;  %9869 = vmatprep.subr.bf16.mxu1 %v18656_v59  ;;  %v18667_v59 = vld [vmem:[#allocation20_spill] sm:$0xff]  ;;  %v18669_v4 = vld [vmem:[#allocation17_spill] sm:$0xff] }
 0x262   : > { %9795 = vmatpush3.bf16.msra.mxu0 %v18652_v63  ;;  %v7851_v12 = vpop.f32.mrb[4].mxu1  ;;  %v18661_v63 = vpack.c.bf16 %v18659_v50, %v18660_v2  ;;  %v18670_v44 = vand.u32 4294901760, %v18669_v4  ;;  %v18673_v2 = vld [vmem:[#allocation87_spill] sm:$0xff] }
 0x263   : > { %18651 = vst [vmem:[#allocation94_spill] sm:$0xff] %v13559_v36  ;;  %9797 = vmatprep.subr.bf16.mxu0 %v18655_v0  ;;  %v7852_v11 = vpop.f32.mrb[5].mxu1  ;;  %2938 = vmatmul.mubr.f32.vlgmr.msra.gmra.mrb[14].mxu1 %v18658_v1  ;;  %v18665_v0 = vld [vmem:[#allocation14_spill] sm:$0xff]  ;;  %v18668_v36 = vand.u32 4294901760, %v18667_v59  ;;  %v18679_v59 = vand.u32 4294901760, %v12513_v51 }
 0x264   : > { %v7853_v8 = vadd.f32 %v7852_v11, %v7851_v12  ;;  %9871 = vmatpush3.bf16.msra.mxu1 %v18662_v30  ;;  %3208 = vmatprep.mubr.f32.mxu1 %v18663_v54  ;;  %v18666_v32 = vpack.c.bf16 %v18664_v3, %v18665_v0  ;;  %v13589_v11 = vld [vmem:[#allocation5 + $0x388] sm:$0xff]  ;;  %v18671_v12 = vld [vmem:[#allocation80_spill] sm:$0xff]  ;;  %v18676_v3 = vand.u32 4294901760, %v12503_v29  ;;  %v18677_v0 = vand.u32 4294901760, %v12508_v18 }
 0x265   : > { %v9836_v1 = vpack.c.bf16 %v18670_v44, %v18668_v36  ;;  %9873 = vmatprep.subr.bf16.mxu1 %v18671_v12  ;;  %v18672_v30 = vld [vmem:[#allocation88_spill] sm:$0xff]  ;;  %v3267_v4 = vand.u32 4294901760, %v13589_v11  ;;  %v18680_v12 = vand.u32 4294901760, %v12524_v38  ;;  %v18681_v29 = vand.u32 4294901760, %v13579_v25 }
 0x266   : > { %9799 = vmatpush3.bf16.msra.mxu0 %v18661_v63  ;;  %v18674_v63 = vpack.c.bf16 %v18672_v30, %v18673_v2  ;;  %v18678_v44 = vld [vmem:[#allocation16_spill] sm:$0xff] }
 0x267   : > { %9801 = vmatprep.subr.bf16.mxu0 %v18666_v32  ;;  %v9838_v32 = vpack.c.bf16 %v18677_v0, %v18676_v3  ;;  %v9840_v50 = vpack.c.bf16 %v18680_v12, %v18679_v59  ;;  %v13611_v18 = vsub.f32 %v13579_v25, %v18681_v29  ;;  %v13621_v38 = vsub.f32 %v13589_v11, %v3267_v4 }
 0x268   : > { %9875 = vmatpush3.bf16.msra.mxu1 %v18675_v28  ;;  %v18683_v28 = vand.u32 4294901760, %v12529_v47  ;;  %v18687_v3 = vand.u32 4294901760, %v12555_v20  ;;  %v18688_v0 = vand.u32 4294901760, %v18435_v46  ;;  %v18690_v20 = vand.u32 4294901760, %v18445_v13 }
 0x269   : > { %v7816_v36 = vpop.f32.mrb[4].mxu0  ;;  %9877 = vmatprep.subr.bf16.mxu1 %v18678_v44  ;;  %18682 = vst [vmem:[#allocation83_spill] sm:$0xff] %v13611_v18  ;;  %18685 = vst [vmem:[#allocation12_spill] sm:$0xff] %v13621_v38  ;;  %v17548_v47 = vand.u32 4294901760, %v13611_v18  ;;  %v17544_v46 = vand.u32 4294901760, %v13289_v10  ;;  %v18694_v13 = vand.u32 4294901760, %v18458_v40 }
 0x26a   : > { %9803 = vmatpush3.bf16.msra.mxu0 %v18674_v63  ;;  %v7817_v30 = vpop.f32.mrb[5].mxu0  ;;  %v18686_v63 = vand.u32 4294901760, %v12546_v35  ;;  %v18691_v35 = vand.u32 4294901760, %v18446_v52  ;;  %v18695_v52 = vand.u32 4294901760, %v18459_v37  ;;  %v17542_v40 = vand.u32 4294901760, %v13307_v17 }
 0x26b   : > { %9837 = vmatprep.subr.bf16.mxu0 %v9836_v1  ;;  %v7818_v2 = vadd.f32 %v7817_v30, %v7816_v36  ;;  %v18684_v1 = vand.u32 4294901760, %v18426_v57  ;;  %v18692_v36 = vand.u32 4294901760, %v18456_v34  ;;  %v17541_v37 = vand.u32 4294901760, %v13312_v26 }
 0x26c   : > { %9879 = vmatpush3.bf16.msra.mxu1 %v13087_v41  ;;  %v17547_v41 = vand.u32 4294901760, %v13621_v38  ;;  %v9852_v59 = vpack.c.bf16 %v18695_v52, %v18694_v13  ;;  %v3457_v30 = vsub.f32 %v13289_v10, %v17544_v46  ;;  %v17561_v29 = vand.u32 4294901760, %v13479_v23  ;;  %v18714_v46 = vld [vmem:[#allocation35_spill] sm:$0xff] }
 0x26d   : > { %2830 = vmatmul.mubr.f32.vlgmr.msra.gmra.mrb[14].mxu0 %v18657_v61  ;;  %v9842_v51 = vpack.c.bf16 %v18684_v1, %v18683_v28  ;;  %v1384_v61 = vadd.f32 %v7818_v2, %v13405_v14  ;;  %9881 = vmatprep.subr.bf16.mxu1 %v13094_v58  ;;  %v9848_v58 = vpack.c.bf16 %v18691_v35, %v18690_v20  ;;  %v17539_v2 = vand.u32 4294901760, %v13319_v62 }
 0x26e   : > { %9839 = vmatpush3.bf16.msra.mxu0 %v9838_v32  ;;  %3104 = vmatprep.mubr.f32.mxu0 %v18663_v54  ;;  %v9844_v54 = vpack.c.bf16 %v18687_v3, %v18686_v63  ;;  %v18689_v32 = vand.u32 4294901760, %v18436_v31  ;;  %v3443_v31 = vsub.f32 %v13611_v18, %v17548_v47  ;;  %v18696_v28 = vand.u32 4294901760, %v18465_v5  ;;  %v18717_v47 = vld [vmem:[#allocation22_spill] sm:$0xff] }
 0x26f   : > { %9841 = vmatprep.subr.bf16.mxu0 %v9840_v50  ;;  %v13631_v57 = vadd.f32 %v7853_v8, %v1384_v61  ;;  %v17546_v50 = vand.u32 4294901760, %v13270_v15  ;;  %v17545_v8 = vand.u32 4294901760, %v13275_v16  ;;  %v18697_v1 = vand.u32 4294901760, %v18466_v24 }
 0x270   : > { %v9846_v14 = vpack.c.bf16 %v18689_v32, %v18688_v0  ;;  %9883 = vmatpush3.bf16.msra.mxu1 %v13114_v60  ;;  %v18693_v60 = vand.u32 4294901760, %v18457_v42  ;;  %v17543_v42 = vand.u32 4294901760, %v13294_v19  ;;  %v18698_v61 = vand.u32 4294901760, %v18467_v7 }
 0x271   : > { %9885 = vmatprep.subr.bf16.mxu1 %v13120_v49  ;;  %v3450_v49 = vsub.f32 %v13621_v38, %v17547_v41  ;;  %v13664_v12 = vsub.f32 %v13270_v15, %v17546_v50  ;;  %v3338_v34 = vsub.f32 %v13275_v16, %v17545_v8  ;;  %v18699_v63 = vand.u32 4294901760, %v18468_v56 }
 0x272   : > { %9843 = vmatpush3.bf16.msra.mxu0 %v9842_v51  ;;  %v9850_v44 = vpack.c.bf16 %v18693_v60, %v18692_v36  ;;  %v9854_v51 = vpack.c.bf16 %v18697_v1, %v18696_v28  ;;  %v18700_v3 = vand.u32 4294901760, %v18479_v48  ;;  %v3444_v32 = vand.u32 4294901760, %v3443_v31  ;;  %v18708_v1 = vld [vmem:[#allocation76_spill] sm:$0xff] }
 0x273   : > { %9845 = vmatprep.subr.bf16.mxu0 %v9844_v54  ;;  %v18701_v54 = vand.u32 4294901760, %v18480_v39  ;;  %v3332_v20 = vand.u32 4294901760, %v13664_v12  ;;  %v17540_v5 = vand.u32 4294901760, %v13324_v45  ;;  %v3339_v48 = vand.u32 4294901760, %v3338_v34  ;;  %v18706_v12 = vld [vmem:[#allocation91_spill] sm:$0xff] }
 0x274   : > { %9887 = vmatpush3.bf16.msra.mxu1 %v13134_v9  ;;  %v17562_v9 = vand.u32 4294901760, %v13474_v27  ;;  %v3464_v7 = vsub.f32 %v13294_v19, %v17543_v42  ;;  %v17560_v56 = vand.u32 4294901760, %v13510_v53  ;;  %v17558_v39 = vand.u32 4294901760, %v13515_v21 }
 0x275   : > { %9889 = vmatprep.subr.bf16.mxu1 %v13141_v33  ;;  %v9856_v33 = vpack.c.bf16 %v18699_v63, %v18698_v61  ;;  %v9858_v0 = vpack.c.bf16 %v18701_v54, %v18700_v3  ;;  %v3458_v35 = vand.u32 4294901760, %v3457_v30  ;;  %v3471_v31 = vsub.f32 %v13319_v62, %v17539_v2  ;;  %v18707_v30 = vld [vmem:[#allocation92_spill] sm:$0xff]  ;;  %v18709_v63 = vld [vmem:[#allocation93_spill] sm:$0xff]  ;;  %v18710_v54 = vld [vmem:[#allocation94_spill] sm:$0xff] }
 0x276   : > { %9847 = vmatpush3.bf16.msra.mxu0 %v9846_v14  ;;  %v3451_v14 = vand.u32 4294901760, %v3450_v49  ;;  %v13698_v24 = vpack.c.bf16 %v17561_v29, %v17562_v9  ;;  %v17550_v36 = vand.u32 4294901760, %v13331_v43  ;;  %v17553_v60 = vand.u32 4294901760, %v13522_v55  ;;  %v18729_v9 = vld [vmem:[#allocation11_spill] sm:$0xff] }
 0x277   : > { %9849 = vmatprep.subr.bf16.mxu0 %v9848_v58  ;;  %v3345_v58 = vsub.f32 %v13307_v17, %v17542_v40  ;;  %v3478_v52 = vsub.f32 %v13324_v45, %v17540_v5  ;;  %v17551_v34 = vand.u32 4294901760, %v18706_v12  ;;  %v17549_v28 = vand.u32 4294901760, %v18707_v30  ;;  %v18712_v5 = vld [vmem:[#allocation45_spill] sm:$0xff]  ;;  %v18713_v40 = vld [vmem:[#allocation34_spill] sm:$0xff] }
 0x278   : > { %18702 = vst [vmem:[#allocation44_spill] sm:$0xff] %v13698_v24  ;;  %9891 = vmatpush3.bf16.msra.mxu1 %v13148_v6  ;;  %v3352_v6 = vsub.f32 %v13312_v26, %v17541_v37  ;;  %v3465_v61 = vand.u32 4294901760, %v3464_v7  ;;  %v17557_v3 = vand.u32 4294901760, %v18709_v63  ;;  %v17555_v2 = vand.u32 4294901760, %v18710_v54 }
 0x279   : > { %9893 = vmatprep.subr.bf16.mxu1 %v13155_v22  ;;  %v13723_v22 = vpack.c.bf16 %v17558_v39, %v17560_v56  ;;  %v9932_v37 = vpack.c.bf16 %v3451_v14, %v3444_v32  ;;  %v17556_v42 = vand.u32 4294901760, %v18713_v40  ;;  %v17559_v8 = vand.u32 4294901760, %v18714_v46  ;;  %v18727_v39 = vld [vmem:[#allocation71_spill] sm:$0xff]  ;;  %v18728_v56 = vld [vmem:[#allocation72_spill] sm:$0xff] }
 0x27a   : > { %9851 = vmatpush3.bf16.msra.mxu0 %v9850_v44  ;;  %v18703_v44 = vld [vmem:[#allocation90_spill] sm:$0xff]  ;;  %v3346_v7 = vand.u32 4294901760, %v3345_v58  ;;  %v3359_v50 = vsub.f32 %v13331_v43, %v17550_v36  ;;  %v13756_v32 = vpack.c.bf16 %v17555_v2, %v17557_v3  ;;  %v3472_v14 = vand.u32 4294901760, %v3471_v31  ;;  %v18719_v36 = vld [vmem:[#allocation39_spill] sm:$0xff] }
 0x27b   : > { %9853 = vmatprep.subr.bf16.mxu0 %v9852_v59  ;;  %v17552_v13 = vand.u32 4294901760, %v18703_v44  ;;  %18704 = vst [vmem:[#allocation24_spill] sm:$0xff] %v13723_v22  ;;  %v18705_v59 = vld [vmem:[#allocation68_spill] sm:$0xff]  ;;  %v18718_v58 = vld [vmem:[#allocation66_spill] sm:$0xff]  ;;  %v3492_v31 = vsub.f32 %v18714_v46, %v17559_v8  ;;  %v18780_v24 = vand.u32 4294901760, %v18709_v63 }
 0x27c   : > { %v17554_v49 = vand.u32 4294901760, %v18705_v59  ;;  %9895 = vmatpush3.bf16.msra.mxu1 %v18708_v1  ;;  %v3353_v1 = vand.u32 4294901760, %v3352_v6  ;;  %18716 = vst [vmem:[#allocation81_spill] sm:$0xff] %v13756_v32  ;;  %v9934_v6 = vpack.c.bf16 %v3339_v48, %v3332_v20  ;;  %v18723_v20 = vand.u32 4294901760, %v13579_v25 }
 0x27d   : > { %9897 = vmatprep.subr.bf16.mxu1 %v18712_v5  ;;  %v3479_v5 = vand.u32 4294901760, %v3478_v52  ;;  %v18721_v52 = vld [vmem:[#allocation61_spill] sm:$0xff] }
 0x27e   : > { %9855 = vmatpush3.bf16.msra.mxu0 %v9854_v51  ;;  %v13738_v51 = vpack.c.bf16 %v17552_v13, %v17553_v60  ;;  %v3366_v41 = vsub.f32 %v18705_v59, %v17554_v49  ;;  %v18720_v13 = vld [vmem:[#allocation40_spill] sm:$0xff]  ;;  %v17565_v49 = vand.u32 4294901760, %v18721_v52  ;;  %v13777_v48 = vpack.c.bf16 %v3267_v4, %v18723_v20  ;;  %v18730_v4 = vld [vmem:[#allocation38_spill] sm:$0xff] }
 0x27f   : > { %9857 = vmatprep.subr.bf16.mxu0 %v9856_v33  ;;  %v13747_v33 = vpack.c.bf16 %v17549_v28, %v17551_v34  ;;  %v9936_v28 = vpack.c.bf16 %v3465_v61, %v3458_v35  ;;  %v17563_v34 = vand.u32 4294901760, %v18719_v36  ;;  %v17564_v60 = vand.u32 4294901760, %v18720_v13  ;;  %v18725_v35 = vld [vmem:[#allocation52_spill] sm:$0xff]  ;;  %v18726_v61 = vld [vmem:[#allocation78_spill] sm:$0xff] }
 0x280   : > { %18711 = vst [vmem:[#allocation85_spill] sm:$0xff] %v13738_v51  ;;  %9899 = vmatpush3.bf16.msra.mxu1 %v18717_v47  ;;  %v18722_v47 = vld [vmem:[#allocation62_spill] sm:$0xff]  ;;  %18724 = vst [vmem:[#allocation69_spill] sm:$0xff] %v13777_v48  ;;  %v3367_v3 = vand.u32 4294901760, %v3366_v41  ;;  %v18760_v51 = vld [vmem:[#allocation53_spill] sm:$0xff] }
 0x281   : > { %18715 = vst [vmem:[#allocation84_spill] sm:$0xff] %v13747_v33  ;;  %9933 = vmatprep.subr.bf16.mxu1 %v9932_v37  ;;  %v17566_v2 = vand.u32 4294901760, %v18722_v47  ;;  %v3360_v37 = vand.u32 4294901760, %v3359_v50  ;;  %v3373_v25 = vsub.f32 %v18719_v36, %v17563_v34  ;;  %v3380_v11 = vsub.f32 %v18720_v13, %v17564_v60  ;;  %v18737_v50 = vld [vmem:[#allocation82_spill] sm:$0xff] }
 0x282   : > { %9859 = vmatpush3.bf16.msra.mxu0 %v9858_v0  ;;  %v3485_v0 = vsub.f32 %v18713_v40, %v17556_v42  ;;  %v9940_v42 = vpack.c.bf16 %v3479_v5, %v3472_v14  ;;  %v3493_v14 = vand.u32 4294901760, %v3492_v31  ;;  %v18740_v31 = vld [vmem:[#allocation51_spill] sm:$0xff]  ;;  %v18751_v33 = vand.u32 4294901760, %v13474_v27 }
 0x283   : > { %9861 = vmatprep.subr.bf16.mxu0 %v18718_v58  ;;  %v9938_v58 = vpack.c.bf16 %v3353_v1, %v3346_v7  ;;  %3210 = vmatmul.mubr.f32.vlgmr.msra.gmra.mrb[16].mxu1 %v18725_v35  ;;  %v18731_v7 = vld [vmem:[#allocation33_spill] sm:$0xff]  ;;  %v3506_v5 = vsub.f32 %v18722_v47, %v17566_v2  ;;  %v9942_v1 = vpack.c.bf16 %v3367_v3, %v3360_v37  ;;  %v18741_v29 = vand.u32 4294901760, %v18740_v31 }
 0x284   : > { %9935 = vmatpush3.bf16.msra.mxu1 %v9934_v6  ;;  %v3486_v41 = vand.u32 4294901760, %v3485_v0  ;;  %v18732_v6 = vld [vmem:[#allocation47_spill] sm:$0xff]  ;;  %v18744_v2 = vand.u32 4294901760, %v18728_v56  ;;  %v18745_v3 = vand.u32 4294901760, %v18730_v4 }
 0x285   : > { %9937 = vmatprep.subr.bf16.mxu1 %v9936_v28  ;;  %v18733_v20 = vand.u32 4294901760, %v18732_v6  ;;  %v18738_v28 = vld [vmem:[#allocation49_spill] sm:$0xff] }
 0x286   : > { %9863 = vmatpush3.bf16.msra.mxu0 %v18726_v61  ;;  %v18734_v61 = vld [vmem:[#allocation21_spill] sm:$0xff]  ;;  %v18739_v0 = vand.u32 4294901760, %v18738_v28  ;;  %v3394_v6 = vsub.f32 %v18728_v56, %v18744_v2  ;;  %v3513_v37 = vsub.f32 %v18730_v4, %v18745_v3  ;;  %v3507_v28 = vand.u32 4294901760, %v3506_v5  ;;  %v18747_v2 = vld [vmem:[#allocation64_spill] sm:$0xff] }
 0x287   : > { %9865 = vmatprep.subr.bf16.mxu0 %v18729_v9  ;;  %v3499_v9 = vsub.f32 %v18721_v52, %v17565_v49  ;;  %v18735_v34 = vand.u32 4294901760, %v18734_v61  ;;  %v18743_v49 = vand.u32 4294901760, %v18727_v39  ;;  %v9944_v61 = vpack.c.bf16 %v3493_v14, %v3486_v41  ;;  %v18753_v14 = vld [vmem:[#allocation75_spill] sm:$0xff]  ;;  %v18755_v5 = vld [vmem:[#allocation77_spill] sm:$0xff] }
 0x288   : > { %v13809_v8 = vpack.c.bf16 %v18741_v29, %v18739_v0  ;;  %9939 = vmatpush3.bf16.msra.mxu1 %v9938_v58  ;;  %v18746_v29 = vand.u32 4294901760, %v18731_v7  ;;  %v18748_v58 = vand.u32 4294901760, %v18747_v2  ;;  %v18749_v0 = vld [vmem:[#allocation58_spill] sm:$0xff]  ;;  %v3395_v3 = vand.u32 4294901760, %v3394_v6 }
 0x289   : > { %v13802_v60 = vpack.c.bf16 %v18735_v34, %v18733_v20  ;;  %v3387_v32 = vsub.f32 %v18727_v39, %v18743_v49  ;;  %v3374_v34 = vand.u32 4294901760, %v3373_v25  ;;  %9941 = vmatprep.subr.bf16.mxu1 %v9940_v42  ;;  %v3500_v49 = vand.u32 4294901760, %v3499_v9 }
 0x28a   : > { %9867 = vmatpush3.bf16.msra.mxu0 %v18737_v50  ;;  %18742 = vst [vmem:[#allocation14_spill] sm:$0xff] %v13809_v8  ;;  %v3381_v50 = vand.u32 4294901760, %v3380_v11  ;;  %v3520_v20 = vsub.f32 %v18731_v7, %v18746_v29  ;;  %v18750_v31 = vand.u32 4294901760, %v18749_v0  ;;  %v3401_v29 = vsub.f32 %v13474_v27, %v18751_v33 }
 0x28b   : > { %18736 = vst [vmem:[#allocation86_spill] sm:$0xff] %v13802_v60  ;;  %9901 = vmatprep.subr.bf16.mxu0 %v13777_v48  ;;  %v3388_v11 = vand.u32 4294901760, %v3387_v32  ;;  %v18752_v42 = vand.u32 4294901760, %v13479_v23  ;;  %v18754_v9 = vand.u32 4294901760, %v18753_v14  ;;  %v18756_v2 = vand.u32 4294901760, %v18755_v5 }
 0x28c   : > { %v13829_v25 = vpack.c.bf16 %v18750_v31, %v18748_v58  ;;  %9943 = vmatpush3.bf16.msra.mxu1 %v9942_v1  ;;  %v3514_v32 = vand.u32 4294901760, %v3513_v37  ;;  %v3521_v6 = vand.u32 4294901760, %v3520_v20  ;;  %v9948_v0 = vpack.c.bf16 %v3507_v28, %v3500_v49  ;;  %v18764_v20 = vld [vmem:[#allocation37_spill] sm:$0xff] }
 0x28d   : > { %3106 = vmatmul.mubr.f32.vlgmr.msra.gmra.mrb[16].mxu0 %v18725_v35  ;;  %v3408_v41 = vsub.f32 %v13479_v23, %v18752_v42  ;;  %v9946_v35 = vpack.c.bf16 %v3381_v50, %v3374_v34  ;;  %v13843_v58 = vpack.c.bf16 %v18756_v2, %v18754_v9  ;;  %9945 = vmatprep.subr.bf16.mxu1 %v9944_v61  ;;  %v18758_v33 = vand.u32 4294901760, %v13510_v53  ;;  %v18762_v50 = vld [vmem:[#allocation26_spill] sm:$0xff]  ;;  %v18766_v49 = vld [vmem:[#allocation57_spill] sm:$0xff] }
 0x28e   : > { %9903 = vmatpush3.bf16.msra.mxu0 %v13802_v60  ;;  %v18759_v42 = vand.u32 4294901760, %v13515_v21  ;;  %v18761_v34 = vand.u32 4294901760, %v18760_v51  ;;  %v18763_v14 = vand.u32 4294901760, %v18762_v50  ;;  %v9950_v37 = vpack.c.bf16 %v3395_v3, %v3388_v11 }
 0x28f   : > { %9905 = vmatprep.subr.bf16.mxu0 %v13809_v8  ;;  %18757 = vst [vmem:[#allocation20_spill] sm:$0xff] %v13843_v58  ;;  %v3527_v31 = vsub.f32 %v13510_v53, %v18758_v33  ;;  %v18765_v61 = vand.u32 4294901760, %v18764_v20  ;;  %v18767_v28 = vand.u32 4294901760, %v18766_v49  ;;  %v3402_v5 = vand.u32 4294901760, %v3401_v29  ;;  %v18774_v20 = vld [vmem:[#allocation65_spill] sm:$0xff] }
 0x290   : > { %v3534_v1 = vsub.f32 %v13515_v21, %v18759_v42  ;;  %v13855_v22 = vpack.c.bf16 %v18763_v14, %v18761_v34  ;;  %v3409_v2 = vand.u32 4294901760, %v3408_v41  ;;  %9947 = vmatpush3.bf16.msra.mxu1 %v9946_v35  ;;  %v9952_v33 = vpack.c.bf16 %v3521_v6, %v3514_v32  ;;  %v18772_v32 = vld [vmem:[#allocation60_spill] sm:$0xff] }
 0x291   : > { %v13862_v9 = vpack.c.bf16 %v18767_v28, %v18765_v61  ;;  %v18768_v51 = vand.u32 4294901760, %v13522_v55  ;;  %v18769_v34 = vand.u32 4294901760, %v18703_v44  ;;  %9949 = vmatprep.subr.bf16.mxu1 %v9948_v0  ;;  %v3528_v3 = vand.u32 4294901760, %v3527_v31  ;;  %v18776_v0 = vld [vmem:[#allocation13_spill] sm:$0xff] }
 0x292   : > { %9907 = vmatpush3.bf16.msra.mxu0 %v13829_v25  ;;  %v3535_v50 = vand.u32 4294901760, %v3534_v1  ;;  %v18770_v14 = vand.u32 4294901760, %v18706_v12  ;;  %v18771_v41 = vand.u32 4294901760, %v18707_v30  ;;  %v18773_v6 = vand.u32 4294901760, %v18772_v32  ;;  %v18778_v1 = vld [vmem:[#allocation74_spill] sm:$0xff] }
 0x293   : > { %9909 = vmatprep.subr.bf16.mxu0 %v13843_v58  ;;  %v3415_v42 = vsub.f32 %v13522_v55, %v18768_v51  ;;  %v3422_v11 = vsub.f32 %v18703_v44, %v18769_v34  ;;  %v18775_v61 = vand.u32 4294901760, %v18774_v20  ;;  %v9954_v28 = vpack.c.bf16 %v3409_v2, %v3402_v5 }
 0x294   : > { %v3541_v29 = vsub.f32 %v18706_v12, %v18770_v14  ;;  %v3548_v35 = vsub.f32 %v18707_v30, %v18771_v41  ;;  %v18777_v31 = vand.u32 4294901760, %v18776_v0  ;;  %v18779_v51 = vand.u32 4294901760, %v18778_v1  ;;  %9951 = vmatpush3.bf16.msra.mxu1 %v9950_v37  ;;  %v18782_v0 = vld [vmem:[#allocation15_spill] sm:$0xff]  ;;  %v13996_v30 = vld [vmem:[#allocation5 + $0x4a0] sm:$0xff] }
 0x295   : > { %v13882_v49 = vpack.c.bf16 %v18775_v61, %v18773_v6  ;;  %v3416_v14 = vand.u32 4294901760, %v3415_v42  ;;  %v3423_v41 = vand.u32 4294901760, %v3422_v11  ;;  %v3429_v32 = vsub.f32 %v18709_v63, %v18780_v24  ;;  %9953 = vmatprep.subr.bf16.mxu1 %v9952_v33  ;;  %v18786_v11 = vld [vmem:[#allocation41_spill] sm:$0xff]  ;;  %v18788_v63 = vld [vmem:[#allocation42_spill] sm:$0xff]  ;;  %18832 = vst [vmem:[#allocation61_spill] sm:$0xff] %v13996_v30 }
 0x296   : > { %9911 = vmatpush3.bf16.msra.mxu0 %v13855_v22  ;;  %v13888_v34 = vpack.c.bf16 %v18779_v51, %v18777_v31  ;;  %v18781_v20 = vand.u32 4294901760, %v18710_v54  ;;  %v9956_v5 = vpack.c.bf16 %v3535_v50, %v3528_v3  ;;  %v3542_v2 = vand.u32 4294901760, %v3541_v29  ;;  %v18784_v31 = vld [vmem:[#allocation31_spill] sm:$0xff] }
 0x297   : > { %9913 = vmatprep.subr.bf16.mxu0 %v13862_v9  ;;  %v3549_v61 = vand.u32 4294901760, %v3548_v35  ;;  %v18783_v37 = vand.u32 4294901760, %v18782_v0  ;;  %v18785_v1 = vand.u32 4294901760, %v18784_v31  ;;  %v9958_v24 = vpack.c.bf16 %v3423_v41, %v3416_v14  ;;  %v18790_v0 = vld [vmem:[#allocation55_spill] sm:$0xff]  ;;  %v18792_v31 = vld [vmem:[#allocation56_spill] sm:$0xff]  ;;  %v18794_v41 = vld [vmem:[#allocation18_spill] sm:$0xff] }
 0x298   : > { %v3436_v6 = vsub.f32 %v18710_v54, %v18781_v20  ;;  %9955 = vmatpush3.bf16.msra.mxu1 %v9954_v28  ;;  %v18787_v51 = vand.u32 4294901760, %v18786_v11  ;;  %v18789_v20 = vand.u32 4294901760, %v18788_v63  ;;  %v3430_v3 = vand.u32 4294901760, %v3429_v32  ;;  %v18796_v32 = vld [vmem:[#allocation19_spill] sm:$0xff] }
 0x299   : > { %v13902_v42 = vpack.c.bf16 %v18785_v1, %v18783_v37  ;;  %9957 = vmatprep.subr.bf16.mxu1 %v9956_v5  ;;  %v9960_v29 = vpack.c.bf16 %v3549_v61, %v3542_v2  ;;  %v18791_v37 = vand.u32 4294901760, %v18790_v0  ;;  %v18793_v28 = vand.u32 4294901760, %v18792_v31  ;;  %v18798_v61 = vld [vmem:[#allocation43_spill] sm:$0xff] }
 0x29a   : > { %9915 = vmatpush3.bf16.msra.mxu0 %v13882_v49  ;;  %v13909_v33 = vpack.c.bf16 %v18789_v20, %v18787_v51  ;;  %v3437_v50 = vand.u32 4294901760, %v3436_v6  ;;  %v18795_v11 = vand.u32 4294901760, %v18794_v41  ;;  %v18797_v6 = vand.u32 4294901760, %v18796_v32  ;;  %v18800_v20 = vld [vmem:[#allocation48_spill] sm:$0xff]  ;;  %v18810_v41 = vld [vmem:[#allocation25_spill] sm:$0xff] }
 0x29b   : > { %9917 = vmatprep.subr.bf16.mxu0 %v13888_v34  ;;  %v13916_v1 = vpack.c.bf16 %v18793_v28, %v18791_v37  ;;  %v18799_v51 = vand.u32 4294901760, %v18798_v61  ;;  %v18801_v0 = vand.u32 4294901760, %v18800_v20 }
 0x29c   : > { %v7921_v35 = vpop.f32.mrb[6].mxu1  ;;  %9959 = vmatpush3.bf16.msra.mxu1 %v9958_v24  ;;  %v9962_v63 = vpack.c.bf16 %v3437_v50, %v3430_v3  ;;  %v13923_v5 = vpack.c.bf16 %v18797_v6, %v18795_v11  ;;  %v18803_v24 = vld [vmem:[#allocation50_spill] sm:$0xff]  ;;  %v18805_v50 = vld [vmem:[#allocation59_spill] sm:$0xff]  ;;  %v18811_v11 = vand.u32 4294901760, %v18810_v41  ;;  %v9964_v6 = vpack.c.bf16 %v13621_v38, %v13611_v18  ;;  %v13963_v41 = vld [vmem:[#allocation5 + $0x400] sm:$0xff] }
 0x29d   : > { %v7922_v14 = vpop.f32.mrb[7].mxu1  ;;  %9961 = vmatprep.subr.bf16.mxu1 %v9960_v29  ;;  %v13930_v37 = vpack.c.bf16 %v18801_v0, %v18799_v51  ;;  %v18804_v3 = vand.u32 4294901760, %v18803_v24  ;;  %v18806_v31 = vand.u32 4294901760, %v18805_v50  ;;  %v18813_v24 = vld [vmem:[#allocation46_spill] sm:$0xff]  ;;  %18817 = vst [vmem:[#allocation32_spill] sm:$0xff] %v13963_v41  ;;  %v18838_v55 = vand.u32 4294901760, %v13963_v41 }
 0x29e   : > { %9919 = vmatpush3.bf16.msra.mxu0 %v13902_v42  ;;  %v7923_v2 = vadd.f32 %v7922_v14, %v7921_v35  ;;  %v18808_v35 = vld [vmem:[#allocation67_spill] sm:$0xff] }
 0x29f   : > { %9921 = vmatprep.subr.bf16.mxu0 %v13909_v33  ;;  %18802 = vst [vmem:[#allocation17_spill] sm:$0xff] %v13930_v37  ;;  %v13937_v28 = vpack.c.bf16 %v18806_v31, %v18804_v3  ;;  %v18809_v14 = vand.u32 4294901760, %v18808_v35  ;;  %v18816_v35 = vld [vmem:[#allocation63_spill] sm:$0xff] }
 0x2a0   : > { %9963 = vmatpush3.bf16.msra.mxu1 %v9962_v63 }
 0x2a1   : > { %18807 = vst [vmem:[#allocation80_spill] sm:$0xff] %v13937_v28  ;;  %9997 = vmatprep.subr.bf16.mxu1 %v13777_v48  ;;  %v13945_v32 = vpack.c.bf16 %v18811_v11, %v18809_v14 }
 0x2a2   : > { %9923 = vmatpush3.bf16.msra.mxu0 %v13916_v1 }
 0x2a3   : > { %9925 = vmatprep.subr.bf16.mxu0 %v13923_v5  ;;  %18812 = vst [vmem:[#allocation88_spill] sm:$0xff] %v13945_v32 }
 0x2a4   : > { %v7886_v29 = vpop.f32.mrb[6].mxu0 }
 0x2a5   : > { %v7887_v63 = vpop.f32.mrb[7].mxu0 }
 0x2a6   : > { %9927 = vmatpush3.bf16.msra.mxu0 %v13930_v37  ;;  %v7888_v61 = vadd.f32 %v7887_v63, %v7886_v29 }
 0x2a7   : > { %9929 = vmatprep.subr.bf16.mxu0 %v13937_v28 }
 0x2a8   : > { %v1600_v51 = vadd.f32 %v7888_v61, %v13631_v57  ;;  %v18818_v57 = vld [vmem:[#allocation70_spill] sm:$0xff] }
 0x2aa   : > { %9931 = vmatpush3.bf16.msra.mxu0 %v13945_v32  ;;  %v13952_v20 = vadd.f32 %v7923_v2, %v1600_v51  ;;  %v18820_v51 = vld [vmem:[#allocation79_spill] sm:$0xff] }
 0x2ab   : > { %9965 = vmatprep.subr.bf16.mxu0 %v9964_v6  ;;  %v13966_v6 = vld [vmem:[#allocation5 + $0x408] sm:$0xff] }
 0x2ac   : > { %18819 = vst [vmem:[#allocation16_spill] sm:$0xff] %v13966_v6 }
 0x2b3   : > { %v298_v0 = vpop.permute.xlu1 %297 }
 0x2b4   : > { %v327_v50 = vsel %vm317_vm1, %v18813_v24, %v298_v0  ;;  %v13957_v31 = vpop.permute.xlu0 %299 }
 0x2b5   : > { %18815 = vst [vmem:[#allocation87_spill] sm:$0xff] %v13957_v31  ;;  %v340_v14 = vmax.f32 %v18816_v35, %v327_v50  ;;  %v326_v29 = vsel %vm317_vm1, %v298_v0, %v13957_v31  ;;  %v13974_v35 = vld [vmem:[#allocation5 + $0x490] sm:$0xff]  ;;  %v13976_v0 = vld [vmem:[#allocation5 + $0x498] sm:$0xff]  ;;  %v18830_v50 = vld [vmem:[#allocation29_spill] sm:$0xff] }
 0x2b6   : > { %v341_v11 = vmax.f32 %v18818_v57, %v326_v29  ;;  %18822 = vst [vmem:[#allocation76_spill] sm:$0xff] %v13974_v35  ;;  %18823 = vst [vmem:[#allocation45_spill] sm:$0xff] %v13976_v0  ;;  %v18825_v29 = vld [vmem:[#allocation54_spill] sm:$0xff] }
 0x2b7   : > { %v356_v63 = vmax.f32 %v340_v14, 0.0  ;;  %v235_v2 = vpop.permute.xlu1 %234 }
 0x2b8   : > { %v357_v61 = vmax.f32 %v341_v11, 0.0  ;;  %v260_v24 = vsel %vm252_vm0, %v18820_v51, %v235_v2  ;;  %v13971_v54 = vpop.permute.xlu0 %236  ;;  %v13986_v11 = vld [vmem:[#allocation5 + $0x410] sm:$0xff]  ;;  %v13988_v51 = vld [vmem:[#allocation5 + $0x418] sm:$0xff] }
 0x2b9   : > { %18821 = vst [vmem:[#allocation68_spill] sm:$0xff] %v13971_v54  ;;  %v13978_v31 = vand.u32 4294901760, %v356_v63  ;;  %v13981_v14 = vmax.f32 %v18825_v29, %v260_v24  ;;  %v259_v57 = vsel %vm252_vm0, %v235_v2, %v13971_v54  ;;  %18827 = vst [vmem:[#allocation22_spill] sm:$0xff] %v13986_v11  ;;  %v13998_v24 = vld [vmem:[#allocation5 + $0x4a8] sm:$0xff]  ;;  %v14000_v29 = vld [vmem:[#allocation5 + $0x420] sm:$0xff]  ;;  %v18840_v54 = vand.u32 4294901760, %v13966_v6 }
 0x2ba   : > { %18828 = vst [vmem:[#allocation66_spill] sm:$0xff] %v13988_v51  ;;  %v13990_v38 = vand.u32 4294901760, %v357_v61  ;;  %v13993_v18 = vmax.f32 %v18830_v50, %v259_v57  ;;  %18833 = vst [vmem:[#allocation62_spill] sm:$0xff] %v13998_v24  ;;  %v14009_v57 = vld [vmem:[#allocation5 + $0x428] sm:$0xff] }
 0x2bb   : > { %18824 = vst [vmem:[#allocation34_spill] sm:$0xff] %v13978_v31  ;;  %18826 = vst [vmem:[#allocation35_spill] sm:$0xff] %v13981_v14  ;;  %v14003_v2 = vsub.f32 %v356_v63, %v13978_v31  ;;  %301 = vrot.lane.b32.xlu1 %v13981_v14, %s11061_s18  ;;  %v14018_v63 = vld [vmem:[%s11223_s7 + $0x50] sm:$0xff]  ;;  %v14023_v14 = vsub.f32 %v13963_v41, %v18838_v55  ;;  %v14042_v50 = vsub.f32 %v13966_v6, %v18840_v54  ;;  %v14063_v6 = vld [vmem:[#allocation5 + $0x4b8] sm:$0xff] }
 0x2bc   : > { %18829 = vst [vmem:[#allocation39_spill] sm:$0xff] %v13990_v38  ;;  %18831 = vst [vmem:[#allocation40_spill] sm:$0xff] %v13993_v18  ;;  %v14012_v12 = vsub.f32 %v357_v61, %v13990_v38  ;;  %v7991_v3 = vpop.f32.mrb[8].mxu1  ;;  %3552 = vmatprep.mubr.f32.mxu1 %v13990_v38  ;;  %303 = vrot.lane.b32.xlu0 %v13993_v18, %s11061_s18  ;;  %v14030_v38 = vld [vmem:[%s11223_s7 + $0x58] sm:$0xff]  ;;  %v18843_v18 = vand.u32 4294901760, %v13976_v0  ;;  %v14061_v61 = vld [vmem:[#allocation5 + $0x4b0] sm:$0xff] }
 0x2bd   : > { %18834 = vst [vmem:[#allocation52_spill] sm:$0xff] %v14000_v29  ;;  %18835 = vst [vmem:[#allocation78_spill] sm:$0xff] %v14003_v2  ;;  %v7992_v44 = vpop.f32.mrb[9].mxu1  ;;  %3554 = vmatmul.mubr.f32.vlgmr.msra.gmra.mrb[18].mxu1 %v13978_v31  ;;  %v18841_v53 = vand.u32 4294901760, %v14003_v2  ;;  %v14080_v41 = vld [vmem:[#allocation5 + $0x438] sm:$0xff] }
 0x2be   : > { %18836 = vst [vmem:[#allocation71_spill] sm:$0xff] %v14009_v57  ;;  %18837 = vst [vmem:[#allocation72_spill] sm:$0xff] %v14018_v63  ;;  %v14035_v21 = vadd.f32 %v7992_v44, %v7991_v3  ;;  %9999 = vmatpush3.bf16.msra.mxu1 %v13802_v60  ;;  %v3313_v55 = vand.u32 4294901760, %v14012_v12  ;;  %v18842_v3 = vand.u32 4294901760, %v13974_v35  ;;  %v14059_v54 = vsub.f32 %v13976_v0, %v18843_v18  ;;  %v14078_v0 = vld [vmem:[#allocation5 + $0x430] sm:$0xff] }
 0x2bf   : > { %18839 = vst [vmem:[#allocation11_spill] sm:$0xff] %v14030_v38  ;;  %238 = vrot.lane.b32.xlu1 %v14018_v63, %s11060_s20  ;;  %10001 = vmatprep.subr.bf16.mxu1 %v13809_v8  ;;  %v3320_v44 = vsub.f32 %v14003_v2, %v18841_v53  ;;  %18845 = vst [vmem:[#allocation33_spill] sm:$0xff] %v14061_v61  ;;  %v18847_v63 = vand.u32 4294901760, %v13986_v11  ;;  %v18851_v8 = vand.u32 4294901760, %v13996_v30  ;;  %v14105_v2 = vld [vmem:[#allocation5 + $0x4c0] sm:$0xff] }
 0x2c0   : > { %v14054_v48 = vsub.f32 %v13974_v35, %v18842_v3  ;;  %18844 = vst [vmem:[#allocation38_spill] sm:$0xff] %v14059_v54  ;;  %18846 = vst [vmem:[#allocation47_spill] sm:$0xff] %v14063_v6  ;;  %3796 = vmatprep.mubr.f32.mxu1 %v3313_v55  ;;  %240 = vrot.lane.b32.xlu0 %v14030_v38, %s11060_s20  ;;  %v3314_v53 = vsub.f32 %v14012_v12, %v3313_v55  ;;  %v18848_v35 = vand.u32 4294901760, %v13988_v51 }
 0x2c1   : > { %v14071_v3 = vsub.f32 %v13986_v11, %v18847_v63  ;;  %18849 = vst [vmem:[#allocation21_spill] sm:$0xff] %v14078_v0  ;;  %18850 = vst [vmem:[#allocation82_spill] sm:$0xff] %v14080_v41  ;;  %v3321_v31 = vand.u32 4294901760, %v3320_v44  ;;  %v14085_v38 = vsub.f32 %v13996_v30, %v18851_v8  ;;  %v18852_v55 = vand.u32 4294901760, %v13998_v24  ;;  %v14116_v8 = vld [vmem:[#allocation5 + $0x440] sm:$0xff]  ;;  %v14118_v30 = vld [vmem:[#allocation5 + $0x448] sm:$0xff] }
 0x2c2   : > { %v14076_v18 = vsub.f32 %v13988_v51, %v18848_v35  ;;  %v18853_v11 = vand.u32 4294901760, %v14000_v29  ;;  %10003 = vmatpush3.bf16.msra.mxu1 %v13829_v25  ;;  %v3315_v51 = vand.u32 4294901760, %v3314_v53  ;;  %v18854_v44 = vand.u32 4294901760, %v14009_v57  ;;  %18855 = vst [vmem:[#allocation49_spill] sm:$0xff] %v14105_v2  ;;  %18857 = vst [vmem:[#allocation64_spill] sm:$0xff] %v14116_v8 }
 0x2c3   : > { %v14090_v63 = vsub.f32 %v13998_v24, %v18852_v55  ;;  %10005 = vmatprep.subr.bf16.mxu1 %v13843_v58  ;;  %18858 = vst [vmem:[#allocation58_spill] sm:$0xff] %v14118_v30  ;;  %v18860_v54 = vand.u32 4294901760, %v14061_v61  ;;  %v18878_v58 = vpack.c.bf16 %v13324_v45, %v13319_v62 }
 0x2c4   : > { %v14095_v35 = vsub.f32 %v14000_v29, %v18853_v11  ;;  %v14101_v60 = vsub.f32 %v14009_v57, %v18854_v44  ;;  %v14110_v29 = vld [vmem:[#allocation5 + $0x4c8] sm:$0xff]  ;;  %v7956_v57 = vpop.f32.mrb[8].mxu0  ;;  %3316 = vmatprep.mubr.f32.mxu0 %v3315_v51  ;;  %v18859_v51 = vpack.c.bf16 %v13275_v16, %v13270_v15  ;;  %v18862_v11 = vand.u32 4294901760, %v14063_v6 }
 0x2c5   : > { %18856 = vst [vmem:[#allocation51_spill] sm:$0xff] %v14110_v29  ;;  %v7957_v55 = vpop.f32.mrb[9].mxu0  ;;  %3322 = vmatmul.mubr.f32.vlgmr.msra.gmra.mrb[18].mxu0 %v3321_v31  ;;  %v14134_v24 = vsub.f32 %v14061_v61, %v18860_v54  ;;  %v18867_v54 = vand.u32 4294901760, %v14080_v41  ;;  %v14164_v61 = vld [vmem:[#allocation5 + $0x450] sm:$0xff] }
 0x2c6   : > { %v7958_v44 = vadd.f32 %v7957_v55, %v7956_v57  ;;  %9967 = vmatpush3.bf16.msra.mxu0 %v18859_v51  ;;  %10007 = vmatpush3.bf16.msra.mxu1 %v13855_v22  ;;  %v14139_v31 = vsub.f32 %v14063_v6, %v18862_v11  ;;  %v18864_v57 = vpack.c.bf16 %v13294_v19, %v13289_v10  ;;  %v18865_v55 = vand.u32 4294901760, %v14078_v0  ;;  %v14158_v6 = vld [vmem:[#allocation5 + $0x4d0] sm:$0xff] }
 0x2c7   : > { %18861 = vst [vmem:[#allocation75_spill] sm:$0xff] %v14134_v24  ;;  %3689 = vmatprep.mubr.f32.mxu0 %v14012_v12  ;;  %v14154_v53 = vsub.f32 %v14080_v41, %v18867_v54  ;;  %18869 = vst [vmem:[#allocation37_spill] sm:$0xff] %v14158_v6  ;;  %v14160_v12 = vld [vmem:[#allocation5 + $0x4d8] sm:$0xff]  ;;  %10009 = vmatprep.subr.bf16.mxu1 %v13862_v9  ;;  %v18873_v41 = vand.u32 4294901760, %v14105_v2 }
 0x2c8   : > { %18863 = vst [vmem:[#allocation77_spill] sm:$0xff] %v14139_v31  ;;  %9969 = vmatprep.subr.bf16.mxu0 %v18864_v57  ;;  %v14149_v51 = vsub.f32 %v14078_v0, %v18865_v55  ;;  %18870 = vst [vmem:[#allocation57_spill] sm:$0xff] %v14160_v12  ;;  %v1970_v57 = vadd.f32 %v7958_v44, %v13952_v20  ;;  %v14166_v55 = vld [vmem:[#allocation5 + $0x458] sm:$0xff]  ;;  %v18875_v20 = vpack.c.bf16 %v13312_v26, %v13307_v17 }
 0x2c9   : > { %18868 = vst [vmem:[#allocation26_spill] sm:$0xff] %v14154_v53  ;;  %18871 = vst [vmem:[#allocation60_spill] sm:$0xff] %v14164_v61  ;;  %v14173_v11 = vsub.f32 %v14105_v2, %v18873_v41  ;;  %v18876_v0 = vand.u32 4294901760, %v14110_v29  ;;  %v14211_v53 = vld [vmem:[#allocation5 + $0x4e8] sm:$0xff]  ;;  %v14259_v31 = vld [vmem:[#allocation5 + $0x478] sm:$0xff] }
 0x2ca   : > { %18866 = vst [vmem:[#allocation53_spill] sm:$0xff] %v14149_v51  ;;  %18872 = vst [vmem:[#allocation65_spill] sm:$0xff] %v14166_v55  ;;  %9971 = vmatpush3.bf16.msra.mxu0 %v18875_v20  ;;  %10011 = vmatpush3.bf16.msra.mxu1 %v13882_v49  ;;  %v14182_v44 = vadd.f32 %v14035_v21, %v1970_v57  ;;  %v18879_v20 = vand.u32 4294901760, %v14116_v8  ;;  %v18881_v57 = vand.u32 4294901760, %v14118_v30 }
 0x2cb   : > { %18874 = vst [vmem:[#allocation13_spill] sm:$0xff] %v14173_v11  ;;  %v14187_v54 = vsub.f32 %v14110_v29, %v18876_v0  ;;  %9973 = vmatprep.subr.bf16.mxu0 %v18878_v58  ;;  %10013 = vmatprep.subr.bf16.mxu1 %v13888_v34  ;;  %v14209_v58 = vld [vmem:[#allocation5 + $0x4e0] sm:$0xff]  ;;  %18884 = vst [vmem:[#allocation42_spill] sm:$0xff] %v14211_v53  ;;  %v18888_v29 = vand.u32 4294901760, %v14160_v12  ;;  %v14251_v11 = vld [vmem:[#allocation5 + $0x4f8] sm:$0xff] }
 0x2cc   : > { %v14198_v21 = vsub.f32 %v14116_v8, %v18879_v20  ;;  %v14203_v0 = vsub.f32 %v14118_v30, %v18881_v57  ;;  %18883 = vst [vmem:[#allocation41_spill] sm:$0xff] %v14209_v58  ;;  %v18885_v8 = vpack.c.bf16 %v18705_v59, %v13331_v43  ;;  %v18886_v57 = vand.u32 4294901760, %v14158_v6  ;;  %v14229_v30 = vld [vmem:[#allocation5 + $0x460] sm:$0xff]  ;;  %18896 = vst [vmem:[#allocation48_spill] sm:$0xff] %v14251_v11 }
 0x2cd   : > { %18877 = vst [vmem:[#allocation74_spill] sm:$0xff] %v14187_v54  ;;  %v14227_v41 = vsub.f32 %v14160_v12, %v18888_v29  ;;  %18890 = vst [vmem:[#allocation18_spill] sm:$0xff] %v14229_v30  ;;  %v14231_v54 = vld [vmem:[#allocation5 + $0x468] sm:$0xff]  ;;  %v18892_v20 = vpack.c.bf16 %v18714_v46, %v18713_v40  ;;  %v17638_v12 = vand.u32 4294901760, %v14209_v58 }
 0x2ce   : > { %18880 = vst [vmem:[#allocation15_spill] sm:$0xff] %v14198_v21  ;;  %18882 = vst [vmem:[#allocation31_spill] sm:$0xff] %v14203_v0  ;;  %9975 = vmatpush3.bf16.msra.mxu0 %v18885_v8  ;;  %10015 = vmatpush3.bf16.msra.mxu1 %v13902_v42  ;;  %v14222_v2 = vsub.f32 %v14158_v6, %v18886_v57  ;;  %v18893_v8 = vand.u32 4294901760, %v14164_v61  ;;  %v18894_v6 = vand.u32 4294901760, %v14166_v55  ;;  %v14249_v21 = vld [vmem:[#allocation5 + $0x4f0] sm:$0xff]  ;;  %v18906_v51 = vand.u32 4294901760, %v14231_v54 }
 0x2cf   : > { %18889 = vst [vmem:[#allocation56_spill] sm:$0xff] %v14227_v41  ;;  %18891 = vst [vmem:[#allocation19_spill] sm:$0xff] %v14231_v54  ;;  %9977 = vmatprep.subr.bf16.mxu0 %v18892_v20  ;;  %10017 = vmatprep.subr.bf16.mxu1 %v13909_v33  ;;  %v18899_v0 = vpack.c.bf16 %v18720_v13, %v18719_v36  ;;  %v18900_v20 = vpack.c.bf16 %v18722_v47, %v18721_v52  ;;  %v18912_v41 = vand.u32 4294901760, %v14251_v11 }
 0x2d0   : > { %18887 = vst [vmem:[#allocation55_spill] sm:$0xff] %v14222_v2  ;;  %v14240_v57 = vsub.f32 %v14164_v61, %v18893_v8  ;;  %v14245_v29 = vsub.f32 %v14166_v55, %v18894_v6  ;;  %18895 = vst [vmem:[#allocation43_spill] sm:$0xff] %v14249_v21  ;;  %v14257_v61 = vld [vmem:[#allocation5 + $0x470] sm:$0xff]  ;;  %v14276_v6 = vsub.f32 %v14209_v58, %v17638_v12  ;;  %v18902_v55 = vand.u32 4294901760, %v14211_v53 }
 0x2d1   : > { %18897 = vst [vmem:[#allocation50_spill] sm:$0xff] %v14257_v61  ;;  %18898 = vst [vmem:[#allocation59_spill] sm:$0xff] %v14259_v31  ;;  %v18904_v2 = vand.u32 4294901760, %v14229_v30  ;;  %v14293_v24 = vsub.f32 %v14231_v54, %v18906_v51  ;;  %v18908_v12 = vpack.c.bf16 %v18728_v56, %v18727_v39 }
 0x2d2   : > { %9979 = vmatpush3.bf16.msra.mxu0 %v18899_v0  ;;  %10019 = vmatpush3.bf16.msra.mxu1 %v13916_v1  ;;  %18901 = vst [vmem:[#allocation67_spill] sm:$0xff] %v14276_v6  ;;  %v14281_v0 = vsub.f32 %v14211_v53, %v18902_v55  ;;  %v18914_v55 = vand.u32 4294901760, %v14257_v61 }
 0x2d3   : > { %9981 = vmatprep.subr.bf16.mxu0 %v18900_v20  ;;  %10021 = vmatprep.subr.bf16.mxu1 %v13923_v5  ;;  %v14288_v8 = vsub.f32 %v14229_v30, %v18904_v2  ;;  %18907 = vst [vmem:[#allocation63_spill] sm:$0xff] %v14293_v24  ;;  %v18909_v20 = vpack.c.bf16 %v18731_v7, %v18730_v4  ;;  %v18910_v2 = vand.u32 4294901760, %v14249_v21 }
 0x2d4   : > { %18903 = vst [vmem:[#allocation25_spill] sm:$0xff] %v14281_v0  ;;  %v14320_v30 = vsub.f32 %v14257_v61, %v18914_v55  ;;  %v18920_v55 = vld [vmem:[#allocation73_spill] sm:$0xff] }
 0x2d5   : > { %18905 = vst [vmem:[#allocation46_spill] sm:$0xff] %v14288_v8  ;;  %v14308_v51 = vsub.f32 %v14249_v21, %v18910_v2  ;;  %v18922_v21 = vld [vmem:[#allocation69_spill] sm:$0xff] }
 0x2d6   : > { %9983 = vmatpush3.bf16.msra.mxu0 %v18908_v12  ;;  %10023 = vmatpush3.bf16.msra.mxu1 %v13930_v37  ;;  %v14313_v12 = vsub.f32 %v14251_v11, %v18912_v41  ;;  %18915 = vst [vmem:[#allocation54_spill] sm:$0xff] %v14320_v30  ;;  %v18918_v41 = vpack.c.bf16 %v13479_v23, %v13474_v27  ;;  %v18919_v11 = vld [vmem:[#allocation36_spill] sm:$0xff]  ;;  %v18926_v37 = vld [vmem:[#allocation89_spill] sm:$0xff]  ;;  %v18928_v23 = vld [vmem:[#allocation86_spill] sm:$0xff] }
 0x2d7   : > { %9985 = vmatprep.subr.bf16.mxu0 %v18909_v20  ;;  %10025 = vmatprep.subr.bf16.mxu1 %v13937_v28  ;;  %18911 = vst [vmem:[#allocation70_spill] sm:$0xff] %v14308_v51  ;;  %v18916_v20 = vand.u32 4294901760, %v14259_v31  ;;  %v18921_v61 = vpack.c.bf16 %v18919_v11, %v18920_v55  ;;  %v18925_v28 = vld [vmem:[#allocation90_spill] sm:$0xff]  ;;  %v18930_v11 = vld [vmem:[#allocation92_spill] sm:$0xff] }
 0x2d8   : > { %18913 = vst [vmem:[#allocation79_spill] sm:$0xff] %v14313_v12  ;;  %v18927_v27 = vpack.c.bf16 %v18925_v28, %v18926_v37  ;;  %v18935_v30 = vld [vmem:[#allocation12_spill] sm:$0xff]  ;;  %v14355_v51 = vld [vmem:[#allocation5 + $0x488] sm:$0xff] }
 0x2d9   : > { %v14325_v53 = vsub.f32 %v14259_v31, %v18916_v20  ;;  %v18923_v31 = vld [vmem:[#allocation78_spill] sm:$0xff] }
 0x2da   : > { %9987 = vmatpush3.bf16.msra.mxu0 %v18918_v41  ;;  %10027 = vmatpush3.bf16.msra.mxu1 %v13945_v32  ;;  %v18924_v58 = vand.u32 4294901760, %v18923_v31  ;;  %v14345_v41 = vld [vmem:[#allocation5 + $0x480] sm:$0xff]  ;;  %v18929_v32 = vld [vmem:[#allocation39_spill] sm:$0xff]  ;;  %v18937_v37 = vld [vmem:[#allocation14_spill] sm:$0xff] }
 0x2db   : > { %18917 = vst [vmem:[#allocation29_spill] sm:$0xff] %v14325_v53  ;;  %9989 = vmatprep.subr.bf16.mxu0 %v18921_v61  ;;  %10061 = vmatprep.subr.bf16.mxu1 %v18922_v21  ;;  %v18931_v61 = vld [vmem:[#allocation91_spill] sm:$0xff]  ;;  %v4126_v28 = vand.u32 4294901760, %v14345_v41 }
 0x2dc   : > { %v18932_v55 = vpack.c.bf16 %v18930_v11, %v18931_v61  ;;  %v18933_v21 = vld [vmem:[#allocation83_spill] sm:$0xff]  ;;  %v18942_v11 = vand.u32 4294901760, %v13275_v16 }
 0x2dd   : > { %v8061_v20 = vpop.f32.mrb[10].mxu1  ;;  %3800 = vmatmul.mubr.f32.vlgmr.msra.gmra.mrb[20].mxu1 %v18924_v58  ;;  %v18934_v53 = vand.u32 4294901760, %v18933_v21  ;;  %v18936_v58 = vand.u32 4294901760, %v18935_v30  ;;  %v4129_v30 = vand.u32 4294901760, %v14355_v51  ;;  %v18945_v21 = vand.u32 4294901760, %v13294_v19 }
 0x2de   : > { %v8062_v2 = vpop.f32.mrb[11].mxu1  ;;  %9991 = vmatpush3.bf16.msra.mxu0 %v18927_v27  ;;  %10063 = vmatpush3.bf16.msra.mxu1 %v18928_v23  ;;  %v18938_v27 = vld [vmem:[#allocation94_spill] sm:$0xff]  ;;  %v18939_v23 = vld [vmem:[#allocation93_spill] sm:$0xff] }
 0x2df   : > { %v8063_v54 = vadd.f32 %v8062_v2, %v8061_v20  ;;  %4070 = vmatprep.mubr.f32.mxu1 %v18929_v32  ;;  %9993 = vmatprep.subr.bf16.mxu0 %v18932_v55  ;;  %v10028_v12 = vpack.c.bf16 %v18936_v58, %v18934_v53  ;;  %v18940_v2 = vpack.c.bf16 %v18938_v27, %v18939_v23  ;;  %v18941_v20 = vand.u32 4294901760, %v13270_v15  ;;  %v18943_v53 = vld [vmem:[#allocation20_spill] sm:$0xff] }
 0x2e0   : > { %10065 = vmatprep.subr.bf16.mxu1 %v18937_v37  ;;  %v18944_v55 = vand.u32 4294901760, %v13289_v10  ;;  %v14377_v15 = vsub.f32 %v14345_v41, %v4126_v28  ;;  %v18948_v10 = vand.u32 4294901760, %v13312_v26  ;;  %v14387_v19 = vsub.f32 %v14355_v51, %v4129_v30 }
 0x2e1   : > { %v10030_v61 = vpack.c.bf16 %v18942_v11, %v18941_v20  ;;  %v18951_v23 = vand.u32 4294901760, %v13324_v45  ;;  %v18953_v20 = vand.u32 4294901760, %v18705_v59  ;;  %v18954_v45 = vand.u32 4294901760, %v18713_v40 }
 0x2e2   : > { %9995 = vmatpush3.bf16.msra.mxu0 %v18940_v2  ;;  %10067 = vmatpush3.bf16.msra.mxu1 %v13829_v25  ;;  %v10032_v58 = vpack.c.bf16 %v18945_v21, %v18944_v55  ;;  %18946 = vst [vmem:[#allocation36_spill] sm:$0xff] %v14377_v15  ;;  %v18947_v25 = vand.u32 4294901760, %v13307_v17  ;;  %18949 = vst [vmem:[#allocation73_spill] sm:$0xff] %v14387_v19  ;;  %v17667_v26 = vand.u32 4294901760, %v14377_v15  ;;  %v18952_v17 = vand.u32 4294901760, %v13331_v43 }
 0x2e3   : > { %10029 = vmatprep.subr.bf16.mxu0 %v10028_v12  ;;  %10069 = vmatprep.subr.bf16.mxu1 %v18943_v53  ;;  %v17664_v53 = vand.u32 4294901760, %v14042_v50  ;;  %v17663_v43 = vand.u32 4294901760, %v14054_v48  ;;  %v18958_v40 = vand.u32 4294901760, %v18721_v52 }
 0x2e4   : > { %v8026_v37 = vpop.f32.mrb[10].mxu0  ;;  %v10034_v12 = vpack.c.bf16 %v18948_v10, %v18947_v25  ;;  %v10038_v11 = vpack.c.bf16 %v18953_v20, %v18952_v17  ;;  %v4305_v59 = vsub.f32 %v14377_v15, %v17667_v26  ;;  %v17680_v25 = vand.u32 4294901760, %v14245_v29 }
 0x2e5   : > { %v8027_v27 = vpop.f32.mrb[11].mxu0  ;;  %3692 = vmatmul.mubr.f32.vlgmr.msra.gmra.mrb[20].mxu0 %v18923_v31  ;;  %v18950_v31 = vand.u32 4294901760, %v13319_v62  ;;  %v18961_v10 = vand.u32 4294901760, %v18727_v39 }
 0x2e6   : > { %v8028_v16 = vadd.f32 %v8027_v27, %v8026_v37  ;;  %10031 = vmatpush3.bf16.msra.mxu0 %v10030_v61  ;;  %3966 = vmatprep.mubr.f32.mxu0 %v18929_v32  ;;  %v17665_v61 = vand.u32 4294901760, %v14023_v14  ;;  %v17660_v37 = vand.u32 4294901760, %v14076_v18  ;;  %v4319_v27 = vsub.f32 %v14054_v48, %v17663_v43  ;;  %v18975_v43 = vld [vmem:[#allocation77_spill] sm:$0xff] }
 0x2e7   : > { %10071 = vmatpush3.bf16.msra.mxu1 %v13855_v22  ;;  %10033 = vmatprep.subr.bf16.mxu0 %v10032_v58  ;;  %v10036_v2 = vpack.c.bf16 %v18951_v23, %v18950_v31  ;;  %v17666_v22 = vand.u32 4294901760, %v14387_v19  ;;  %v18963_v23 = vand.u32 4294901760, %v18730_v4  ;;  %v17679_v4 = vand.u32 4294901760, %v14276_v6 }
 0x2e8   : > { %v2246_v32 = vadd.f32 %v8028_v16, %v14182_v44  ;;  %10073 = vmatprep.subr.bf16.mxu1 %v13862_v9  ;;  %v18955_v9 = vand.u32 4294901760, %v18714_v46  ;;  %v18959_v46 = vand.u32 4294901760, %v18722_v47  ;;  %v4193_v58 = vsub.f32 %v14023_v14, %v17665_v61 }
 0x2e9   : > { %v17661_v47 = vand.u32 4294901760, %v14071_v3  ;;  %v17658_v16 = vand.u32 4294901760, %v14085_v38 }
 0x2ea   : > { %10035 = vmatpush3.bf16.msra.mxu0 %v10034_v12  ;;  %v14403_v62 = vadd.f32 %v8063_v54, %v2246_v32  ;;  %v10040_v44 = vpack.c.bf16 %v18955_v9, %v18954_v45  ;;  %v18956_v54 = vand.u32 4294901760, %v18719_v36  ;;  %v10044_v21 = vpack.c.bf16 %v18959_v46, %v18958_v40 }
 0x2eb   : > { %10075 = vmatpush3.bf16.msra.mxu1 %v13882_v49  ;;  %10037 = vmatprep.subr.bf16.mxu0 %v10036_v2  ;;  %v18957_v49 = vand.u32 4294901760, %v18720_v13  ;;  %v4200_v36 = vsub.f32 %v14042_v50, %v17664_v53  ;;  %v18960_v13 = vld [vmem:[#allocation38_spill] sm:$0xff]  ;;  %v18962_v12 = vand.u32 4294901760, %v18728_v56  ;;  %v18964_v2 = vand.u32 4294901760, %v18731_v7 }
 0x2ec   : > { %10077 = vmatprep.subr.bf16.mxu1 %v13888_v34  ;;  %v4312_v34 = vsub.f32 %v14387_v19, %v17666_v22  ;;  %v17662_v52 = vand.u32 4294901760, %v18960_v13  ;;  %v4306_v32 = vand.u32 4294901760, %v4305_v59  ;;  %v4194_v20 = vand.u32 4294901760, %v4193_v58  ;;  %v18968_v58 = vld [vmem:[#allocation79_spill] sm:$0xff] }
 0x2ed   : > { %v10042_v55 = vpack.c.bf16 %v18957_v49, %v18956_v54  ;;  %v10046_v31 = vpack.c.bf16 %v18962_v12, %v18961_v10  ;;  %v4201_v56 = vand.u32 4294901760, %v4200_v36  ;;  %v17673_v7 = vand.u32 4294901760, %v14281_v0  ;;  %v18970_v12 = vld [vmem:[#allocation54_spill] sm:$0xff] }
 0x2ee   : > { %10039 = vmatpush3.bf16.msra.mxu0 %v10038_v11  ;;  %v4313_v17 = vand.u32 4294901760, %v4312_v34  ;;  %v17659_v11 = vand.u32 4294901760, %v14090_v63  ;;  %v4326_v39 = vsub.f32 %v18960_v13, %v17662_v52  ;;  %v4320_v9 = vand.u32 4294901760, %v4319_v27  ;;  %v18969_v27 = vld [vmem:[#allocation17_spill] sm:$0xff] }
 0x2ef   : > { %10079 = vmatpush3.bf16.msra.mxu1 %v13902_v42  ;;  %10041 = vmatprep.subr.bf16.mxu0 %v10040_v44  ;;  %v17681_v42 = vand.u32 4294901760, %v14240_v57  ;;  %v4207_v44 = vsub.f32 %v14071_v3, %v17661_v47  ;;  %v4333_v59 = vsub.f32 %v14085_v38, %v17658_v16  ;;  %v17669_v54 = vand.u32 4294901760, %v14095_v35  ;;  %v18974_v47 = vld [vmem:[#allocation75_spill] sm:$0xff] }
 0x2f0   : > { %10081 = vmatprep.subr.bf16.mxu1 %v13909_v33  ;;  %v10048_v33 = vpack.c.bf16 %v18964_v2, %v18963_v23  ;;  %v17672_v49 = vand.u32 4294901760, %v14288_v8  ;;  %v4340_v40 = vsub.f32 %v14090_v63, %v17659_v11  ;;  %v17674_v46 = vand.u32 4294901760, %v14101_v60  ;;  %v18971_v2 = vld [vmem:[#allocation29_spill] sm:$0xff]  ;;  %v18973_v11 = vld [vmem:[#allocation80_spill] sm:$0xff] }
 0x2f1   : > { %v14457_v45 = vpack.c.bf16 %v17680_v25, %v17681_v42  ;;  %v17668_v36 = vand.u32 4294901760, %v18968_v58  ;;  %v4327_v10 = vand.u32 4294901760, %v4326_v39  ;;  %v17677_v23 = vand.u32 4294901760, %v18970_v12  ;;  %v18990_v42 = vld [vmem:[#allocation84_spill] sm:$0xff] }
 0x2f2   : > { %10043 = vmatpush3.bf16.msra.mxu0 %v10042_v55  ;;  %v17671_v55 = vand.u32 4294901760, %v14293_v24  ;;  %v17675_v16 = vand.u32 4294901760, %v18971_v2  ;;  %v17676_v52 = vand.u32 4294901760, %v18974_v47  ;;  %v17678_v53 = vand.u32 4294901760, %v18975_v43 }
 0x2f3   : > { %18965 = vst [vmem:[#allocation69_spill] sm:$0xff] %v14457_v45  ;;  %10083 = vmatpush3.bf16.msra.mxu1 %v13916_v1  ;;  %10045 = vmatprep.subr.bf16.mxu0 %v10044_v21  ;;  %v4214_v1 = vsub.f32 %v14076_v18, %v17660_v37  ;;  %v18967_v21 = vld [vmem:[#allocation70_spill] sm:$0xff]  ;;  %v10124_v37 = vpack.c.bf16 %v4313_v17, %v4306_v32  ;;  %v4208_v39 = vand.u32 4294901760, %v4207_v44  ;;  %v18978_v17 = vld [vmem:[#allocation44_spill] sm:$0xff]  ;;  %v4341_v22 = vand.u32 4294901760, %v4340_v40 }
 0x2f4   : > { %10085 = vmatprep.subr.bf16.mxu1 %v13923_v5  ;;  %v14482_v5 = vpack.c.bf16 %v17673_v7, %v17679_v4  ;;  %v17670_v34 = vand.u32 4294901760, %v18967_v21  ;;  %v4221_v61 = vsub.f32 %v14095_v35, %v17669_v54  ;;  %v14515_v32 = vpack.c.bf16 %v17675_v16, %v17677_v23  ;;  %v18979_v44 = vld [vmem:[#allocation88_spill] sm:$0xff]  ;;  %v18988_v23 = vld [vmem:[#allocation15_spill] sm:$0xff] }
 0x2f5   : > { %v4228_v26 = vsub.f32 %v14101_v60, %v17674_v46  ;;  %v10128_v54 = vpack.c.bf16 %v4327_v10, %v4320_v9  ;;  %v4354_v40 = vsub.f32 %v18975_v43, %v17678_v53  ;;  %v18987_v9 = vld [vmem:[#allocation85_spill] sm:$0xff]  ;;  %v18989_v4 = vld [vmem:[#allocation31_spill] sm:$0xff]  ;;  %v19041_v45 = vand.u32 4294901760, %v18970_v12 }
 0x2f6   : > { %18966 = vst [vmem:[#allocation78_spill] sm:$0xff] %v14482_v5  ;;  %10047 = vmatpush3.bf16.msra.mxu0 %v10046_v31  ;;  %v14497_v31 = vpack.c.bf16 %v17671_v55, %v17672_v49  ;;  %18977 = vst [vmem:[#allocation86_spill] sm:$0xff] %v14515_v32  ;;  %v18982_v49 = vld [vmem:[#allocation26_spill] sm:$0xff] }
 0x2f7   : > { %10087 = vmatpush3.bf16.msra.mxu1 %v18969_v27  ;;  %10049 = vmatprep.subr.bf16.mxu0 %v10048_v33  ;;  %v14506_v33 = vpack.c.bf16 %v17668_v36, %v17670_v34  ;;  %v4215_v27 = vand.u32 4294901760, %v4214_v1  ;;  %v18980_v1 = vld [vmem:[#allocation24_spill] sm:$0xff]  ;;  %v10126_v36 = vpack.c.bf16 %v4201_v56, %v4194_v20  ;;  %v18981_v34 = vld [vmem:[#allocation53_spill] sm:$0xff]  ;;  %v17683_v7 = vand.u32 4294901760, %v18982_v49  ;;  %v18986_v56 = vld [vmem:[#allocation34_spill] sm:$0xff] }
 0x2f8   : > { %18972 = vst [vmem:[#allocation90_spill] sm:$0xff] %v14497_v31  ;;  %10089 = vmatprep.subr.bf16.mxu1 %v18973_v11  ;;  %v4334_v11 = vand.u32 4294901760, %v4333_v59  ;;  %v17682_v55 = vand.u32 4294901760, %v18981_v34  ;;  %v4347_v59 = vsub.f32 %v18974_v47, %v17676_v52  ;;  %v14537_v20 = vpack.c.bf16 %v4129_v30, %v4126_v28  ;;  %v18991_v28 = vld [vmem:[#allocation55_spill] sm:$0xff]  ;;  %v18998_v30 = vld [vmem:[#allocation81_spill] sm:$0xff]  ;;  %v19021_v31 = vld [vmem:[#allocation52_spill] sm:$0xff] }
 0x2f9   : > { %18976 = vst [vmem:[#allocation89_spill] sm:$0xff] %v14506_v33  ;;  %v4229_v52 = vand.u32 4294901760, %v4228_v26  ;;  %v4242_v41 = vsub.f32 %v18982_v49, %v17683_v7  ;;  %v19012_v33 = vand.u32 4294901760, %v14240_v57 }
 0x2fa   : > { %10051 = vmatpush3.bf16.msra.mxu0 %v18978_v17  ;;  %v18983_v17 = vld [vmem:[#allocation13_spill] sm:$0xff]  ;;  %18985 = vst [vmem:[#allocation39_spill] sm:$0xff] %v14537_v20  ;;  %v10132_v10 = vpack.c.bf16 %v4341_v22, %v4334_v11  ;;  %v4235_v51 = vsub.f32 %v18981_v34, %v17682_v55  ;;  %v4348_v26 = vand.u32 4294901760, %v4347_v59 }
 0x2fb   : > { %10091 = vmatpush3.bf16.msra.mxu1 %v18979_v44  ;;  %10053 = vmatprep.subr.bf16.mxu0 %v18980_v1  ;;  %v17684_v46 = vand.u32 4294901760, %v18983_v17  ;;  %v18984_v44 = vld [vmem:[#allocation74_spill] sm:$0xff]  ;;  %v10130_v1 = vpack.c.bf16 %v4215_v27, %v4208_v39  ;;  %v4355_v39 = vand.u32 4294901760, %v4354_v40  ;;  %v18993_v27 = vld [vmem:[#allocation32_spill] sm:$0xff]  ;;  %v19001_v40 = vld [vmem:[#allocation45_spill] sm:$0xff] }
 0x2fc   : > { %10125 = vmatprep.subr.bf16.mxu1 %v10124_v37  ;;  %v17685_v16 = vand.u32 4294901760, %v18984_v44  ;;  %v4222_v37 = vand.u32 4294901760, %v4221_v61  ;;  %v18992_v61 = vld [vmem:[#allocation56_spill] sm:$0xff]  ;;  %v18994_v11 = vand.u32 4294901760, %v18993_v27  ;;  %v19002_v25 = vand.u32 4294901760, %v19001_v40 }
 0x2fe   : > { %4072 = vmatmul.mubr.f32.vlgmr.msra.gmra.mrb[22].mxu1 %v18986_v56  ;;  %10055 = vmatpush3.bf16.msra.mxu0 %v18987_v9  ;;  %v18995_v9 = vld [vmem:[#allocation16_spill] sm:$0xff]  ;;  %v10134_v22 = vpack.c.bf16 %v4229_v52, %v4222_v37  ;;  %v19006_v52 = vand.u32 4294901760, %v18991_v28 }
 0x2ff   : > { %10057 = vmatprep.subr.bf16.mxu0 %v18990_v42  ;;  %10127 = vmatpush3.bf16.msra.mxu1 %v10126_v36  ;;  %v4361_v42 = vsub.f32 %v18983_v17, %v17684_v46  ;;  %v4368_v36 = vsub.f32 %v18984_v44, %v17685_v16  ;;  %v18996_v55 = vand.u32 4294901760, %v18995_v9  ;;  %v19004_v46 = vand.u32 4294901760, %v18988_v23 }
 0x300   : > { %10129 = vmatprep.subr.bf16.mxu1 %v10128_v54  ;;  %v18999_v54 = vld [vmem:[#allocation76_spill] sm:$0xff]  ;;  %v19005_v16 = vand.u32 4294901760, %v18989_v4  ;;  %v4375_v37 = vsub.f32 %v18991_v28, %v19006_v52  ;;  %v10136_v9 = vpack.c.bf16 %v4355_v39, %v4348_v26  ;;  %v19014_v39 = vld [vmem:[#allocation61_spill] sm:$0xff] }
 0x301   : > { %v14562_v7 = vpack.c.bf16 %v18996_v55, %v18994_v11  ;;  %v19000_v59 = vand.u32 4294901760, %v18999_v54  ;;  %v4249_v32 = vsub.f32 %v18988_v23, %v19004_v46  ;;  %v4236_v55 = vand.u32 4294901760, %v4235_v51 }
 0x302   : > { %10059 = vmatpush3.bf16.msra.mxu0 %v18998_v30  ;;  %v4256_v27 = vsub.f32 %v18989_v4, %v19005_v16  ;;  %v4243_v30 = vand.u32 4294901760, %v4242_v41  ;;  %v4362_v46 = vand.u32 4294901760, %v4361_v42  ;;  %v4369_v54 = vand.u32 4294901760, %v4368_v36  ;;  %v19008_v16 = vld [vmem:[#allocation22_spill] sm:$0xff] }
 0x303   : > { %18997 = vst [vmem:[#allocation92_spill] sm:$0xff] %v14562_v7  ;;  %v14569_v53 = vpack.c.bf16 %v19002_v25, %v19000_v59  ;;  %10131 = vmatpush3.bf16.msra.mxu1 %v10130_v1  ;;  %10093 = vmatprep.subr.bf16.mxu0 %v14537_v20  ;;  %v19007_v25 = vand.u32 4294901760, %v18992_v61  ;;  %v19009_v1 = vand.u32 4294901760, %v19008_v16  ;;  %v19010_v59 = vld [vmem:[#allocation66_spill] sm:$0xff]  ;;  %v4250_v41 = vand.u32 4294901760, %v4249_v32 }
 0x304   : > { %10133 = vmatprep.subr.bf16.mxu1 %v10132_v10  ;;  %v19011_v40 = vand.u32 4294901760, %v19010_v59  ;;  %v4257_v52 = vand.u32 4294901760, %v4256_v27  ;;  %v19013_v10 = vand.u32 4294901760, %v14245_v29  ;;  %v19015_v42 = vand.u32 4294901760, %v19014_v39  ;;  %v19016_v36 = vld [vmem:[#allocation62_spill] sm:$0xff] }
 0x305   : > { %19003 = vst [vmem:[#allocation91_spill] sm:$0xff] %v14569_v53  ;;  %v4382_v11 = vsub.f32 %v18992_v61, %v19007_v25  ;;  %3968 = vmatmul.mubr.f32.vlgmr.msra.gmra.mrb[22].mxu0 %v18986_v56  ;;  %v4263_v25 = vsub.f32 %v14240_v57, %v19012_v33  ;;  %v10138_v56 = vpack.c.bf16 %v4243_v30, %v4236_v55  ;;  %v19017_v16 = vand.u32 4294901760, %v19016_v36  ;;  %v19023_v30 = vld [vmem:[#allocation71_spill] sm:$0xff] }
 0x306   : > { %v14589_v51 = vpack.c.bf16 %v19011_v40, %v19009_v1  ;;  %10095 = vmatpush3.bf16.msra.mxu0 %v14562_v7  ;;  %v4270_v26 = vsub.f32 %v14245_v29, %v19013_v10  ;;  %v4376_v32 = vand.u32 4294901760, %v4375_v37  ;;  %v10140_v59 = vpack.c.bf16 %v4369_v54, %v4362_v46  ;;  %v19027_v46 = vld [vmem:[#allocation47_spill] sm:$0xff] }
 0x307   : > { %10135 = vmatpush3.bf16.msra.mxu1 %v10134_v22  ;;  %10097 = vmatprep.subr.bf16.mxu0 %v14569_v53  ;;  %v14603_v1 = vpack.c.bf16 %v19017_v16, %v19015_v42  ;;  %v4383_v27 = vand.u32 4294901760, %v4382_v11  ;;  %v19019_v33 = vand.u32 4294901760, %v14276_v6  ;;  %v19020_v10 = vand.u32 4294901760, %v14281_v0  ;;  %v19025_v11 = vld [vmem:[#allocation33_spill] sm:$0xff] }
 0x308   : > { %10137 = vmatprep.subr.bf16.mxu1 %v10136_v9  ;;  %v19022_v55 = vand.u32 4294901760, %v19021_v31  ;;  %v19024_v39 = vand.u32 4294901760, %v19023_v30  ;;  %v10142_v37 = vpack.c.bf16 %v4257_v52, %v4250_v41  ;;  %v19026_v9 = vand.u32 4294901760, %v19025_v11  ;;  %v19035_v11 = vld [vmem:[#allocation82_spill] sm:$0xff] }
 0x309   : > { %19018 = vst [vmem:[#allocation83_spill] sm:$0xff] %v14603_v1  ;;  %v4389_v40 = vsub.f32 %v14276_v6, %v19019_v33  ;;  %v4396_v22 = vsub.f32 %v14281_v0, %v19020_v10  ;;  %v19028_v54 = vand.u32 4294901760, %v19027_v46  ;;  %v4264_v36 = vand.u32 4294901760, %v4263_v25 }
 0x30a   : > { %v14615_v5 = vpack.c.bf16 %v19024_v39, %v19022_v55  ;;  %10099 = vmatpush3.bf16.msra.mxu0 %v14589_v51  ;;  %v4271_v16 = vand.u32 4294901760, %v4270_v26  ;;  %v10144_v33 = vpack.c.bf16 %v4383_v27, %v4376_v32  ;;  %v19029_v31 = vand.u32 4294901760, %v14288_v8  ;;  %v19033_v32 = vld [vmem:[#allocation21_spill] sm:$0xff] }
 0x30b   : > { %v14622_v42 = vpack.c.bf16 %v19028_v54, %v19026_v9  ;;  %10139 = vmatpush3.bf16.msra.mxu1 %v10138_v56  ;;  %10101 = vmatprep.subr.bf16.mxu0 %v14603_v1  ;;  %v19030_v55 = vand.u32 4294901760, %v14293_v24  ;;  %v4390_v52 = vand.u32 4294901760, %v4389_v40  ;;  %v4397_v30 = vand.u32 4294901760, %v4396_v22  ;;  %v19039_v22 = vld [vmem:[#allocation51_spill] sm:$0xff] }
 0x30c   : > { %v4277_v10 = vsub.f32 %v14288_v8, %v19029_v31  ;;  %10141 = vmatprep.subr.bf16.mxu1 %v10140_v59  ;;  %v19031_v39 = vand.u32 4294901760, %v18967_v21  ;;  %v19032_v26 = vand.u32 4294901760, %v18968_v58  ;;  %v19034_v27 = vand.u32 4294901760, %v19033_v32  ;;  %v19037_v59 = vld [vmem:[#allocation49_spill] sm:$0xff] }
 0x30d   : > { %v4284_v41 = vsub.f32 %v14293_v24, %v19030_v55  ;;  %v19036_v9 = vand.u32 4294901760, %v19035_v11  ;;  %v10146_v54 = vpack.c.bf16 %v4271_v16, %v4264_v36  ;;  %v19038_v40 = vand.u32 4294901760, %v19037_v59  ;;  %v19043_v59 = vld [vmem:[#allocation64_spill] sm:$0xff] }
 0x30e   : > { %v4403_v25 = vsub.f32 %v18967_v21, %v19031_v39  ;;  %v4410_v56 = vsub.f32 %v18968_v58, %v19032_v26  ;;  %10103 = vmatpush3.bf16.msra.mxu0 %v14615_v5  ;;  %v19040_v31 = vand.u32 4294901760, %v19039_v22  ;;  %v4278_v39 = vand.u32 4294901760, %v4277_v10  ;;  %v14756_v58 = vld [vmem:[#allocation5 + $0x5a0] sm:$0xff] }
 0x30f   : > { %v14642_v46 = vpack.c.bf16 %v19036_v9, %v19034_v27  ;;  %10143 = vmatpush3.bf16.msra.mxu1 %v10142_v37  ;;  %10105 = vmatprep.subr.bf16.mxu0 %v14622_v42  ;;  %v4285_v26 = vand.u32 4294901760, %v4284_v41  ;;  %v4291_v32 = vsub.f32 %v18970_v12, %v19041_v45  ;;  %v19042_v11 = vand.u32 4294901760, %v18971_v2  ;;  %v19047_v41 = vld [vmem:[#allocation37_spill] sm:$0xff]  ;;  %19093 = vst [vmem:[#allocation13_spill] sm:$0xff] %v14756_v58 }
 0x310   : > { %v14648_v55 = vpack.c.bf16 %v19040_v31, %v19038_v40  ;;  %10145 = vmatprep.subr.bf16.mxu1 %v10144_v33  ;;  %v10148_v36 = vpack.c.bf16 %v4397_v30, %v4390_v52  ;;  %v4404_v16 = vand.u32 4294901760, %v4403_v25  ;;  %v4411_v9 = vand.u32 4294901760, %v4410_v56  ;;  %v19045_v40 = vld [vmem:[#allocation58_spill] sm:$0xff]  ;;  %v19049_v12 = vld [vmem:[#allocation57_spill] sm:$0xff] }
 0x311   : > { %v4298_v27 = vsub.f32 %v18971_v2, %v19042_v11  ;;  %v19044_v37 = vand.u32 4294901760, %v19043_v59  ;;  %v19046_v22 = vand.u32 4294901760, %v19045_v40  ;;  %v10150_v45 = vpack.c.bf16 %v4285_v26, %v4278_v39  ;;  %v19051_v59 = vld [vmem:[#allocation60_spill] sm:$0xff]  ;;  %v19053_v40 = vld [vmem:[#allocation65_spill] sm:$0xff] }
 0x312   : > { %10107 = vmatpush3.bf16.msra.mxu0 %v14642_v46  ;;  %v19048_v31 = vand.u32 4294901760, %v19047_v41  ;;  %v19050_v11 = vand.u32 4294901760, %v19049_v12  ;;  %v4292_v52 = vand.u32 4294901760, %v4291_v32  ;;  %v10152_v25 = vpack.c.bf16 %v4411_v9, %v4404_v16  ;;  %v19055_v26 = vld [vmem:[#allocation41_spill] sm:$0xff]  ;;  %v19057_v32 = vld [vmem:[#allocation42_spill] sm:$0xff] }
 0x313   : > { %v14662_v10 = vpack.c.bf16 %v19046_v22, %v19044_v37  ;;  %10147 = vmatpush3.bf16.msra.mxu1 %v10146_v54  ;;  %10109 = vmatprep.subr.bf16.mxu0 %v14648_v55  ;;  %v4299_v30 = vand.u32 4294901760, %v4298_v27  ;;  %v19052_v37 = vand.u32 4294901760, %v19051_v59  ;;  %v19054_v54 = vand.u32 4294901760, %v19053_v40  ;;  %v19059_v9 = vld [vmem:[#allocation18_spill] sm:$0xff] }
 0x314   : > { %v14669_v33 = vpack.c.bf16 %v19050_v11, %v19048_v31  ;;  %10149 = vmatprep.subr.bf16.mxu1 %v10148_v36  ;;  %v19056_v41 = vand.u32 4294901760, %v19055_v26  ;;  %v19058_v27 = vand.u32 4294901760, %v19057_v32  ;;  %v19060_v31 = vand.u32 4294901760, %v19059_v9  ;;  %v19061_v11 = vld [vmem:[#allocation19_spill] sm:$0xff] }
 0x315   : > { %v14676_v22 = vpack.c.bf16 %v19054_v54, %v19052_v37  ;;  %v10154_v12 = vpack.c.bf16 %v4299_v30, %v4292_v52  ;;  %v19062_v59 = vand.u32 4294901760, %v19061_v11  ;;  %v19066_v30 = vld [vmem:[#allocation48_spill] sm:$0xff]  ;;  %v19071_v26 = vld [vmem:[#allocation59_spill] sm:$0xff] }
 0x316   : > { %v8131_v56 = vpop.f32.mrb[12].mxu1  ;;  %10111 = vmatpush3.bf16.msra.mxu0 %v14662_v10  ;;  %v14683_v36 = vpack.c.bf16 %v19058_v27, %v19056_v41  ;;  %v19067_v40 = vand.u32 4294901760, %v19066_v30  ;;  %v19072_v41 = vand.u32 4294901760, %v19071_v26  ;;  %v10156_v27 = vpack.c.bf16 %v14387_v19, %v14377_v15  ;;  %v14723_v26 = vld [vmem:[#allocation5 + $0x500] sm:$0xff] }
 0x317   : > { %v8132_v39 = vpop.f32.mrb[13].mxu1  ;;  %10151 = vmatpush3.bf16.msra.mxu1 %v10150_v45  ;;  %10113 = vmatprep.subr.bf16.mxu0 %v14669_v33  ;;  %v14690_v37 = vpack.c.bf16 %v19062_v59, %v19060_v31  ;;  %v19064_v45 = vld [vmem:[#allocation43_spill] sm:$0xff]  ;;  %19078 = vst [vmem:[#allocation20_spill] sm:$0xff] %v14723_v26  ;;  %v19099_v8 = vand.u32 4294901760, %v14723_v26 }
 0x318   : > { %v8133_v16 = vadd.f32 %v8132_v39, %v8131_v56  ;;  %10153 = vmatprep.subr.bf16.mxu1 %v10152_v25  ;;  %v19065_v52 = vand.u32 4294901760, %v19064_v45  ;;  %v19069_v56 = vld [vmem:[#allocation50_spill] sm:$0xff]  ;;  %v19074_v45 = vld [vmem:[#allocation87_spill] sm:$0xff] }
 0x319   : > { %19063 = vst [vmem:[#allocation12_spill] sm:$0xff] %v14690_v37  ;;  %v19070_v39 = vand.u32 4294901760, %v19069_v56  ;;  %v19077_v56 = vld [vmem:[#allocation35_spill] sm:$0xff] }
 0x31a   : > { %10115 = vmatpush3.bf16.msra.mxu0 %v14676_v22  ;;  %v14697_v54 = vpack.c.bf16 %v19067_v40, %v19065_v52 }
 0x31b   : > { %10155 = vmatpush3.bf16.msra.mxu1 %v10154_v12  ;;  %10117 = vmatprep.subr.bf16.mxu0 %v14683_v36  ;;  %v14705_v32 = vpack.c.bf16 %v19072_v41, %v19070_v39 }
 0x31c   : > { %19068 = vst [vmem:[#allocation14_spill] sm:$0xff] %v14697_v54  ;;  %10189 = vmatprep.subr.bf16.mxu1 %v14537_v20 }
 0x31d   : > { %19073 = vst [vmem:[#allocation94_spill] sm:$0xff] %v14705_v32 }
 0x31e   : > { %v8096_v25 = vpop.f32.mrb[12].mxu0  ;;  %10119 = vmatpush3.bf16.msra.mxu0 %v14690_v37 }
 0x31f   : > { %v8097_v12 = vpop.f32.mrb[13].mxu0  ;;  %10121 = vmatprep.subr.bf16.mxu0 %v14697_v54 }
 0x320   : > { %v8098_v9 = vadd.f32 %v8097_v12, %v8096_v25 }
 0x322   : > { %v2462_v31 = vadd.f32 %v8098_v9, %v14403_v62  ;;  %10123 = vmatpush3.bf16.msra.mxu0 %v14705_v32  ;;  %v19079_v62 = vld [vmem:[#allocation40_spill] sm:$0xff] }
 0x323   : > { %10157 = vmatprep.subr.bf16.mxu0 %v10156_v27  ;;  %v14726_v27 = vld [vmem:[#allocation5 + $0x508] sm:$0xff] }
 0x324   : > { %v14712_v11 = vadd.f32 %v8133_v16, %v2462_v31  ;;  %19080 = vst [vmem:[#allocation38_spill] sm:$0xff] %v14726_v27  ;;  %v19081_v31 = vld [vmem:[#allocation68_spill] sm:$0xff] }
 0x32d   : > { %v302_v59 = vpop.permute.xlu1 %301 }
 0x32e   : > { %v325_v30 = vsel %vm317_vm1, %v19074_v45, %v302_v59  ;;  %v14717_v40 = vpop.permute.xlu0 %303 }
 0x32f   : > { %19076 = vst [vmem:[#allocation93_spill] sm:$0xff] %v14717_v40  ;;  %v342_v39 = vmax.f32 %v19077_v56, %v325_v30  ;;  %v324_v25 = vsel %vm317_vm1, %v302_v59, %v14717_v40  ;;  %v14734_v56 = vld [vmem:[#allocation5 + $0x590] sm:$0xff]  ;;  %v14736_v59 = vld [vmem:[#allocation5 + $0x598] sm:$0xff] }
 0x330   : > { %v343_v41 = vmax.f32 %v19079_v62, %v324_v25  ;;  %19083 = vst [vmem:[#allocation80_spill] sm:$0xff] %v14734_v56  ;;  %19084 = vst [vmem:[#allocation75_spill] sm:$0xff] %v14736_v59  ;;  %v19086_v25 = vld [vmem:[#allocation72_spill] sm:$0xff]  ;;  %v19091_v30 = vld [vmem:[#allocation11_spill] sm:$0xff] }
 0x331   : > { %v358_v12 = vmax.f32 %v342_v39, 0.0  ;;  %v239_v16 = vpop.permute.xlu1 %238 }
 0x332   : > { %v359_v9 = vmax.f32 %v343_v41, 0.0  ;;  %v258_v45 = vsel %vm252_vm0, %v19081_v31, %v239_v16  ;;  %v14731_v2 = vpop.permute.xlu0 %240  ;;  %v14746_v41 = vld [vmem:[#allocation5 + $0x510] sm:$0xff]  ;;  %v14748_v31 = vld [vmem:[#allocation5 + $0x518] sm:$0xff] }
 0x333   : > { %19082 = vst [vmem:[#allocation17_spill] sm:$0xff] %v14731_v2  ;;  %v14738_v40 = vand.u32 4294901760, %v358_v12  ;;  %v14741_v39 = vmax.f32 %v19086_v25, %v258_v45  ;;  %v257_v62 = vsel %vm252_vm0, %v239_v16, %v14731_v2  ;;  %19088 = vst [vmem:[#allocation88_spill] sm:$0xff] %v14746_v41  ;;  %v14758_v45 = vld [vmem:[#allocation5 + $0x5a8] sm:$0xff]  ;;  %v14760_v25 = vld [vmem:[#allocation5 + $0x520] sm:$0xff]  ;;  %v19101_v2 = vand.u32 4294901760, %v14726_v27 }
 0x334   : > { %19089 = vst [vmem:[#allocation24_spill] sm:$0xff] %v14748_v31  ;;  %v14750_v19 = vand.u32 4294901760, %v359_v9  ;;  %v14753_v15 = vmax.f32 %v19091_v30, %v257_v62  ;;  %19094 = vst [vmem:[#allocation74_spill] sm:$0xff] %v14758_v45  ;;  %v14769_v62 = vld [vmem:[#allocation5 + $0x528] sm:$0xff] }
 0x335   : > { %19085 = vst [vmem:[#allocation77_spill] sm:$0xff] %v14738_v40  ;;  %19087 = vst [vmem:[#allocation44_spill] sm:$0xff] %v14741_v39  ;;  %v14763_v16 = vsub.f32 %v358_v12, %v14738_v40  ;;  %305 = vrot.lane.b32.xlu1 %v14741_v39, %s11061_s18  ;;  %v14778_v12 = vld [vmem:[%s11223_s7 + $0x60] sm:$0xff]  ;;  %v14783_v39 = vsub.f32 %v14723_v26, %v19099_v8  ;;  %v14802_v30 = vsub.f32 %v14726_v27, %v19101_v2  ;;  %v14823_v27 = vld [vmem:[#allocation5 + $0x5b8] sm:$0xff] }
 0x336   : > { %19090 = vst [vmem:[#allocation53_spill] sm:$0xff] %v14750_v19  ;;  %19092 = vst [vmem:[#allocation26_spill] sm:$0xff] %v14753_v15  ;;  %v14772_v21 = vsub.f32 %v359_v9, %v14750_v19  ;;  %v8201_v52 = vpop.f32.mrb[14].mxu1  ;;  %4414 = vmatprep.mubr.f32.mxu1 %v14750_v19  ;;  %307 = vrot.lane.b32.xlu0 %v14753_v15, %s11061_s18  ;;  %v14790_v19 = vld [vmem:[%s11223_s7 + $0x68] sm:$0xff]  ;;  %v19104_v15 = vand.u32 4294901760, %v14736_v59  ;;  %v14821_v9 = vld [vmem:[#allocation5 + $0x5b0] sm:$0xff] }
 0x337   : > { %19095 = vst [vmem:[#allocation34_spill] sm:$0xff] %v14760_v25  ;;  %19096 = vst [vmem:[#allocation85_spill] sm:$0xff] %v14763_v16  ;;  %v8202_v24 = vpop.f32.mrb[15].mxu1  ;;  %4416 = vmatmul.mubr.f32.vlgmr.msra.gmra.mrb[24].mxu1 %v14738_v40  ;;  %v19102_v6 = vand.u32 4294901760, %v14763_v16  ;;  %v14840_v26 = vld [vmem:[#allocation5 + $0x538] sm:$0xff] }
 0x338   : > { %19097 = vst [vmem:[#allocation15_spill] sm:$0xff] %v14769_v62  ;;  %19098 = vst [vmem:[#allocation31_spill] sm:$0xff] %v14778_v12  ;;  %v14795_v0 = vadd.f32 %v8202_v24, %v8201_v52  ;;  %10191 = vmatpush3.bf16.msra.mxu1 %v14562_v7  ;;  %v4175_v8 = vand.u32 4294901760, %v14772_v21  ;;  %v19103_v52 = vand.u32 4294901760, %v14734_v56  ;;  %v14819_v2 = vsub.f32 %v14736_v59, %v19104_v15  ;;  %v14838_v59 = vld [vmem:[#allocation5 + $0x530] sm:$0xff] }
 0x339   : > { %19100 = vst [vmem:[#allocation84_spill] sm:$0xff] %v14790_v19  ;;  %10193 = vmatprep.subr.bf16.mxu1 %v14569_v53  ;;  %242 = vrot.lane.b32.xlu1 %v14778_v12, %s11060_s20  ;;  %v4182_v24 = vsub.f32 %v14763_v16, %v19102_v6  ;;  %19106 = vst [vmem:[#allocation56_spill] sm:$0xff] %v14821_v9  ;;  %v19108_v12 = vand.u32 4294901760, %v14746_v41  ;;  %v19112_v53 = vand.u32 4294901760, %v14756_v58  ;;  %v14865_v16 = vld [vmem:[#allocation5 + $0x5c0] sm:$0xff] }
 0x33a   : > { %v14814_v20 = vsub.f32 %v14734_v56, %v19103_v52  ;;  %19105 = vst [vmem:[#allocation55_spill] sm:$0xff] %v14819_v2  ;;  %19107 = vst [vmem:[#allocation32_spill] sm:$0xff] %v14823_v27  ;;  %4658 = vmatprep.mubr.f32.mxu1 %v4175_v8  ;;  %244 = vrot.lane.b32.xlu0 %v14790_v19, %s11060_s20  ;;  %v4176_v6 = vsub.f32 %v14772_v21, %v4175_v8  ;;  %v19109_v56 = vand.u32 4294901760, %v14748_v31 }
 0x33b   : > { %v14831_v52 = vsub.f32 %v14746_v41, %v19108_v12  ;;  %19110 = vst [vmem:[#allocation16_spill] sm:$0xff] %v14838_v59  ;;  %19111 = vst [vmem:[#allocation81_spill] sm:$0xff] %v14840_v26  ;;  %v4183_v40 = vand.u32 4294901760, %v4182_v24  ;;  %v14845_v19 = vsub.f32 %v14756_v58, %v19112_v53  ;;  %v19113_v8 = vand.u32 4294901760, %v14758_v45  ;;  %v14876_v53 = vld [vmem:[#allocation5 + $0x540] sm:$0xff]  ;;  %v14878_v58 = vld [vmem:[#allocation5 + $0x548] sm:$0xff] }
 0x33c   : > { %v14836_v15 = vsub.f32 %v14748_v31, %v19109_v56  ;;  %v19114_v41 = vand.u32 4294901760, %v14760_v25  ;;  %10195 = vmatpush3.bf16.msra.mxu1 %v14589_v51  ;;  %v4177_v31 = vand.u32 4294901760, %v4176_v6  ;;  %v19115_v24 = vand.u32 4294901760, %v14769_v62  ;;  %19116 = vst [vmem:[#allocation76_spill] sm:$0xff] %v14865_v16  ;;  %19118 = vst [vmem:[#allocation22_spill] sm:$0xff] %v14876_v53 }
 0x33d   : > { %v14850_v12 = vsub.f32 %v14758_v45, %v19113_v8  ;;  %10197 = vmatprep.subr.bf16.mxu1 %v14603_v1  ;;  %19119 = vst [vmem:[#allocation66_spill] sm:$0xff] %v14878_v58  ;;  %v19121_v2 = vand.u32 4294901760, %v14821_v9  ;;  %v19139_v1 = vpack.c.bf16 %v14090_v63, %v14085_v38 }
 0x33e   : > { %v14855_v56 = vsub.f32 %v14760_v25, %v19114_v41  ;;  %v14861_v7 = vsub.f32 %v14769_v62, %v19115_v24  ;;  %v14870_v25 = vld [vmem:[#allocation5 + $0x5c8] sm:$0xff]  ;;  %4178 = vmatprep.mubr.f32.mxu0 %v4177_v31  ;;  %v19120_v31 = vpack.c.bf16 %v14042_v50, %v14023_v14  ;;  %v19123_v41 = vand.u32 4294901760, %v14823_v27 }
 0x33f   : > { %19117 = vst [vmem:[#allocation45_spill] sm:$0xff] %v14870_v25  ;;  %4184 = vmatmul.mubr.f32.vlgmr.msra.gmra.mrb[24].mxu0 %v4183_v40  ;;  %v14894_v45 = vsub.f32 %v14821_v9, %v19121_v2  ;;  %v19128_v2 = vand.u32 4294901760, %v14840_v26  ;;  %v14924_v9 = vld [vmem:[#allocation5 + $0x550] sm:$0xff] }
 0x340   : > { %v8166_v62 = vpop.f32.mrb[14].mxu0  ;;  %10159 = vmatpush3.bf16.msra.mxu0 %v19120_v31  ;;  %10199 = vmatpush3.bf16.msra.mxu1 %v14615_v5  ;;  %v14899_v40 = vsub.f32 %v14823_v27, %v19123_v41  ;;  %v14918_v27 = vld [vmem:[#allocation5 + $0x5d0] sm:$0xff]  ;;  %19132 = vst [vmem:[#allocation21_spill] sm:$0xff] %v14924_v9 }
 0x341   : > { %v8167_v8 = vpop.f32.mrb[15].mxu0  ;;  %19122 = vst [vmem:[#allocation61_spill] sm:$0xff] %v14894_v45  ;;  %4551 = vmatprep.mubr.f32.mxu0 %v14772_v21  ;;  %v14914_v6 = vsub.f32 %v14840_v26, %v19128_v2  ;;  %19130 = vst [vmem:[#allocation33_spill] sm:$0xff] %v14918_v27  ;;  %v14920_v21 = vld [vmem:[#allocation5 + $0x5d8] sm:$0xff]  ;;  %10201 = vmatprep.subr.bf16.mxu1 %v14622_v42  ;;  %v19134_v26 = vand.u32 4294901760, %v14865_v16 }
 0x342   : > { %v8168_v24 = vadd.f32 %v8167_v8, %v8166_v62  ;;  %19124 = vst [vmem:[#allocation62_spill] sm:$0xff] %v14899_v40  ;;  %v19125_v62 = vpack.c.bf16 %v18960_v13, %v14054_v48  ;;  %v19126_v8 = vand.u32 4294901760, %v14838_v59  ;;  %19131 = vst [vmem:[#allocation47_spill] sm:$0xff] %v14920_v21  ;;  %v15019_v40 = vld [vmem:[#allocation5 + $0x578] sm:$0xff] }
 0x343   : > { %19129 = vst [vmem:[#allocation71_spill] sm:$0xff] %v14914_v6  ;;  %v14933_v41 = vsub.f32 %v14865_v16, %v19134_v26  ;;  %v14971_v6 = vld [vmem:[#allocation5 + $0x5e8] sm:$0xff]  ;;  %19159 = vst [vmem:[#allocation48_spill] sm:$0xff] %v15019_v40 }
 0x344   : > { %10161 = vmatprep.subr.bf16.mxu0 %v19125_v62  ;;  %v14909_v31 = vsub.f32 %v14838_v59, %v19126_v8  ;;  %v2832_v62 = vadd.f32 %v8168_v24, %v14712_v11  ;;  %v14926_v8 = vld [vmem:[#allocation5 + $0x558] sm:$0xff]  ;;  %v19136_v11 = vpack.c.bf16 %v14076_v18, %v14071_v3  ;;  %10203 = vmatpush3.bf16.msra.mxu1 %v14642_v46  ;;  %v19137_v59 = vand.u32 4294901760, %v14870_v25 }
 0x345   : > { %19133 = vst [vmem:[#allocation82_spill] sm:$0xff] %v14926_v8  ;;  %19135 = vst [vmem:[#allocation49_spill] sm:$0xff] %v14933_v41  ;;  %10205 = vmatprep.subr.bf16.mxu1 %v14648_v55  ;;  %v15011_v41 = vld [vmem:[#allocation5 + $0x5f8] sm:$0xff] }
 0x346   : > { %19127 = vst [vmem:[#allocation52_spill] sm:$0xff] %v14909_v31  ;;  %10163 = vmatpush3.bf16.msra.mxu0 %v19136_v11  ;;  %v14942_v24 = vadd.f32 %v14795_v0, %v2832_v62  ;;  %v14947_v2 = vsub.f32 %v14870_v25, %v19137_v59  ;;  %v19140_v11 = vand.u32 4294901760, %v14876_v53  ;;  %v19142_v62 = vand.u32 4294901760, %v14878_v58  ;;  %19145 = vst [vmem:[#allocation57_spill] sm:$0xff] %v14971_v6 }
 0x347   : > { %10165 = vmatprep.subr.bf16.mxu0 %v19139_v1  ;;  %v14969_v1 = vld [vmem:[#allocation5 + $0x5e0] sm:$0xff]  ;;  %v19149_v25 = vand.u32 4294901760, %v14920_v21  ;;  %19157 = vst [vmem:[#allocation19_spill] sm:$0xff] %v15011_v41 }
 0x348   : > { %19138 = vst [vmem:[#allocation51_spill] sm:$0xff] %v14947_v2  ;;  %v14958_v0 = vsub.f32 %v14876_v53, %v19140_v11  ;;  %v14963_v59 = vsub.f32 %v14878_v58, %v19142_v62  ;;  %19144 = vst [vmem:[#allocation37_spill] sm:$0xff] %v14969_v1  ;;  %v19146_v53 = vpack.c.bf16 %v14101_v60, %v14095_v35  ;;  %10207 = vmatpush3.bf16.msra.mxu1 %v14662_v10  ;;  %v14989_v58 = vld [vmem:[#allocation5 + $0x560] sm:$0xff]  ;;  %v14991_v2 = vld [vmem:[#allocation5 + $0x568] sm:$0xff] }
 0x349   : > { %v19147_v62 = vand.u32 4294901760, %v14918_v27  ;;  %v14987_v26 = vsub.f32 %v14920_v21, %v19149_v25  ;;  %19151 = vst [vmem:[#allocation41_spill] sm:$0xff] %v14989_v58  ;;  %19152 = vst [vmem:[#allocation42_spill] sm:$0xff] %v14991_v2  ;;  %v19153_v11 = vpack.c.bf16 %v18975_v43, %v18974_v47  ;;  %10209 = vmatprep.subr.bf16.mxu1 %v14669_v33  ;;  %v17757_v21 = vand.u32 4294901760, %v14969_v1 }
 0x34a   : > { %19141 = vst [vmem:[#allocation64_spill] sm:$0xff] %v14958_v0  ;;  %19143 = vst [vmem:[#allocation58_spill] sm:$0xff] %v14963_v59  ;;  %10167 = vmatpush3.bf16.msra.mxu0 %v19146_v53  ;;  %v19154_v53 = vand.u32 4294901760, %v14924_v9  ;;  %v15009_v0 = vld [vmem:[#allocation5 + $0x5f0] sm:$0xff]  ;;  %v19160_v59 = vpack.c.bf16 %v18982_v49, %v18981_v34  ;;  %v19167_v31 = vand.u32 4294901760, %v14991_v2 }
 0x34b   : > { %v14982_v16 = vsub.f32 %v14918_v27, %v19147_v62  ;;  %19150 = vst [vmem:[#allocation65_spill] sm:$0xff] %v14987_v26  ;;  %10169 = vmatprep.subr.bf16.mxu0 %v19153_v11  ;;  %v19155_v27 = vand.u32 4294901760, %v14926_v8  ;;  %19156 = vst [vmem:[#allocation18_spill] sm:$0xff] %v15009_v0  ;;  %v19161_v11 = vpack.c.bf16 %v18984_v44, %v18983_v17  ;;  %v19173_v26 = vand.u32 4294901760, %v15011_v41 }
 0x34c   : > { %v15000_v62 = vsub.f32 %v14924_v9, %v19154_v53  ;;  %v15017_v9 = vld [vmem:[#allocation5 + $0x570] sm:$0xff]  ;;  %10211 = vmatpush3.bf16.msra.mxu1 %v14676_v22  ;;  %v15053_v45 = vsub.f32 %v14991_v2, %v19167_v31 }
 0x34d   : > { %19148 = vst [vmem:[#allocation60_spill] sm:$0xff] %v14982_v16  ;;  %v15005_v25 = vsub.f32 %v14926_v8, %v19155_v27  ;;  %19158 = vst [vmem:[#allocation43_spill] sm:$0xff] %v15017_v9  ;;  %10213 = vmatprep.subr.bf16.mxu1 %v14683_v36  ;;  %v15036_v27 = vsub.f32 %v14969_v1, %v17757_v21  ;;  %v19163_v8 = vand.u32 4294901760, %v14971_v6  ;;  %v19165_v16 = vand.u32 4294901760, %v14989_v58 }
 0x34e   : > { %10171 = vmatpush3.bf16.msra.mxu0 %v19160_v59  ;;  %19168 = vst [vmem:[#allocation35_spill] sm:$0xff] %v15053_v45  ;;  %v19169_v21 = vpack.c.bf16 %v18989_v4, %v18988_v23 }
 0x34f   : > { %10173 = vmatprep.subr.bf16.mxu0 %v19161_v11  ;;  %19162 = vst [vmem:[#allocation50_spill] sm:$0xff] %v15036_v27  ;;  %v15041_v59 = vsub.f32 %v14971_v6, %v19163_v8  ;;  %v15048_v53 = vsub.f32 %v14989_v58, %v19165_v16  ;;  %v19170_v11 = vpack.c.bf16 %v18992_v61, %v18991_v28  ;;  %v19171_v16 = vand.u32 4294901760, %v15009_v0 }
 0x350   : > { %10215 = vmatpush3.bf16.msra.mxu1 %v14690_v37  ;;  %v19175_v8 = vand.u32 4294901760, %v15017_v9  ;;  %v19187_v37 = vld [vmem:[#allocation46_spill] sm:$0xff] }
 0x351   : > { %19164 = vst [vmem:[#allocation59_spill] sm:$0xff] %v15041_v59  ;;  %19166 = vst [vmem:[#allocation87_spill] sm:$0xff] %v15048_v53  ;;  %10217 = vmatprep.subr.bf16.mxu1 %v14697_v54  ;;  %v15068_v31 = vsub.f32 %v15009_v0, %v19171_v16  ;;  %v19183_v0 = vld [vmem:[#allocation39_spill] sm:$0xff] }
 0x352   : > { %10175 = vmatpush3.bf16.msra.mxu0 %v19169_v21  ;;  %v15073_v21 = vsub.f32 %v15011_v41, %v19173_v26  ;;  %v15080_v58 = vsub.f32 %v15017_v9, %v19175_v8  ;;  %v19179_v26 = vpack.c.bf16 %v14245_v29, %v14240_v57  ;;  %v19180_v41 = vld [vmem:[#allocation25_spill] sm:$0xff]  ;;  %v19181_v8 = vld [vmem:[#allocation67_spill] sm:$0xff]  ;;  %v19189_v29 = vld [vmem:[#allocation92_spill] sm:$0xff] }
 0x353   : > { %10177 = vmatprep.subr.bf16.mxu0 %v19170_v11  ;;  %19172 = vst [vmem:[#allocation40_spill] sm:$0xff] %v15068_v31  ;;  %v19177_v11 = vand.u32 4294901760, %v15019_v40  ;;  %v19182_v9 = vpack.c.bf16 %v19180_v41, %v19181_v8  ;;  %v19186_v54 = vld [vmem:[#allocation63_spill] sm:$0xff]  ;;  %v15115_v31 = vld [vmem:[#allocation5 + $0x588] sm:$0xff] }
 0x354   : > { %19174 = vst [vmem:[#allocation68_spill] sm:$0xff] %v15073_v21  ;;  %19176 = vst [vmem:[#allocation72_spill] sm:$0xff] %v15080_v58  ;;  %10219 = vmatpush3.bf16.msra.mxu1 %v14705_v32  ;;  %v19188_v57 = vpack.c.bf16 %v19186_v54, %v19187_v37  ;;  %v19190_v32 = vld [vmem:[#allocation53_spill] sm:$0xff]  ;;  %v19191_v41 = vld [vmem:[#allocation79_spill] sm:$0xff] }
 0x355   : > { %v15085_v6 = vsub.f32 %v15019_v40, %v19177_v11  ;;  %10253 = vmatprep.subr.bf16.mxu1 %v19183_v0  ;;  %v19184_v40 = vld [vmem:[#allocation85_spill] sm:$0xff]  ;;  %v19194_v0 = vld [vmem:[#allocation36_spill] sm:$0xff]  ;;  %v19198_v37 = vld [vmem:[#allocation91_spill] sm:$0xff] }
 0x356   : > { %10179 = vmatpush3.bf16.msra.mxu0 %v19179_v26  ;;  %v8271_v11 = vpop.f32.mrb[16].mxu1  ;;  %v19185_v1 = vand.u32 4294901760, %v19184_v40  ;;  %v15105_v26 = vld [vmem:[#allocation5 + $0x580] sm:$0xff] }
 0x357   : > { %19178 = vst [vmem:[#allocation11_spill] sm:$0xff] %v15085_v6  ;;  %10181 = vmatprep.subr.bf16.mxu0 %v19182_v9  ;;  %v8272_v16 = vpop.f32.mrb[17].mxu1  ;;  %v19192_v9 = vld [vmem:[#allocation70_spill] sm:$0xff]  ;;  %v19195_v6 = vand.u32 4294901760, %v19194_v0  ;;  %v19196_v58 = vld [vmem:[#allocation73_spill] sm:$0xff]  ;;  %v4988_v54 = vand.u32 4294901760, %v15105_v26 }
 0x358   : > { %4662 = vmatmul.mubr.f32.vlgmr.msra.gmra.mrb[26].mxu1 %v19185_v1  ;;  %v8273_v2 = vadd.f32 %v8272_v16, %v8271_v11  ;;  %v19193_v8 = vpack.c.bf16 %v19191_v41, %v19192_v9  ;;  %v19197_v1 = vand.u32 4294901760, %v19196_v58  ;;  %v19202_v11 = vand.u32 4294901760, %v14023_v14 }
 0x359   : > { %10255 = vmatpush3.bf16.msra.mxu1 %v19189_v29  ;;  %4932 = vmatprep.mubr.f32.mxu1 %v19190_v32  ;;  %v19200_v29 = vld [vmem:[#allocation54_spill] sm:$0xff]  ;;  %v19203_v41 = vand.u32 4294901760, %v14042_v50  ;;  %v4991_v58 = vand.u32 4294901760, %v15115_v31  ;;  %v19206_v0 = vand.u32 4294901760, %v18960_v13  ;;  %v15137_v14 = vsub.f32 %v15105_v26, %v4988_v54 }
 0x35a   : > { %10183 = vmatpush3.bf16.msra.mxu0 %v19188_v57  ;;  %v10220_v21 = vpack.c.bf16 %v19197_v1, %v19195_v6  ;;  %10257 = vmatprep.subr.bf16.mxu1 %v19198_v37  ;;  %v19199_v57 = vld [vmem:[#allocation29_spill] sm:$0xff]  ;;  %v19204_v6 = vld [vmem:[#allocation83_spill] sm:$0xff] }
 0x35b   : > { %10185 = vmatprep.subr.bf16.mxu0 %v19193_v8  ;;  %v19201_v16 = vpack.c.bf16 %v19199_v57, %v19200_v29  ;;  %v10222_v9 = vpack.c.bf16 %v19203_v41, %v19202_v11  ;;  %v19205_v8 = vand.u32 4294901760, %v14054_v48  ;;  %19207 = vst [vmem:[#allocation25_spill] sm:$0xff] %v15137_v14  ;;  %v19209_v48 = vand.u32 4294901760, %v14076_v18 }
 0x35c   : > { %v15147_v13 = vsub.f32 %v15115_v31, %v4991_v58  ;;  %v19212_v29 = vand.u32 4294901760, %v14090_v63  ;;  %v19213_v18 = vand.u32 4294901760, %v14095_v35  ;;  %v19214_v11 = vand.u32 4294901760, %v14101_v60 }
 0x35d   : > { %10259 = vmatpush3.bf16.msra.mxu1 %v14589_v51  ;;  %v10224_v1 = vpack.c.bf16 %v19206_v0, %v19205_v8  ;;  %v19208_v51 = vand.u32 4294901760, %v14071_v3  ;;  %v17786_v3 = vand.u32 4294901760, %v15137_v14  ;;  %v19215_v63 = vand.u32 4294901760, %v18974_v47 }
 0x35e   : > { %10187 = vmatpush3.bf16.msra.mxu0 %v19201_v16  ;;  %10261 = vmatprep.subr.bf16.mxu1 %v19204_v6  ;;  %19210 = vst [vmem:[#allocation67_spill] sm:$0xff] %v15147_v13  ;;  %v10230_v41 = vpack.c.bf16 %v19214_v11, %v19213_v18  ;;  %v17783_v6 = vand.u32 4294901760, %v14802_v30  ;;  %v17782_v60 = vand.u32 4294901760, %v14814_v20  ;;  %v19219_v47 = vand.u32 4294901760, %v18983_v17 }
 0x35f   : > { %10221 = vmatprep.subr.bf16.mxu0 %v10220_v21  ;;  %v10226_v21 = vpack.c.bf16 %v19209_v48, %v19208_v51  ;;  %v5167_v35 = vsub.f32 %v15137_v14, %v17786_v3  ;;  %v17799_v51 = vand.u32 4294901760, %v15005_v25  ;;  %v19222_v48 = vand.u32 4294901760, %v18988_v23 }
 0x360   : > { %v8236_v37 = vpop.f32.mrb[16].mxu0 }
 0x361   : > { %v8237_v57 = vpop.f32.mrb[17].mxu0  ;;  %4554 = vmatmul.mubr.f32.vlgmr.msra.gmra.mrb[26].mxu0 %v19184_v40  ;;  %10263 = vmatpush3.bf16.msra.mxu1 %v14615_v5  ;;  %v19211_v40 = vand.u32 4294901760, %v14085_v38  ;;  %v17785_v5 = vand.u32 4294901760, %v15147_v13 }
 0x362   : > { %v8238_v50 = vadd.f32 %v8237_v57, %v8236_v37  ;;  %10223 = vmatpush3.bf16.msra.mxu0 %v10222_v9  ;;  %4828 = vmatprep.mubr.f32.mxu0 %v19190_v32  ;;  %v17784_v9 = vand.u32 4294901760, %v14783_v39  ;;  %v17779_v37 = vand.u32 4294901760, %v14836_v15  ;;  %v5181_v57 = vsub.f32 %v14814_v20, %v17782_v60  ;;  %v19236_v60 = vld [vmem:[#allocation62_spill] sm:$0xff] }
 0x363   : > { %10225 = vmatprep.subr.bf16.mxu0 %v10224_v1  ;;  %v10228_v16 = vpack.c.bf16 %v19212_v29, %v19211_v40  ;;  %10265 = vmatprep.subr.bf16.mxu1 %v14622_v42  ;;  %v19216_v42 = vand.u32 4294901760, %v18975_v43  ;;  %v19220_v43 = vand.u32 4294901760, %v18984_v44  ;;  %v17780_v44 = vand.u32 4294901760, %v14831_v52 }
 0x364   : > { %v3108_v32 = vadd.f32 %v8238_v50, %v14942_v24  ;;  %v5055_v1 = vsub.f32 %v14783_v39, %v17784_v9  ;;  %v17777_v50 = vand.u32 4294901760, %v14845_v19  ;;  %v19224_v29 = vand.u32 4294901760, %v18991_v28 }
 0x365   : > { %10267 = vmatpush3.bf16.msra.mxu1 %v14642_v46  ;;  %v10232_v24 = vpack.c.bf16 %v19216_v42, %v19215_v63  ;;  %v19218_v46 = vand.u32 4294901760, %v18982_v49  ;;  %v10236_v0 = vpack.c.bf16 %v19220_v43, %v19219_v47  ;;  %v5062_v49 = vsub.f32 %v14802_v30, %v17783_v6 }
 0x366   : > { %10227 = vmatpush3.bf16.msra.mxu0 %v10226_v21  ;;  %v15163_v38 = vadd.f32 %v8273_v2, %v3108_v32  ;;  %10269 = vmatprep.subr.bf16.mxu1 %v14648_v55  ;;  %v19217_v2 = vand.u32 4294901760, %v18981_v34  ;;  %v5174_v55 = vsub.f32 %v15147_v13, %v17785_v5  ;;  %v19221_v34 = vld [vmem:[#allocation55_spill] sm:$0xff]  ;;  %v19223_v21 = vand.u32 4294901760, %v18989_v4 }
 0x367   : > { %10229 = vmatprep.subr.bf16.mxu0 %v10228_v16  ;;  %v17781_v17 = vand.u32 4294901760, %v19221_v34  ;;  %v19225_v16 = vand.u32 4294901760, %v18992_v61  ;;  %v5168_v32 = vand.u32 4294901760, %v5167_v35  ;;  %v5056_v11 = vand.u32 4294901760, %v5055_v1  ;;  %v19229_v1 = vld [vmem:[#allocation68_spill] sm:$0xff] }
 0x368   : > { %v10234_v8 = vpack.c.bf16 %v19218_v46, %v19217_v2  ;;  %v10238_v40 = vpack.c.bf16 %v19223_v21, %v19222_v48  ;;  %v5175_v18 = vand.u32 4294901760, %v5174_v55  ;;  %v5063_v4 = vand.u32 4294901760, %v5062_v49  ;;  %v19231_v21 = vld [vmem:[#allocation72_spill] sm:$0xff] }
 0x369   : > { %10271 = vmatpush3.bf16.msra.mxu1 %v14662_v10  ;;  %v17800_v10 = vand.u32 4294901760, %v15000_v62  ;;  %v5188_v23 = vsub.f32 %v19221_v34, %v17781_v17  ;;  %v17798_v28 = vand.u32 4294901760, %v15036_v27  ;;  %v17792_v61 = vand.u32 4294901760, %v15041_v59 }
 0x36a   : > { %10231 = vmatpush3.bf16.msra.mxu0 %v10230_v41  ;;  %10273 = vmatprep.subr.bf16.mxu1 %v14669_v33  ;;  %v10240_v33 = vpack.c.bf16 %v19225_v16, %v19224_v29  ;;  %v17778_v41 = vand.u32 4294901760, %v14850_v12  ;;  %v5182_v42 = vand.u32 4294901760, %v5181_v57  ;;  %v5195_v35 = vsub.f32 %v14845_v19, %v17777_v50  ;;  %v19230_v57 = vld [vmem:[#allocation12_spill] sm:$0xff]  ;;  %v19232_v16 = vld [vmem:[#allocation11_spill] sm:$0xff] }
 0x36b   : > { %10233 = vmatprep.subr.bf16.mxu0 %v10232_v24  ;;  %v15217_v63 = vpack.c.bf16 %v17799_v51, %v17800_v10  ;;  %v5069_v24 = vsub.f32 %v14831_v52, %v17780_v44  ;;  %v17788_v2 = vand.u32 4294901760, %v14855_v56  ;;  %v17791_v46 = vand.u32 4294901760, %v15048_v53  ;;  %v19235_v44 = vld [vmem:[#allocation61_spill] sm:$0xff] }
 0x36c   : > { %v5202_v47 = vsub.f32 %v14850_v12, %v17778_v41  ;;  %v17793_v43 = vand.u32 4294901760, %v14861_v7  ;;  %v17787_v49 = vand.u32 4294901760, %v19229_v1  ;;  %v5189_v48 = vand.u32 4294901760, %v5188_v23  ;;  %v19234_v41 = vld [vmem:[#allocation14_spill] sm:$0xff]  ;;  %v19251_v10 = vld [vmem:[#allocation89_spill] sm:$0xff] }
 0x36d   : > { %19226 = vst [vmem:[#allocation39_spill] sm:$0xff] %v15217_v63  ;;  %10275 = vmatpush3.bf16.msra.mxu1 %v14676_v22  ;;  %v5076_v22 = vsub.f32 %v14836_v15, %v17779_v37  ;;  %v17796_v29 = vand.u32 4294901760, %v19231_v21  ;;  %v17794_v50 = vand.u32 4294901760, %v19232_v16  ;;  %v10316_v37 = vpack.c.bf16 %v5175_v18, %v5168_v32  ;;  %v19239_v18 = vld [vmem:[#allocation69_spill] sm:$0xff] }
 0x36e   : > { %10235 = vmatpush3.bf16.msra.mxu0 %v10234_v8  ;;  %10277 = vmatprep.subr.bf16.mxu1 %v14683_v36  ;;  %v17790_v8 = vand.u32 4294901760, %v15053_v45  ;;  %v15242_v36 = vpack.c.bf16 %v17792_v61, %v17798_v28  ;;  %v17795_v17 = vand.u32 4294901760, %v19235_v44  ;;  %v17797_v6 = vand.u32 4294901760, %v19236_v60  ;;  %v19250_v28 = vld [vmem:[#allocation58_spill] sm:$0xff] }
 0x36f   : > { %10237 = vmatprep.subr.bf16.mxu0 %v10236_v0  ;;  %v19228_v0 = vld [vmem:[#allocation40_spill] sm:$0xff]  ;;  %v5070_v23 = vand.u32 4294901760, %v5069_v24  ;;  %v5083_v9 = vsub.f32 %v14855_v56, %v17788_v2  ;;  %v15275_v32 = vpack.c.bf16 %v17794_v50, %v17796_v29  ;;  %v5203_v5 = vand.u32 4294901760, %v5202_v47  ;;  %v19240_v24 = vld [vmem:[#allocation94_spill] sm:$0xff] }
 0x370   : > { %19227 = vst [vmem:[#allocation85_spill] sm:$0xff] %v15242_v36  ;;  %v17789_v55 = vand.u32 4294901760, %v19228_v0  ;;  %v5090_v3 = vsub.f32 %v14861_v7, %v17793_v43  ;;  %v10320_v2 = vpack.c.bf16 %v5189_v48, %v5182_v42  ;;  %v5216_v47 = vsub.f32 %v19236_v60, %v17797_v6  ;;  %v19248_v42 = vld [vmem:[#allocation90_spill] sm:$0xff]  ;;  %v19249_v29 = vld [vmem:[#allocation64_spill] sm:$0xff] }
 0x371   : > { %10279 = vmatpush3.bf16.msra.mxu1 %v19230_v57  ;;  %v5077_v57 = vand.u32 4294901760, %v5076_v22  ;;  %19238 = vst [vmem:[#allocation92_spill] sm:$0xff] %v15275_v32  ;;  %v19241_v22 = vld [vmem:[#allocation78_spill] sm:$0xff]  ;;  %v19303_v63 = vand.u32 4294901760, %v19231_v21 }
 0x372   : > { %10239 = vmatpush3.bf16.msra.mxu0 %v10238_v40  ;;  %v15257_v40 = vpack.c.bf16 %v17790_v8, %v17791_v46  ;;  %10281 = vmatprep.subr.bf16.mxu1 %v19234_v41  ;;  %v5196_v41 = vand.u32 4294901760, %v5195_v35  ;;  %v19243_v46 = vld [vmem:[#allocation71_spill] sm:$0xff]  ;;  %v5209_v35 = vsub.f32 %v19235_v44, %v17795_v17  ;;  %v5091_v17 = vand.u32 4294901760, %v5090_v3 }
 0x373   : > { %10241 = vmatprep.subr.bf16.mxu0 %v10240_v33  ;;  %v15266_v33 = vpack.c.bf16 %v17787_v49, %v17789_v55  ;;  %v10318_v49 = vpack.c.bf16 %v5063_v4, %v5056_v11  ;;  %v19242_v55 = vld [vmem:[#allocation52_spill] sm:$0xff]  ;;  %v17802_v61 = vand.u32 4294901760, %v19243_v46  ;;  %v15297_v11 = vpack.c.bf16 %v4991_v58, %v4988_v54  ;;  %v19247_v4 = vld [vmem:[#allocation77_spill] sm:$0xff]  ;;  %v19259_v58 = vld [vmem:[#allocation86_spill] sm:$0xff] }
 0x374   : > { %19233 = vst [vmem:[#allocation63_spill] sm:$0xff] %v15257_v40  ;;  %v17801_v8 = vand.u32 4294901760, %v19242_v55  ;;  %v10324_v48 = vpack.c.bf16 %v5203_v5, %v5196_v41  ;;  %v19252_v54 = vld [vmem:[#allocation60_spill] sm:$0xff]  ;;  %v5210_v3 = vand.u32 4294901760, %v5209_v35  ;;  %v19283_v40 = vld [vmem:[#allocation34_spill] sm:$0xff] }
 0x375   : > { %19237 = vst [vmem:[#allocation46_spill] sm:$0xff] %v15266_v33  ;;  %10283 = vmatpush3.bf16.msra.mxu1 %v19240_v24  ;;  %v19245_v24 = vld [vmem:[#allocation51_spill] sm:$0xff]  ;;  %19246 = vst [vmem:[#allocation53_spill] sm:$0xff] %v15297_v11  ;;  %v5104_v26 = vsub.f32 %v19243_v46, %v17802_v61  ;;  %v19274_v33 = vand.u32 4294901760, %v15000_v62 }
 0x376   : > { %10243 = vmatpush3.bf16.msra.mxu0 %v19239_v18  ;;  %10317 = vmatprep.subr.bf16.mxu1 %v10316_v37  ;;  %v19244_v18 = vld [vmem:[#allocation49_spill] sm:$0xff]  ;;  %v17804_v50 = vand.u32 4294901760, %v19245_v24  ;;  %v5084_v37 = vand.u32 4294901760, %v5083_v9  ;;  %v5097_v31 = vsub.f32 %v19242_v55, %v17801_v8 }
 0x377   : > { %10245 = vmatprep.subr.bf16.mxu0 %v19241_v22  ;;  %v17803_v43 = vand.u32 4294901760, %v19244_v18  ;;  %v10322_v22 = vpack.c.bf16 %v5077_v57, %v5070_v23  ;;  %v19253_v9 = vld [vmem:[#allocation65_spill] sm:$0xff]  ;;  %v5217_v23 = vand.u32 4294901760, %v5216_v47  ;;  %v19254_v57 = vld [vmem:[#allocation20_spill] sm:$0xff]  ;;  %v19262_v47 = vld [vmem:[#allocation75_spill] sm:$0xff] }
 0x378   : > { %4934 = vmatmul.mubr.f32.vlgmr.msra.gmra.mrb[28].mxu1 %v19247_v4  ;;  %v19255_v41 = vand.u32 4294901760, %v19254_v57  ;;  %v10326_v5 = vpack.c.bf16 %v5091_v17, %v5084_v37  ;;  %v19263_v51 = vand.u32 4294901760, %v19262_v47  ;;  %v19267_v17 = vand.u32 4294901760, %v19252_v54 }
 0x379   : > { %10319 = vmatpush3.bf16.msra.mxu1 %v10318_v49  ;;  %v5230_v49 = vsub.f32 %v19245_v24, %v17804_v50  ;;  %v19266_v50 = vand.u32 4294901760, %v19250_v28 }
 0x37a   : > { %10247 = vmatpush3.bf16.msra.mxu0 %v19248_v42  ;;  %10321 = vmatprep.subr.bf16.mxu1 %v10320_v2  ;;  %v19256_v42 = vld [vmem:[#allocation38_spill] sm:$0xff]  ;;  %v19260_v2 = vld [vmem:[#allocation80_spill] sm:$0xff]  ;;  %v5237_v37 = vsub.f32 %v19252_v54, %v19267_v17 }
 0x37b   : > { %10249 = vmatprep.subr.bf16.mxu0 %v19251_v10  ;;  %v5223_v10 = vsub.f32 %v19244_v18, %v17803_v43  ;;  %v19257_v8 = vand.u32 4294901760, %v19256_v42  ;;  %v19261_v35 = vand.u32 4294901760, %v19260_v2  ;;  %v19265_v43 = vand.u32 4294901760, %v19249_v29 }
 0x37c   : > { %v5118_v57 = vsub.f32 %v19250_v28, %v19266_v50  ;;  %v10328_v42 = vpack.c.bf16 %v5217_v23, %v5210_v3  ;;  %v5231_v2 = vand.u32 4294901760, %v5230_v49  ;;  %v19269_v50 = vld [vmem:[#allocation88_spill] sm:$0xff]  ;;  %v19276_v23 = vld [vmem:[#allocation13_spill] sm:$0xff]  ;;  %v19278_v49 = vld [vmem:[#allocation74_spill] sm:$0xff] }
 0x37d   : > { %v15322_v61 = vpack.c.bf16 %v19257_v8, %v19255_v41  ;;  %v15329_v6 = vpack.c.bf16 %v19263_v51, %v19261_v35  ;;  %v5111_v32 = vsub.f32 %v19249_v29, %v19265_v43  ;;  %10323 = vmatpush3.bf16.msra.mxu1 %v10322_v22  ;;  %v5098_v8 = vand.u32 4294901760, %v5097_v31  ;;  %v19271_v35 = vld [vmem:[#allocation24_spill] sm:$0xff] }
 0x37e   : > { %10251 = vmatpush3.bf16.msra.mxu0 %v19259_v58  ;;  %v5105_v58 = vand.u32 4294901760, %v5104_v26  ;;  %v19268_v51 = vand.u32 4294901760, %v19253_v9  ;;  %10325 = vmatprep.subr.bf16.mxu1 %v10324_v48  ;;  %v5224_v43 = vand.u32 4294901760, %v5223_v10  ;;  %v19270_v22 = vand.u32 4294901760, %v19269_v50 }
 0x37f   : > { %19258 = vst [vmem:[#allocation79_spill] sm:$0xff] %v15322_v61  ;;  %19264 = vst [vmem:[#allocation70_spill] sm:$0xff] %v15329_v6  ;;  %10285 = vmatprep.subr.bf16.mxu0 %v15297_v11  ;;  %v19272_v47 = vand.u32 4294901760, %v19271_v35  ;;  %v5112_v26 = vand.u32 4294901760, %v5111_v32  ;;  %v5119_v17 = vand.u32 4294901760, %v5118_v57  ;;  %v19275_v48 = vand.u32 4294901760, %v15005_v25 }
 0x380   : > { %v5244_v41 = vsub.f32 %v19253_v9, %v19268_v51  ;;  %v5125_v51 = vsub.f32 %v15000_v62, %v19274_v33  ;;  %v19277_v10 = vand.u32 4294901760, %v19276_v23  ;;  %v19279_v50 = vand.u32 4294901760, %v19278_v49 }
 0x381   : > { %4830 = vmatmul.mubr.f32.vlgmr.msra.gmra.mrb[28].mxu0 %v19247_v4  ;;  %v15349_v31 = vpack.c.bf16 %v19272_v47, %v19270_v22  ;;  %v5132_v3 = vsub.f32 %v15005_v25, %v19275_v48  ;;  %10327 = vmatpush3.bf16.msra.mxu1 %v10326_v5  ;;  %v10330_v4 = vpack.c.bf16 %v5105_v58, %v5098_v8  ;;  %v5238_v32 = vand.u32 4294901760, %v5237_v37  ;;  %v19285_v58 = vld [vmem:[#allocation15_spill] sm:$0xff] }
 0x382   : > { %10287 = vmatpush3.bf16.msra.mxu0 %v15322_v61  ;;  %v15363_v22 = vpack.c.bf16 %v19279_v50, %v19277_v10  ;;  %v5245_v57 = vand.u32 4294901760, %v5244_v41  ;;  %10329 = vmatprep.subr.bf16.mxu1 %v10328_v42  ;;  %v10332_v35 = vpack.c.bf16 %v5231_v2, %v5224_v43  ;;  %v19281_v33 = vand.u32 4294901760, %v15036_v27  ;;  %v19287_v41 = vld [vmem:[#allocation56_spill] sm:$0xff] }
 0x383   : > { %19273 = vst [vmem:[#allocation36_spill] sm:$0xff] %v15349_v31  ;;  %10289 = vmatprep.subr.bf16.mxu0 %v15329_v6  ;;  %v19282_v48 = vand.u32 4294901760, %v15041_v59  ;;  %v19284_v8 = vand.u32 4294901760, %v19283_v40  ;;  %v19286_v23 = vand.u32 4294901760, %v19285_v58  ;;  %v10334_v37 = vpack.c.bf16 %v5119_v17, %v5112_v26  ;;  %v19289_v43 = vld [vmem:[#allocation32_spill] sm:$0xff] }
 0x384   : > { %19280 = vst [vmem:[#allocation73_spill] sm:$0xff] %v15363_v22  ;;  %v5251_v47 = vsub.f32 %v15036_v27, %v19281_v33  ;;  %v19288_v42 = vand.u32 4294901760, %v19287_v41  ;;  %v19290_v2 = vand.u32 4294901760, %v19289_v43  ;;  %v5126_v49 = vand.u32 4294901760, %v5125_v51  ;;  %v19297_v41 = vld [vmem:[#allocation81_spill] sm:$0xff] }
 0x385   : > { %v5258_v5 = vsub.f32 %v15041_v59, %v19282_v48  ;;  %v15375_v36 = vpack.c.bf16 %v19286_v23, %v19284_v8  ;;  %v5133_v50 = vand.u32 4294901760, %v5132_v3  ;;  %10331 = vmatpush3.bf16.msra.mxu1 %v10330_v4  ;;  %v10336_v33 = vpack.c.bf16 %v5245_v57, %v5238_v32  ;;  %v19295_v32 = vld [vmem:[#allocation16_spill] sm:$0xff]  ;;  %v15610_v59 = vld [vmem:[#allocation5 + $0x6c0] sm:$0xff] }
 0x386   : > { %10291 = vmatpush3.bf16.msra.mxu0 %v15349_v31  ;;  %v15382_v10 = vpack.c.bf16 %v19290_v2, %v19288_v42  ;;  %v19291_v40 = vand.u32 4294901760, %v15048_v53  ;;  %v19292_v8 = vand.u32 4294901760, %v15053_v45  ;;  %10333 = vmatprep.subr.bf16.mxu1 %v10332_v35  ;;  %v5252_v17 = vand.u32 4294901760, %v5251_v47  ;;  %v19299_v35 = vld [vmem:[#allocation76_spill] sm:$0xff]  ;;  %19373 = vst [vmem:[#allocation38_spill] sm:$0xff] %v15610_v59 }
 0x387   : > { %10293 = vmatprep.subr.bf16.mxu0 %v15363_v22  ;;  %v5259_v58 = vand.u32 4294901760, %v5258_v5  ;;  %v19293_v23 = vand.u32 4294901760, %v19228_v0  ;;  %v19294_v3 = vand.u32 4294901760, %v19229_v1  ;;  %v19296_v57 = vand.u32 4294901760, %v19295_v32  ;;  %v19301_v5 = vld [vmem:[#allocation45_spill] sm:$0xff] }
 0x388   : > { %v5139_v48 = vsub.f32 %v15048_v53, %v19291_v40  ;;  %v5146_v26 = vsub.f32 %v15053_v45, %v19292_v8  ;;  %v19298_v42 = vand.u32 4294901760, %v19297_v41  ;;  %v10338_v2 = vpack.c.bf16 %v5133_v50, %v5126_v49  ;;  %v15536_v53 = vld [vmem:[#allocation5 + $0x628] sm:$0xff] }
 0x389   : > { %v5265_v51 = vsub.f32 %v19228_v0, %v19293_v23  ;;  %v5272_v4 = vsub.f32 %v19229_v1, %v19294_v3  ;;  %v19300_v47 = vand.u32 4294901760, %v19299_v35  ;;  %v19302_v40 = vand.u32 4294901760, %v19301_v5  ;;  %10335 = vmatpush3.bf16.msra.mxu1 %v10334_v37  ;;  %v19305_v35 = vld [vmem:[#allocation22_spill] sm:$0xff]  ;;  %v15512_v1 = vld [vmem:[#allocation5 + $0x618] sm:$0xff]  ;;  %19359 = vst [vmem:[#allocation64_spill] sm:$0xff] %v15536_v53 }
 0x38a   : > { %10295 = vmatpush3.bf16.msra.mxu0 %v15375_v36  ;;  %v15402_v43 = vpack.c.bf16 %v19298_v42, %v19296_v57  ;;  %v5140_v23 = vand.u32 4294901760, %v5139_v48  ;;  %v5147_v3 = vand.u32 4294901760, %v5146_v26  ;;  %v5153_v32 = vsub.f32 %v19231_v21, %v19303_v63  ;;  %10337 = vmatprep.subr.bf16.mxu1 %v10336_v33  ;;  %v19309_v26 = vld [vmem:[#allocation33_spill] sm:$0xff]  ;;  %v19311_v21 = vld [vmem:[#allocation47_spill] sm:$0xff]  ;;  %19354 = vst [vmem:[#allocation71_spill] sm:$0xff] %v15512_v1 }
 0x38b   : > { %v15408_v8 = vpack.c.bf16 %v19302_v40, %v19300_v47  ;;  %10297 = vmatprep.subr.bf16.mxu0 %v15382_v10  ;;  %v19304_v41 = vand.u32 4294901760, %v19232_v16  ;;  %v10340_v49 = vpack.c.bf16 %v5259_v58, %v5252_v17  ;;  %v5266_v50 = vand.u32 4294901760, %v5265_v51  ;;  %v19307_v47 = vld [vmem:[#allocation66_spill] sm:$0xff] }
 0x38c   : > { %v5273_v42 = vand.u32 4294901760, %v5272_v4  ;;  %v19306_v37 = vand.u32 4294901760, %v19305_v35  ;;  %v19308_v5 = vand.u32 4294901760, %v19307_v47  ;;  %v10342_v63 = vpack.c.bf16 %v5147_v3, %v5140_v23  ;;  %v19313_v35 = vld [vmem:[#allocation21_spill] sm:$0xff]  ;;  %v19315_v47 = vld [vmem:[#allocation82_spill] sm:$0xff] }
 0x38d   : > { %v5160_v57 = vsub.f32 %v19232_v16, %v19304_v41  ;;  %10339 = vmatpush3.bf16.msra.mxu1 %v10338_v2  ;;  %v19310_v40 = vand.u32 4294901760, %v19309_v26  ;;  %v19312_v41 = vand.u32 4294901760, %v19311_v21  ;;  %v5154_v17 = vand.u32 4294901760, %v5153_v32  ;;  %v19317_v3 = vld [vmem:[#allocation37_spill] sm:$0xff] }
 0x38e   : > { %10299 = vmatpush3.bf16.msra.mxu0 %v15402_v43  ;;  %v15422_v48 = vpack.c.bf16 %v19308_v5, %v19306_v37  ;;  %10341 = vmatprep.subr.bf16.mxu1 %v10340_v49  ;;  %v10344_v51 = vpack.c.bf16 %v5273_v42, %v5266_v50  ;;  %v19314_v37 = vand.u32 4294901760, %v19313_v35  ;;  %v19316_v2 = vand.u32 4294901760, %v19315_v47  ;;  %v19319_v32 = vld [vmem:[#allocation57_spill] sm:$0xff] }
 0x38f   : > { %10301 = vmatprep.subr.bf16.mxu0 %v15408_v8  ;;  %v15429_v33 = vpack.c.bf16 %v19312_v41, %v19310_v40  ;;  %v5161_v58 = vand.u32 4294901760, %v5160_v57  ;;  %v19318_v26 = vand.u32 4294901760, %v19317_v3  ;;  %v19320_v57 = vand.u32 4294901760, %v19319_v32  ;;  %v19321_v42 = vld [vmem:[#allocation41_spill] sm:$0xff]  ;;  %v19323_v41 = vld [vmem:[#allocation42_spill] sm:$0xff]  ;;  %v19333_v3 = vld [vmem:[#allocation48_spill] sm:$0xff] }
 0x390   : > { %v8341_v4 = vpop.f32.mrb[18].mxu1  ;;  %v15436_v5 = vpack.c.bf16 %v19316_v2, %v19314_v37  ;;  %v19322_v40 = vand.u32 4294901760, %v19321_v42  ;;  %v19324_v35 = vand.u32 4294901760, %v19323_v41  ;;  %v15487_v16 = vld [vmem:[#allocation5 + $0x600] sm:$0xff] }
 0x391   : > { %v8342_v23 = vpop.f32.mrb[19].mxu1  ;;  %10343 = vmatpush3.bf16.msra.mxu1 %v10342_v63  ;;  %v10346_v21 = vpack.c.bf16 %v5161_v58, %v5154_v17  ;;  %v15443_v49 = vpack.c.bf16 %v19320_v57, %v19318_v26  ;;  %v19326_v63 = vld [vmem:[#allocation18_spill] sm:$0xff]  ;;  %v19328_v58 = vld [vmem:[#allocation19_spill] sm:$0xff]  ;;  %v19334_v26 = vand.u32 4294901760, %v19333_v3  ;;  %v10348_v57 = vpack.c.bf16 %v15147_v13, %v15137_v14  ;;  %19342 = vst [vmem:[#allocation55_spill] sm:$0xff] %v15487_v16  ;;  %v19352_v14 = vld [vmem:[#allocation84_spill] sm:$0xff] }
 0x392   : > { %10303 = vmatpush3.bf16.msra.mxu0 %v15422_v48  ;;  %v8343_v50 = vadd.f32 %v8342_v23, %v8341_v4  ;;  %10345 = vmatprep.subr.bf16.mxu1 %v10344_v51  ;;  %v15450_v37 = vpack.c.bf16 %v19324_v35, %v19322_v40  ;;  %v19327_v17 = vand.u32 4294901760, %v19326_v63  ;;  %v19329_v47 = vand.u32 4294901760, %v19328_v58  ;;  %v19331_v4 = vld [vmem:[#allocation43_spill] sm:$0xff]  ;;  %v19340_v3 = vld [vmem:[#allocation26_spill] sm:$0xff] }
 0x393   : > { %10305 = vmatprep.subr.bf16.mxu0 %v15429_v33  ;;  %v19332_v23 = vand.u32 4294901760, %v19331_v4  ;;  %v15489_v13 = vld [vmem:[#allocation5 + $0x608] sm:$0xff] }
 0x394   : > { %19325 = vst [vmem:[#allocation91_spill] sm:$0xff] %v15450_v37  ;;  %v15457_v2 = vpack.c.bf16 %v19329_v47, %v19327_v17  ;;  %v19337_v17 = vld [vmem:[#allocation93_spill] sm:$0xff]  ;;  %19343 = vst [vmem:[#allocation12_spill] sm:$0xff] %v15489_v13  ;;  %v15523_v58 = vld [vmem:[#allocation5 + $0x6a8] sm:$0xff] }
 0x395   : > { %10347 = vmatpush3.bf16.msra.mxu1 %v10346_v21  ;;  %v15465_v32 = vpack.c.bf16 %v19334_v26, %v19332_v23  ;;  %v19339_v23 = vld [vmem:[#allocation44_spill] sm:$0xff]  ;;  %19357 = vst [vmem:[#allocation77_spill] sm:$0xff] %v15523_v58 }
 0x396   : > { %10307 = vmatpush3.bf16.msra.mxu0 %v15436_v5  ;;  %19330 = vst [vmem:[#allocation29_spill] sm:$0xff] %v15457_v2  ;;  %10381 = vmatprep.subr.bf16.mxu1 %v15297_v11 }
 0x397   : > { %10309 = vmatprep.subr.bf16.mxu0 %v15443_v49  ;;  %19335 = vst [vmem:[#allocation54_spill] sm:$0xff] %v15465_v32 }
 0x398   : > { %v8306_v51 = vpop.f32.mrb[18].mxu0 }
 0x399   : > { %v8307_v21 = vpop.f32.mrb[19].mxu0 }
 0x39a   : > { %10311 = vmatpush3.bf16.msra.mxu0 %v15450_v37  ;;  %v8308_v42 = vadd.f32 %v8307_v21, %v8306_v51 }
 0x39b   : > { %10313 = vmatprep.subr.bf16.mxu0 %v15457_v2 }
 0x39c   : > { %v3324_v40 = vadd.f32 %v8308_v42, %v15163_v38  ;;  %v19341_v42 = vld [vmem:[#allocation17_spill] sm:$0xff] }
 0x39e   : > { %10315 = vmatpush3.bf16.msra.mxu0 %v15465_v32  ;;  %v15472_v41 = vadd.f32 %v8343_v50, %v3324_v40 }
 0x39f   : > { %10349 = vmatprep.subr.bf16.mxu0 %v10348_v57 }
 0x3a7   : > { %v306_v35 = vpop.permute.xlu1 %305 }
 0x3a8   : > { %v15474_v63 = vpop.permute.xlu0 %307  ;;  %v323_v47 = vsel %vm317_vm1, %v19337_v17, %v306_v35 }
 0x3a9   : > { %19336 = vst [vmem:[#allocation83_spill] sm:$0xff] %v15474_v63  ;;  %v322_v4 = vsel %vm317_vm1, %v306_v35, %v15474_v63  ;;  %v344_v51 = vmax.f32 %v19339_v23, %v323_v47  ;;  %v19345_v47 = vld [vmem:[#allocation31_spill] sm:$0xff] }
 0x3aa   : > { %v345_v38 = vmax.f32 %v19340_v3, %v322_v4  ;;  %v15498_v4 = vld [vmem:[#allocation5 + $0x690] sm:$0xff] }
 0x3ab   : > { %v360_v26 = vmax.f32 %v344_v51, 0.0  ;;  %v243_v21 = vpop.permute.xlu1 %242  ;;  %19347 = vst [vmem:[#allocation62_spill] sm:$0xff] %v15498_v4  ;;  %v15500_v51 = vld [vmem:[#allocation5 + $0x698] sm:$0xff]  ;;  %v15502_v3 = vld [vmem:[#allocation5 + $0x610] sm:$0xff] }
 0x3ac   : > { %v361_v57 = vmax.f32 %v345_v38, 0.0  ;;  %v245_v50 = vpop.permute.xlu0 %244  ;;  %v256_v40 = vsel %vm252_vm0, %v19341_v42, %v243_v21  ;;  %19348 = vst [vmem:[#allocation69_spill] sm:$0xff] %v15500_v51  ;;  %19349 = vst [vmem:[#allocation94_spill] sm:$0xff] %v15502_v3  ;;  %v19351_v42 = vld [vmem:[#allocation27_spill] sm:$0xff] }
 0x3ad   : > { %v15491_v17 = vand.u32 4294901760, %v360_v26  ;;  %v255_v35 = vsel %vm252_vm0, %v243_v21, %v245_v50  ;;  %v15496_v23 = vmax.f32 %v19345_v47, %v256_v40  ;;  %v254_v63 = vsel %vm252_vm0, %v245_v50, %v19351_v42  ;;  %v15514_v21 = vld [vmem:[#allocation5 + $0x6a0] sm:$0xff] }
 0x3ae   : > { %v15504_v38 = vand.u32 4294901760, %v361_v57  ;;  %v15510_v0 = vmax.f32 %v19352_v14, %v255_v35  ;;  %19355 = vst [vmem:[#allocation49_spill] sm:$0xff] %v15514_v21  ;;  %v15534_v47 = vld [vmem:[#allocation5 + $0x620] sm:$0xff]  ;;  %v15565_v35 = vld [vmem:[#allocation5 + $0x6b8] sm:$0xff] }
 0x3af   : > { %19344 = vst [vmem:[#allocation14_spill] sm:$0xff] %v15491_v17  ;;  %19346 = vst [vmem:[#allocation61_spill] sm:$0xff] %v15496_v23  ;;  %v15517_v40 = vsub.f32 %v360_v26, %v15491_v17  ;;  %309 = vrot.lane.b32.xlu1 %v15496_v23, %s11061_s18 }
 0x3b0   : > { %19350 = vst [vmem:[#allocation78_spill] sm:$0xff] %v15504_v38  ;;  %19353 = vst [vmem:[#allocation52_spill] sm:$0xff] %v15510_v0  ;;  %v15526_v14 = vsub.f32 %v361_v57, %v15504_v38  ;;  %v8411_v50 = vpop.f32.mrb[20].mxu1  ;;  %5276 = vmatprep.mubr.f32.mxu1 %v15504_v38  ;;  %311 = vrot.lane.b32.xlu0 %v15510_v0, %s11061_s18  ;;  %v10925_v57 = vld [vmem:[%s11223_s7 + $0x70] sm:$0xff] }
 0x3b1   : > { %19356 = vst [vmem:[#allocation51_spill] sm:$0xff] %v15517_v40  ;;  %19358 = vst [vmem:[#allocation90_spill] sm:$0xff] %v15534_v47  ;;  %v17823_v23 = vand.u32 4294901760, %v15517_v40  ;;  %v15540_v45 = vmax.f32 %v10925_v57, %v254_v63  ;;  %v8412_v11 = vpop.f32.mrb[21].mxu1  ;;  %5278 = vmatmul.mubr.f32.vlgmr.msra.gmra.mrb[30].mxu1 %v15491_v17  ;;  %v19361_v57 = vand.u32 4294901760, %v15487_v16  ;;  %v15563_v0 = vld [vmem:[#allocation5 + $0x6b0] sm:$0xff] }
 0x3b2   : > { %v15545_v38 = vadd.f32 %v8412_v11, %v8411_v50  ;;  %10383 = vmatpush3.bf16.msra.mxu1 %v15322_v61  ;;  %v5037_v42 = vand.u32 4294901760, %v15526_v14  ;;  %19362 = vst [vmem:[#allocation89_spill] sm:$0xff] %v15563_v0  ;;  %19363 = vst [vmem:[#allocation60_spill] sm:$0xff] %v15565_v35  ;;  %v19364_v17 = vand.u32 4294901760, %v15489_v13  ;;  %v19366_v50 = vand.u32 4294901760, %v15500_v51  ;;  %v15585_v61 = vld [vmem:[#allocation5 + $0x638] sm:$0xff] }
 0x3b3   : > { %19360 = vst [vmem:[#allocation58_spill] sm:$0xff] %v15540_v45  ;;  %10385 = vmatprep.subr.bf16.mxu1 %v15329_v6  ;;  %313 = vrot.lane.b32.xlu1 %v15540_v45, %s11061_s18  ;;  %v5044_v63 = vsub.f32 %v15517_v40, %v17823_v23  ;;  %v15559_v11 = vsub.f32 %v15487_v16, %v19361_v57  ;;  %v19365_v6 = vand.u32 4294901760, %v15498_v4  ;;  %v15583_v16 = vld [vmem:[#allocation5 + $0x630] sm:$0xff]  ;;  %19368 = vst [vmem:[#allocation20_spill] sm:$0xff] %v15585_v61 }
 0x3b4   : > { %5520 = vmatprep.mubr.f32.mxu1 %v5037_v42  ;;  %v5038_v45 = vsub.f32 %v15526_v14, %v5037_v42  ;;  %v15571_v23 = vsub.f32 %v15489_v13, %v19364_v17  ;;  %v15581_v26 = vsub.f32 %v15500_v51, %v19366_v50  ;;  %19367 = vst [vmem:[#allocation65_spill] sm:$0xff] %v15583_v16  ;;  %v19369_v40 = vand.u32 4294901760, %v15502_v3 }
 0x3b5   : > { %v15576_v57 = vsub.f32 %v15498_v4, %v19365_v6  ;;  %v5045_v42 = vand.u32 4294901760, %v5044_v63  ;;  %v19370_v13 = vand.u32 4294901760, %v15512_v1  ;;  %v19371_v4 = vand.u32 4294901760, %v15514_v21 }
 0x3b6   : > { %v15590_v17 = vsub.f32 %v15502_v3, %v19369_v40  ;;  %10387 = vmatpush3.bf16.msra.mxu1 %v15349_v31  ;;  %v5039_v51 = vand.u32 4294901760, %v5038_v45  ;;  %v19372_v63 = vand.u32 4294901760, %v15523_v58  ;;  %v19375_v45 = vand.u32 4294901760, %v15536_v53 }
 0x3b7   : > { %v15595_v6 = vsub.f32 %v15512_v1, %v19370_v13  ;;  %v15600_v50 = vsub.f32 %v15514_v21, %v19371_v4  ;;  %10389 = vmatprep.subr.bf16.mxu1 %v15363_v22  ;;  %v19374_v13 = vand.u32 4294901760, %v15534_v47  ;;  %v15627_v1 = vld [vmem:[#allocation5 + $0x640] sm:$0xff]  ;;  %v15629_v22 = vld [vmem:[#allocation5 + $0x648] sm:$0xff] }
 0x3b8   : > { %v15606_v27 = vsub.f32 %v15523_v58, %v19372_v63  ;;  %v15621_v21 = vsub.f32 %v15536_v53, %v19375_v45  ;;  %v15625_v58 = vld [vmem:[#allocation5 + $0x6c8] sm:$0xff]  ;;  %v8376_v3 = vpop.f32.mrb[20].mxu0  ;;  %5040 = vmatprep.mubr.f32.mxu0 %v5039_v51  ;;  %19378 = vst [vmem:[#allocation75_spill] sm:$0xff] %v15627_v1  ;;  %19379 = vst [vmem:[#allocation88_spill] sm:$0xff] %v15629_v22  ;;  %v19399_v51 = vpack.c.bf16 %v14850_v12, %v14845_v19 }
 0x3b9   : > { %v15616_v4 = vsub.f32 %v15534_v47, %v19374_v13  ;;  %19377 = vst [vmem:[#allocation80_spill] sm:$0xff] %v15625_v58  ;;  %v8377_v63 = vpop.f32.mrb[21].mxu0  ;;  %5046 = vmatmul.mubr.f32.vlgmr.msra.gmra.mrb[30].mxu0 %v5045_v42  ;;  %v19380_v13 = vpack.c.bf16 %v14802_v30, %v14783_v39  ;;  %v19381_v47 = vand.u32 4294901760, %v15563_v0  ;;  %v19383_v42 = vand.u32 4294901760, %v15565_v35 }
 0x3ba   : > { %19376 = vst [vmem:[#allocation86_spill] sm:$0xff] %v15621_v21  ;;  %v8378_v31 = vadd.f32 %v8377_v63, %v8376_v3  ;;  %10391 = vmatpush3.bf16.msra.mxu1 %v15375_v36  ;;  %5413 = vmatprep.mubr.f32.mxu0 %v15526_v14  ;;  %v19385_v3 = vpack.c.bf16 %v19221_v34, %v14814_v20  ;;  %v19386_v63 = vand.u32 4294901760, %v15583_v16  ;;  %v15675_v14 = vld [vmem:[#allocation5 + $0x6d8] sm:$0xff] }
 0x3bb   : > { %10351 = vmatpush3.bf16.msra.mxu0 %v19380_v13  ;;  %v15649_v45 = vsub.f32 %v15563_v0, %v19381_v47  ;;  %v15654_v40 = vsub.f32 %v15565_v35, %v19383_v42  ;;  %v19388_v47 = vand.u32 4294901760, %v15585_v61  ;;  %v15673_v35 = vld [vmem:[#allocation5 + $0x6d0] sm:$0xff]  ;;  %19391 = vst [vmem:[#allocation56_spill] sm:$0xff] %v15675_v14  ;;  %10393 = vmatprep.subr.bf16.mxu1 %v15382_v10 }
 0x3bc   : > { %10353 = vmatprep.subr.bf16.mxu0 %v19385_v3  ;;  %v15664_v13 = vsub.f32 %v15583_v16, %v19386_v63  ;;  %19390 = vst [vmem:[#allocation15_spill] sm:$0xff] %v15673_v35  ;;  %v3694_v3 = vadd.f32 %v8378_v31, %v15472_v41  ;;  %v15679_v0 = vld [vmem:[#allocation5 + $0x650] sm:$0xff]  ;;  %v15681_v63 = vld [vmem:[#allocation5 + $0x658] sm:$0xff]  ;;  %v19396_v31 = vpack.c.bf16 %v14836_v15, %v14831_v52  ;;  %v19397_v16 = vand.u32 4294901760, %v15625_v58 }
 0x3bd   : > { %19382 = vst [vmem:[#allocation24_spill] sm:$0xff] %v15649_v45  ;;  %19384 = vst [vmem:[#allocation13_spill] sm:$0xff] %v15654_v40  ;;  %v15669_v53 = vsub.f32 %v15585_v61, %v19388_v47  ;;  %v19394_v61 = vand.u32 4294901760, %v15610_v59  ;;  %v15774_v40 = vld [vmem:[#allocation5 + $0x678] sm:$0xff] }
 0x3be   : > { %19387 = vst [vmem:[#allocation74_spill] sm:$0xff] %v15664_v13  ;;  %19392 = vst [vmem:[#allocation32_spill] sm:$0xff] %v15679_v0  ;;  %10395 = vmatpush3.bf16.msra.mxu1 %v15402_v43  ;;  %v15697_v41 = vadd.f32 %v15545_v38, %v3694_v3  ;;  %v15702_v47 = vsub.f32 %v15625_v58, %v19397_v16  ;;  %v19402_v3 = vand.u32 4294901760, %v15629_v22  ;;  %v19409_v58 = vand.u32 4294901760, %v15675_v14 }
 0x3bf   : > { %19389 = vst [vmem:[#allocation34_spill] sm:$0xff] %v15669_v53  ;;  %19393 = vst [vmem:[#allocation16_spill] sm:$0xff] %v15681_v63  ;;  %v15688_v42 = vsub.f32 %v15610_v59, %v19394_v61  ;;  %10355 = vmatpush3.bf16.msra.mxu0 %v19396_v31  ;;  %10397 = vmatprep.subr.bf16.mxu1 %v15408_v8  ;;  %v19400_v31 = vand.u32 4294901760, %v15627_v1  ;;  %v15726_v53 = vld [vmem:[#allocation5 + $0x6e8] sm:$0xff] }
 0x3c0   : > { %19398 = vst [vmem:[#allocation76_spill] sm:$0xff] %v15702_v47  ;;  %10357 = vmatprep.subr.bf16.mxu0 %v19399_v51  ;;  %v15718_v16 = vsub.f32 %v15629_v22, %v19402_v3  ;;  %v15724_v51 = vld [vmem:[#allocation5 + $0x6e0] sm:$0xff]  ;;  %19405 = vst [vmem:[#allocation33_spill] sm:$0xff] %v15726_v53  ;;  %v19407_v3 = vand.u32 4294901760, %v15673_v35  ;;  %v15742_v61 = vsub.f32 %v15675_v14, %v19409_v58  ;;  %v15746_v47 = vld [vmem:[#allocation5 + $0x668] sm:$0xff] }
 0x3c1   : > { %19395 = vst [vmem:[#allocation81_spill] sm:$0xff] %v15688_v42  ;;  %v15713_v38 = vsub.f32 %v15627_v1, %v19400_v31  ;;  %19404 = vst [vmem:[#allocation66_spill] sm:$0xff] %v15724_v51  ;;  %v19406_v1 = vpack.c.bf16 %v14861_v7, %v14855_v56  ;;  %v15744_v22 = vld [vmem:[#allocation5 + $0x660] sm:$0xff]  ;;  %v19413_v31 = vpack.c.bf16 %v19236_v60, %v19235_v44  ;;  %v17874_v14 = vand.u32 4294901760, %v15724_v51  ;;  %v15766_v42 = vld [vmem:[#allocation5 + $0x6f8] sm:$0xff] }
 0x3c2   : > { %19403 = vst [vmem:[#allocation22_spill] sm:$0xff] %v15718_v16  ;;  %10399 = vmatpush3.bf16.msra.mxu1 %v15422_v48  ;;  %v15737_v59 = vsub.f32 %v15673_v35, %v19407_v3  ;;  %19410 = vst [vmem:[#allocation21_spill] sm:$0xff] %v15742_v61  ;;  %v19415_v35 = vand.u32 4294901760, %v15681_v63  ;;  %v19420_v16 = vpack.c.bf16 %v19243_v46, %v19242_v55  ;;  %v19424_v13 = vand.u32 4294901760, %v15746_v47 }
 0x3c3   : > { %19401 = vst [vmem:[#allocation45_spill] sm:$0xff] %v15713_v38  ;;  %10359 = vmatpush3.bf16.msra.mxu0 %v19406_v1  ;;  %19411 = vst [vmem:[#allocation82_spill] sm:$0xff] %v15744_v22  ;;  %10401 = vmatprep.subr.bf16.mxu1 %v15429_v33  ;;  %v19414_v1 = vand.u32 4294901760, %v15679_v0  ;;  %v15764_v38 = vld [vmem:[#allocation5 + $0x6f0] sm:$0xff]  ;;  %v19430_v61 = vand.u32 4294901760, %v15766_v42 }
 0x3c4   : > { %19408 = vst [vmem:[#allocation47_spill] sm:$0xff] %v15737_v59  ;;  %19412 = vst [vmem:[#allocation37_spill] sm:$0xff] %v15746_v47  ;;  %10361 = vmatprep.subr.bf16.mxu0 %v19413_v31  ;;  %v15760_v58 = vsub.f32 %v15681_v63, %v19415_v35  ;;  %v19421_v31 = vpack.c.bf16 %v19245_v24, %v19244_v18  ;;  %v15791_v35 = vsub.f32 %v15724_v51, %v17874_v14  ;;  %v19441_v51 = vld [vmem:[#allocation51_spill] sm:$0xff] }
 0x3c5   : > { %v15755_v3 = vsub.f32 %v15679_v0, %v19414_v1  ;;  %19416 = vst [vmem:[#allocation57_spill] sm:$0xff] %v15764_v38  ;;  %19417 = vst [vmem:[#allocation41_spill] sm:$0xff] %v15766_v42  ;;  %v15772_v0 = vld [vmem:[#allocation5 + $0x670] sm:$0xff]  ;;  %v19422_v63 = vand.u32 4294901760, %v15726_v53  ;;  %v19423_v59 = vand.u32 4294901760, %v15744_v22  ;;  %v15808_v45 = vsub.f32 %v15746_v47, %v19424_v13 }
 0x3c6   : > { %19418 = vst [vmem:[#allocation42_spill] sm:$0xff] %v15772_v0  ;;  %19419 = vst [vmem:[#allocation18_spill] sm:$0xff] %v15774_v40  ;;  %10403 = vmatpush3.bf16.msra.mxu1 %v15436_v5  ;;  %v19426_v14 = vpack.c.bf16 %v19250_v28, %v19249_v29  ;;  %v19446_v47 = vld [vmem:[#allocation79_spill] sm:$0xff] }
 0x3c7   : > { %10363 = vmatpush3.bf16.msra.mxu0 %v19420_v16  ;;  %10405 = vmatprep.subr.bf16.mxu1 %v15443_v49  ;;  %v15796_v16 = vsub.f32 %v15726_v53, %v19422_v63  ;;  %v15803_v1 = vsub.f32 %v15744_v22, %v19423_v59  ;;  %19425 = vst [vmem:[#allocation19_spill] sm:$0xff] %v15808_v45  ;;  %v19428_v59 = vand.u32 4294901760, %v15764_v38  ;;  %v19432_v63 = vand.u32 4294901760, %v15772_v0 }
 0x3c8   : > { %10365 = vmatprep.subr.bf16.mxu0 %v19421_v31  ;;  %v19427_v31 = vpack.c.bf16 %v19253_v9, %v19252_v54 }
 0x3c9   : > { %v15823_v13 = vsub.f32 %v15764_v38, %v19428_v59  ;;  %v15835_v22 = vsub.f32 %v15772_v0, %v19432_v63  ;;  %v19438_v63 = vld [vmem:[#allocation50_spill] sm:$0xff]  ;;  %v19440_v38 = vld [vmem:[#allocation53_spill] sm:$0xff] }
 0x3ca   : > { %10407 = vmatpush3.bf16.msra.mxu1 %v15450_v37 }
 0x3cb   : > { %10367 = vmatpush3.bf16.msra.mxu0 %v19426_v14  ;;  %10409 = vmatprep.subr.bf16.mxu1 %v15457_v2  ;;  %19429 = vst [vmem:[#allocation43_spill] sm:$0xff] %v15823_v13  ;;  %v15828_v14 = vsub.f32 %v15766_v42, %v19430_v61  ;;  %19433 = vst [vmem:[#allocation93_spill] sm:$0xff] %v15835_v22  ;;  %v19436_v61 = vpack.c.bf16 %v15005_v25, %v15000_v62  ;;  %v19437_v42 = vld [vmem:[#allocation59_spill] sm:$0xff]  ;;  %v19442_v2 = vand.u32 4294901760, %v19441_v51  ;;  %v19451_v22 = vld [vmem:[#allocation25_spill] sm:$0xff] }
 0x3cc   : > { %10369 = vmatprep.subr.bf16.mxu0 %v19427_v31  ;;  %v19434_v31 = vand.u32 4294901760, %v15774_v40  ;;  %v19439_v0 = vpack.c.bf16 %v19437_v42, %v19438_v63  ;;  %v19443_v25 = vld [vmem:[#allocation35_spill] sm:$0xff]  ;;  %v19447_v42 = vld [vmem:[#allocation78_spill] sm:$0xff] }
 0x3cd   : > { %19431 = vst [vmem:[#allocation48_spill] sm:$0xff] %v15828_v14  ;;  %v19452_v14 = vand.u32 4294901760, %v19451_v22  ;;  %v19453_v13 = vld [vmem:[#allocation67_spill] sm:$0xff] }
 0x3ce   : > { %v15840_v53 = vsub.f32 %v15774_v40, %v19434_v31  ;;  %10411 = vmatpush3.bf16.msra.mxu1 %v15465_v32  ;;  %v15854_v31 = vld [vmem:[#allocation5 + $0x680] sm:$0xff]  ;;  %v15856_v40 = vld [vmem:[#allocation5 + $0x688] sm:$0xff]  ;;  %v19454_v37 = vand.u32 4294901760, %v19453_v13 }
 0x3cf   : > { %10371 = vmatpush3.bf16.msra.mxu0 %v19436_v61  ;;  %10445 = vmatprep.subr.bf16.mxu1 %v19440_v38  ;;  %v19444_v61 = vld [vmem:[#allocation87_spill] sm:$0xff]  ;;  %v19449_v38 = vld [vmem:[#allocation40_spill] sm:$0xff]  ;;  %v5853_v45 = vand.u32 4294901760, %v15856_v40  ;;  %v19462_v13 = vld [vmem:[#allocation73_spill] sm:$0xff] }
 0x3d0   : > { %19435 = vst [vmem:[#allocation44_spill] sm:$0xff] %v15840_v53  ;;  %10373 = vmatprep.subr.bf16.mxu0 %v19439_v0  ;;  %v19445_v32 = vpack.c.bf16 %v19443_v25, %v19444_v61  ;;  %v19448_v0 = vld [vmem:[#allocation68_spill] sm:$0xff]  ;;  %v10412_v21 = vpack.c.bf16 %v19454_v37, %v19452_v14  ;;  %v19455_v25 = vld [vmem:[#allocation70_spill] sm:$0xff]  ;;  %v19460_v61 = vand.u32 4294901760, %v14783_v39  ;;  %v19463_v37 = vand.u32 4294901760, %v14814_v20 }
 0x3d1   : > { %v8481_v59 = vpop.f32.mrb[22].mxu1  ;;  %5524 = vmatmul.mubr.f32.vlgmr.msra.gmra.mrb[32].mxu1 %v19442_v2  ;;  %v19450_v63 = vpack.c.bf16 %v19448_v0, %v19449_v38  ;;  %v5850_v2 = vand.u32 4294901760, %v15854_v31  ;;  %v19461_v0 = vand.u32 4294901760, %v14802_v30  ;;  %v19464_v14 = vand.u32 4294901760, %v19221_v34 }
 0x3d2   : > { %v8482_v62 = vpop.f32.mrb[23].mxu1  ;;  %10447 = vmatpush3.bf16.msra.mxu1 %v19446_v47  ;;  %5794 = vmatprep.mubr.f32.mxu1 %v19447_v42  ;;  %v19457_v47 = vld [vmem:[#allocation72_spill] sm:$0xff]  ;;  %v15896_v39 = vsub.f32 %v15856_v40, %v5853_v45  ;;  %v19465_v20 = vand.u32 4294901760, %v14831_v52  ;;  %v19466_v34 = vand.u32 4294901760, %v14836_v15  ;;  %v19469_v52 = vand.u32 4294901760, %v14855_v56 }
 0x3d3   : > { %10375 = vmatpush3.bf16.msra.mxu0 %v19445_v32  ;;  %v8483_v53 = vadd.f32 %v8482_v62, %v8481_v59  ;;  %10449 = vmatprep.subr.bf16.mxu1 %v19455_v25  ;;  %v19456_v32 = vld [vmem:[#allocation11_spill] sm:$0xff]  ;;  %v19459_v62 = vld [vmem:[#allocation36_spill] sm:$0xff]  ;;  %v10414_v22 = vpack.c.bf16 %v19461_v0, %v19460_v61  ;;  %v10416_v38 = vpack.c.bf16 %v19464_v14, %v19463_v37  ;;  %v19470_v15 = vand.u32 4294901760, %v14861_v7 }
 0x3d4   : > { %10377 = vmatprep.subr.bf16.mxu0 %v19450_v63  ;;  %v19458_v59 = vpack.c.bf16 %v19456_v32, %v19457_v47  ;;  %v15891_v63 = vsub.f32 %v15854_v31, %v5850_v2  ;;  %v10418_v32 = vpack.c.bf16 %v19466_v34, %v19465_v20  ;;  %v19467_v47 = vand.u32 4294901760, %v14845_v19  ;;  %v19508_v31 = vld [vmem:[#allocation47_spill] sm:$0xff] }
 0x3d5   : > { %v17904_v56 = vand.u32 4294901760, %v15571_v23  ;;  %v19478_v20 = vand.u32 4294901760, %v19250_v28 }
 0x3d6   : > { %10451 = vmatpush3.bf16.msra.mxu1 %v19459_v62  ;;  %v17908_v61 = vand.u32 4294901760, %v15891_v63 }
 0x3d7   : > { %10379 = vmatpush3.bf16.msra.mxu0 %v19458_v59  ;;  %10453 = vmatprep.subr.bf16.mxu1 %v19462_v13  ;;  %v19468_v59 = vand.u32 4294901760, %v14850_v12  ;;  %v19471_v12 = vand.u32 4294901760, %v19235_v44  ;;  %v19474_v44 = vand.u32 4294901760, %v19243_v46  ;;  %v19476_v13 = vand.u32 4294901760, %v19245_v24 }
 0x3d8   : > { %10413 = vmatprep.subr.bf16.mxu0 %v10412_v21  ;;  %v8446_v30 = vpop.f32.mrb[22].mxu0  ;;  %v5924_v46 = vsub.f32 %v15571_v23, %v17904_v56  ;;  %v17901_v24 = vand.u32 4294901760, %v15590_v17 }
 0x3d9   : > { %v8447_v25 = vpop.f32.mrb[23].mxu0  ;;  %v10420_v62 = vpack.c.bf16 %v19468_v59, %v19467_v47  ;;  %v19480_v47 = vand.u32 4294901760, %v19253_v9  ;;  %v17919_v9 = vand.u32 4294901760, %v15791_v35 }
 0x3da   : > { %5416 = vmatmul.mubr.f32.vlgmr.msra.gmra.mrb[32].mxu0 %v19441_v51  ;;  %v8448_v21 = vadd.f32 %v8447_v25, %v8446_v30  ;;  %10455 = vmatpush3.bf16.msra.mxu1 %v15375_v36  ;;  %v17906_v51 = vand.u32 4294901760, %v15896_v39  ;;  %v10422_v36 = vpack.c.bf16 %v19470_v15, %v19469_v52  ;;  %v17900_v30 = vand.u32 4294901760, %v15595_v6 }
 0x3db   : > { %10415 = vmatpush3.bf16.msra.mxu0 %v10414_v22  ;;  %5690 = vmatprep.mubr.f32.mxu0 %v19447_v42  ;;  %v17905_v42 = vand.u32 4294901760, %v15559_v11  ;;  %v19472_v22 = vand.u32 4294901760, %v19236_v60  ;;  %v19475_v60 = vand.u32 4294901760, %v19244_v18  ;;  %v17902_v18 = vand.u32 4294901760, %v15581_v26 }
 0x3dc   : > { %10417 = vmatprep.subr.bf16.mxu0 %v10416_v38  ;;  %v3970_v0 = vadd.f32 %v8448_v21, %v15697_v41  ;;  %10457 = vmatprep.subr.bf16.mxu1 %v15382_v10  ;;  %v6029_v10 = vsub.f32 %v15891_v63, %v17908_v61  ;;  %v6036_v7 = vsub.f32 %v15896_v39, %v17906_v51  ;;  %v17903_v38 = vand.u32 4294901760, %v15576_v57 }
 0x3dd   : > { %v10424_v41 = vpack.c.bf16 %v19472_v22, %v19471_v12  ;;  %v10428_v37 = vpack.c.bf16 %v19476_v13, %v19475_v60  ;;  %v15944_v14 = vsub.f32 %v15559_v11, %v17905_v42  ;;  %v17921_v25 = vand.u32 4294901760, %v15755_v3  ;;  %v19484_v60 = vld [vmem:[#allocation86_spill] sm:$0xff] }
 0x3de   : > { %v15918_v19 = vadd.f32 %v8483_v53, %v3970_v0  ;;  %10459 = vmatpush3.bf16.msra.mxu1 %v15402_v43  ;;  %v19473_v53 = vand.u32 4294901760, %v19242_v55  ;;  %v6037_v55 = vand.u32 4294901760, %v6036_v7  ;;  %v17920_v21 = vand.u32 4294901760, %v15760_v58 }
 0x3df   : > { %10419 = vmatpush3.bf16.msra.mxu0 %v10418_v32  ;;  %10461 = vmatprep.subr.bf16.mxu1 %v15408_v8  ;;  %v6030_v8 = vand.u32 4294901760, %v6029_v10  ;;  %v19479_v32 = vand.u32 4294901760, %v19252_v54  ;;  %v17898_v0 = vand.u32 4294901760, %v15606_v27  ;;  %v6050_v54 = vsub.f32 %v15581_v26, %v17902_v18  ;;  %v19482_v10 = vld [vmem:[#allocation19_spill] sm:$0xff] }
 0x3e0   : > { %10421 = vmatprep.subr.bf16.mxu0 %v10420_v62  ;;  %v10426_v43 = vpack.c.bf16 %v19474_v44, %v19473_v53  ;;  %v17899_v62 = vand.u32 4294901760, %v15600_v50  ;;  %v15974_v28 = vpack.c.bf16 %v17920_v21, %v17921_v25  ;;  %v17917_v52 = vand.u32 4294901760, %v15796_v16  ;;  %v19507_v25 = vld [vmem:[#allocation46_spill] sm:$0xff] }
 0x3e1   : > { %v10432_v59 = vpack.c.bf16 %v19480_v47, %v19479_v32  ;;  %v10508_v15 = vpack.c.bf16 %v6037_v55, %v6030_v8  ;;  %v5931_v12 = vsub.f32 %v15590_v17, %v17901_v24  ;;  %v17907_v22 = vand.u32 4294901760, %v15616_v4  ;;  %v19486_v8 = vld [vmem:[#allocation43_spill] sm:$0xff]  ;;  %v19490_v32 = vld [vmem:[#allocation24_spill] sm:$0xff] }
 0x3e2   : > { %10463 = vmatpush3.bf16.msra.mxu1 %v15422_v48  ;;  %v19477_v48 = vand.u32 4294901760, %v19249_v29  ;;  %19481 = vst [vmem:[#allocation26_spill] sm:$0xff] %v15974_v28  ;;  %v5918_v29 = vand.u32 4294901760, %v15944_v14  ;;  %v17914_v7 = vand.u32 4294901760, %v19482_v10  ;;  %v6057_v44 = vsub.f32 %v15600_v50, %v17899_v62  ;;  %v19492_v62 = vld [vmem:[#allocation93_spill] sm:$0xff] }
 0x3e3   : > { %10423 = vmatpush3.bf16.msra.mxu0 %v10422_v36  ;;  %10465 = vmatprep.subr.bf16.mxu1 %v15429_v33  ;;  %v6043_v33 = vsub.f32 %v15576_v57, %v17903_v38  ;;  %v5925_v36 = vand.u32 4294901760, %v5924_v46  ;;  %v17911_v13 = vand.u32 4294901760, %v19484_v60  ;;  %v6051_v14 = vand.u32 4294901760, %v6050_v54  ;;  %v19487_v46 = vld [vmem:[#allocation48_spill] sm:$0xff] }
 0x3e4   : > { %10425 = vmatprep.subr.bf16.mxu0 %v10424_v41  ;;  %v10430_v34 = vpack.c.bf16 %v19478_v20, %v19477_v48  ;;  %v17915_v41 = vand.u32 4294901760, %v15803_v1  ;;  %v17910_v55 = vand.u32 4294901760, %v19486_v8  ;;  %v17909_v48 = vand.u32 4294901760, %v19487_v46 }
 0x3e5   : > { %v6044_v53 = vand.u32 4294901760, %v6043_v33  ;;  %v17916_v47 = vand.u32 4294901760, %v19490_v32  ;;  %v19491_v33 = vld [vmem:[#allocation13_spill] sm:$0xff]  ;;  %v5945_v18 = vsub.f32 %v15616_v4, %v17907_v22  ;;  %v6058_v56 = vand.u32 4294901760, %v6057_v44  ;;  %v19500_v44 = vld [vmem:[#allocation34_spill] sm:$0xff] }
 0x3e6   : > { %10467 = vmatpush3.bf16.msra.mxu1 %v15436_v5  ;;  %v5938_v5 = vsub.f32 %v15595_v6, %v17900_v30  ;;  %v16013_v20 = vpack.c.bf16 %v17914_v7, %v17915_v41  ;;  %v5932_v30 = vand.u32 4294901760, %v5931_v12  ;;  %v16027_v38 = vpack.c.bf16 %v17909_v48, %v17910_v55  ;;  %v19498_v22 = vld [vmem:[#allocation85_spill] sm:$0xff]  ;;  %v19499_v55 = vld [vmem:[#allocation74_spill] sm:$0xff] }
 0x3e7   : > { %10427 = vmatpush3.bf16.msra.mxu0 %v10426_v43  ;;  %10469 = vmatprep.subr.bf16.mxu1 %v15443_v49  ;;  %v15997_v49 = vpack.c.bf16 %v17917_v52, %v17919_v9  ;;  %v6064_v43 = vsub.f32 %v15606_v27, %v17898_v0  ;;  %v17918_v0 = vand.u32 4294901760, %v19491_v33  ;;  %v5952_v51 = vsub.f32 %v19484_v60, %v17911_v13  ;;  %v19505_v52 = vld [vmem:[#allocation45_spill] sm:$0xff]  ;;  %v19506_v9 = vld [vmem:[#allocation22_spill] sm:$0xff] }
 0x3e8   : > { %10429 = vmatprep.subr.bf16.mxu0 %v10428_v37  ;;  %v19485_v37 = vld [vmem:[#allocation91_spill] sm:$0xff]  ;;  %19488 = vst [vmem:[#allocation31_spill] sm:$0xff] %v16013_v20  ;;  %v5939_v24 = vand.u32 4294901760, %v5938_v5  ;;  %19494 = vst [vmem:[#allocation27_spill] sm:$0xff] %v16027_v38  ;;  %v19497_v5 = vld [vmem:[#allocation54_spill] sm:$0xff]  ;;  %v10510_v61 = vpack.c.bf16 %v5925_v36, %v5918_v29  ;;  %v10512_v48 = vpack.c.bf16 %v6051_v14, %v6044_v53  ;;  %v19527_v38 = vand.u32 4294901760, %v15755_v3 }
 0x3e9   : > { %19483 = vst [vmem:[#allocation17_spill] sm:$0xff] %v15997_v49  ;;  %v6065_v42 = vand.u32 4294901760, %v6064_v43  ;;  %v17923_v43 = vand.u32 4294901760, %v19500_v44  ;;  %v6071_v13 = vsub.f32 %v19490_v32, %v17916_v47  ;;  %v16055_v29 = vpack.c.bf16 %v5853_v45, %v5850_v2  ;;  %v19503_v36 = vld [vmem:[#allocation14_spill] sm:$0xff]  ;;  %v19504_v53 = vld [vmem:[#allocation63_spill] sm:$0xff]  ;;  %v19514_v2 = vld [vmem:[#allocation92_spill] sm:$0xff] }
 0x3ea   : > { %10471 = vmatpush3.bf16.msra.mxu1 %v19485_v37  ;;  %v17913_v37 = vand.u32 4294901760, %v19492_v62  ;;  %v5953_v47 = vand.u32 4294901760, %v5952_v51  ;;  %v19535_v20 = vld [vmem:[#allocation90_spill] sm:$0xff]  ;;  %v19555_v28 = vand.u32 4294901760, %v19492_v62 }
 0x3eb   : > { %10431 = vmatpush3.bf16.msra.mxu0 %v10430_v34  ;;  %v19489_v34 = vld [vmem:[#allocation29_spill] sm:$0xff]  ;;  %v10516_v14 = vpack.c.bf16 %v6065_v42, %v6058_v56  ;;  %v5966_v45 = vsub.f32 %v19500_v44, %v17923_v43  ;;  %v6072_v51 = vand.u32 4294901760, %v6071_v13 }
 0x3ec   : > { %10433 = vmatprep.subr.bf16.mxu0 %v10432_v59  ;;  %10473 = vmatprep.subr.bf16.mxu1 %v19489_v34  ;;  %v19493_v59 = vld [vmem:[#allocation44_spill] sm:$0xff]  ;;  %v19495_v34 = vld [vmem:[#allocation39_spill] sm:$0xff] }
 0x3ed   : > { %v17912_v54 = vand.u32 4294901760, %v19493_v59 }
 0x3ee   : > { %10475 = vmatpush3.bf16.msra.mxu1 %v19497_v5  ;;  %v19502_v5 = vld [vmem:[#allocation76_spill] sm:$0xff] }
 0x3ef   : > { %10435 = vmatpush3.bf16.msra.mxu0 %v19495_v34  ;;  %v16037_v12 = vpack.c.bf16 %v17912_v54, %v17913_v37  ;;  %v17922_v34 = vand.u32 4294901760, %v19499_v55  ;;  %10509 = vmatprep.subr.bf16.mxu1 %v10508_v15  ;;  %v6078_v54 = vsub.f32 %v19491_v33, %v17918_v0  ;;  %v19501_v37 = vld [vmem:[#allocation81_spill] sm:$0xff]  ;;  %v17925_v41 = vand.u32 4294901760, %v19502_v5 }
 0x3f0   : > { %10437 = vmatprep.subr.bf16.mxu0 %v19498_v22  ;;  %v17924_v7 = vand.u32 4294901760, %v19501_v37  ;;  %v10514_v22 = vpack.c.bf16 %v5939_v24, %v5932_v30  ;;  %v5946_v15 = vand.u32 4294901760, %v5945_v18  ;;  %v19509_v18 = vld [vmem:[#allocation21_spill] sm:$0xff]  ;;  %v19510_v30 = vld [vmem:[#allocation55_spill] sm:$0xff] }
 0x3f1   : > { %19496 = vst [vmem:[#allocation84_spill] sm:$0xff] %v16037_v12  ;;  %5796 = vmatmul.mubr.f32.vlgmr.msra.gmra.mrb[34].mxu1 %v19503_v36  ;;  %v5959_v40 = vsub.f32 %v19499_v55, %v17922_v34  ;;  %v6079_v56 = vand.u32 4294901760, %v6078_v54  ;;  %v19517_v54 = vld [vmem:[#allocation69_spill] sm:$0xff] }
 0x3f2   : > { %10511 = vmatpush3.bf16.msra.mxu1 %v10510_v61  ;;  %v6085_v24 = vsub.f32 %v19501_v37, %v17924_v7  ;;  %v6092_v61 = vsub.f32 %v19502_v5, %v17925_v41  ;;  %v10518_v42 = vpack.c.bf16 %v5953_v47, %v5946_v15  ;;  %v19518_v21 = vand.u32 4294901760, %v19517_v54 }
 0x3f3   : > { %10439 = vmatpush3.bf16.msra.mxu0 %v19504_v53  ;;  %10513 = vmatprep.subr.bf16.mxu1 %v10512_v48  ;;  %v19512_v53 = vld [vmem:[#allocation12_spill] sm:$0xff]  ;;  %v19515_v48 = vld [vmem:[#allocation62_spill] sm:$0xff]  ;;  %v19519_v7 = vand.u32 4294901760, %v19505_v52  ;;  %v19520_v41 = vand.u32 4294901760, %v19506_v9  ;;  %v19521_v47 = vand.u32 4294901760, %v19508_v31 }
 0x3f4   : > { %10441 = vmatprep.subr.bf16.mxu0 %v19507_v25  ;;  %v19511_v25 = vand.u32 4294901760, %v19510_v30  ;;  %v19513_v34 = vand.u32 4294901760, %v19512_v53  ;;  %v19516_v13 = vand.u32 4294901760, %v19515_v48  ;;  %v10520_v53 = vpack.c.bf16 %v6079_v56, %v6072_v51  ;;  %v19529_v56 = vld [vmem:[#allocation49_spill] sm:$0xff] }
 0x3f5   : > { %v5973_v12 = vsub.f32 %v19505_v52, %v19519_v7  ;;  %v5980_v30 = vsub.f32 %v19506_v9, %v19520_v41  ;;  %v6099_v15 = vsub.f32 %v19508_v31, %v19521_v47  ;;  %v6086_v7 = vand.u32 4294901760, %v6085_v24  ;;  %v19523_v41 = vld [vmem:[#allocation94_spill] sm:$0xff] }
 0x3f6   : > { %v16080_v43 = vpack.c.bf16 %v19513_v34, %v19511_v25  ;;  %v16087_v0 = vpack.c.bf16 %v19518_v21, %v19516_v13  ;;  %10515 = vmatpush3.bf16.msra.mxu1 %v10514_v22  ;;  %v5960_v34 = vand.u32 4294901760, %v5959_v40  ;;  %v19522_v21 = vand.u32 4294901760, %v19509_v18  ;;  %v19525_v13 = vld [vmem:[#allocation71_spill] sm:$0xff] }
 0x3f7   : > { %10443 = vmatpush3.bf16.msra.mxu0 %v19514_v2  ;;  %v5967_v2 = vand.u32 4294901760, %v5966_v45  ;;  %10517 = vmatprep.subr.bf16.mxu1 %v10516_v14  ;;  %v6093_v48 = vand.u32 4294901760, %v6092_v61  ;;  %v19524_v22 = vand.u32 4294901760, %v19523_v41  ;;  %v19526_v54 = vand.u32 4294901760, %v19525_v13  ;;  %v19531_v61 = vld [vmem:[#allocation77_spill] sm:$0xff] }
 0x3f8   : > { %10477 = vmatprep.subr.bf16.mxu0 %v16055_v29  ;;  %v6106_v25 = vsub.f32 %v19509_v18, %v19522_v21  ;;  %v5974_v45 = vand.u32 4294901760, %v5973_v12  ;;  %v5981_v47 = vand.u32 4294901760, %v5980_v30  ;;  %v5987_v21 = vsub.f32 %v15755_v3, %v19527_v38 }
 0x3f9   : > { %v16107_v40 = vpack.c.bf16 %v19526_v54, %v19524_v22  ;;  %v19528_v14 = vand.u32 4294901760, %v15760_v58  ;;  %v19530_v24 = vand.u32 4294901760, %v19529_v56  ;;  %v19532_v41 = vand.u32 4294901760, %v19531_v61 }
 0x3fa   : > { %5692 = vmatmul.mubr.f32.vlgmr.msra.gmra.mrb[34].mxu0 %v19503_v36  ;;  %10519 = vmatpush3.bf16.msra.mxu1 %v10518_v42  ;;  %v10522_v36 = vpack.c.bf16 %v5967_v2, %v5960_v34  ;;  %v6100_v12 = vand.u32 4294901760, %v6099_v15  ;;  %v6107_v30 = vand.u32 4294901760, %v6106_v25  ;;  %v10524_v13 = vpack.c.bf16 %v6093_v48, %v6086_v7  ;;  %v19537_v2 = vld [vmem:[#allocation64_spill] sm:$0xff]  ;;  %v19539_v25 = vld [vmem:[#allocation89_spill] sm:$0xff] }
 0x3fb   : > { %10479 = vmatpush3.bf16.msra.mxu0 %v16080_v43  ;;  %v5994_v51 = vsub.f32 %v15760_v58, %v19528_v14  ;;  %v16121_v22 = vpack.c.bf16 %v19532_v41, %v19530_v24  ;;  %10521 = vmatprep.subr.bf16.mxu1 %v10520_v53  ;;  %v19533_v38 = vand.u32 4294901760, %v15791_v35  ;;  %v19534_v14 = vand.u32 4294901760, %v15796_v16  ;;  %v19541_v7 = vld [vmem:[#allocation60_spill] sm:$0xff] }
 0x3fc   : > { %10481 = vmatprep.subr.bf16.mxu0 %v16087_v0  ;;  %v19536_v34 = vand.u32 4294901760, %v19535_v20  ;;  %v19538_v56 = vand.u32 4294901760, %v19537_v2  ;;  %v10526_v15 = vpack.c.bf16 %v5981_v47, %v5974_v45  ;;  %v19540_v53 = vand.u32 4294901760, %v19539_v25  ;;  %v19549_v25 = vld [vmem:[#allocation20_spill] sm:$0xff] }
 0x3fd   : > { %v6113_v54 = vsub.f32 %v15791_v35, %v19533_v38  ;;  %v6120_v42 = vsub.f32 %v15796_v16, %v19534_v14  ;;  %v19542_v48 = vand.u32 4294901760, %v19541_v7  ;;  %v5988_v61 = vand.u32 4294901760, %v5987_v21 }
 0x3fe   : > { %v16133_v49 = vpack.c.bf16 %v19538_v56, %v19536_v34  ;;  %v5995_v41 = vand.u32 4294901760, %v5994_v51  ;;  %10523 = vmatpush3.bf16.msra.mxu1 %v10522_v36  ;;  %v10528_v38 = vpack.c.bf16 %v6107_v30, %v6100_v12  ;;  %v19543_v20 = vand.u32 4294901760, %v15803_v1  ;;  %v19547_v12 = vld [vmem:[#allocation65_spill] sm:$0xff] }
 0x3ff   : > { %10483 = vmatpush3.bf16.msra.mxu0 %v16107_v40  ;;  %v16140_v24 = vpack.c.bf16 %v19542_v48, %v19540_v53  ;;  %v19544_v34 = vand.u32 4294901760, %v19482_v10  ;;  %10525 = vmatprep.subr.bf16.mxu1 %v10524_v13  ;;  %v6114_v47 = vand.u32 4294901760, %v6113_v54  ;;  %v6121_v2 = vand.u32 4294901760, %v6120_v42  ;;  %v19551_v13 = vld [vmem:[#allocation38_spill] sm:$0xff]  ;;  %v19553_v42 = vld [vmem:[#allocation80_spill] sm:$0xff] }
 0x400   : > { %10485 = vmatprep.subr.bf16.mxu0 %v16121_v22  ;;  %v6001_v14 = vsub.f32 %v15803_v1, %v19543_v20  ;;  %v19545_v56 = vand.u32 4294901760, %v19486_v8  ;;  %v19546_v51 = vand.u32 4294901760, %v19487_v46  ;;  %v19548_v30 = vand.u32 4294901760, %v19547_v12 }
 0x401   : > { %v6008_v45 = vsub.f32 %v19482_v10, %v19544_v34  ;;  %v19550_v53 = vand.u32 4294901760, %v19549_v25  ;;  %v10530_v48 = vpack.c.bf16 %v5995_v41, %v5988_v61  ;;  %v19552_v54 = vand.u32 4294901760, %v19551_v13  ;;  %v19557_v13 = vld [vmem:[#allocation75_spill] sm:$0xff] }
 0x402   : > { %v6127_v21 = vsub.f32 %v19486_v8, %v19545_v56  ;;  %v6134_v36 = vsub.f32 %v19487_v46, %v19546_v51  ;;  %v19554_v20 = vand.u32 4294901760, %v19553_v42  ;;  %10527 = vmatpush3.bf16.msra.mxu1 %v10526_v15  ;;  %v6002_v56 = vand.u32 4294901760, %v6001_v14 }
 0x403   : > { %10487 = vmatpush3.bf16.msra.mxu0 %v16133_v49  ;;  %v16160_v7 = vpack.c.bf16 %v19550_v53, %v19548_v30  ;;  %v6009_v51 = vand.u32 4294901760, %v6008_v45  ;;  %v6015_v12 = vsub.f32 %v19492_v62, %v19555_v28  ;;  %v19556_v25 = vand.u32 4294901760, %v19493_v59  ;;  %10529 = vmatprep.subr.bf16.mxu1 %v10528_v38  ;;  %v19561_v45 = vld [vmem:[#allocation15_spill] sm:$0xff]  ;;  %v19563_v62 = vld [vmem:[#allocation56_spill] sm:$0xff] }
 0x404   : > { %v16166_v34 = vpack.c.bf16 %v19554_v20, %v19552_v54  ;;  %10489 = vmatprep.subr.bf16.mxu0 %v16140_v24  ;;  %v10532_v61 = vpack.c.bf16 %v6121_v2, %v6114_v47  ;;  %v6128_v41 = vand.u32 4294901760, %v6127_v21  ;;  %v6135_v53 = vand.u32 4294901760, %v6134_v36  ;;  %v19559_v54 = vld [vmem:[#allocation88_spill] sm:$0xff] }
 0x405   : > { %v6022_v30 = vsub.f32 %v19493_v59, %v19556_v25  ;;  %v19558_v15 = vand.u32 4294901760, %v19557_v13  ;;  %v19560_v42 = vand.u32 4294901760, %v19559_v54  ;;  %v10534_v28 = vpack.c.bf16 %v6009_v51, %v6002_v56  ;;  %v19566_v13 = vld [vmem:[#allocation32_spill] sm:$0xff]  ;;  %v19571_v51 = vld [vmem:[#allocation66_spill] sm:$0xff] }
 0x406   : > { %10531 = vmatpush3.bf16.msra.mxu1 %v10530_v48  ;;  %v19562_v20 = vand.u32 4294901760, %v19561_v45  ;;  %v19564_v25 = vand.u32 4294901760, %v19563_v62  ;;  %v6016_v47 = vand.u32 4294901760, %v6015_v12  ;;  %v10536_v21 = vpack.c.bf16 %v6135_v53, %v6128_v41  ;;  %v19568_v54 = vld [vmem:[#allocation16_spill] sm:$0xff]  ;;  %v19573_v12 = vld [vmem:[#allocation33_spill] sm:$0xff]  ;;  %v19576_v53 = vld [vmem:[#allocation82_spill] sm:$0xff] }
 0x407   : > { %10491 = vmatpush3.bf16.msra.mxu0 %v16160_v7  ;;  %v16180_v14 = vpack.c.bf16 %v19560_v42, %v19558_v15  ;;  %v6023_v2 = vand.u32 4294901760, %v6022_v30  ;;  %10533 = vmatprep.subr.bf16.mxu1 %v10532_v61  ;;  %v19567_v15 = vand.u32 4294901760, %v19566_v13  ;;  %v19569_v48 = vand.u32 4294901760, %v19568_v54 }
 0x408   : > { %10493 = vmatprep.subr.bf16.mxu0 %v16166_v34  ;;  %v16187_v38 = vpack.c.bf16 %v19564_v25, %v19562_v20  ;;  %v19572_v45 = vand.u32 4294901760, %v19571_v51  ;;  %v19574_v30 = vand.u32 4294901760, %v19573_v12  ;;  %v19577_v20 = vand.u32 4294901760, %v19576_v53  ;;  %v19578_v25 = vld [vmem:[#allocation37_spill] sm:$0xff]  ;;  %v19588_v51 = vld [vmem:[#allocation18_spill] sm:$0xff] }
 0x409   : > { %v16194_v42 = vpack.c.bf16 %v19569_v48, %v19567_v15  ;;  %v10538_v62 = vpack.c.bf16 %v6023_v2, %v6016_v47  ;;  %v19579_v13 = vand.u32 4294901760, %v19578_v25  ;;  %v19583_v2 = vld [vmem:[#allocation41_spill] sm:$0xff] }
 0x40a   : > { %19565 = vst [vmem:[#allocation59_spill] sm:$0xff] %v16187_v38  ;;  %v8551_v36 = vpop.f32.mrb[24].mxu1  ;;  %10535 = vmatpush3.bf16.msra.mxu1 %v10534_v28  ;;  %v16201_v61 = vpack.c.bf16 %v19574_v30, %v19572_v45  ;;  %v19581_v28 = vld [vmem:[#allocation57_spill] sm:$0xff]  ;;  %v19584_v54 = vand.u32 4294901760, %v19583_v2  ;;  %v19589_v45 = vand.u32 4294901760, %v19588_v51  ;;  %v10540_v30 = vpack.c.bf16 %v15896_v39, %v15891_v63 }
 0x40b   : > { %10495 = vmatpush3.bf16.msra.mxu0 %v16180_v14  ;;  %19570 = vst [vmem:[#allocation50_spill] sm:$0xff] %v16194_v42  ;;  %v8552_v56 = vpop.f32.mrb[25].mxu1  ;;  %10537 = vmatprep.subr.bf16.mxu1 %v10536_v21  ;;  %v16208_v15 = vpack.c.bf16 %v19579_v13, %v19577_v20  ;;  %v19582_v47 = vand.u32 4294901760, %v19581_v28  ;;  %v19591_v28 = vld [vmem:[#allocation83_spill] sm:$0xff] }
 0x40c   : > { %10497 = vmatprep.subr.bf16.mxu0 %v16187_v38  ;;  %19575 = vst [vmem:[#allocation53_spill] sm:$0xff] %v16201_v61  ;;  %v8553_v41 = vadd.f32 %v8552_v56, %v8551_v36  ;;  %v19586_v36 = vld [vmem:[#allocation42_spill] sm:$0xff] }
 0x40d   : > { %19580 = vst [vmem:[#allocation51_spill] sm:$0xff] %v16208_v15  ;;  %v16215_v48 = vpack.c.bf16 %v19584_v54, %v19582_v47  ;;  %v19587_v56 = vand.u32 4294901760, %v19586_v36  ;;  %v19594_v36 = vld [vmem:[#allocation61_spill] sm:$0xff] }
 0x40e   : > { %10539 = vmatpush3.bf16.msra.mxu1 %v10538_v62 }
 0x40f   : > { %10499 = vmatpush3.bf16.msra.mxu0 %v16194_v42  ;;  %19585 = vst [vmem:[#allocation35_spill] sm:$0xff] %v16215_v48  ;;  %10573 = vmatprep.subr.bf16.mxu1 %v16055_v29  ;;  %v16223_v12 = vpack.c.bf16 %v19589_v45, %v19587_v56 }
 0x410   : > { %10501 = vmatprep.subr.bf16.mxu0 %v16201_v61 }
 0x411   : > { %19590 = vst [vmem:[#allocation87_spill] sm:$0xff] %v16223_v12 }
 0x412   : > { %v8516_v21 = vpop.f32.mrb[24].mxu0 }
 0x413   : > { %10503 = vmatpush3.bf16.msra.mxu0 %v16208_v15  ;;  %v8517_v62 = vpop.f32.mrb[25].mxu0 }
 0x414   : > { %10505 = vmatprep.subr.bf16.mxu0 %v16215_v48  ;;  %v8518_v53 = vadd.f32 %v8517_v62, %v8516_v21  ;;  %v19595_v21 = vld [vmem:[#allocation52_spill] sm:$0xff] }
 0x416   : > { %v4186_v20 = vadd.f32 %v8518_v53, %v15918_v19 }
 0x417   : > { %10507 = vmatpush3.bf16.msra.mxu0 %v16223_v12 }
 0x418   : > { %10541 = vmatprep.subr.bf16.mxu0 %v10540_v30  ;;  %v4418_v25 = vadd.f32 %v8553_v41, %v4186_v20 }
 0x421   : > { %v310_v13 = vpop.permute.xlu1 %309 }
 0x422   : > { %v321_v2 = vsel %vm317_vm1, %v19591_v28, %v310_v13  ;;  %v16233_v54 = vpop.permute.xlu0 %311 }
 0x423   : > { %19593 = vst [vmem:[#allocation79_spill] sm:$0xff] %v16233_v54  ;;  %v346_v56 = vmax.f32 %v19594_v36, %v321_v2  ;;  %v320_v51 = vsel %vm317_vm1, %v310_v13, %v16233_v54  ;;  %v19597_v54 = vpack.c.bf16 %v15571_v23, %v15559_v11 }
 0x424   : > { %v347_v45 = vmax.f32 %v19595_v21, %v320_v51 }
 0x425   : > { %v362_v19 = vmax.f32 %v346_v56, 0.0 }
 0x426   : > { %v363_v62 = vmax.f32 %v347_v45, 0.0 }
 0x427   : > { %v16240_v53 = vand.u32 4294901760, %v362_v19 }
 0x428   : > { %v16242_v41 = vand.u32 4294901760, %v363_v62 }
 0x429   : > { %19596 = vst [vmem:[#allocation78_spill] sm:$0xff] %v16240_v53  ;;  %v16245_v30 = vsub.f32 %v362_v19, %v16240_v53 }
 0x42a   : > { %v5898_v20 = vsub.f32 %v363_v62, %v16242_v41  ;;  %6138 = vmatprep.mubr.f32.mxu1 %v16242_v41 }
 0x42b   : > { %v8621_v28 = vpop.f32.mrb[26].mxu1  ;;  %v17928_v2 = vand.u32 4294901760, %v16245_v30  ;;  %6140 = vmatmul.mubr.f32.vlgmr.msra.gmra.mrb[36].mxu1 %v16240_v53 }
 0x42c   : > { %v8622_v36 = vpop.f32.mrb[27].mxu1  ;;  %10575 = vmatpush3.bf16.msra.mxu1 %v16080_v43  ;;  %v5899_v56 = vand.u32 4294901760, %v5898_v20 }
 0x42d   : > { %v8623_v13 = vadd.f32 %v8622_v36, %v8621_v28  ;;  %10577 = vmatprep.subr.bf16.mxu1 %v16087_v0  ;;  %v5906_v51 = vsub.f32 %v16245_v30, %v17928_v2  ;;  %v16306_v2 = vld [vmem:[#allocation5 + $0x7f8] sm:$0xff] }
 0x42e   : > { %6382 = vmatprep.mubr.f32.mxu1 %v5899_v56  ;;  %v5900_v21 = vsub.f32 %v5898_v20, %v5899_v56  ;;  %v19598_v56 = vpack.c.bf16 %v15581_v26, %v15576_v57  ;;  %19610 = vst [vmem:[#allocation11_spill] sm:$0xff] %v16306_v2 }
 0x42f   : > { %v5907_v45 = vand.u32 4294901760, %v5906_v51 }
 0x430   : > { %10579 = vmatpush3.bf16.msra.mxu1 %v16107_v40  ;;  %v5901_v19 = vand.u32 4294901760, %v5900_v21  ;;  %v19599_v21 = vpack.c.bf16 %v15595_v6, %v15590_v17 }
 0x431   : > { %10581 = vmatprep.subr.bf16.mxu1 %v16121_v22 }
 0x432   : > { %5902 = vmatprep.mubr.f32.mxu0 %v5901_v19  ;;  %v16282_v19 = vld [vmem:[#allocation5 + $0x7e8] sm:$0xff] }
 0x433   : > { %5908 = vmatmul.mubr.f32.vlgmr.msra.gmra.mrb[36].mxu0 %v5907_v45  ;;  %19603 = vst [vmem:[#allocation40_spill] sm:$0xff] %v16282_v19  ;;  %v19615_v53 = vand.u32 4294901760, %v16282_v19 }
 0x434   : > { %v8586_v62 = vpop.f32.mrb[26].mxu0  ;;  %10543 = vmatpush3.bf16.msra.mxu0 %v19597_v54  ;;  %10583 = vmatpush3.bf16.msra.mxu1 %v16133_v49  ;;  %v19600_v54 = vpack.c.bf16 %v15606_v27, %v15600_v50 }
 0x435   : > { %v8587_v28 = vpop.f32.mrb[27].mxu0  ;;  %6275 = vmatprep.mubr.f32.mxu0 %v5898_v20  ;;  %10545 = vmatprep.subr.bf16.mxu0 %v19598_v56  ;;  %v19601_v20 = vpack.c.bf16 %v19484_v60, %v15616_v4  ;;  %v16308_v56 = vld [vmem:[#allocation5 + $0x770] sm:$0xff] }
 0x436   : > { %v8588_v36 = vadd.f32 %v8587_v28, %v8586_v62  ;;  %10585 = vmatprep.subr.bf16.mxu1 %v16140_v24  ;;  %v16288_v62 = vld [vmem:[#allocation5 + $0x760] sm:$0xff]  ;;  %v16290_v28 = vld [vmem:[#allocation5 + $0x768] sm:$0xff]  ;;  %19611 = vst [vmem:[#allocation72_spill] sm:$0xff] %v16308_v56 }
 0x437   : > { %19605 = vst [vmem:[#allocation25_spill] sm:$0xff] %v16288_v62  ;;  %19606 = vst [vmem:[#allocation67_spill] sm:$0xff] %v16290_v28 }
 0x438   : > { %v4556_v51 = vadd.f32 %v8588_v36, %v4418_v25  ;;  %10547 = vmatpush3.bf16.msra.mxu0 %v19599_v21  ;;  %10587 = vmatpush3.bf16.msra.mxu1 %v16160_v7  ;;  %v16280_v25 = vld [vmem:[#allocation5 + $0x7e0] sm:$0xff]  ;;  %v16310_v36 = vld [vmem:[#allocation5 + $0x778] sm:$0xff] }
 0x439   : > { %10549 = vmatprep.subr.bf16.mxu0 %v19600_v54  ;;  %10589 = vmatprep.subr.bf16.mxu1 %v16166_v34  ;;  %19602 = vst [vmem:[#allocation68_spill] sm:$0xff] %v16280_v25  ;;  %v19608_v54 = vpack.c.bf16 %v19502_v5, %v19501_v37  ;;  %19612 = vst [vmem:[#allocation36_spill] sm:$0xff] %v16310_v36 }
 0x43a   : > { %v16270_v45 = vadd.f32 %v8623_v13, %v4556_v51  ;;  %v19604_v13 = vpack.c.bf16 %v19491_v33, %v19490_v32  ;;  %v19607_v51 = vpack.c.bf16 %v19500_v44, %v19499_v55 }
 0x43c   : > { %10551 = vmatpush3.bf16.msra.mxu0 %v19601_v20  ;;  %10591 = vmatpush3.bf16.msra.mxu1 %v16180_v14  ;;  %v19617_v20 = vpack.c.bf16 %v19506_v9, %v19505_v52 }
 0x43d   : > { %10553 = vmatprep.subr.bf16.mxu0 %v19604_v13  ;;  %10593 = vmatprep.subr.bf16.mxu1 %v16187_v38  ;;  %v16304_v13 = vld [vmem:[#allocation5 + $0x7f0] sm:$0xff]  ;;  %v19623_v38 = vand.u32 4294901760, %v16306_v2 }
 0x43e   : > { %19609 = vst [vmem:[#allocation70_spill] sm:$0xff] %v16304_v13 }
 0x440   : > { %10555 = vmatpush3.bf16.msra.mxu0 %v19607_v51  ;;  %10595 = vmatpush3.bf16.msra.mxu1 %v16194_v42  ;;  %v19613_v51 = vand.u32 4294901760, %v16280_v25 }
 0x441   : > { %10557 = vmatprep.subr.bf16.mxu0 %v19608_v54  ;;  %10597 = vmatprep.subr.bf16.mxu1 %v16201_v61  ;;  %v16320_v54 = vsub.f32 %v16282_v19, %v19615_v53  ;;  %v19618_v61 = vand.u32 4294901760, %v16288_v62  ;;  %v19620_v53 = vand.u32 4294901760, %v16290_v28 }
 0x442   : > { %v16315_v21 = vsub.f32 %v16280_v25, %v19613_v51  ;;  %v19619_v25 = vpack.c.bf16 %v19509_v18, %v19508_v31  ;;  %v16365_v51 = vsub.f32 %v16306_v2, %v19623_v38  ;;  %v19626_v38 = vand.u32 4294901760, %v16310_v36 }
 0x443   : > { %19616 = vst [vmem:[#allocation19_spill] sm:$0xff] %v16320_v54  ;;  %v16329_v42 = vsub.f32 %v16288_v62, %v19618_v61  ;;  %v16344_v62 = vld [vmem:[#allocation5 + $0x780] sm:$0xff]  ;;  %v19622_v61 = vand.u32 4294901760, %v16304_v13 }
 0x444   : > { %19614 = vst [vmem:[#allocation73_spill] sm:$0xff] %v16315_v21  ;;  %10559 = vmatpush3.bf16.msra.mxu0 %v19617_v20  ;;  %10599 = vmatpush3.bf16.msra.mxu1 %v16208_v15  ;;  %v16340_v20 = vsub.f32 %v16290_v28, %v19620_v53  ;;  %v16354_v53 = vld [vmem:[#allocation5 + $0x700] sm:$0xff]  ;;  %v16384_v2 = vsub.f32 %v16310_v36, %v19626_v38  ;;  %v19630_v15 = vand.u32 4294901760, %v16245_v30 }
 0x445   : > { %10561 = vmatprep.subr.bf16.mxu0 %v19619_v25  ;;  %10601 = vmatprep.subr.bf16.mxu1 %v16215_v48  ;;  %v19621_v25 = vpack.c.bf16 %v15760_v58, %v15755_v3  ;;  %v16352_v48 = vld [vmem:[#allocation5 + $0x788] sm:$0xff]  ;;  %v16360_v28 = vsub.f32 %v16304_v13, %v19622_v61  ;;  %v19624_v3 = vpack.c.bf16 %v15796_v16, %v15791_v35  ;;  %v19625_v61 = vand.u32 4294901760, %v16308_v56 }
 0x446   : > { %v16371_v58 = vld [vmem:[#allocation5 + $0x708] sm:$0xff]  ;;  %v19627_v35 = vand.u32 4294901760, %v16315_v21  ;;  %v19628_v16 = vand.u32 4294901760, %v16320_v54  ;;  %v16403_v54 = vld [vmem:[#allocation5 + $0x710] sm:$0xff]  ;;  %v17949_v21 = vand.u32 4294901760, %v16365_v51 }
 0x447   : > { %v16379_v13 = vsub.f32 %v16308_v56, %v19625_v61  ;;  %v19631_v61 = vand.u32 4294901760, %v15891_v63  ;;  %v19632_v56 = vand.u32 4294901760, %v15896_v39  ;;  %v17954_v63 = vand.u32 4294901760, %v16371_v58 }
 0x448   : > { %10563 = vmatpush3.bf16.msra.mxu0 %v19621_v25  ;;  %10603 = vmatpush3.bf16.msra.mxu1 %v16223_v12  ;;  %v16373_v25 = vld [vmem:[#allocation5 + $0x790] sm:$0xff]  ;;  %v16393_v12 = vld [vmem:[#allocation5 + $0x798] sm:$0xff] }
 0x449   : > { %10565 = vmatprep.subr.bf16.mxu0 %v19624_v3  ;;  %10637 = vmatprep.subr.bf16.mxu1 %v16055_v29  ;;  %v16390_v29 = vpack.c.bf16 %v19628_v16, %v19627_v35  ;;  %v10604_v38 = vpack.c.bf16 %v19632_v56, %v19631_v61  ;;  %v19633_v35 = vand.u32 4294901760, %v16329_v42  ;;  %v19634_v16 = vand.u32 4294901760, %v16340_v20  ;;  %v16417_v56 = vld [vmem:[#allocation5 + $0x718] sm:$0xff] }
 0x44a   : > { %v17953_v39 = vand.u32 4294901760, %v16373_v25  ;;  %v17950_v61 = vand.u32 4294901760, %v16360_v28 }
 0x44b   : > { %19629 = vst [vmem:[#allocation86_spill] sm:$0xff] %v16390_v29  ;;  %v8691_v19 = vpop.f32.mrb[28].mxu1  ;;  %6386 = vmatmul.mubr.f32.vlgmr.msra.gmra.mrb[38].mxu1 %v19630_v15  ;;  %v16409_v3 = vpack.c.bf16 %v19634_v16, %v19633_v35  ;;  %v19636_v15 = vpack.c.bf16 %v19482_v10, %v15803_v1  ;;  %v19637_v35 = vpack.c.bf16 %v19487_v46, %v19486_v8  ;;  %v17952_v10 = vand.u32 4294901760, %v16379_v13 }
 0x44c   : > { %v8692_v29 = vpop.f32.mrb[29].mxu1  ;;  %10639 = vmatpush3.bf16.msra.mxu1 %v16080_v43  ;;  %6656 = vmatprep.mubr.f32.mxu1 %v16242_v41  ;;  %v17951_v43 = vand.u32 4294901760, %v16384_v2  ;;  %v19638_v16 = vand.u32 4294901760, %v16344_v62  ;;  %v16439_v8 = vpack.c.bf16 %v17949_v21, %v17950_v61  ;;  %v19640_v46 = vand.u32 4294901760, %v16352_v48 }
 0x44d   : > { %19635 = vst [vmem:[#allocation91_spill] sm:$0xff] %v16409_v3  ;;  %10567 = vmatpush3.bf16.msra.mxu0 %v19636_v15  ;;  %v8693_v36 = vadd.f32 %v8692_v29, %v8691_v19  ;;  %10641 = vmatprep.subr.bf16.mxu1 %v16087_v0  ;;  %v19645_v21 = vand.u32 4294901760, %v15559_v11  ;;  %v19646_v61 = vand.u32 4294901760, %v15571_v23  ;;  %v19647_v1 = vand.u32 4294901760, %v16354_v53 }
 0x44e   : > { %10569 = vmatprep.subr.bf16.mxu0 %v19637_v35  ;;  %v16432_v15 = vsub.f32 %v16344_v62, %v19638_v16  ;;  %19639 = vst [vmem:[#allocation43_spill] sm:$0xff] %v16439_v8  ;;  %v16444_v29 = vsub.f32 %v16352_v48, %v19640_v46  ;;  %v16451_v35 = vpack.c.bf16 %v17951_v43, %v17952_v10  ;;  %v19643_v16 = vld [vmem:[#allocation93_spill] sm:$0xff]  ;;  %v19651_v11 = vand.u32 4294901760, %v15581_v26 }
 0x44f   : > { %v19644_v19 = vpack.c.bf16 %v19493_v59, %v19643_v16  ;;  %v10606_v46 = vpack.c.bf16 %v19646_v61, %v19645_v21  ;;  %v16464_v0 = vsub.f32 %v16354_v53, %v19647_v1  ;;  %v16469_v43 = vsub.f32 %v16371_v58, %v17954_v63  ;;  %v16486_v1 = vld [vmem:[#allocation5 + $0x7a0] sm:$0xff]  ;;  %v16505_v63 = vpop.permute.xlu1 %313 }
 0x450   : > { %19641 = vst [vmem:[#allocation48_spill] sm:$0xff] %v16444_v29  ;;  %19642 = vst [vmem:[#allocation29_spill] sm:$0xff] %v16451_v35  ;;  %10643 = vmatpush3.bf16.msra.mxu1 %v16107_v40  ;;  %v19650_v59 = vand.u32 4294901760, %v15576_v57  ;;  %v16479_v23 = vsub.f32 %v16373_v25, %v17953_v39  ;;  %v19653_v21 = vand.u32 4294901760, %v16393_v12  ;;  %v19655_v57 = vand.u32 4294901760, %v16403_v54 }
 0x451   : > { %10571 = vmatpush3.bf16.msra.mxu0 %v19644_v19  ;;  %19648 = vst [vmem:[#allocation24_spill] sm:$0xff] %v16464_v0  ;;  %19649 = vst [vmem:[#allocation13_spill] sm:$0xff] %v16469_v43  ;;  %10645 = vmatprep.subr.bf16.mxu1 %v16121_v22  ;;  %v19657_v16 = vand.u32 4294901760, %v15590_v17  ;;  %v19659_v10 = vand.u32 4294901760, %v16417_v56 }
 0x452   : > { %10605 = vmatprep.subr.bf16.mxu0 %v10604_v38  ;;  %v10608_v40 = vpack.c.bf16 %v19651_v11, %v19650_v59  ;;  %19652 = vst [vmem:[#allocation44_spill] sm:$0xff] %v16479_v23  ;;  %v16484_v61 = vsub.f32 %v16393_v12, %v19653_v21  ;;  %v16492_v26 = vsub.f32 %v16403_v54, %v19655_v57  ;;  %v19658_v59 = vand.u32 4294901760, %v15595_v6  ;;  %v16510_v57 = vld [vmem:[#allocation5 + $0x7a8] sm:$0xff] }
 0x453   : > { %v17955_v21 = vand.u32 4294901760, %v16444_v29  ;;  %v16503_v39 = vsub.f32 %v16417_v56, %v19659_v10  ;;  %v19661_v10 = vand.u32 4294901760, %v15600_v50  ;;  %v19664_v6 = vand.u32 4294901760, %v19484_v60 }
 0x454   : > { %19654 = vst [vmem:[#allocation39_spill] sm:$0xff] %v16484_v61  ;;  %v8656_v38 = vpop.f32.mrb[28].mxu0  ;;  %19656 = vst [vmem:[#allocation54_spill] sm:$0xff] %v16492_v26  ;;  %6278 = vmatmul.mubr.f32.vlgmr.msra.gmra.mrb[38].mxu0 %v16245_v30  ;;  %v10610_v11 = vpack.c.bf16 %v19658_v59, %v19657_v16  ;;  %v17956_v30 = vand.u32 4294901760, %v16464_v0  ;;  %10647 = vmatpush3.bf16.msra.mxu1 %v16133_v49  ;;  %v19662_v16 = vand.u32 4294901760, %v15606_v27  ;;  %v19665_v49 = vand.u32 4294901760, %v16432_v15 }
 0x455   : > { %v8657_v19 = vpop.f32.mrb[29].mxu0  ;;  %19660 = vst [vmem:[#allocation85_spill] sm:$0xff] %v16503_v39  ;;  %10607 = vmatpush3.bf16.msra.mxu0 %v10606_v46  ;;  %6552 = vmatprep.mubr.f32.mxu0 %v16242_v41  ;;  %v17958_v46 = vand.u32 4294901760, %v16479_v23  ;;  %v17957_v41 = vand.u32 4294901760, %v16484_v61  ;;  %v17959_v27 = vand.u32 4294901760, %v16492_v26 }
 0x456   : > { %v8658_v22 = vadd.f32 %v8657_v19, %v8656_v38  ;;  %10609 = vmatprep.subr.bf16.mxu0 %v10608_v40  ;;  %v10612_v59 = vpack.c.bf16 %v19662_v16, %v19661_v10  ;;  %10649 = vmatprep.subr.bf16.mxu1 %v16140_v24  ;;  %v19663_v19 = vand.u32 4294901760, %v15616_v4  ;;  %v6891_v50 = vsub.f32 %v16432_v15, %v19665_v49  ;;  %v16530_v40 = vld [vmem:[#allocation5 + $0x720] sm:$0xff]  ;;  %v19666_v10 = vld [vmem:[#allocation30_spill] sm:$0xff] }
 0x457   : > { %v6898_v4 = vsub.f32 %v16444_v29, %v17955_v21  ;;  %v19731_v29 = vand.u32 4294901760, %v16371_v58 }
 0x458   : > { %v4832_v38 = vadd.f32 %v8658_v22, %v16270_v45  ;;  %v10614_v17 = vpack.c.bf16 %v19664_v6, %v19663_v19  ;;  %v318_v45 = vsel %vm317_vm1, %v16505_v63, %v19666_v10  ;;  %v6779_v22 = vsub.f32 %v16464_v0, %v17956_v30  ;;  %v16552_v10 = vld [vmem:[#allocation5 + $0x728] sm:$0xff]  ;;  %10651 = vmatpush3.bf16.msra.mxu1 %v16160_v7 }
 0x459   : > { %10611 = vmatpush3.bf16.msra.mxu0 %v10610_v11  ;;  %v19667_v6 = vand.u32 4294901760, %v16469_v43  ;;  %v19668_v19 = vand.u32 4294901760, %v16486_v1  ;;  %v19671_v11 = vand.u32 4294901760, %v19490_v32  ;;  %v19672_v30 = vand.u32 4294901760, %v19491_v33  ;;  %10653 = vmatprep.subr.bf16.mxu1 %v16166_v34 }
 0x45a   : > { %v16554_v21 = vadd.f32 %v8693_v36, %v4832_v38  ;;  %10613 = vmatprep.subr.bf16.mxu0 %v10612_v59  ;;  %v19673_v36 = vld [vmem:[#allocation28_spill] sm:$0xff]  ;;  %v19674_v7 = vand.u32 4294901760, %v19499_v55  ;;  %v19675_v32 = vand.u32 4294901760, %v19500_v44  ;;  %v19677_v59 = vand.u32 4294901760, %v19502_v5 }
 0x45b   : > { %v6786_v16 = vsub.f32 %v16469_v43, %v19667_v6  ;;  %v16550_v49 = vsub.f32 %v16486_v1, %v19668_v19  ;;  %v10616_v24 = vpack.c.bf16 %v19672_v30, %v19671_v11  ;;  %v6905_v6 = vsub.f32 %v16479_v23, %v17958_v46  ;;  %v16581_v46 = vld [vmem:[#allocation5 + $0x7b0] sm:$0xff]  ;;  %v16592_v5 = vld [vmem:[#allocation5 + $0x7b8] sm:$0xff] }
 0x45c   : > { %19670 = vst [vmem:[#allocation34_spill] sm:$0xff] %v16554_v21  ;;  %v6912_v19 = vsub.f32 %v16484_v61, %v17957_v41  ;;  %v349_v38 = vmax.f32 %v19673_v36, %v318_v45  ;;  %v10618_v33 = vpack.c.bf16 %v19675_v32, %v19674_v7  ;;  %v19676_v30 = vand.u32 4294901760, %v19501_v37  ;;  %10655 = vmatpush3.bf16.msra.mxu1 %v16180_v14  ;;  %v19691_v14 = vld [vmem:[#allocation50_spill] sm:$0xff]  ;;  %v19714_v61 = vld [vmem:[#allocation87_spill] sm:$0xff] }
 0x45d   : > { %19669 = vst [vmem:[#allocation74_spill] sm:$0xff] %v16550_v49  ;;  %v6793_v41 = vsub.f32 %v16492_v26, %v17959_v27  ;;  %v6892_v60 = vand.u32 4294901760, %v6891_v50  ;;  %v19678_v45 = vand.u32 4294901760, %v16503_v39  ;;  %v19679_v55 = vand.u32 4294901760, %v16510_v57  ;;  %10615 = vmatpush3.bf16.msra.mxu0 %v10614_v17  ;;  %v16595_v50 = vld [vmem:[#allocation5 + $0x730] sm:$0xff] }
 0x45e   : > { %v10620_v11 = vpack.c.bf16 %v19677_v59, %v19676_v30  ;;  %v6899_v36 = vand.u32 4294901760, %v6898_v4  ;;  %v6780_v7 = vand.u32 4294901760, %v6779_v22  ;;  %v6787_v32 = vand.u32 4294901760, %v6786_v16  ;;  %10617 = vmatprep.subr.bf16.mxu0 %v10616_v24  ;;  %v19683_v4 = vld [vmem:[#allocation59_spill] sm:$0xff]  ;;  %v16610_v24 = vld [vmem:[#allocation5 + $0x738] sm:$0xff] }
 0x45f   : > { %v6800_v34 = vsub.f32 %v16503_v39, %v19678_v45  ;;  %v16589_v44 = vsub.f32 %v16510_v57, %v19679_v55  ;;  %v6906_v59 = vand.u32 4294901760, %v6905_v6  ;;  %v6913_v45 = vand.u32 4294901760, %v6912_v19  ;;  %10657 = vmatprep.subr.bf16.mxu1 %v19683_v4  ;;  %v16619_v4 = vld [vmem:[#allocation5 + $0x7c0] sm:$0xff]  ;;  %v19711_v39 = vld [vmem:[#allocation26_spill] sm:$0xff] }
 0x460   : > { %v19681_v55 = vand.u32 4294901760, %v16530_v40  ;;  %v365_v17 = vmax.f32 %v349_v38, 0.0  ;;  %v19684_v22 = vand.u32 4294901760, %v19505_v52  ;;  %v19685_v16 = vand.u32 4294901760, %v19506_v9  ;;  %v16621_v52 = vld [vmem:[#allocation5 + $0x7c8] sm:$0xff]  ;;  %10659 = vmatpush3.bf16.msra.mxu1 %v19691_v14 }
 0x461   : > { %19680 = vst [vmem:[#allocation81_spill] sm:$0xff] %v16589_v44  ;;  %v6794_v35 = vand.u32 4294901760, %v6793_v41  ;;  %v6801_v6 = vand.u32 4294901760, %v6800_v34  ;;  %10619 = vmatpush3.bf16.msra.mxu0 %v10618_v33  ;;  %v19688_v9 = vand.u32 4294901760, %v19508_v31  ;;  %v19689_v41 = vand.u32 4294901760, %v19509_v18 }
 0x462   : > { %v16601_v27 = vsub.f32 %v16530_v40, %v19681_v55  ;;  %v10622_v30 = vpack.c.bf16 %v19685_v16, %v19684_v22  ;;  %v19686_v55 = vand.u32 4294901760, %v16552_v10  ;;  %v10700_v34 = vpack.c.bf16 %v6899_v36, %v6892_v60  ;;  %10621 = vmatprep.subr.bf16.mxu0 %v10620_v11  ;;  %v16642_v60 = vld [vmem:[#allocation5 + $0x740] sm:$0xff]  ;;  %v16644_v36 = vld [vmem:[#allocation5 + $0x748] sm:$0xff] }
 0x463   : > { %v10624_v22 = vpack.c.bf16 %v19689_v41, %v19688_v9  ;;  %v16627_v16 = vpack.c.bf16 %v6787_v32, %v6780_v7  ;;  %v19690_v19 = vand.u32 4294901760, %v16550_v49  ;;  %v16633_v38 = vpack.c.bf16 %v6913_v45, %v6906_v59  ;;  %v19695_v32 = vld [vmem:[#allocation53_spill] sm:$0xff]  ;;  %v16658_v9 = vld [vmem:[#allocation5 + $0x7d8] sm:$0xff] }
 0x464   : > { %19682 = vst [vmem:[#allocation76_spill] sm:$0xff] %v16601_v27  ;;  %v16616_v37 = vsub.f32 %v16552_v10, %v19686_v55  ;;  %v19692_v33 = vand.u32 4294901760, %v16581_v46  ;;  %v16646_v7 = vand.u32 4294901760, %v365_v17  ;;  %10661 = vmatprep.subr.bf16.mxu1 %v19695_v32  ;;  %v19696_v11 = vand.u32 4294901760, %v16592_v5 }
 0x465   : > { %v6919_v55 = vsub.f32 %v16550_v49, %v19690_v19  ;;  %v16656_v19 = vld [vmem:[#allocation5 + $0x7d0] sm:$0xff]  ;;  %v16660_v41 = vpack.c.bf16 %v6801_v6, %v6794_v35  ;;  %v19698_v18 = vand.u32 4294901760, %v16595_v50  ;;  %10623 = vmatpush3.bf16.msra.mxu0 %v10622_v30  ;;  %v19700_v14 = vand.u32 4294901760, %v16344_v62 }
 0x466   : > { %19687 = vst [vmem:[#allocation14_spill] sm:$0xff] %v16616_v37  ;;  %v16639_v31 = vsub.f32 %v16581_v46, %v19692_v33  ;;  %19694 = vst [vmem:[#allocation45_spill] sm:$0xff] %v16646_v7  ;;  %v16652_v59 = vsub.f32 %v16592_v5, %v19696_v11  ;;  %v19697_v33 = vand.u32 4294901760, %v16589_v44  ;;  %v19701_v45 = vand.u32 4294901760, %v16352_v48  ;;  %10625 = vmatprep.subr.bf16.mxu0 %v10624_v22 }
 0x467   : > { %v16669_v11 = vsub.f32 %v16595_v50, %v19698_v18  ;;  %v6920_v35 = vand.u32 4294901760, %v6919_v55  ;;  %v19703_v18 = vand.u32 4294901760, %v16610_v24  ;;  %v16690_v55 = vld [vmem:[#allocation5 + $0x758] sm:$0xff]  ;;  %v19706_v32 = vand.u32 4294901760, %v16619_v4 }
 0x468   : > { %19693 = vst [vmem:[#allocation63_spill] sm:$0xff] %v16639_v31  ;;  %v6926_v8 = vsub.f32 %v16589_v44, %v19697_v33  ;;  %v16675_v3 = vpack.c.bf16 %v19701_v45, %v19700_v14  ;;  %v19702_v33 = vld [vmem:[#allocation51_spill] sm:$0xff]  ;;  %v16693_v14 = vsub.f32 %v365_v17, %v16646_v7  ;;  %v19708_v62 = vand.u32 4294901760, %v16621_v52 }
 0x469   : > { %19699 = vst [vmem:[#allocation22_spill] sm:$0xff] %v16669_v11  ;;  %10663 = vmatpush3.bf16.msra.mxu1 %v19702_v33  ;;  %v16684_v30 = vsub.f32 %v16610_v24, %v19703_v18  ;;  %v16688_v45 = vld [vmem:[#allocation5 + $0x750] sm:$0xff]  ;;  %v16700_v18 = vsub.f32 %v16619_v4, %v19706_v32  ;;  %v19709_v6 = vand.u32 4294901760, %v16601_v27  ;;  %v19710_v44 = vand.u32 4294901760, %v16616_v37  ;;  %10627 = vmatpush3.bf16.msra.mxu0 %v19711_v39 }
 0x46a   : > { %v19705_v33 = vld [vmem:[#allocation35_spill] sm:$0xff]  ;;  %v16705_v48 = vsub.f32 %v16621_v52, %v19708_v62  ;;  %v6927_v49 = vand.u32 4294901760, %v6926_v8  ;;  %v19712_v32 = vand.u32 4294901760, %v16642_v60  ;;  %v19713_v62 = vand.u32 4294901760, %v16644_v36 }
 0x46b   : > { %19704 = vst [vmem:[#allocation46_spill] sm:$0xff] %v16684_v30  ;;  %10665 = vmatprep.subr.bf16.mxu1 %v19705_v33  ;;  %19707 = vst [vmem:[#allocation47_spill] sm:$0xff] %v16700_v18  ;;  %v6807_v17 = vsub.f32 %v16601_v27, %v19709_v6  ;;  %v6814_v33 = vsub.f32 %v16616_v37, %v19710_v44  ;;  %v19715_v44 = vld [vmem:[#allocation17_spill] sm:$0xff]  ;;  %v19716_v39 = vand.u32 4294901760, %v16639_v31  ;;  %v19717_v37 = vand.u32 4294901760, %v16656_v19 }
 0x46c   : > { %v16718_v26 = vsub.f32 %v16642_v60, %v19712_v32  ;;  %v16723_v8 = vsub.f32 %v16644_v36, %v19713_v62  ;;  %10629 = vmatprep.subr.bf16.mxu0 %v19715_v44  ;;  %v19718_v62 = vand.u32 4294901760, %v16658_v9  ;;  %v19719_v44 = vand.u32 4294901760, %v16652_v59 }
 0x46d   : > { %10667 = vmatpush3.bf16.msra.mxu1 %v19714_v61  ;;  %v6933_v22 = vsub.f32 %v16639_v31, %v19716_v39  ;;  %v16736_v23 = vsub.f32 %v16656_v19, %v19717_v37  ;;  %v10708_v31 = vpack.c.bf16 %v6927_v49, %v6920_v35  ;;  %v6808_v43 = vand.u32 4294901760, %v6807_v17 }
 0x46e   : > { %v16741_v6 = vsub.f32 %v16658_v9, %v19718_v62  ;;  %10701 = vmatprep.subr.bf16.mxu1 %v10700_v34  ;;  %v6940_v27 = vsub.f32 %v16652_v59, %v19719_v44  ;;  %v6815_v37 = vand.u32 4294901760, %v6814_v33  ;;  %v19720_v0 = vand.u32 4294901760, %v16669_v11  ;;  %v19721_v62 = vld [vmem:[#allocation78_spill] sm:$0xff]  ;;  %v19722_v34 = vld [vmem:[#allocation31_spill] sm:$0xff] }
 0x46f   : > { %10631 = vmatpush3.bf16.msra.mxu0 %v19722_v34  ;;  %v19723_v44 = vand.u32 4294901760, %v16688_v45  ;;  %v19724_v49 = vand.u32 4294901760, %v16690_v55  ;;  %v19725_v17 = vand.u32 4294901760, %v16684_v30  ;;  %v19728_v32 = vand.u32 4294901760, %v16700_v18 }
 0x470   : > { %v6821_v21 = vsub.f32 %v16669_v11, %v19720_v0  ;;  %6658 = vmatmul.mubr.f32.vlgmr.msra.gmra.mrb[40].mxu1 %v19721_v62  ;;  %v6934_v0 = vand.u32 4294901760, %v6933_v22  ;;  %v19730_v34 = vand.u32 4294901760, %v16354_v53  ;;  %v19734_v11 = vld [vmem:[#allocation84_spill] sm:$0xff]  ;;  %v19752_v47 = vand.u32 4294901760, %v16592_v5 }
 0x471   : > { %v16759_v39 = vsub.f32 %v16688_v45, %v19723_v44  ;;  %v16764_v35 = vsub.f32 %v16690_v55, %v19724_v49  ;;  %10703 = vmatpush3.bf16.msra.mxu1 %v16627_v16  ;;  %7000 = vmatprep.mubr.f32.mxu1 %v16646_v7  ;;  %v6828_v33 = vsub.f32 %v16684_v30, %v19725_v17  ;;  %v19726_v44 = vld [vmem:[#allocation27_spill] sm:$0xff]  ;;  %v19727_v49 = vand.u32 4294901760, %v16693_v14 }
 0x472   : > { %10633 = vmatprep.subr.bf16.mxu0 %v19726_v44  ;;  %10705 = vmatprep.subr.bf16.mxu1 %v16633_v38  ;;  %v6941_v16 = vand.u32 4294901760, %v6940_v27  ;;  %v6947_v22 = vsub.f32 %v16700_v18, %v19728_v32  ;;  %v19729_v7 = vand.u32 4294901760, %v16705_v48  ;;  %v16788_v44 = vpack.c.bf16 %v19731_v29, %v19730_v34 }
 0x473   : > { %v6762_v61 = vsub.f32 %v16693_v14, %v19727_v49  ;;  %v10710_v38 = vpack.c.bf16 %v6815_v37, %v6808_v43  ;;  %v19732_v30 = vand.u32 4294901760, %v16373_v25  ;;  %v19733_v49 = vand.u32 4294901760, %v16393_v12  ;;  %10635 = vmatpush3.bf16.msra.mxu0 %v19734_v11 }
 0x474   : > { %v6954_v17 = vsub.f32 %v16705_v48, %v19729_v7  ;;  %v19735_v32 = vand.u32 4294901760, %v16718_v26  ;;  %v19736_v7 = vand.u32 4294901760, %v16723_v8  ;;  %v6848_v58 = vand.u32 4294901760, %v16759_v39  ;;  %10669 = vmatprep.subr.bf16.mxu0 %v16675_v3 }
 0x475   : > { %v16794_v27 = vpack.c.bf16 %v19733_v49, %v19732_v30  ;;  %10707 = vmatpush3.bf16.msra.mxu1 %v16660_v41  ;;  %v6822_v12 = vand.u32 4294901760, %v6821_v21  ;;  %v6829_v25 = vand.u32 4294901760, %v6828_v33  ;;  %v19737_v29 = vand.u32 4294901760, %v16736_v23 }
 0x476   : > { %v6835_v18 = vsub.f32 %v16718_v26, %v19735_v32  ;;  %v6842_v53 = vsub.f32 %v16723_v8, %v19736_v7  ;;  %v19738_v30 = vand.u32 4294901760, %v16741_v6  ;;  %10709 = vmatprep.subr.bf16.mxu1 %v10708_v31  ;;  %v6763_v34 = vand.u32 4294901760, %v6762_v61  ;;  %6554 = vmatmul.mubr.f32.vlgmr.msra.gmra.mrb[40].mxu0 %v19721_v62 }
 0x477   : > { %v6961_v11 = vsub.f32 %v16736_v23, %v19737_v29  ;;  %v10712_v49 = vpack.c.bf16 %v6941_v16, %v6934_v0  ;;  %v6948_v32 = vand.u32 4294901760, %v6947_v22  ;;  %v6955_v7 = vand.u32 4294901760, %v6954_v17  ;;  %10671 = vmatpush3.bf16.msra.mxu0 %v16788_v44  ;;  %v19744_v17 = vld [vmem:[#allocation79_spill] sm:$0xff] }
 0x478   : > { %v6968_v37 = vsub.f32 %v16741_v6, %v19738_v30  ;;  %v19739_v41 = vand.u32 4294901760, %v16403_v54  ;;  %v19740_v21 = vand.u32 4294901760, %v16417_v56  ;;  %6764 = vmatprep.mubr.f32.mxu0 %v6763_v34  ;;  %v6836_v29 = vand.u32 4294901760, %v6835_v18  ;;  %10673 = vmatprep.subr.bf16.mxu0 %v16794_v27  ;;  %v19745_v34 = vld [vmem:[#allocation73_spill] sm:$0xff] }
 0x479   : > { %v6843_v43 = vand.u32 4294901760, %v6842_v53  ;;  %v6849_v31 = vsub.f32 %v16759_v39, %v6848_v58  ;;  %v19741_v61 = vand.u32 4294901760, %v16764_v35  ;;  %10711 = vmatpush3.bf16.msra.mxu1 %v10710_v38  ;;  %v10714_v54 = vpack.c.bf16 %v6829_v25, %v6822_v12  ;;  %v19747_v12 = vld [vmem:[#allocation19_spill] sm:$0xff] }
 0x47a   : > { %v16818_v33 = vpack.c.bf16 %v19740_v21, %v19739_v41  ;;  %v19742_v56 = vand.u32 4294901760, %v16486_v1  ;;  %v19743_v62 = vand.u32 4294901760, %v16510_v57  ;;  %v6962_v18 = vand.u32 4294901760, %v6961_v11  ;;  %10713 = vmatprep.subr.bf16.mxu1 %v10712_v49 }
 0x47b   : > { %v6856_v0 = vsub.f32 %v16764_v35, %v19741_v61  ;;  %v6969_v22 = vand.u32 4294901760, %v6968_v37  ;;  %v319_v53 = vsel %vm317_vm1, %v19744_v17, %v16505_v63  ;;  %v10716_v30 = vpack.c.bf16 %v6955_v7, %v6948_v32 }
 0x47c   : > { %v16832_v16 = vpack.c.bf16 %v19743_v62, %v19742_v56  ;;  %v19746_v38 = vand.u32 4294901760, %v19745_v34  ;;  %v19748_v25 = vand.u32 4294901760, %v19747_v12  ;;  %v19749_v57 = vand.u32 4294901760, %v16530_v40  ;;  %10675 = vmatpush3.bf16.msra.mxu0 %v16818_v33  ;;  %v19754_v40 = vld [vmem:[#allocation58_spill] sm:$0xff] }
 0x47d   : > { %v19750_v11 = vand.u32 4294901760, %v16552_v10  ;;  %v19751_v21 = vand.u32 4294901760, %v16581_v46  ;;  %v10718_v49 = vpack.c.bf16 %v6843_v43, %v6836_v29  ;;  %v6850_v32 = vand.u32 4294901760, %v6849_v31  ;;  %10715 = vmatpush3.bf16.msra.mxu1 %v10714_v54 }
 0x47e   : > { %v6975_v41 = vsub.f32 %v19745_v34, %v19746_v38  ;;  %v6982_v1 = vsub.f32 %v19747_v12, %v19748_v25  ;;  %v6857_v7 = vand.u32 4294901760, %v6856_v0  ;;  %v19753_v61 = vand.u32 4294901760, %v16329_v42  ;;  %10677 = vmatprep.subr.bf16.mxu0 %v16832_v16  ;;  %10717 = vmatprep.subr.bf16.mxu1 %v10716_v30 }
 0x47f   : > { %v16848_v37 = vpack.c.bf16 %v19750_v11, %v19749_v57  ;;  %v16854_v63 = vpack.c.bf16 %v19752_v47, %v19751_v21  ;;  %v348_v62 = vmax.f32 %v19754_v40, %v319_v53  ;;  %v10720_v10 = vpack.c.bf16 %v6969_v22, %v6962_v18 }
 0x480   : > { %v6863_v56 = vsub.f32 %v16329_v42, %v19753_v61  ;;  %v19755_v46 = vand.u32 4294901760, %v16340_v20  ;;  %v6976_v17 = vand.u32 4294901760, %v6975_v41  ;;  %v6983_v38 = vand.u32 4294901760, %v6982_v1 }
 0x481   : > { %v19756_v43 = vand.u32 4294901760, %v16360_v28  ;;  %v19757_v31 = vand.u32 4294901760, %v16365_v51  ;;  %10679 = vmatpush3.bf16.msra.mxu0 %v16848_v37  ;;  %v19758_v54 = vand.u32 4294901760, %v16595_v50  ;;  %v19759_v18 = vand.u32 4294901760, %v16610_v24  ;;  %10719 = vmatpush3.bf16.msra.mxu1 %v10718_v49 }
 0x482   : > { %v6870_v5 = vsub.f32 %v16340_v20, %v19755_v46  ;;  %v10722_v53 = vpack.c.bf16 %v6857_v7, %v6850_v32  ;;  %v19760_v30 = vand.u32 4294901760, %v16619_v4  ;;  %v19761_v41 = vand.u32 4294901760, %v16621_v52  ;;  %10681 = vmatprep.subr.bf16.mxu0 %v16854_v63  ;;  %10721 = vmatprep.subr.bf16.mxu1 %v10720_v10 }
 0x483   : > { %v6989_v29 = vsub.f32 %v16360_v28, %v19756_v43  ;;  %v6996_v0 = vsub.f32 %v16365_v51, %v19757_v31  ;;  %v16876_v22 = vpack.c.bf16 %v19759_v18, %v19758_v54  ;;  %v6864_v1 = vand.u32 4294901760, %v6863_v56  ;;  %v19772_v18 = vld [vmem:[#allocation40_spill] sm:$0xff] }
 0x484   : > { %v16882_v25 = vpack.c.bf16 %v19761_v41, %v19760_v30  ;;  %v364_v57 = vmax.f32 %v348_v62, 0.0  ;;  %v6871_v11 = vand.u32 4294901760, %v6870_v5  ;;  %v19762_v21 = vand.u32 4294901760, %v16379_v13 }
 0x485   : > { %v19763_v24 = vand.u32 4294901760, %v16384_v2  ;;  %v10724_v4 = vpack.c.bf16 %v6983_v38, %v6976_v17  ;;  %v6990_v32 = vand.u32 4294901760, %v6989_v29  ;;  %v6997_v52 = vand.u32 4294901760, %v6996_v0  ;;  %10683 = vmatpush3.bf16.msra.mxu0 %v16876_v22  ;;  %10723 = vmatpush3.bf16.msra.mxu1 %v10722_v53  ;;  %v19770_v0 = vld [vmem:[#allocation68_spill] sm:$0xff] }
 0x486   : > { %v6877_v50 = vsub.f32 %v16379_v13, %v19762_v21  ;;  %v19764_v7 = vand.u32 4294901760, %v16642_v60  ;;  %v19765_v49 = vand.u32 4294901760, %v16644_v36  ;;  %v19766_v56 = vand.u32 4294901760, %v16656_v19  ;;  %10685 = vmatprep.subr.bf16.mxu0 %v16882_v25  ;;  %v8761_v36 = vpop.f32.mrb[30].mxu1 }
 0x487   : > { %v6884_v47 = vsub.f32 %v16384_v2, %v19763_v24  ;;  %v19767_v40 = vand.u32 4294901760, %v16658_v9  ;;  %v16904_v46 = vand.u32 4294901760, %v364_v57  ;;  %v10726_v10 = vpack.c.bf16 %v6871_v11, %v6864_v1  ;;  %10725 = vmatprep.subr.bf16.mxu1 %v10724_v4  ;;  %v8762_v29 = vpop.f32.mrb[31].mxu1  ;;  %v19776_v1 = vld [vmem:[#allocation67_spill] sm:$0xff] }
 0x488   : > { %v16896_v61 = vpack.c.bf16 %v19765_v49, %v19764_v7  ;;  %v6878_v5 = vand.u32 4294901760, %v6877_v50  ;;  %v10728_v60 = vpack.c.bf16 %v6997_v52, %v6990_v32  ;;  %v19768_v38 = vand.u32 4294901760, %v16688_v45  ;;  %v19774_v45 = vld [vmem:[#allocation25_spill] sm:$0xff]  ;;  %v19778_v50 = vld [vmem:[#allocation70_spill] sm:$0xff]  ;;  %v19782_v7 = vld [vmem:[#allocation72_spill] sm:$0xff] }
 0x489   : > { %v16902_v62 = vpack.c.bf16 %v19767_v40, %v19766_v56  ;;  %v6885_v17 = vand.u32 4294901760, %v6884_v47  ;;  %v19769_v19 = vand.u32 4294901760, %v16690_v55  ;;  %v16915_v43 = vsub.f32 %v364_v57, %v16904_v46  ;;  %10727 = vmatpush3.bf16.msra.mxu1 %v10726_v10  ;;  %v19780_v47 = vld [vmem:[#allocation11_spill] sm:$0xff]  ;;  %v19784_v56 = vld [vmem:[#allocation36_spill] sm:$0xff] }
 0x48a   : > { %10687 = vmatpush3.bf16.msra.mxu0 %v16896_v61  ;;  %v19771_v54 = vand.u32 4294901760, %v19770_v0  ;;  %v19773_v53 = vand.u32 4294901760, %v19772_v18  ;;  %v8763_v41 = vadd.f32 %v8762_v29, %v8761_v36  ;;  %10729 = vmatprep.subr.bf16.mxu1 %v10728_v60  ;;  %v19775_v55 = vand.u32 4294901760, %v19774_v45  ;;  %v19787_v36 = vld [vmem:[#allocation48_spill] sm:$0xff]  ;;  %v19788_v29 = vld [vmem:[#allocation34_spill] sm:$0xff] }
 0x48b   : > { %v16912_v9 = vpack.c.bf16 %v19769_v19, %v19768_v38  ;;  %10689 = vmatprep.subr.bf16.mxu0 %v16902_v62  ;;  %v10730_v31 = vpack.c.bf16 %v6885_v17, %v6878_v5  ;;  %v19777_v57 = vand.u32 4294901760, %v19776_v1  ;;  %v6767_v21 = vand.u32 4294901760, %v16915_v43  ;;  %v19789_v0 = vld [vmem:[#allocation24_spill] sm:$0xff] }
 0x48c   : > { %v16922_v30 = vpack.c.bf16 %v19773_v53, %v19771_v54  ;;  %v19779_v24 = vand.u32 4294901760, %v19778_v50  ;;  %v19781_v4 = vand.u32 4294901760, %v19780_v47  ;;  %v8726_v52 = vpop.f32.mrb[30].mxu0  ;;  %v19783_v49 = vand.u32 4294901760, %v19782_v7  ;;  %v19790_v54 = vld [vmem:[#allocation13_spill] sm:$0xff]  ;;  %v19791_v45 = vld [vmem:[#allocation44_spill] sm:$0xff] }
 0x48d   : > { %v16929_v11 = vpack.c.bf16 %v19777_v57, %v19775_v55  ;;  %10731 = vmatpush3.bf16.msra.mxu1 %v10730_v31  ;;  %v19785_v40 = vand.u32 4294901760, %v19784_v56  ;;  %v19786_v5 = vand.u32 4294901760, %v16693_v14  ;;  %v8727_v17 = vpop.f32.mrb[31].mxu0  ;;  %v6768_v60 = vsub.f32 %v16915_v43, %v6767_v21  ;;  %v19792_v55 = vld [vmem:[#allocation39_spill] sm:$0xff]  ;;  %v19793_v50 = vld [vmem:[#allocation54_spill] sm:$0xff] }
 0x48e   : > { %10691 = vmatpush3.bf16.msra.mxu0 %v16912_v9  ;;  %10765 = vmatprep.subr.bf16.mxu1 %v16675_v3  ;;  %v16938_v32 = vpack.c.bf16 %v19781_v4, %v19779_v24  ;;  %v10732_v38 = vpack.c.bf16 %v19787_v36, %v16432_v15  ;;  %v8728_v19 = vadd.f32 %v8727_v17, %v8726_v52  ;;  %v19794_v24 = vld [vmem:[#allocation85_spill] sm:$0xff]  ;;  %v19795_v4 = vld [vmem:[#allocation74_spill] sm:$0xff] }
 0x48f   : > { %10693 = vmatprep.subr.bf16.mxu0 %v16922_v30  ;;  %v16946_v10 = vpack.c.bf16 %v19785_v40, %v19783_v49  ;;  %v10734_v18 = vpack.c.bf16 %v19790_v54, %v19789_v0  ;;  %v6769_v53 = vand.u32 4294901760, %v6768_v60  ;;  %v10736_v1 = vpack.c.bf16 %v19792_v55, %v19791_v45  ;;  %v19796_v52 = vld [vmem:[#allocation81_spill] sm:$0xff]  ;;  %v19797_v49 = vld [vmem:[#allocation76_spill] sm:$0xff]  ;;  %v19798_v56 = vld [vmem:[#allocation14_spill] sm:$0xff] }
 0x490   : > { %7002 = vmatmul.mubr.f32.vlgmr.msra.gmra.mrb[42].mxu1 %v16904_v46  ;;  %v5048_v31 = vadd.f32 %v8728_v19, %v19788_v29  ;;  %v10738_v47 = vpack.c.bf16 %v19794_v24, %v19793_v50  ;;  %v10740_v7 = vpack.c.bf16 %v19796_v52, %v19795_v4  ;;  %v10742_v40 = vpack.c.bf16 %v19798_v56, %v19797_v49  ;;  %v19801_v17 = vld [vmem:[#allocation46_spill] sm:$0xff] }
 0x491   : > { %10767 = vmatpush3.bf16.msra.mxu1 %v16788_v44  ;;  %7244 = vmatprep.mubr.f32.mxu1 %v19786_v5  ;;  %v19800_v5 = vld [vmem:[#allocation22_spill] sm:$0xff]  ;;  %v10750_v29 = vpack.c.bf16 %v16723_v8, %v16718_v26 }
 0x492   : > { %10695 = vmatpush3.bf16.msra.mxu0 %v16929_v11  ;;  %10769 = vmatprep.subr.bf16.mxu1 %v16794_v27  ;;  %v5280_v57 = vadd.f32 %v8763_v41, %v5048_v31  ;;  %v19799_v41 = vld [vmem:[#allocation63_spill] sm:$0xff]  ;;  %v10746_v60 = vpack.c.bf16 %v19801_v17, %v19800_v5  ;;  %v10752_v31 = vpack.c.bf16 %v16741_v6, %v16736_v23 }
 0x493   : > { %10697 = vmatprep.subr.bf16.mxu0 %v16938_v32 }
 0x495   : > { %10771 = vmatpush3.bf16.msra.mxu1 %v16818_v33 }
 0x496   : > { %10699 = vmatpush3.bf16.msra.mxu0 %v16946_v10  ;;  %10773 = vmatprep.subr.bf16.mxu1 %v16832_v16 }
 0x497   : > { %10733 = vmatprep.subr.bf16.mxu0 %v10732_v38  ;;  %v19802_v38 = vld [vmem:[#allocation47_spill] sm:$0xff] }
 0x498   : > { %v10748_v19 = vpack.c.bf16 %v16705_v48, %v19802_v38 }
 0x499   : > { %6770 = vmatmul.mubr.f32.vlgmr.msra.gmra.mrb[42].mxu0 %v6769_v53  ;;  %10775 = vmatpush3.bf16.msra.mxu1 %v16848_v37  ;;  %v10754_v53 = vpack.c.bf16 %v16764_v35, %v16759_v39  ;;  %v19828_v39 = vld [vmem:[#allocation91_spill] sm:$0xff] }
 0x49a   : > { %10735 = vmatpush3.bf16.msra.mxu0 %v10734_v18  ;;  %7137 = vmatprep.mubr.f32.mxu0 %v16693_v14  ;;  %v10744_v14 = vpack.c.bf16 %v16652_v59, %v19799_v41 }
 0x49b   : > { %10737 = vmatprep.subr.bf16.mxu0 %v10736_v1  ;;  %10777 = vmatprep.subr.bf16.mxu1 %v16854_v63 }
 0x49d   : > { %10779 = vmatpush3.bf16.msra.mxu1 %v16876_v22 }
 0x49e   : > { %10739 = vmatpush3.bf16.msra.mxu0 %v10738_v47  ;;  %10781 = vmatprep.subr.bf16.mxu1 %v16882_v25  ;;  %v10756_v47 = vpack.c.bf16 %v19747_v12, %v19745_v34  ;;  %v10762_v34 = vpack.c.bf16 %v16384_v2, %v16379_v13  ;;  %v19803_v12 = vld [vmem:[#allocation45_spill] sm:$0xff]  ;;  %v19807_v2 = vand.u32 4294901760, %v19790_v54 }
 0x49f   : > { %10741 = vmatprep.subr.bf16.mxu0 %v10740_v7 }
 0x4a1   : > { %10783 = vmatpush3.bf16.msra.mxu1 %v16896_v61 }
 0x4a2   : > { %10743 = vmatpush3.bf16.msra.mxu0 %v10742_v40  ;;  %10785 = vmatprep.subr.bf16.mxu1 %v16902_v62  ;;  %v10758_v40 = vpack.c.bf16 %v16340_v20, %v16329_v42  ;;  %v19804_v20 = vand.u32 4294901760, %v16432_v15  ;;  %v19809_v15 = vand.u32 4294901760, %v19792_v55 }
 0x4a3   : > { %10745 = vmatprep.subr.bf16.mxu0 %v10744_v14  ;;  %v10760_v14 = vpack.c.bf16 %v16365_v51, %v16360_v28  ;;  %v19806_v51 = vand.u32 4294901760, %v19789_v0  ;;  %v19811_v0 = vand.u32 4294901760, %v19794_v24 }
 0x4a4   : > { %v8831_v18 = vpop.f32.mrb[32].mxu1 }
 0x4a5   : > { %10787 = vmatpush3.bf16.msra.mxu1 %v16912_v9  ;;  %v8832_v1 = vpop.f32.mrb[33].mxu1  ;;  %v10798_v13 = vpack.c.bf16 %v19807_v2, %v19806_v51 }
 0x4a6   : > { %10747 = vmatpush3.bf16.msra.mxu0 %v10746_v60  ;;  %10789 = vmatprep.subr.bf16.mxu1 %v16922_v30  ;;  %v8833_v7 = vadd.f32 %v8832_v1, %v8831_v18 }
 0x4a7   : > { %10749 = vmatprep.subr.bf16.mxu0 %v10748_v19 }
 0x4a9   : > { %10791 = vmatpush3.bf16.msra.mxu1 %v16929_v11 }
 0x4aa   : > { %10751 = vmatpush3.bf16.msra.mxu0 %v10750_v29  ;;  %10793 = vmatprep.subr.bf16.mxu1 %v16938_v32 }
 0x4ab   : > { %10753 = vmatprep.subr.bf16.mxu0 %v10752_v31 }
 0x4ad   : > { %10795 = vmatpush3.bf16.msra.mxu1 %v16946_v10  ;;  %v8796_v60 = vpop.f32.mrb[32].mxu0 }
 0x4ae   : > { %10755 = vmatpush3.bf16.msra.mxu0 %v10754_v53  ;;  %10829 = vmatprep.subr.bf16.mxu1 %v16675_v3  ;;  %v8797_v42 = vpop.f32.mrb[33].mxu0  ;;  %v19805_v3 = vand.u32 4294901760, %v19787_v36 }
 0x4af   : > { %10757 = vmatprep.subr.bf16.mxu0 %v10756_v47  ;;  %v8798_v29 = vadd.f32 %v8797_v42, %v8796_v60 }
 0x4b0   : > { %7248 = vmatmul.mubr.f32.vlgmr.msra.gmra.mrb[44].mxu1 %v6767_v21  ;;  %v10796_v19 = vpack.c.bf16 %v19805_v3, %v19804_v20 }
 0x4b1   : > { %10831 = vmatpush3.bf16.msra.mxu1 %v16788_v44  ;;  %7518 = vmatprep.mubr.f32.mxu1 %v19803_v12  ;;  %v5418_v28 = vadd.f32 %v8798_v29, %v5280_v57  ;;  %v19808_v44 = vand.u32 4294901760, %v19791_v45  ;;  %v19813_v45 = vand.u32 4294901760, %v19796_v52 }
 0x4b2   : > { %10759 = vmatpush3.bf16.msra.mxu0 %v10758_v40  ;;  %10833 = vmatprep.subr.bf16.mxu1 %v16794_v27  ;;  %v19810_v27 = vand.u32 4294901760, %v19793_v50  ;;  %v19816_v50 = vand.u32 4294901760, %v19799_v41 }
 0x4b3   : > { %10761 = vmatprep.subr.bf16.mxu0 %v10760_v14  ;;  %v10800_v21 = vpack.c.bf16 %v19809_v15, %v19808_v44  ;;  %v5526_v36 = vadd.f32 %v8833_v7, %v5418_v28 }
 0x4b4   : > { %v10802_v54 = vpack.c.bf16 %v19811_v0, %v19810_v27 }
 0x4b5   : > { %10835 = vmatpush3.bf16.msra.mxu1 %v16818_v33  ;;  %v19812_v33 = vand.u32 4294901760, %v19795_v4  ;;  %v19818_v4 = vand.u32 4294901760, %v19800_v5  ;;  %v19824_v5 = vand.u32 4294901760, %v16736_v23  ;;  %v19827_v23 = vld [vmem:[#allocation86_spill] sm:$0xff] }
 0x4b6   : > { %10763 = vmatpush3.bf16.msra.mxu0 %v10762_v34  ;;  %10837 = vmatprep.subr.bf16.mxu1 %v16832_v16  ;;  %v19814_v16 = vand.u32 4294901760, %v19797_v49  ;;  %v19820_v49 = vand.u32 4294901760, %v19802_v38  ;;  %v19830_v38 = vld [vmem:[#allocation29_spill] sm:$0xff] }
 0x4b7   : > { %10797 = vmatprep.subr.bf16.mxu0 %v10796_v19  ;;  %v10804_v55 = vpack.c.bf16 %v19813_v45, %v19812_v33 }
 0x4b9   : > { %7140 = vmatmul.mubr.f32.vlgmr.msra.gmra.mrb[44].mxu0 %v16915_v43  ;;  %10839 = vmatpush3.bf16.msra.mxu1 %v16848_v37  ;;  %v19815_v43 = vand.u32 4294901760, %v19798_v56  ;;  %v19817_v37 = vand.u32 4294901760, %v16652_v59  ;;  %v19822_v59 = vand.u32 4294901760, %v16718_v26 }
 0x4ba   : > { %10799 = vmatpush3.bf16.msra.mxu0 %v10798_v13  ;;  %7414 = vmatprep.mubr.f32.mxu0 %v19803_v12 }
 0x4bb   : > { %10801 = vmatprep.subr.bf16.mxu0 %v10800_v21  ;;  %10841 = vmatprep.subr.bf16.mxu1 %v16854_v63  ;;  %v10806_v57 = vpack.c.bf16 %v19815_v43, %v19814_v16  ;;  %v10808_v24 = vpack.c.bf16 %v19817_v37, %v19816_v50  ;;  %v19819_v63 = vand.u32 4294901760, %v19801_v17 }
 0x4bd   : > { %10843 = vmatpush3.bf16.msra.mxu1 %v16876_v22  ;;  %v10810_v52 = vpack.c.bf16 %v19819_v63, %v19818_v4  ;;  %v19821_v22 = vand.u32 4294901760, %v16705_v48  ;;  %v19826_v48 = vand.u32 4294901760, %v16764_v35 }
 0x4be   : > { %10803 = vmatpush3.bf16.msra.mxu0 %v10802_v54  ;;  %10845 = vmatprep.subr.bf16.mxu1 %v16882_v25  ;;  %v19823_v25 = vand.u32 4294901760, %v16723_v8 }
 0x4bf   : > { %10805 = vmatprep.subr.bf16.mxu0 %v10804_v55  ;;  %v10812_v56 = vpack.c.bf16 %v19821_v22, %v19820_v49 }
 0x4c0   : > { %v10814_v41 = vpack.c.bf16 %v19823_v25, %v19822_v59 }
 0x4c1   : > { %10847 = vmatpush3.bf16.msra.mxu1 %v16896_v61  ;;  %v19825_v61 = vand.u32 4294901760, %v16741_v6 }
 0x4c2   : > { %10807 = vmatpush3.bf16.msra.mxu0 %v10806_v57  ;;  %10849 = vmatprep.subr.bf16.mxu1 %v16902_v62  ;;  %v10818_v62 = vpack.c.bf16 %v19826_v48, %v6848_v58  ;;  %v19829_v58 = vld [vmem:[#allocation43_spill] sm:$0xff] }
 0x4c3   : > { %10809 = vmatprep.subr.bf16.mxu0 %v10808_v24  ;;  %v10816_v17 = vpack.c.bf16 %v19825_v61, %v19824_v5 }
 0x4c4   : > { %v8901_v26 = vpop.f32.mrb[34].mxu1 }
 0x4c5   : > { %10851 = vmatpush3.bf16.msra.mxu1 %v16912_v9  ;;  %v8902_v8 = vpop.f32.mrb[35].mxu1 }
 0x4c6   : > { %10811 = vmatpush3.bf16.msra.mxu0 %v10810_v52  ;;  %10853 = vmatprep.subr.bf16.mxu1 %v16922_v30  ;;  %v8903_v9 = vadd.f32 %v8902_v8, %v8901_v26 }
 0x4c7   : > { %10813 = vmatprep.subr.bf16.mxu0 %v10812_v56 }
 0x4c9   : > { %10855 = vmatpush3.bf16.msra.mxu1 %v16929_v11 }
 0x4ca   : > { %10815 = vmatpush3.bf16.msra.mxu0 %v10814_v41  ;;  %10857 = vmatprep.subr.bf16.mxu1 %v16938_v32 }
 0x4cb   : > { %10817 = vmatprep.subr.bf16.mxu0 %v10816_v17 }
 0x4cd   : > { %10859 = vmatpush3.bf16.msra.mxu1 %v16946_v10  ;;  %v8866_v6 = vpop.f32.mrb[34].mxu0 }
 0x4ce   : > { %10819 = vmatpush3.bf16.msra.mxu0 %v10818_v62  ;;  %v8867_v35 = vpop.f32.mrb[35].mxu0 }
 0x4cf   : > { %10821 = vmatprep.subr.bf16.mxu0 %v19827_v23  ;;  %v8868_v30 = vadd.f32 %v8867_v35, %v8866_v6 }
 0x4d0   : > { %7520 = vmatmul.mubr.f32.vlgmr.msra.gmra.mrb[46].mxu1 %v16904_v46 }
 0x4d1   : > { %v5694_v11 = vadd.f32 %v8868_v30, %v5526_v36 }
 0x4d2   : > { %10823 = vmatpush3.bf16.msra.mxu0 %v19828_v39 }
 0x4d3   : > { %10825 = vmatprep.subr.bf16.mxu0 %v19829_v58  ;;  %v5798_v31 = vadd.f32 %v8903_v9, %v5694_v11 }
 0x4d6   : > { %10827 = vmatpush3.bf16.msra.mxu0 %v19830_v38 }
 0x4d9   : > { %7416 = vmatmul.mubr.f32.vlgmr.msra.gmra.mrb[46].mxu0 %v16904_v46 }
 0x4fe   : > { %v8971_v32 = vpop.f32.mrb[36].mxu1 }
 0x4ff   : > { %v8972_v18 = vpop.f32.mrb[37].mxu1 }
 0x500   : > { %v8973_v10 = vadd.f32 %v8972_v18, %v8971_v32 }
 0x506   : > { %v8936_v53 = vpop.f32.mrb[36].mxu0 }
 0x507   : > { %v8937_v1 = vpop.f32.mrb[37].mxu0 }
 0x508   : > { %v8938_v47 = vadd.f32 %v8937_v1, %v8936_v53 }
 0x50a   : > { %v5910_v7 = vadd.f32 %v8938_v47, %v5798_v31 }
 0x50c   : > { %v6142_v40 = vadd.f32 %v8973_v10, %v5910_v7 }
 0x51e   : > { %v9041_v14 = vpop.f32.mrb[38].mxu1 }
 0x51f   : > { %v9042_v60 = vpop.f32.mrb[39].mxu1 }
 0x520   : > { %v9043_v34 = vadd.f32 %v9042_v60, %v9041_v14 }
 0x527   : > { %v9006_v12 = vpop.f32.mrb[38].mxu0 }
 0x528   : > { %v9007_v42 = vpop.f32.mrb[39].mxu0 }
 0x529   : > { %v9008_v20 = vadd.f32 %v9007_v42, %v9006_v12 }
 0x52b   : > { %v6280_v3 = vadd.f32 %v9008_v20, %v6142_v40 }
 0x52d   : > { %v6388_v19 = vadd.f32 %v9043_v34, %v6280_v3 }
 0x543   : > { %v9111_v29 = vpop.f32.mrb[40].mxu1 }
 0x544   : > { %v9112_v28 = vpop.f32.mrb[41].mxu1 }
 0x545   : > { %v9113_v51 = vadd.f32 %v9112_v28, %v9111_v29 }
 0x549   : > { %v9076_v46 = vpop.f32.mrb[40].mxu0 }
 0x54a   : > { %v9077_v2 = vpop.f32.mrb[41].mxu0 }
 0x54b   : > { %v9078_v13 = vadd.f32 %v9077_v2, %v9076_v46 }
 0x54d   : > { %v6556_v44 = vadd.f32 %v9078_v13, %v6388_v19 }
 0x54f   : > { %v6660_v15 = vadd.f32 %v9113_v51, %v6556_v44 }
 0x563   : > { %v9181_v21 = vpop.f32.mrb[42].mxu1 }
 0x564   : > { %v9182_v36 = vpop.f32.mrb[43].mxu1 }
 0x565   : > { %v9183_v27 = vadd.f32 %v9182_v36, %v9181_v21 }
 0x56c   : > { %v9146_v0 = vpop.f32.mrb[42].mxu0 }
 0x56d   : > { %v9147_v54 = vpop.f32.mrb[43].mxu0 }
 0x56e   : > { %v9148_v33 = vadd.f32 %v9147_v54, %v9146_v0 }
 0x570   : > { %v6772_v45 = vadd.f32 %v9148_v33, %v6660_v15 }
 0x572   : > { %v7004_v55 = vadd.f32 %v9183_v27, %v6772_v45 }
 0x583   : > { %v9251_v16 = vpop.f32.mrb[44].mxu1 }
 0x584   : > { %v9252_v43 = vpop.f32.mrb[45].mxu1 }
 0x585   : > { %v9253_v57 = vadd.f32 %v9252_v43, %v9251_v16 }
 0x58c   : > { %v9216_v50 = vpop.f32.mrb[44].mxu0 }
 0x58d   : > { %v9217_v37 = vpop.f32.mrb[45].mxu0 }
 0x58e   : > { %v9218_v24 = vadd.f32 %v9217_v37, %v9216_v50 }
 0x590   : > { %v7142_v4 = vadd.f32 %v9218_v24, %v7004_v55 }
 0x592   : > { %v7250_v63 = vadd.f32 %v9253_v57, %v7142_v4 }
 0x5a3   : > { %v9321_v52 = vpop.f32.mrb[46].mxu1 }
 0x5a4   : > { %v9322_v49 = vpop.f32.mrb[47].mxu1 }
 0x5a5   : > { %v9323_v22 = vadd.f32 %v9322_v49, %v9321_v52 }
 0x5ac   : > { %v9286_v56 = vpop.f32.mrb[46].mxu0 }
 0x5ad   : > { %v9287_v59 = vpop.f32.mrb[47].mxu0 }
 0x5ae   : > { %v9288_v25 = vadd.f32 %v9287_v59, %v9286_v56 }
 0x5b0   : > { %v7418_v41 = vadd.f32 %v9288_v25, %v7250_v63 }
 0x5b2   : > { %v7522_v5 = vadd.f32 %v9323_v22, %v7418_v41 }
 0x5b4   : > { %v7638_v61 = vmul.f32 -1.442695, %v7522_v5 }
 0x5b6   : > { %10921 = vpow2.f32 %v7638_v61 }
 0x5c0   : > { %v10922_v17 = vpop.eup %10921 }
 0x5c1   : > { %v7528_v48 = vadd.f32 1.0, %v10922_v17 }
 0x5c3   : > { %10923 = vrcp.f32 %v7528_v48 }
 0x5cd   : > { %v10924_v62 = vpop.eup %10923 }
 0x5ce   : > { %7531 = vst [vmem:[%s201_s8] sm:$0xff] %v10924_v62 }
 0x5cf   : > { %10997 = shalt.err (!%p10994_p7)
}
 0x5d0   : > { %s10998_s30 = scalar_lea.hbm %s17084_s27, 128  ;;  %s11002_s20 = scalar_lea.hbm %s17131_s3, 256 }
 0x5d1   : > { %p10999_p9 = scmp.ne.s32.totalorder %s17084_s27, %s10998_s30  ;;  %p11003_p0 = scmp.lt.u32.totalorder %s17084_s27, %s17131_s3 }
 0x5d2   : > { %p11004_p11 = scmp.lt.u32.totalorder %s11002_s20, %s10998_s30  ;;  %p11006_p4 = scmp.lt.u32.totalorder %s10998_s30, %s17084_s27 }
 0x5d3   : > { %p11000_p2 = pnand %p10999_p9, %p11174_p12 }
 0x5d4   : > { %p11005_p1 = por %p11004_p11, %p11003_p0 }
 0x5d5   : > { %p11001_p5 = pneg %p11000_p2 }
 0x5d6   : > { %p11007_p6 = por %p11006_p4, %p11005_p1 }
 0x5d8   : > { %p11008_p8 = pnand %p11007_p6, %p11001_p5 }
 0x5da   : > { %11011 = shalt.err (!%p11008_p8)
}
 0x5db   : > { %10866 = dma.vmem_to_hbm [thread:$0]  (%p11174_p12), %s17086_s9, 128, %s17084_s27, %s7533_s28  }
 0x5dc PF: > { %s7558_s25 = sand.u32 1, %s11042_s12   ;;  %p19831_p10 = scmp.ne.s32.totalorder %s17993_s19, 0 }
 0x5dd   : > { %p19832_p13 = scmp.ge.s32.totalorder %s11054_s15, 2  ;;  %s7559_s26 = scalar_lea.sflag [#allocation4], %s7558_s25 }
 0x5df   : > { %p10877_p3 = pnand %p19832_p13, %p19831_p10 }
 0x5e1   : > { %11037 = dma.done.wait (!%p10877_p3), %s7559_s26, 128  }
 0x5e2   : > { %11039 = vsyncadd (!%p10877_p3), %s7559_s26, 4294967168  ;;  %p17_p7 = scmp.ge.s32.totalorder %s11139_s24, 4   ;;  %s19833_s12 = smov %s11046_s13 }
 0x5e3   : > { %s19834_s13 = smov %s11050_s14  ;;  %s19835_s14 = smov %s11170_s17 }
 0x5e4   : > { %s19836_s15 = smov %s11139_s24  ;;  %19 = sbr.rel (!%p17_p7) target bundleno = 6 (0x6), region = 81 }
 0x5eb   :  { %7564 = vsyncpa [#allocation3], 1 }
 0x5ec   :  { %7566 = vsyncpa [#allocation3 + $0x1], 1 }
 0x5ed   :  { %7567 = vsyncpa [#allocation6], 1 }
 0x5ee   :  { %7568 = vsyncpa [#allocation4], 1 }
 0x5ef   :  { %7570 = vsyncpa [#allocation4 + $0x1], 1 }

</bundles_post_ra>
